<compile_context>
chip_gen: v7x
topology: tpu7x:2x2x1
jax: 0.10.0
libtpu: 0.0.40
codegen_flags: <defaults>
</compile_context>

<pallas_src>
import jax
import jax.numpy as jnp
from jax import lax
from jax.experimental import pallas as pl
from jax.experimental.pallas import tpu as pltpu

BN_EPS = 1e-3


def _pick_tile(total, quantum, max_tile):
    """Largest divisor of `total` that is a multiple of `quantum` and <= max_tile.

    Falls back to `total` (a full-extent block is always legal)."""
    if total % quantum != 0:
        return total
    t = min(max_tile, total)
    t -= t % quantum
    while t > 0 and total % t != 0:
        t -= quantum
    return t if t > 0 else total


def _vmem_capacity_bytes():
    try:
        return int(pltpu.get_tpu_info().vmem_capacity_bytes)
    except Exception:  # conservative fallback (v7x per-TC size)
        return 64 * 2 ** 20


def _make_pass1_kernel(C_in, C_conv, TH, Wo, CO_BLK):
    """conv(3x3,s2,p1) + maxpool(2x2,s2) + per-tile BN partial stats."""
    C_out = C_conv + C_in
    cnt = float(TH * Wo)

    def kernel(w_ref, eeb_ref, eob_ref, oe_ref, oo_ref, eeh_ref, eoh_ref,
               y_ref, stats_ref, ees_ref, eos_ref):
        # +1-row-shifted even-row planes (rows oh+1): tile body rows 1..TH-1 plus
        # the 1-row halo, assembled once into VMEM scratch.
        if TH > 1:
            ees_ref[:, 0:TH - 1, :] = eeb_ref[:, 1:TH, :]
            eos_ref[:, 0:TH - 1, :] = eob_ref[:, 1:TH, :]
        ees_ref[:, TH - 1, :] = eeh_ref[...]
        eos_ref[:, TH - 1, :] = eoh_ref[...]

        def tap(kh, kw, ci):
            # stride-2 tap (kh, kw): padded rows 2oh+kh, cols 2ow+kw, expressed as
            # static slices of the parity-plane refs (lazy loads, zero-cost views).
            if kh == 0:
                even_col, odd_col = eeb_ref, eob_ref     # even rows (oh)
            elif kh == 1:
                even_col, odd_col = oe_ref, oo_ref       # odd rows (oh)
            else:
                even_col, odd_col = ees_ref, eos_ref     # even rows shifted (oh+1)
            if kw == 0:
                return even_col[ci, :, 0:Wo]
            if kw == 1:
                return odd_col[ci, :, :]
            return even_col[ci, :, 1:Wo + 1]

        sums, sqs = [], []

        # ---- conv branch: co-blocked VPU broadcast-MACs, lazy tap slices --------
        for co0 in range(0, C_conv, CO_BLK):
            nco = min(CO_BLK, C_conv - co0)
            accs = [jnp.zeros((TH, Wo), jnp.float32) for _ in range(nco)]
            for kh in range(3):
                for kw in range(3):
                    for ci in range(C_in):
                        slab = tap(kh, kw, ci)                         # (TH, Wo)
                        for j in range(nco):
                            widx = (((co0 + j) * C_in + ci) * 3 + kh) * 3 + kw
                            accs[j] = accs[j] + w_ref[widx] * slab
            for j in range(nco):
                a = accs[j]
                y_ref[co0 + j, :, :] = a.astype(y_ref.dtype)
                sums.append(jnp.sum(a))
                sqs.append(jnp.sum(a * a))

        # ---- maxpool branch: 4 shifted views, elementwise max -------------------
        pool = jnp.maximum(
            jnp.maximum(oo_ref[...], oe_ref[:, :, 1:Wo + 1]),
            jnp.maximum(eos_ref[...], ees_ref[:, :, 1:Wo + 1]))      # (C_in, TH, Wo)
        y_ref[C_conv:C_out, :, :] = pool.astype(y_ref.dtype)
        for c in range(C_in):
            p = pool[c]
            sums.append(jnp.sum(p))
            sqs.append(jnp.sum(p * p))

        # ---- per-tile per-channel BN partials (sum, within-tile-centered SSQ) ---
        csum = jnp.stack(sums)                    # (C_out,)
        csq = jnp.stack(sqs)                      # (C_out,)
        stats_ref[0, :] = csum
        stats_ref[1, :] = csq - csum * csum / cnt

    return kernel


def _pass2_kernel(y_ref, scale_ref, shift_ref, out_ref):
    # Lane-dense elementwise affine + ReLU: (TR, TS) * (TR, 1) + (TR, 1).
    out_ref[...] = jnp.maximum(
        y_ref[...].astype(jnp.float32) * scale_ref[...] + shift_ref[...], 0.0)


def down_sampling_block(x, w, gamma, beta):
    """x: (N, C_in, H, W) f32 NCHW;  w: (C_conv, C_in, 3, 3);  gamma/beta: (C_out,)."""
    N, C_in, H, W = x.shape
    assert H % 2 == 0 and W % 2 == 0, "even H, W required (PyTorch floor semantics)"
    C_conv = w.shape[0]
    C_out = C_conv + C_in
    Ho, Wo = H // 2, W // 2
    R = N * Ho * Wo

    x = x.astype(jnp.float32)
    gamma = gamma.astype(jnp.float32)
    beta = beta.astype(jnp.float32)

    vmem_cap = _vmem_capacity_bytes()

    # ---- pass-1 row-tile selection: budget- and generation-aware ----------------
    row_bytes = (2 * (C_in * (2 * (Wo + 1) + 2 * Wo) * 4 + C_out * Wo * 2)
                 + C_in * (2 * Wo + 1) * 4 + 6 * Wo * 4)
    th_budget = max(8, int(0.30 * vmem_cap) // max(row_bytes, 1))
    th_cap = min(128 if vmem_cap >= (100 << 20) else 64, th_budget)
    q_h = 16 if (Ho % 16 == 0 and th_cap >= 16) else 8
    TH = _pick_tile(Ho, q_h, th_cap)

    # bf16 intermediate (pass-1 stores / pass-2 loads are HBM-bound); fall back to
    # f32 if the row tile cannot be made bf16-sublane friendly.
    y_dtype = jnp.bfloat16
    if TH != Ho and TH % 16 != 0:
        t16 = _pick_tile(Ho, 16, max(th_cap, 16))
        if t16 % 16 == 0 and t16 <= max(th_cap, 16):
            TH = t16
        else:
            y_dtype = jnp.float32   # TODO(synk): masked bf16 tail instead
    n_ht = Ho // TH

    acc_vregs = -(-(TH * Wo) // 1024)                     # f32 vregs per accumulator
    CO_BLK = max(1, min(4, C_conv, 32 // max(acc_vregs, 1)))

    # ---- parity-plane slices of the zero-padded input (no gather / transpose) ---
    xp = jnp.pad(x, ((0, 0), (0, 0), (1, 1), (1, 1)))     # (N, C_in, 2Ho+2, 2Wo+2)
    ee_body = xp[:, :, 0:2 * Ho:2, 0::2]                  # (N, C_in, Ho,   Wo+1)
    eo_body = xp[:, :, 0:2 * Ho:2, 1:2 * Wo:2]            # (N, C_in, Ho,   Wo)
    oe = xp[:, :, 1:2 * Ho:2, 0::2]                       # (N, C_in, Ho,   Wo+1)
    oo = xp[:, :, 1:2 * Ho:2, 1:2 * Wo:2]                 # (N, C_in, Ho,   Wo)
    ee_halo = xp[:, :, 2 * TH::2 * TH, 0::2]              # (N, C_in, n_ht, Wo+1)
    eo_halo = xp[:, :, 2 * TH::2 * TH, 1:2 * Wo:2]        # (N, C_in, n_ht, Wo)

    w_flat = w.astype(jnp.float32).reshape(-1)            # (C_conv*C_in*9,) -> SMEM

    even_body_spec = pl.BlockSpec((None, C_in, TH, Wo + 1), lambda n, t: (n, 0, t, 0))
    odd_body_spec = pl.BlockSpec((None, C_in, TH, Wo), lambda n, t: (n, 0, t, 0))
    even_halo_spec = pl.BlockSpec((None, C_in, None, Wo + 1), lambda n, t: (n, 0, t, 0))
    odd_halo_spec = pl.BlockSpec((None, C_in, None, Wo), lambda n, t: (n, 0, t, 0))
    # TODO(synk): pad Wo to a multiple of 128 at production widths (unmasked vst).
    y_spec = pl.BlockSpec((None, C_out, TH, Wo), lambda n, t: (n, 0, t, 0))
    stats_spec = pl.BlockSpec((None, None, 2, C_out), lambda n, t: (n, t, 0, 0))

    y_isize = jnp.dtype(y_dtype).itemsize
    in_tile_b = (2 * C_in * TH * (Wo + 1) + 2 * C_in * TH * Wo
                 + C_in * (Wo + 1) + C_in * Wo) * 4
    out_tile_b = C_out * TH * Wo * y_isize + 2 * C_out * 4
    scratch_b = C_in * TH * (2 * Wo + 1) * 4
    temp_b = (CO_BLK + 2) * TH * Wo * 4
    foot1 = 2 * (in_tile_b + out_tile_b) + scratch_b + temp_b      # double-buffered
    vmem_limit1 = int(min(max(foot1 + (4 << 20), 8 << 20), int(0.75 * vmem_cap)))

    y, stats = pl.pallas_call(
        _make_pass1_kernel(C_in, C_conv, TH, Wo, CO_BLK),
        grid=(N, n_ht),
        in_specs=[pl.BlockSpec(memory_space=pltpu.MemorySpace.SMEM),
                  even_body_spec, odd_body_spec, even_body_spec, odd_body_spec,
                  even_halo_spec, odd_halo_spec],
        out_specs=[y_spec, stats_spec],
        out_shape=[jax.ShapeDtypeStruct((N, C_out, Ho, Wo), y_dtype),
                   jax.ShapeDtypeStruct((N, n_ht, 2, C_out), jnp.float32)],
        scratch_shapes=[pltpu.VMEM((C_in, TH, Wo + 1), jnp.float32),
                        pltpu.VMEM((C_in, TH, Wo), jnp.float32)],
        compiler_params=pltpu.CompilerParams(
            dimension_semantics=("parallel", "parallel"),
            vmem_limit_bytes=vmem_limit1),
    )(w_flat, ee_body, eo_body, oe, oo, ee_halo, eo_halo)

    # ---- combine tiny per-tile partials -> per-channel scale/shift (Chan) -------
    cnt = TH * Wo
    sums_t = stats[:, :, 0, :].reshape(-1, C_out)          # (tiles, C_out)
    m2_t = stats[:, :, 1, :].reshape(-1, C_out)
    mean = jnp.sum(sums_t, axis=0) / R
    mean_t = sums_t / cnt
    m2 = jnp.sum(m2_t, axis=0) + cnt * jnp.sum((mean_t - mean[None, :]) ** 2, axis=0)
    var = m2 / R                                           # biased, train-mode BN
    scale = gamma * lax.rsqrt(var + BN_EPS)
    shift = beta - mean * scale

    # ---- pass 2: lane-dense affine + ReLU ---------------------------------------
    S = Ho * Wo
    n_rows = N * C_out
    y2 = y.reshape(n_rows, S)                              # free reshape (row-major)
    scale_rows = jnp.tile(scale, N).reshape(n_rows, 1)
    shift_rows = jnp.tile(shift, N).reshape(n_rows, 1)

    TS = _pick_tile(S, 128, 2048)
    tr_budget = max(8, (10 << 20) // max(2 * TS * (y_isize + 4), 1))
    q_r = 16 if (y_dtype == jnp.bfloat16 and n_rows % 16 == 0) else 8
    TR = _pick_tile(n_rows, q_r, min(256, tr_budget))
    # TODO(synk): masked-tail grid when neither n_rows nor S divides its quantum.

    blk2_b = TR * TS * (y_isize + 4) + 2 * TR * 4
    vmem_limit2 = int(min(max(2 * blk2_b + (4 << 20), 8 << 20), int(0.75 * vmem_cap)))
    # NOTE: input_output_aliases intentionally skipped: y2 is bf16, output is f32.

    out2 = pl.pallas_call(
        _pass2_kernel,
        grid=(n_rows // TR, S // TS),
        in_specs=[pl.BlockSpec((TR, TS), lambda i, j: (i, j)),
                  pl.BlockSpec((TR, 1), lambda i, j: (i, 0)),
                  pl.BlockSpec((TR, 1), lambda i, j: (i, 0))],
        out_specs=pl.BlockSpec((TR, TS), lambda i, j: (i, j)),
        out_shape=jax.ShapeDtypeStruct((n_rows, S), jnp.float32),
        compiler_params=pltpu.CompilerParams(
            dimension_semantics=("parallel", "parallel"),
            vmem_limit_bytes=vmem_limit2),
    )(y2, scale_rows, shift_rows)

    return out2.reshape(N, C_out, Ho, Wo)


def reference(x, w, gamma, beta):
    """Pure-JAX reference replicating the PyTorch forward (train-mode BN)."""
    conv = lax.conv_general_dilated(
        x, w, window_strides=(2, 2), padding=((1, 1), (1, 1)),
        dimension_numbers=("NCHW", "OIHW", "NCHW"))
    mp = lax.reduce_window(x, -jnp.inf, lax.max,
                           window_dimensions=(1, 1, 2, 2),
                           window_strides=(1, 1, 2, 2), padding="VALID")
    y = jnp.concatenate([conv, mp], axis=1)
    mean = jnp.mean(y, axis=(0, 2, 3), keepdims=True)
    var = jnp.mean((y - mean) ** 2, axis=(0, 2, 3), keepdims=True)
    yhat = (y - mean) * lax.rsqrt(var + BN_EPS)
    yhat = yhat * gamma.reshape(1, -1, 1, 1) + beta.reshape(1, -1, 1, 1)
    return jnp.maximum(yhat, 0.0)


if __name__ == "__main__":
    key = jax.random.PRNGKey(0)
    k_x, k_w, k_g, k_b = jax.random.split(key, 4)

    N, inpc, H, W = 2, 4, 16, 16
    oupc = 16
    C_conv = oupc - inpc

    x = jax.random.normal(k_x, (N, inpc, H, W), dtype=jnp.float32)
    w = 0.1 * jax.random.normal(k_w, (C_conv, inpc, 3, 3), dtype=jnp.float32)
    gamma = 1.0 + 0.1 * jax.random.normal(k_g, (oupc,), dtype=jnp.float32)
    beta = 0.1 * jax.random.normal(k_b, (oupc,), dtype=jnp.float32)

    out = down_sampling_block(x, w, gamma, beta)
    out = jax.block_until_ready(out)

    ref = jax.block_until_ready(reference(x, w, gamma, beta))
    assert out.shape == (N, oupc, H // 2, W // 2), out.shape
    # Tolerance covers the bf16 rounding of the pre-BN intermediate y
    # (the BN statistics themselves are computed in f32 from un-rounded values).
    err = float(jnp.max(jnp.abs(out - ref)))
    assert jnp.allclose(out, ref, atol=3e-2, rtol=3e-2), err

    print("KERNEL_OK")
</pallas_src>

<mosaic_0001>
module attributes {stable_mosaic.version = 11 : i64} {
  func.func @kernel(%arg0: i32, %arg1: i32, %arg2: memref<432xf32, #tpu.memory_space<smem>>, %arg3: memref<1x4x8x9xf32, #tpu.memory_space<vmem>>, %arg4: memref<1x4x8x8xf32, #tpu.memory_space<vmem>>, %arg5: memref<1x4x8x9xf32, #tpu.memory_space<vmem>>, %arg6: memref<1x4x8x8xf32, #tpu.memory_space<vmem>>, %arg7: memref<1x4x1x9xf32, #tpu.memory_space<vmem>>, %arg8: memref<1x4x1x8xf32, #tpu.memory_space<vmem>>, %arg9: memref<1x16x8x8xbf16, #tpu.memory_space<vmem>>, %arg10: memref<1x1x2x16xf32, #tpu.memory_space<vmem>>, %arg11: memref<4x8x9xf32, #tpu.memory_space<vmem>>, %arg12: memref<4x8x8xf32, #tpu.memory_space<vmem>>) attributes {dimension_semantics = [#tpu.dimension_semantics<parallel>, #tpu.dimension_semantics<parallel>], iteration_bounds = array<i64: 2, 1>, scalar_prefetch = 0 : i64, scratch_operands = 2 : i64, tpu.core_type = #tpu.core_type<tc>, window_params = [{transform_indices = @transform_0, window_bounds = array<i64: 432>}, {transform_indices = @transform_1, window_bounds = array<i64: 1, 4, 8, 9>}, {transform_indices = @transform_2, window_bounds = array<i64: 1, 4, 8, 8>}, {transform_indices = @transform_3, window_bounds = array<i64: 1, 4, 8, 9>}, {transform_indices = @transform_4, window_bounds = array<i64: 1, 4, 8, 8>}, {transform_indices = @transform_5, window_bounds = array<i64: 1, 4, 1, 9>}, {transform_indices = @transform_6, window_bounds = array<i64: 1, 4, 1, 8>}, {transform_indices = @transform_7, window_bounds = array<i64: 1, 16, 8, 8>}, {transform_indices = @transform_8, window_bounds = array<i64: 1, 1, 2, 16>}]} {
    %c0 = arith.constant 0 : index
    %c0_0 = arith.constant 0 : index
    %c1 = arith.constant 1 : index
    %c0_1 = arith.constant 0 : index
    %0 = vector.load %arg3[%c0, %c0_0, %c1, %c0_1] : memref<1x4x8x9xf32, #tpu.memory_space<vmem>>, vector<1x4x7x9xf32>
    %1 = vector.shape_cast %0 : vector<1x4x7x9xf32> to vector<4x7x9xf32>
    %c0_2 = arith.constant 0 : index
    %c0_3 = arith.constant 0 : index
    %c0_4 = arith.constant 0 : index
    %2 = vector.load %arg11[%c0_2, %c0_3, %c0_4] : memref<4x8x9xf32, #tpu.memory_space<vmem>>, vector<4x7x9xf32>
    tpu.vector_store %arg11[%c0_2, %c0_3, %c0_4], %1 {strides = array<i32>} : memref<4x8x9xf32, #tpu.memory_space<vmem>>, vector<4x7x9xf32>,
    %c0_5 = arith.constant 0 : index
    %c0_6 = arith.constant 0 : index
    %c1_7 = arith.constant 1 : index
    %c0_8 = arith.constant 0 : index
    %3 = vector.load %arg4[%c0_5, %c0_6, %c1_7, %c0_8] : memref<1x4x8x8xf32, #tpu.memory_space<vmem>>, vector<1x4x7x8xf32>
    %4 = vector.shape_cast %3 : vector<1x4x7x8xf32> to vector<4x7x8xf32>
    %c0_9 = arith.constant 0 : index
    %c0_10 = arith.constant 0 : index
    %c0_11 = arith.constant 0 : index
    %5 = vector.load %arg12[%c0_9, %c0_10, %c0_11] : memref<4x8x8xf32, #tpu.memory_space<vmem>>, vector<4x7x8xf32>
    tpu.vector_store %arg12[%c0_9, %c0_10, %c0_11], %4 {strides = array<i32>} : memref<4x8x8xf32, #tpu.memory_space<vmem>>, vector<4x7x8xf32>,
    %c0_12 = arith.constant 0 : index
    %c0_13 = arith.constant 0 : index
    %c0_14 = arith.constant 0 : index
    %c0_15 = arith.constant 0 : index
    %6 = vector.load %arg7[%c0_12, %c0_13, %c0_14, %c0_15] : memref<1x4x1x9xf32, #tpu.memory_space<vmem>>, vector<1x4x1x9xf32>
    %7 = vector.shape_cast %6 : vector<1x4x1x9xf32> to vector<4x9xf32>
    %c0_16 = arith.constant 0 : index
    %c7 = arith.constant 7 : index
    %c0_17 = arith.constant 0 : index
    %8 = vector.load %arg11[%c0_16, %c7, %c0_17] : memref<4x8x9xf32, #tpu.memory_space<vmem>>, vector<4x1x9xf32>
    %9 = vector.shape_cast %8 : vector<4x1x9xf32> to vector<4x9xf32>
    %10 = vector.shape_cast %7 : vector<4x9xf32> to vector<4x1x9xf32>
    tpu.vector_store %arg11[%c0_16, %c7, %c0_17], %10 {strides = array<i32>} : memref<4x8x9xf32, #tpu.memory_space<vmem>>, vector<4x1x9xf32>,
    %c0_18 = arith.constant 0 : index
    %c0_19 = arith.constant 0 : index
    %c0_20 = arith.constant 0 : index
    %c0_21 = arith.constant 0 : index
    %11 = vector.load %arg8[%c0_18, %c0_19, %c0_20, %c0_21] : memref<1x4x1x8xf32, #tpu.memory_space<vmem>>, vector<1x4x1x8xf32>
    %12 = vector.shape_cast %11 : vector<1x4x1x8xf32> to vector<4x8xf32>
    %c0_22 = arith.constant 0 : index
    %c7_23 = arith.constant 7 : index
    %c0_24 = arith.constant 0 : index
    %13 = vector.load %arg12[%c0_22, %c7_23, %c0_24] : memref<4x8x8xf32, #tpu.memory_space<vmem>>, vector<4x1x8xf32>
    %14 = vector.shape_cast %13 : vector<4x1x8xf32> to vector<4x8xf32>
    %15 = vector.shape_cast %12 : vector<4x8xf32> to vector<4x1x8xf32>
    tpu.vector_store %arg12[%c0_22, %c7_23, %c0_24], %15 {strides = array<i32>} : memref<4x8x8xf32, #tpu.memory_space<vmem>>, vector<4x1x8xf32>,
    %cst = arith.constant 0.000000e+00 : f32
    %16 = vector.broadcast %cst : f32 to vector<8x8xf32>
    %cst_25 = arith.constant 0.000000e+00 : f32
    %17 = vector.broadcast %cst_25 : f32 to vector<8x8xf32>
    %cst_26 = arith.constant 0.000000e+00 : f32
    %18 = vector.broadcast %cst_26 : f32 to vector<8x8xf32>
    %cst_27 = arith.constant 0.000000e+00 : f32
    %19 = vector.broadcast %cst_27 : f32 to vector<8x8xf32>
    %c0_28 = arith.constant 0 : index
    %c0_29 = arith.constant 0 : index
    %c0_30 = arith.constant 0 : index
    %c0_31 = arith.constant 0 : index
    %20 = vector.load %arg3[%c0_28, %c0_29, %c0_30, %c0_31] : memref<1x4x8x9xf32, #tpu.memory_space<vmem>>, vector<1x1x8x8xf32>
    %21 = vector.shape_cast %20 : vector<1x1x8x8xf32> to vector<8x8xf32>
    %c0_32 = arith.constant 0 : index
    %22 = memref.load %arg2[%c0_32] : memref<432xf32, #tpu.memory_space<smem>>
    %23 = vector.broadcast %22 : f32 to vector<8x8xf32>
    %24 = arith.mulf %23, %21 : vector<8x8xf32>
    %25 = arith.addf %16, %24 : vector<8x8xf32>
    %c36 = arith.constant 36 : index
    %26 = memref.load %arg2[%c36] : memref<432xf32, #tpu.memory_space<smem>>
    %27 = vector.broadcast %26 : f32 to vector<8x8xf32>
    %28 = arith.mulf %27, %21 : vector<8x8xf32>
    %29 = arith.addf %17, %28 : vector<8x8xf32>
    %c72 = arith.constant 72 : index
    %30 = memref.load %arg2[%c72] : memref<432xf32, #tpu.memory_space<smem>>
    %31 = vector.broadcast %30 : f32 to vector<8x8xf32>
    %32 = arith.mulf %31, %21 : vector<8x8xf32>
    %33 = arith.addf %18, %32 : vector<8x8xf32>
    %c108 = arith.constant 108 : index
    %34 = memref.load %arg2[%c108] : memref<432xf32, #tpu.memory_space<smem>>
    %35 = vector.broadcast %34 : f32 to vector<8x8xf32>
    %36 = arith.mulf %35, %21 : vector<8x8xf32>
    %37 = arith.addf %19, %36 : vector<8x8xf32>
    %c0_33 = arith.constant 0 : index
    %c1_34 = arith.constant 1 : index
    %c0_35 = arith.constant 0 : index
    %c0_36 = arith.constant 0 : index
    %38 = vector.load %arg3[%c0_33, %c1_34, %c0_35, %c0_36] : memref<1x4x8x9xf32, #tpu.memory_space<vmem>>, vector<1x1x8x8xf32>
    %39 = vector.shape_cast %38 : vector<1x1x8x8xf32> to vector<8x8xf32>
    %c9 = arith.constant 9 : index
    %40 = memref.load %arg2[%c9] : memref<432xf32, #tpu.memory_space<smem>>
    %41 = vector.broadcast %40 : f32 to vector<8x8xf32>
    %42 = arith.mulf %41, %39 : vector<8x8xf32>
    %43 = arith.addf %25, %42 : vector<8x8xf32>
    %c45 = arith.constant 45 : index
    %44 = memref.load %arg2[%c45] : memref<432xf32, #tpu.memory_space<smem>>
    %45 = vector.broadcast %44 : f32 to vector<8x8xf32>
    %46 = arith.mulf %45, %39 : vector<8x8xf32>
    %47 = arith.addf %29, %46 : vector<8x8xf32>
    %c81 = arith.constant 81 : index
    %48 = memref.load %arg2[%c81] : memref<432xf32, #tpu.memory_space<smem>>
    %49 = vector.broadcast %48 : f32 to vector<8x8xf32>
    %50 = arith.mulf %49, %39 : vector<8x8xf32>
    %51 = arith.addf %33, %50 : vector<8x8xf32>
    %c117 = arith.constant 117 : index
    %52 = memref.load %arg2[%c117] : memref<432xf32, #tpu.memory_space<smem>>
    %53 = vector.broadcast %52 : f32 to vector<8x8xf32>
    %54 = arith.mulf %53, %39 : vector<8x8xf32>
    %55 = arith.addf %37, %54 : vector<8x8xf32>
    %c0_37 = arith.constant 0 : index
    %c2 = arith.constant 2 : index
    %c0_38 = arith.constant 0 : index
    %c0_39 = arith.constant 0 : index
    %56 = vector.load %arg3[%c0_37, %c2, %c0_38, %c0_39] : memref<1x4x8x9xf32, #tpu.memory_space<vmem>>, vector<1x1x8x8xf32>
    %57 = vector.shape_cast %56 : vector<1x1x8x8xf32> to vector<8x8xf32>
    %c18 = arith.constant 18 : index
    %58 = memref.load %arg2[%c18] : memref<432xf32, #tpu.memory_space<smem>>
    %59 = vector.broadcast %58 : f32 to vector<8x8xf32>
    %60 = arith.mulf %59, %57 : vector<8x8xf32>
    %61 = arith.addf %43, %60 : vector<8x8xf32>
    %c54 = arith.constant 54 : index
    %62 = memref.load %arg2[%c54] : memref<432xf32, #tpu.memory_space<smem>>
    %63 = vector.broadcast %62 : f32 to vector<8x8xf32>
    %64 = arith.mulf %63, %57 : vector<8x8xf32>
    %65 = arith.addf %47, %64 : vector<8x8xf32>
    %c90 = arith.constant 90 : index
    %66 = memref.load %arg2[%c90] : memref<432xf32, #tpu.memory_space<smem>>
    %67 = vector.broadcast %66 : f32 to vector<8x8xf32>
    %68 = arith.mulf %67, %57 : vector<8x8xf32>
    %69 = arith.addf %51, %68 : vector<8x8xf32>
    %c126 = arith.constant 126 : index
    %70 = memref.load %arg2[%c126] : memref<432xf32, #tpu.memory_space<smem>>
    %71 = vector.broadcast %70 : f32 to vector<8x8xf32>
    %72 = arith.mulf %71, %57 : vector<8x8xf32>
    %73 = arith.addf %55, %72 : vector<8x8xf32>
    %c0_40 = arith.constant 0 : index
    %c3 = arith.constant 3 : index
    %c0_41 = arith.constant 0 : index
    %c0_42 = arith.constant 0 : index
    %74 = vector.load %arg3[%c0_40, %c3, %c0_41, %c0_42] : memref<1x4x8x9xf32, #tpu.memory_space<vmem>>, vector<1x1x8x8xf32>
    %75 = vector.shape_cast %74 : vector<1x1x8x8xf32> to vector<8x8xf32>
    %c27 = arith.constant 27 : index
    %76 = memref.load %arg2[%c27] : memref<432xf32, #tpu.memory_space<smem>>
    %77 = vector.broadcast %76 : f32 to vector<8x8xf32>
    %78 = arith.mulf %77, %75 : vector<8x8xf32>
    %79 = arith.addf %61, %78 : vector<8x8xf32>
    %c63 = arith.constant 63 : index
    %80 = memref.load %arg2[%c63] : memref<432xf32, #tpu.memory_space<smem>>
    %81 = vector.broadcast %80 : f32 to vector<8x8xf32>
    %82 = arith.mulf %81, %75 : vector<8x8xf32>
    %83 = arith.addf %65, %82 : vector<8x8xf32>
    %c99 = arith.constant 99 : index
    %84 = memref.load %arg2[%c99] : memref<432xf32, #tpu.memory_space<smem>>
    %85 = vector.broadcast %84 : f32 to vector<8x8xf32>
    %86 = arith.mulf %85, %75 : vector<8x8xf32>
    %87 = arith.addf %69, %86 : vector<8x8xf32>
    %c135 = arith.constant 135 : index
    %88 = memref.load %arg2[%c135] : memref<432xf32, #tpu.memory_space<smem>>
    %89 = vector.broadcast %88 : f32 to vector<8x8xf32>
    %90 = arith.mulf %89, %75 : vector<8x8xf32>
    %91 = arith.addf %73, %90 : vector<8x8xf32>
    %c0_43 = arith.constant 0 : index
    %c0_44 = arith.constant 0 : index
    %c0_45 = arith.constant 0 : index
    %c0_46 = arith.constant 0 : index
    %92 = vector.load %arg4[%c0_43, %c0_44, %c0_45, %c0_46] : memref<1x4x8x8xf32, #tpu.memory_space<vmem>>, vector<1x1x8x8xf32>
    %93 = vector.shape_cast %92 : vector<1x1x8x8xf32> to vector<8x8xf32>
    %c1_47 = arith.constant 1 : index
    %94 = memref.load %arg2[%c1_47] : memref<432xf32, #tpu.memory_space<smem>>
    %95 = vector.broadcast %94 : f32 to vector<8x8xf32>
    %96 = arith.mulf %95, %93 : vector<8x8xf32>
    %97 = arith.addf %79, %96 : vector<8x8xf32>
    %c37 = arith.constant 37 : index
    %98 = memref.load %arg2[%c37] : memref<432xf32, #tpu.memory_space<smem>>
    %99 = vector.broadcast %98 : f32 to vector<8x8xf32>
    %100 = arith.mulf %99, %93 : vector<8x8xf32>
    %101 = arith.addf %83, %100 : vector<8x8xf32>
    %c73 = arith.constant 73 : index
    %102 = memref.load %arg2[%c73] : memref<432xf32, #tpu.memory_space<smem>>
    %103 = vector.broadcast %102 : f32 to vector<8x8xf32>
    %104 = arith.mulf %103, %93 : vector<8x8xf32>
    %105 = arith.addf %87, %104 : vector<8x8xf32>
    %c109 = arith.constant 109 : index
    %106 = memref.load %arg2[%c109] : memref<432xf32, #tpu.memory_space<smem>>
    %107 = vector.broadcast %106 : f32 to vector<8x8xf32>
    %108 = arith.mulf %107, %93 : vector<8x8xf32>
    %109 = arith.addf %91, %108 : vector<8x8xf32>
    %c0_48 = arith.constant 0 : index
    %c1_49 = arith.constant 1 : index
    %c0_50 = arith.constant 0 : index
    %c0_51 = arith.constant 0 : index
    %110 = vector.load %arg4[%c0_48, %c1_49, %c0_50, %c0_51] : memref<1x4x8x8xf32, #tpu.memory_space<vmem>>, vector<1x1x8x8xf32>
    %111 = vector.shape_cast %110 : vector<1x1x8x8xf32> to vector<8x8xf32>
    %c10 = arith.constant 10 : index
    %112 = memref.load %arg2[%c10] : memref<432xf32, #tpu.memory_space<smem>>
    %113 = vector.broadcast %112 : f32 to vector<8x8xf32>
    %114 = arith.mulf %113, %111 : vector<8x8xf32>
    %115 = arith.addf %97, %114 : vector<8x8xf32>
    %c46 = arith.constant 46 : index
    %116 = memref.load %arg2[%c46] : memref<432xf32, #tpu.memory_space<smem>>
    %117 = vector.broadcast %116 : f32 to vector<8x8xf32>
    %118 = arith.mulf %117, %111 : vector<8x8xf32>
    %119 = arith.addf %101, %118 : vector<8x8xf32>
    %c82 = arith.constant 82 : index
    %120 = memref.load %arg2[%c82] : memref<432xf32, #tpu.memory_space<smem>>
    %121 = vector.broadcast %120 : f32 to vector<8x8xf32>
    %122 = arith.mulf %121, %111 : vector<8x8xf32>
    %123 = arith.addf %105, %122 : vector<8x8xf32>
    %c118 = arith.constant 118 : index
    %124 = memref.load %arg2[%c118] : memref<432xf32, #tpu.memory_space<smem>>
    %125 = vector.broadcast %124 : f32 to vector<8x8xf32>
    %126 = arith.mulf %125, %111 : vector<8x8xf32>
    %127 = arith.addf %109, %126 : vector<8x8xf32>
    %c0_52 = arith.constant 0 : index
    %c2_53 = arith.constant 2 : index
    %c0_54 = arith.constant 0 : index
    %c0_55 = arith.constant 0 : index
    %128 = vector.load %arg4[%c0_52, %c2_53, %c0_54, %c0_55] : memref<1x4x8x8xf32, #tpu.memory_space<vmem>>, vector<1x1x8x8xf32>
    %129 = vector.shape_cast %128 : vector<1x1x8x8xf32> to vector<8x8xf32>
    %c19 = arith.constant 19 : index
    %130 = memref.load %arg2[%c19] : memref<432xf32, #tpu.memory_space<smem>>
    %131 = vector.broadcast %130 : f32 to vector<8x8xf32>
    %132 = arith.mulf %131, %129 : vector<8x8xf32>
    %133 = arith.addf %115, %132 : vector<8x8xf32>
    %c55 = arith.constant 55 : index
    %134 = memref.load %arg2[%c55] : memref<432xf32, #tpu.memory_space<smem>>
    %135 = vector.broadcast %134 : f32 to vector<8x8xf32>
    %136 = arith.mulf %135, %129 : vector<8x8xf32>
    %137 = arith.addf %119, %136 : vector<8x8xf32>
    %c91 = arith.constant 91 : index
    %138 = memref.load %arg2[%c91] : memref<432xf32, #tpu.memory_space<smem>>
    %139 = vector.broadcast %138 : f32 to vector<8x8xf32>
    %140 = arith.mulf %139, %129 : vector<8x8xf32>
    %141 = arith.addf %123, %140 : vector<8x8xf32>
    %c127 = arith.constant 127 : index
    %142 = memref.load %arg2[%c127] : memref<432xf32, #tpu.memory_space<smem>>
    %143 = vector.broadcast %142 : f32 to vector<8x8xf32>
    %144 = arith.mulf %143, %129 : vector<8x8xf32>
    %145 = arith.addf %127, %144 : vector<8x8xf32>
    %c0_56 = arith.constant 0 : index
    %c3_57 = arith.constant 3 : index
    %c0_58 = arith.constant 0 : index
    %c0_59 = arith.constant 0 : index
    %146 = vector.load %arg4[%c0_56, %c3_57, %c0_58, %c0_59] : memref<1x4x8x8xf32, #tpu.memory_space<vmem>>, vector<1x1x8x8xf32>
    %147 = vector.shape_cast %146 : vector<1x1x8x8xf32> to vector<8x8xf32>
    %c28 = arith.constant 28 : index
    %148 = memref.load %arg2[%c28] : memref<432xf32, #tpu.memory_space<smem>>
    %149 = vector.broadcast %148 : f32 to vector<8x8xf32>
    %150 = arith.mulf %149, %147 : vector<8x8xf32>
    %151 = arith.addf %133, %150 : vector<8x8xf32>
    %c64 = arith.constant 64 : index
    %152 = memref.load %arg2[%c64] : memref<432xf32, #tpu.memory_space<smem>>
    %153 = vector.broadcast %152 : f32 to vector<8x8xf32>
    %154 = arith.mulf %153, %147 : vector<8x8xf32>
    %155 = arith.addf %137, %154 : vector<8x8xf32>
    %c100 = arith.constant 100 : index
    %156 = memref.load %arg2[%c100] : memref<432xf32, #tpu.memory_space<smem>>
    %157 = vector.broadcast %156 : f32 to vector<8x8xf32>
    %158 = arith.mulf %157, %147 : vector<8x8xf32>
    %159 = arith.addf %141, %158 : vector<8x8xf32>
    %c136 = arith.constant 136 : index
    %160 = memref.load %arg2[%c136] : memref<432xf32, #tpu.memory_space<smem>>
    %161 = vector.broadcast %160 : f32 to vector<8x8xf32>
    %162 = arith.mulf %161, %147 : vector<8x8xf32>
    %163 = arith.addf %145, %162 : vector<8x8xf32>
    %c0_60 = arith.constant 0 : index
    %c0_61 = arith.constant 0 : index
    %c0_62 = arith.constant 0 : index
    %c1_63 = arith.constant 1 : index
    %164 = vector.load %arg3[%c0_60, %c0_61, %c0_62, %c1_63] : memref<1x4x8x9xf32, #tpu.memory_space<vmem>>, vector<1x1x8x8xf32>
    %165 = vector.shape_cast %164 : vector<1x1x8x8xf32> to vector<8x8xf32>
    %c2_64 = arith.constant 2 : index
    %166 = memref.load %arg2[%c2_64] : memref<432xf32, #tpu.memory_space<smem>>
    %167 = vector.broadcast %166 : f32 to vector<8x8xf32>
    %168 = arith.mulf %167, %165 : vector<8x8xf32>
    %169 = arith.addf %151, %168 : vector<8x8xf32>
    %c38 = arith.constant 38 : index
    %170 = memref.load %arg2[%c38] : memref<432xf32, #tpu.memory_space<smem>>
    %171 = vector.broadcast %170 : f32 to vector<8x8xf32>
    %172 = arith.mulf %171, %165 : vector<8x8xf32>
    %173 = arith.addf %155, %172 : vector<8x8xf32>
    %c74 = arith.constant 74 : index
    %174 = memref.load %arg2[%c74] : memref<432xf32, #tpu.memory_space<smem>>
    %175 = vector.broadcast %174 : f32 to vector<8x8xf32>
    %176 = arith.mulf %175, %165 : vector<8x8xf32>
    %177 = arith.addf %159, %176 : vector<8x8xf32>
    %c110 = arith.constant 110 : index
    %178 = memref.load %arg2[%c110] : memref<432xf32, #tpu.memory_space<smem>>
    %179 = vector.broadcast %178 : f32 to vector<8x8xf32>
    %180 = arith.mulf %179, %165 : vector<8x8xf32>
    %181 = arith.addf %163, %180 : vector<8x8xf32>
    %c0_65 = arith.constant 0 : index
    %c1_66 = arith.constant 1 : index
    %c0_67 = arith.constant 0 : index
    %c1_68 = arith.constant 1 : index
    %182 = vector.load %arg3[%c0_65, %c1_66, %c0_67, %c1_68] : memref<1x4x8x9xf32, #tpu.memory_space<vmem>>, vector<1x1x8x8xf32>
    %183 = vector.shape_cast %182 : vector<1x1x8x8xf32> to vector<8x8xf32>
    %c11 = arith.constant 11 : index
    %184 = memref.load %arg2[%c11] : memref<432xf32, #tpu.memory_space<smem>>
    %185 = vector.broadcast %184 : f32 to vector<8x8xf32>
    %186 = arith.mulf %185, %183 : vector<8x8xf32>
    %187 = arith.addf %169, %186 : vector<8x8xf32>
    %c47 = arith.constant 47 : index
    %188 = memref.load %arg2[%c47] : memref<432xf32, #tpu.memory_space<smem>>
    %189 = vector.broadcast %188 : f32 to vector<8x8xf32>
    %190 = arith.mulf %189, %183 : vector<8x8xf32>
    %191 = arith.addf %173, %190 : vector<8x8xf32>
    %c83 = arith.constant 83 : index
    %192 = memref.load %arg2[%c83] : memref<432xf32, #tpu.memory_space<smem>>
    %193 = vector.broadcast %192 : f32 to vector<8x8xf32>
    %194 = arith.mulf %193, %183 : vector<8x8xf32>
    %195 = arith.addf %177, %194 : vector<8x8xf32>
    %c119 = arith.constant 119 : index
    %196 = memref.load %arg2[%c119] : memref<432xf32, #tpu.memory_space<smem>>
    %197 = vector.broadcast %196 : f32 to vector<8x8xf32>
    %198 = arith.mulf %197, %183 : vector<8x8xf32>
    %199 = arith.addf %181, %198 : vector<8x8xf32>
    %c0_69 = arith.constant 0 : index
    %c2_70 = arith.constant 2 : index
    %c0_71 = arith.constant 0 : index
    %c1_72 = arith.constant 1 : index
    %200 = vector.load %arg3[%c0_69, %c2_70, %c0_71, %c1_72] : memref<1x4x8x9xf32, #tpu.memory_space<vmem>>, vector<1x1x8x8xf32>
    %201 = vector.shape_cast %200 : vector<1x1x8x8xf32> to vector<8x8xf32>
    %c20 = arith.constant 20 : index
    %202 = memref.load %arg2[%c20] : memref<432xf32, #tpu.memory_space<smem>>
    %203 = vector.broadcast %202 : f32 to vector<8x8xf32>
    %204 = arith.mulf %203, %201 : vector<8x8xf32>
    %205 = arith.addf %187, %204 : vector<8x8xf32>
    %c56 = arith.constant 56 : index
    %206 = memref.load %arg2[%c56] : memref<432xf32, #tpu.memory_space<smem>>
    %207 = vector.broadcast %206 : f32 to vector<8x8xf32>
    %208 = arith.mulf %207, %201 : vector<8x8xf32>
    %209 = arith.addf %191, %208 : vector<8x8xf32>
    %c92 = arith.constant 92 : index
    %210 = memref.load %arg2[%c92] : memref<432xf32, #tpu.memory_space<smem>>
    %211 = vector.broadcast %210 : f32 to vector<8x8xf32>
    %212 = arith.mulf %211, %201 : vector<8x8xf32>
    %213 = arith.addf %195, %212 : vector<8x8xf32>
    %c128 = arith.constant 128 : index
    %214 = memref.load %arg2[%c128] : memref<432xf32, #tpu.memory_space<smem>>
    %215 = vector.broadcast %214 : f32 to vector<8x8xf32>
    %216 = arith.mulf %215, %201 : vector<8x8xf32>
    %217 = arith.addf %199, %216 : vector<8x8xf32>
    %c0_73 = arith.constant 0 : index
    %c3_74 = arith.constant 3 : index
    %c0_75 = arith.constant 0 : index
    %c1_76 = arith.constant 1 : index
    %218 = vector.load %arg3[%c0_73, %c3_74, %c0_75, %c1_76] : memref<1x4x8x9xf32, #tpu.memory_space<vmem>>, vector<1x1x8x8xf32>
    %219 = vector.shape_cast %218 : vector<1x1x8x8xf32> to vector<8x8xf32>
    %c29 = arith.constant 29 : index
    %220 = memref.load %arg2[%c29] : memref<432xf32, #tpu.memory_space<smem>>
    %221 = vector.broadcast %220 : f32 to vector<8x8xf32>
    %222 = arith.mulf %221, %219 : vector<8x8xf32>
    %223 = arith.addf %205, %222 : vector<8x8xf32>
    %c65 = arith.constant 65 : index
    %224 = memref.load %arg2[%c65] : memref<432xf32, #tpu.memory_space<smem>>
    %225 = vector.broadcast %224 : f32 to vector<8x8xf32>
    %226 = arith.mulf %225, %219 : vector<8x8xf32>
    %227 = arith.addf %209, %226 : vector<8x8xf32>
    %c101 = arith.constant 101 : index
    %228 = memref.load %arg2[%c101] : memref<432xf32, #tpu.memory_space<smem>>
    %229 = vector.broadcast %228 : f32 to vector<8x8xf32>
    %230 = arith.mulf %229, %219 : vector<8x8xf32>
    %231 = arith.addf %213, %230 : vector<8x8xf32>
    %c137 = arith.constant 137 : index
    %232 = memref.load %arg2[%c137] : memref<432xf32, #tpu.memory_space<smem>>
    %233 = vector.broadcast %232 : f32 to vector<8x8xf32>
    %234 = arith.mulf %233, %219 : vector<8x8xf32>
    %235 = arith.addf %217, %234 : vector<8x8xf32>
    %c0_77 = arith.constant 0 : index
    %c0_78 = arith.constant 0 : index
    %c0_79 = arith.constant 0 : index
    %c0_80 = arith.constant 0 : index
    %236 = vector.load %arg5[%c0_77, %c0_78, %c0_79, %c0_80] : memref<1x4x8x9xf32, #tpu.memory_space<vmem>>, vector<1x1x8x8xf32>
    %237 = vector.shape_cast %236 : vector<1x1x8x8xf32> to vector<8x8xf32>
    %c3_81 = arith.constant 3 : index
    %238 = memref.load %arg2[%c3_81] : memref<432xf32, #tpu.memory_space<smem>>
    %239 = vector.broadcast %238 : f32 to vector<8x8xf32>
    %240 = arith.mulf %239, %237 : vector<8x8xf32>
    %241 = arith.addf %223, %240 : vector<8x8xf32>
    %c39 = arith.constant 39 : index
    %242 = memref.load %arg2[%c39] : memref<432xf32, #tpu.memory_space<smem>>
    %243 = vector.broadcast %242 : f32 to vector<8x8xf32>
    %244 = arith.mulf %243, %237 : vector<8x8xf32>
    %245 = arith.addf %227, %244 : vector<8x8xf32>
    %c75 = arith.constant 75 : index
    %246 = memref.load %arg2[%c75] : memref<432xf32, #tpu.memory_space<smem>>
    %247 = vector.broadcast %246 : f32 to vector<8x8xf32>
    %248 = arith.mulf %247, %237 : vector<8x8xf32>
    %249 = arith.addf %231, %248 : vector<8x8xf32>
    %c111 = arith.constant 111 : index
    %250 = memref.load %arg2[%c111] : memref<432xf32, #tpu.memory_space<smem>>
    %251 = vector.broadcast %250 : f32 to vector<8x8xf32>
    %252 = arith.mulf %251, %237 : vector<8x8xf32>
    %253 = arith.addf %235, %252 : vector<8x8xf32>
    %c0_82 = arith.constant 0 : index
    %c1_83 = arith.constant 1 : index
    %c0_84 = arith.constant 0 : index
    %c0_85 = arith.constant 0 : index
    %254 = vector.load %arg5[%c0_82, %c1_83, %c0_84, %c0_85] : memref<1x4x8x9xf32, #tpu.memory_space<vmem>>, vector<1x1x8x8xf32>
    %255 = vector.shape_cast %254 : vector<1x1x8x8xf32> to vector<8x8xf32>
    %c12 = arith.constant 12 : index
    %256 = memref.load %arg2[%c12] : memref<432xf32, #tpu.memory_space<smem>>
    %257 = vector.broadcast %256 : f32 to vector<8x8xf32>
    %258 = arith.mulf %257, %255 : vector<8x8xf32>
    %259 = arith.addf %241, %258 : vector<8x8xf32>
    %c48 = arith.constant 48 : index
    %260 = memref.load %arg2[%c48] : memref<432xf32, #tpu.memory_space<smem>>
    %261 = vector.broadcast %260 : f32 to vector<8x8xf32>
    %262 = arith.mulf %261, %255 : vector<8x8xf32>
    %263 = arith.addf %245, %262 : vector<8x8xf32>
    %c84 = arith.constant 84 : index
    %264 = memref.load %arg2[%c84] : memref<432xf32, #tpu.memory_space<smem>>
    %265 = vector.broadcast %264 : f32 to vector<8x8xf32>
    %266 = arith.mulf %265, %255 : vector<8x8xf32>
    %267 = arith.addf %249, %266 : vector<8x8xf32>
    %c120 = arith.constant 120 : index
    %268 = memref.load %arg2[%c120] : memref<432xf32, #tpu.memory_space<smem>>
    %269 = vector.broadcast %268 : f32 to vector<8x8xf32>
    %270 = arith.mulf %269, %255 : vector<8x8xf32>
    %271 = arith.addf %253, %270 : vector<8x8xf32>
    %c0_86 = arith.constant 0 : index
    %c2_87 = arith.constant 2 : index
    %c0_88 = arith.constant 0 : index
    %c0_89 = arith.constant 0 : index
    %272 = vector.load %arg5[%c0_86, %c2_87, %c0_88, %c0_89] : memref<1x4x8x9xf32, #tpu.memory_space<vmem>>, vector<1x1x8x8xf32>
    %273 = vector.shape_cast %272 : vector<1x1x8x8xf32> to vector<8x8xf32>
    %c21 = arith.constant 21 : index
    %274 = memref.load %arg2[%c21] : memref<432xf32, #tpu.memory_space<smem>>
    %275 = vector.broadcast %274 : f32 to vector<8x8xf32>
    %276 = arith.mulf %275, %273 : vector<8x8xf32>
    %277 = arith.addf %259, %276 : vector<8x8xf32>
    %c57 = arith.constant 57 : index
    %278 = memref.load %arg2[%c57] : memref<432xf32, #tpu.memory_space<smem>>
    %279 = vector.broadcast %278 : f32 to vector<8x8xf32>
    %280 = arith.mulf %279, %273 : vector<8x8xf32>
    %281 = arith.addf %263, %280 : vector<8x8xf32>
    %c93 = arith.constant 93 : index
    %282 = memref.load %arg2[%c93] : memref<432xf32, #tpu.memory_space<smem>>
    %283 = vector.broadcast %282 : f32 to vector<8x8xf32>
    %284 = arith.mulf %283, %273 : vector<8x8xf32>
    %285 = arith.addf %267, %284 : vector<8x8xf32>
    %c129 = arith.constant 129 : index
    %286 = memref.load %arg2[%c129] : memref<432xf32, #tpu.memory_space<smem>>
    %287 = vector.broadcast %286 : f32 to vector<8x8xf32>
    %288 = arith.mulf %287, %273 : vector<8x8xf32>
    %289 = arith.addf %271, %288 : vector<8x8xf32>
    %c0_90 = arith.constant 0 : index
    %c3_91 = arith.constant 3 : index
    %c0_92 = arith.constant 0 : index
    %c0_93 = arith.constant 0 : index
    %290 = vector.load %arg5[%c0_90, %c3_91, %c0_92, %c0_93] : memref<1x4x8x9xf32, #tpu.memory_space<vmem>>, vector<1x1x8x8xf32>
    %291 = vector.shape_cast %290 : vector<1x1x8x8xf32> to vector<8x8xf32>
    %c30 = arith.constant 30 : index
    %292 = memref.load %arg2[%c30] : memref<432xf32, #tpu.memory_space<smem>>
    %293 = vector.broadcast %292 : f32 to vector<8x8xf32>
    %294 = arith.mulf %293, %291 : vector<8x8xf32>
    %295 = arith.addf %277, %294 : vector<8x8xf32>
    %c66 = arith.constant 66 : index
    %296 = memref.load %arg2[%c66] : memref<432xf32, #tpu.memory_space<smem>>
    %297 = vector.broadcast %296 : f32 to vector<8x8xf32>
    %298 = arith.mulf %297, %291 : vector<8x8xf32>
    %299 = arith.addf %281, %298 : vector<8x8xf32>
    %c102 = arith.constant 102 : index
    %300 = memref.load %arg2[%c102] : memref<432xf32, #tpu.memory_space<smem>>
    %301 = vector.broadcast %300 : f32 to vector<8x8xf32>
    %302 = arith.mulf %301, %291 : vector<8x8xf32>
    %303 = arith.addf %285, %302 : vector<8x8xf32>
    %c138 = arith.constant 138 : index
    %304 = memref.load %arg2[%c138] : memref<432xf32, #tpu.memory_space<smem>>
    %305 = vector.broadcast %304 : f32 to vector<8x8xf32>
    %306 = arith.mulf %305, %291 : vector<8x8xf32>
    %307 = arith.addf %289, %306 : vector<8x8xf32>
    %c0_94 = arith.constant 0 : index
    %c0_95 = arith.constant 0 : index
    %c0_96 = arith.constant 0 : index
    %c0_97 = arith.constant 0 : index
    %308 = vector.load %arg6[%c0_94, %c0_95, %c0_96, %c0_97] : memref<1x4x8x8xf32, #tpu.memory_space<vmem>>, vector<1x1x8x8xf32>
    %309 = vector.shape_cast %308 : vector<1x1x8x8xf32> to vector<8x8xf32>
    %c4 = arith.constant 4 : index
    %310 = memref.load %arg2[%c4] : memref<432xf32, #tpu.memory_space<smem>>
    %311 = vector.broadcast %310 : f32 to vector<8x8xf32>
    %312 = arith.mulf %311, %309 : vector<8x8xf32>
    %313 = arith.addf %295, %312 : vector<8x8xf32>
    %c40 = arith.constant 40 : index
    %314 = memref.load %arg2[%c40] : memref<432xf32, #tpu.memory_space<smem>>
    %315 = vector.broadcast %314 : f32 to vector<8x8xf32>
    %316 = arith.mulf %315, %309 : vector<8x8xf32>
    %317 = arith.addf %299, %316 : vector<8x8xf32>
    %c76 = arith.constant 76 : index
    %318 = memref.load %arg2[%c76] : memref<432xf32, #tpu.memory_space<smem>>
    %319 = vector.broadcast %318 : f32 to vector<8x8xf32>
    %320 = arith.mulf %319, %309 : vector<8x8xf32>
    %321 = arith.addf %303, %320 : vector<8x8xf32>
    %c112 = arith.constant 112 : index
    %322 = memref.load %arg2[%c112] : memref<432xf32, #tpu.memory_space<smem>>
    %323 = vector.broadcast %322 : f32 to vector<8x8xf32>
    %324 = arith.mulf %323, %309 : vector<8x8xf32>
    %325 = arith.addf %307, %324 : vector<8x8xf32>
    %c0_98 = arith.constant 0 : index
    %c1_99 = arith.constant 1 : index
    %c0_100 = arith.constant 0 : index
    %c0_101 = arith.constant 0 : index
    %326 = vector.load %arg6[%c0_98, %c1_99, %c0_100, %c0_101] : memref<1x4x8x8xf32, #tpu.memory_space<vmem>>, vector<1x1x8x8xf32>
    %327 = vector.shape_cast %326 : vector<1x1x8x8xf32> to vector<8x8xf32>
    %c13 = arith.constant 13 : index
    %328 = memref.load %arg2[%c13] : memref<432xf32, #tpu.memory_space<smem>>
    %329 = vector.broadcast %328 : f32 to vector<8x8xf32>
    %330 = arith.mulf %329, %327 : vector<8x8xf32>
    %331 = arith.addf %313, %330 : vector<8x8xf32>
    %c49 = arith.constant 49 : index
    %332 = memref.load %arg2[%c49] : memref<432xf32, #tpu.memory_space<smem>>
    %333 = vector.broadcast %332 : f32 to vector<8x8xf32>
    %334 = arith.mulf %333, %327 : vector<8x8xf32>
    %335 = arith.addf %317, %334 : vector<8x8xf32>
    %c85 = arith.constant 85 : index
    %336 = memref.load %arg2[%c85] : memref<432xf32, #tpu.memory_space<smem>>
    %337 = vector.broadcast %336 : f32 to vector<8x8xf32>
    %338 = arith.mulf %337, %327 : vector<8x8xf32>
    %339 = arith.addf %321, %338 : vector<8x8xf32>
    %c121 = arith.constant 121 : index
    %340 = memref.load %arg2[%c121] : memref<432xf32, #tpu.memory_space<smem>>
    %341 = vector.broadcast %340 : f32 to vector<8x8xf32>
    %342 = arith.mulf %341, %327 : vector<8x8xf32>
    %343 = arith.addf %325, %342 : vector<8x8xf32>
    %c0_102 = arith.constant 0 : index
    %c2_103 = arith.constant 2 : index
    %c0_104 = arith.constant 0 : index
    %c0_105 = arith.constant 0 : index
    %344 = vector.load %arg6[%c0_102, %c2_103, %c0_104, %c0_105] : memref<1x4x8x8xf32, #tpu.memory_space<vmem>>, vector<1x1x8x8xf32>
    %345 = vector.shape_cast %344 : vector<1x1x8x8xf32> to vector<8x8xf32>
    %c22 = arith.constant 22 : index
    %346 = memref.load %arg2[%c22] : memref<432xf32, #tpu.memory_space<smem>>
    %347 = vector.broadcast %346 : f32 to vector<8x8xf32>
    %348 = arith.mulf %347, %345 : vector<8x8xf32>
    %349 = arith.addf %331, %348 : vector<8x8xf32>
    %c58 = arith.constant 58 : index
    %350 = memref.load %arg2[%c58] : memref<432xf32, #tpu.memory_space<smem>>
    %351 = vector.broadcast %350 : f32 to vector<8x8xf32>
    %352 = arith.mulf %351, %345 : vector<8x8xf32>
    %353 = arith.addf %335, %352 : vector<8x8xf32>
    %c94 = arith.constant 94 : index
    %354 = memref.load %arg2[%c94] : memref<432xf32, #tpu.memory_space<smem>>
    %355 = vector.broadcast %354 : f32 to vector<8x8xf32>
    %356 = arith.mulf %355, %345 : vector<8x8xf32>
    %357 = arith.addf %339, %356 : vector<8x8xf32>
    %c130 = arith.constant 130 : index
    %358 = memref.load %arg2[%c130] : memref<432xf32, #tpu.memory_space<smem>>
    %359 = vector.broadcast %358 : f32 to vector<8x8xf32>
    %360 = arith.mulf %359, %345 : vector<8x8xf32>
    %361 = arith.addf %343, %360 : vector<8x8xf32>
    %c0_106 = arith.constant 0 : index
    %c3_107 = arith.constant 3 : index
    %c0_108 = arith.constant 0 : index
    %c0_109 = arith.constant 0 : index
    %362 = vector.load %arg6[%c0_106, %c3_107, %c0_108, %c0_109] : memref<1x4x8x8xf32, #tpu.memory_space<vmem>>, vector<1x1x8x8xf32>
    %363 = vector.shape_cast %362 : vector<1x1x8x8xf32> to vector<8x8xf32>
    %c31 = arith.constant 31 : index
    %364 = memref.load %arg2[%c31] : memref<432xf32, #tpu.memory_space<smem>>
    %365 = vector.broadcast %364 : f32 to vector<8x8xf32>
    %366 = arith.mulf %365, %363 : vector<8x8xf32>
    %367 = arith.addf %349, %366 : vector<8x8xf32>
    %c67 = arith.constant 67 : index
    %368 = memref.load %arg2[%c67] : memref<432xf32, #tpu.memory_space<smem>>
    %369 = vector.broadcast %368 : f32 to vector<8x8xf32>
    %370 = arith.mulf %369, %363 : vector<8x8xf32>
    %371 = arith.addf %353, %370 : vector<8x8xf32>
    %c103 = arith.constant 103 : index
    %372 = memref.load %arg2[%c103] : memref<432xf32, #tpu.memory_space<smem>>
    %373 = vector.broadcast %372 : f32 to vector<8x8xf32>
    %374 = arith.mulf %373, %363 : vector<8x8xf32>
    %375 = arith.addf %357, %374 : vector<8x8xf32>
    %c139 = arith.constant 139 : index
    %376 = memref.load %arg2[%c139] : memref<432xf32, #tpu.memory_space<smem>>
    %377 = vector.broadcast %376 : f32 to vector<8x8xf32>
    %378 = arith.mulf %377, %363 : vector<8x8xf32>
    %379 = arith.addf %361, %378 : vector<8x8xf32>
    %c0_110 = arith.constant 0 : index
    %c0_111 = arith.constant 0 : index
    %c0_112 = arith.constant 0 : index
    %c1_113 = arith.constant 1 : index
    %380 = vector.load %arg5[%c0_110, %c0_111, %c0_112, %c1_113] : memref<1x4x8x9xf32, #tpu.memory_space<vmem>>, vector<1x1x8x8xf32>
    %381 = vector.shape_cast %380 : vector<1x1x8x8xf32> to vector<8x8xf32>
    %c5 = arith.constant 5 : index
    %382 = memref.load %arg2[%c5] : memref<432xf32, #tpu.memory_space<smem>>
    %383 = vector.broadcast %382 : f32 to vector<8x8xf32>
    %384 = arith.mulf %383, %381 : vector<8x8xf32>
    %385 = arith.addf %367, %384 : vector<8x8xf32>
    %c41 = arith.constant 41 : index
    %386 = memref.load %arg2[%c41] : memref<432xf32, #tpu.memory_space<smem>>
    %387 = vector.broadcast %386 : f32 to vector<8x8xf32>
    %388 = arith.mulf %387, %381 : vector<8x8xf32>
    %389 = arith.addf %371, %388 : vector<8x8xf32>
    %c77 = arith.constant 77 : index
    %390 = memref.load %arg2[%c77] : memref<432xf32, #tpu.memory_space<smem>>
    %391 = vector.broadcast %390 : f32 to vector<8x8xf32>
    %392 = arith.mulf %391, %381 : vector<8x8xf32>
    %393 = arith.addf %375, %392 : vector<8x8xf32>
    %c113 = arith.constant 113 : index
    %394 = memref.load %arg2[%c113] : memref<432xf32, #tpu.memory_space<smem>>
    %395 = vector.broadcast %394 : f32 to vector<8x8xf32>
    %396 = arith.mulf %395, %381 : vector<8x8xf32>
    %397 = arith.addf %379, %396 : vector<8x8xf32>
    %c0_114 = arith.constant 0 : index
    %c1_115 = arith.constant 1 : index
    %c0_116 = arith.constant 0 : index
    %c1_117 = arith.constant 1 : index
    %398 = vector.load %arg5[%c0_114, %c1_115, %c0_116, %c1_117] : memref<1x4x8x9xf32, #tpu.memory_space<vmem>>, vector<1x1x8x8xf32>
    %399 = vector.shape_cast %398 : vector<1x1x8x8xf32> to vector<8x8xf32>
    %c14 = arith.constant 14 : index
    %400 = memref.load %arg2[%c14] : memref<432xf32, #tpu.memory_space<smem>>
    %401 = vector.broadcast %400 : f32 to vector<8x8xf32>
    %402 = arith.mulf %401, %399 : vector<8x8xf32>
    %403 = arith.addf %385, %402 : vector<8x8xf32>
    %c50 = arith.constant 50 : index
    %404 = memref.load %arg2[%c50] : memref<432xf32, #tpu.memory_space<smem>>
    %405 = vector.broadcast %404 : f32 to vector<8x8xf32>
    %406 = arith.mulf %405, %399 : vector<8x8xf32>
    %407 = arith.addf %389, %406 : vector<8x8xf32>
    %c86 = arith.constant 86 : index
    %408 = memref.load %arg2[%c86] : memref<432xf32, #tpu.memory_space<smem>>
    %409 = vector.broadcast %408 : f32 to vector<8x8xf32>
    %410 = arith.mulf %409, %399 : vector<8x8xf32>
    %411 = arith.addf %393, %410 : vector<8x8xf32>
    %c122 = arith.constant 122 : index
    %412 = memref.load %arg2[%c122] : memref<432xf32, #tpu.memory_space<smem>>
    %413 = vector.broadcast %412 : f32 to vector<8x8xf32>
    %414 = arith.mulf %413, %399 : vector<8x8xf32>
    %415 = arith.addf %397, %414 : vector<8x8xf32>
    %c0_118 = arith.constant 0 : index
    %c2_119 = arith.constant 2 : index
    %c0_120 = arith.constant 0 : index
    %c1_121 = arith.constant 1 : index
    %416 = vector.load %arg5[%c0_118, %c2_119, %c0_120, %c1_121] : memref<1x4x8x9xf32, #tpu.memory_space<vmem>>, vector<1x1x8x8xf32>
    %417 = vector.shape_cast %416 : vector<1x1x8x8xf32> to vector<8x8xf32>
    %c23 = arith.constant 23 : index
    %418 = memref.load %arg2[%c23] : memref<432xf32, #tpu.memory_space<smem>>
    %419 = vector.broadcast %418 : f32 to vector<8x8xf32>
    %420 = arith.mulf %419, %417 : vector<8x8xf32>
    %421 = arith.addf %403, %420 : vector<8x8xf32>
    %c59 = arith.constant 59 : index
    %422 = memref.load %arg2[%c59] : memref<432xf32, #tpu.memory_space<smem>>
    %423 = vector.broadcast %422 : f32 to vector<8x8xf32>
    %424 = arith.mulf %423, %417 : vector<8x8xf32>
    %425 = arith.addf %407, %424 : vector<8x8xf32>
    %c95 = arith.constant 95 : index
    %426 = memref.load %arg2[%c95] : memref<432xf32, #tpu.memory_space<smem>>
    %427 = vector.broadcast %426 : f32 to vector<8x8xf32>
    %428 = arith.mulf %427, %417 : vector<8x8xf32>
    %429 = arith.addf %411, %428 : vector<8x8xf32>
    %c131 = arith.constant 131 : index
    %430 = memref.load %arg2[%c131] : memref<432xf32, #tpu.memory_space<smem>>
    %431 = vector.broadcast %430 : f32 to vector<8x8xf32>
    %432 = arith.mulf %431, %417 : vector<8x8xf32>
    %433 = arith.addf %415, %432 : vector<8x8xf32>
    %c0_122 = arith.constant 0 : index
    %c3_123 = arith.constant 3 : index
    %c0_124 = arith.constant 0 : index
    %c1_125 = arith.constant 1 : index
    %434 = vector.load %arg5[%c0_122, %c3_123, %c0_124, %c1_125] : memref<1x4x8x9xf32, #tpu.memory_space<vmem>>, vector<1x1x8x8xf32>
    %435 = vector.shape_cast %434 : vector<1x1x8x8xf32> to vector<8x8xf32>
    %c32 = arith.constant 32 : index
    %436 = memref.load %arg2[%c32] : memref<432xf32, #tpu.memory_space<smem>>
    %437 = vector.broadcast %436 : f32 to vector<8x8xf32>
    %438 = arith.mulf %437, %435 : vector<8x8xf32>
    %439 = arith.addf %421, %438 : vector<8x8xf32>
    %c68 = arith.constant 68 : index
    %440 = memref.load %arg2[%c68] : memref<432xf32, #tpu.memory_space<smem>>
    %441 = vector.broadcast %440 : f32 to vector<8x8xf32>
    %442 = arith.mulf %441, %435 : vector<8x8xf32>
    %443 = arith.addf %425, %442 : vector<8x8xf32>
    %c104 = arith.constant 104 : index
    %444 = memref.load %arg2[%c104] : memref<432xf32, #tpu.memory_space<smem>>
    %445 = vector.broadcast %444 : f32 to vector<8x8xf32>
    %446 = arith.mulf %445, %435 : vector<8x8xf32>
    %447 = arith.addf %429, %446 : vector<8x8xf32>
    %c140 = arith.constant 140 : index
    %448 = memref.load %arg2[%c140] : memref<432xf32, #tpu.memory_space<smem>>
    %449 = vector.broadcast %448 : f32 to vector<8x8xf32>
    %450 = arith.mulf %449, %435 : vector<8x8xf32>
    %451 = arith.addf %433, %450 : vector<8x8xf32>
    %c0_126 = arith.constant 0 : index
    %c0_127 = arith.constant 0 : index
    %c0_128 = arith.constant 0 : index
    %452 = vector.load %arg11[%c0_126, %c0_127, %c0_128] : memref<4x8x9xf32, #tpu.memory_space<vmem>>, vector<1x8x8xf32>
    %453 = vector.shape_cast %452 : vector<1x8x8xf32> to vector<8x8xf32>
    %c6 = arith.constant 6 : index
    %454 = memref.load %arg2[%c6] : memref<432xf32, #tpu.memory_space<smem>>
    %455 = vector.broadcast %454 : f32 to vector<8x8xf32>
    %456 = arith.mulf %455, %453 : vector<8x8xf32>
    %457 = arith.addf %439, %456 : vector<8x8xf32>
    %c42 = arith.constant 42 : index
    %458 = memref.load %arg2[%c42] : memref<432xf32, #tpu.memory_space<smem>>
    %459 = vector.broadcast %458 : f32 to vector<8x8xf32>
    %460 = arith.mulf %459, %453 : vector<8x8xf32>
    %461 = arith.addf %443, %460 : vector<8x8xf32>
    %c78 = arith.constant 78 : index
    %462 = memref.load %arg2[%c78] : memref<432xf32, #tpu.memory_space<smem>>
    %463 = vector.broadcast %462 : f32 to vector<8x8xf32>
    %464 = arith.mulf %463, %453 : vector<8x8xf32>
    %465 = arith.addf %447, %464 : vector<8x8xf32>
    %c114 = arith.constant 114 : index
    %466 = memref.load %arg2[%c114] : memref<432xf32, #tpu.memory_space<smem>>
    %467 = vector.broadcast %466 : f32 to vector<8x8xf32>
    %468 = arith.mulf %467, %453 : vector<8x8xf32>
    %469 = arith.addf %451, %468 : vector<8x8xf32>
    %c1_129 = arith.constant 1 : index
    %c0_130 = arith.constant 0 : index
    %c0_131 = arith.constant 0 : index
    %470 = vector.load %arg11[%c1_129, %c0_130, %c0_131] : memref<4x8x9xf32, #tpu.memory_space<vmem>>, vector<1x8x8xf32>
    %471 = vector.shape_cast %470 : vector<1x8x8xf32> to vector<8x8xf32>
    %c15 = arith.constant 15 : index
    %472 = memref.load %arg2[%c15] : memref<432xf32, #tpu.memory_space<smem>>
    %473 = vector.broadcast %472 : f32 to vector<8x8xf32>
    %474 = arith.mulf %473, %471 : vector<8x8xf32>
    %475 = arith.addf %457, %474 : vector<8x8xf32>
    %c51 = arith.constant 51 : index
    %476 = memref.load %arg2[%c51] : memref<432xf32, #tpu.memory_space<smem>>
    %477 = vector.broadcast %476 : f32 to vector<8x8xf32>
    %478 = arith.mulf %477, %471 : vector<8x8xf32>
    %479 = arith.addf %461, %478 : vector<8x8xf32>
    %c87 = arith.constant 87 : index
    %480 = memref.load %arg2[%c87] : memref<432xf32, #tpu.memory_space<smem>>
    %481 = vector.broadcast %480 : f32 to vector<8x8xf32>
    %482 = arith.mulf %481, %471 : vector<8x8xf32>
    %483 = arith.addf %465, %482 : vector<8x8xf32>
    %c123 = arith.constant 123 : index
    %484 = memref.load %arg2[%c123] : memref<432xf32, #tpu.memory_space<smem>>
    %485 = vector.broadcast %484 : f32 to vector<8x8xf32>
    %486 = arith.mulf %485, %471 : vector<8x8xf32>
    %487 = arith.addf %469, %486 : vector<8x8xf32>
    %c2_132 = arith.constant 2 : index
    %c0_133 = arith.constant 0 : index
    %c0_134 = arith.constant 0 : index
    %488 = vector.load %arg11[%c2_132, %c0_133, %c0_134] : memref<4x8x9xf32, #tpu.memory_space<vmem>>, vector<1x8x8xf32>
    %489 = vector.shape_cast %488 : vector<1x8x8xf32> to vector<8x8xf32>
    %c24 = arith.constant 24 : index
    %490 = memref.load %arg2[%c24] : memref<432xf32, #tpu.memory_space<smem>>
    %491 = vector.broadcast %490 : f32 to vector<8x8xf32>
    %492 = arith.mulf %491, %489 : vector<8x8xf32>
    %493 = arith.addf %475, %492 : vector<8x8xf32>
    %c60 = arith.constant 60 : index
    %494 = memref.load %arg2[%c60] : memref<432xf32, #tpu.memory_space<smem>>
    %495 = vector.broadcast %494 : f32 to vector<8x8xf32>
    %496 = arith.mulf %495, %489 : vector<8x8xf32>
    %497 = arith.addf %479, %496 : vector<8x8xf32>
    %c96 = arith.constant 96 : index
    %498 = memref.load %arg2[%c96] : memref<432xf32, #tpu.memory_space<smem>>
    %499 = vector.broadcast %498 : f32 to vector<8x8xf32>
    %500 = arith.mulf %499, %489 : vector<8x8xf32>
    %501 = arith.addf %483, %500 : vector<8x8xf32>
    %c132 = arith.constant 132 : index
    %502 = memref.load %arg2[%c132] : memref<432xf32, #tpu.memory_space<smem>>
    %503 = vector.broadcast %502 : f32 to vector<8x8xf32>
    %504 = arith.mulf %503, %489 : vector<8x8xf32>
    %505 = arith.addf %487, %504 : vector<8x8xf32>
    %c3_135 = arith.constant 3 : index
    %c0_136 = arith.constant 0 : index
    %c0_137 = arith.constant 0 : index
    %506 = vector.load %arg11[%c3_135, %c0_136, %c0_137] : memref<4x8x9xf32, #tpu.memory_space<vmem>>, vector<1x8x8xf32>
    %507 = vector.shape_cast %506 : vector<1x8x8xf32> to vector<8x8xf32>
    %c33 = arith.constant 33 : index
    %508 = memref.load %arg2[%c33] : memref<432xf32, #tpu.memory_space<smem>>
    %509 = vector.broadcast %508 : f32 to vector<8x8xf32>
    %510 = arith.mulf %509, %507 : vector<8x8xf32>
    %511 = arith.addf %493, %510 : vector<8x8xf32>
    %c69 = arith.constant 69 : index
    %512 = memref.load %arg2[%c69] : memref<432xf32, #tpu.memory_space<smem>>
    %513 = vector.broadcast %512 : f32 to vector<8x8xf32>
    %514 = arith.mulf %513, %507 : vector<8x8xf32>
    %515 = arith.addf %497, %514 : vector<8x8xf32>
    %c105 = arith.constant 105 : index
    %516 = memref.load %arg2[%c105] : memref<432xf32, #tpu.memory_space<smem>>
    %517 = vector.broadcast %516 : f32 to vector<8x8xf32>
    %518 = arith.mulf %517, %507 : vector<8x8xf32>
    %519 = arith.addf %501, %518 : vector<8x8xf32>
    %c141 = arith.constant 141 : index
    %520 = memref.load %arg2[%c141] : memref<432xf32, #tpu.memory_space<smem>>
    %521 = vector.broadcast %520 : f32 to vector<8x8xf32>
    %522 = arith.mulf %521, %507 : vector<8x8xf32>
    %523 = arith.addf %505, %522 : vector<8x8xf32>
    %c0_138 = arith.constant 0 : index
    %c0_139 = arith.constant 0 : index
    %c0_140 = arith.constant 0 : index
    %524 = vector.load %arg12[%c0_138, %c0_139, %c0_140] : memref<4x8x8xf32, #tpu.memory_space<vmem>>, vector<1x8x8xf32>
    %525 = vector.shape_cast %524 : vector<1x8x8xf32> to vector<8x8xf32>
    %c7_141 = arith.constant 7 : index
    %526 = memref.load %arg2[%c7_141] : memref<432xf32, #tpu.memory_space<smem>>
    %527 = vector.broadcast %526 : f32 to vector<8x8xf32>
    %528 = arith.mulf %527, %525 : vector<8x8xf32>
    %529 = arith.addf %511, %528 : vector<8x8xf32>
    %c43 = arith.constant 43 : index
    %530 = memref.load %arg2[%c43] : memref<432xf32, #tpu.memory_space<smem>>
    %531 = vector.broadcast %530 : f32 to vector<8x8xf32>
    %532 = arith.mulf %531, %525 : vector<8x8xf32>
    %533 = arith.addf %515, %532 : vector<8x8xf32>
    %c79 = arith.constant 79 : index
    %534 = memref.load %arg2[%c79] : memref<432xf32, #tpu.memory_space<smem>>
    %535 = vector.broadcast %534 : f32 to vector<8x8xf32>
    %536 = arith.mulf %535, %525 : vector<8x8xf32>
    %537 = arith.addf %519, %536 : vector<8x8xf32>
    %c115 = arith.constant 115 : index
    %538 = memref.load %arg2[%c115] : memref<432xf32, #tpu.memory_space<smem>>
    %539 = vector.broadcast %538 : f32 to vector<8x8xf32>
    %540 = arith.mulf %539, %525 : vector<8x8xf32>
    %541 = arith.addf %523, %540 : vector<8x8xf32>
    %c1_142 = arith.constant 1 : index
    %c0_143 = arith.constant 0 : index
    %c0_144 = arith.constant 0 : index
    %542 = vector.load %arg12[%c1_142, %c0_143, %c0_144] : memref<4x8x8xf32, #tpu.memory_space<vmem>>, vector<1x8x8xf32>
    %543 = vector.shape_cast %542 : vector<1x8x8xf32> to vector<8x8xf32>
    %c16 = arith.constant 16 : index
    %544 = memref.load %arg2[%c16] : memref<432xf32, #tpu.memory_space<smem>>
    %545 = vector.broadcast %544 : f32 to vector<8x8xf32>
    %546 = arith.mulf %545, %543 : vector<8x8xf32>
    %547 = arith.addf %529, %546 : vector<8x8xf32>
    %c52 = arith.constant 52 : index
    %548 = memref.load %arg2[%c52] : memref<432xf32, #tpu.memory_space<smem>>
    %549 = vector.broadcast %548 : f32 to vector<8x8xf32>
    %550 = arith.mulf %549, %543 : vector<8x8xf32>
    %551 = arith.addf %533, %550 : vector<8x8xf32>
    %c88 = arith.constant 88 : index
    %552 = memref.load %arg2[%c88] : memref<432xf32, #tpu.memory_space<smem>>
    %553 = vector.broadcast %552 : f32 to vector<8x8xf32>
    %554 = arith.mulf %553, %543 : vector<8x8xf32>
    %555 = arith.addf %537, %554 : vector<8x8xf32>
    %c124 = arith.constant 124 : index
    %556 = memref.load %arg2[%c124] : memref<432xf32, #tpu.memory_space<smem>>
    %557 = vector.broadcast %556 : f32 to vector<8x8xf32>
    %558 = arith.mulf %557, %543 : vector<8x8xf32>
    %559 = arith.addf %541, %558 : vector<8x8xf32>
    %c2_145 = arith.constant 2 : index
    %c0_146 = arith.constant 0 : index
    %c0_147 = arith.constant 0 : index
    %560 = vector.load %arg12[%c2_145, %c0_146, %c0_147] : memref<4x8x8xf32, #tpu.memory_space<vmem>>, vector<1x8x8xf32>
    %561 = vector.shape_cast %560 : vector<1x8x8xf32> to vector<8x8xf32>
    %c25 = arith.constant 25 : index
    %562 = memref.load %arg2[%c25] : memref<432xf32, #tpu.memory_space<smem>>
    %563 = vector.broadcast %562 : f32 to vector<8x8xf32>
    %564 = arith.mulf %563, %561 : vector<8x8xf32>
    %565 = arith.addf %547, %564 : vector<8x8xf32>
    %c61 = arith.constant 61 : index
    %566 = memref.load %arg2[%c61] : memref<432xf32, #tpu.memory_space<smem>>
    %567 = vector.broadcast %566 : f32 to vector<8x8xf32>
    %568 = arith.mulf %567, %561 : vector<8x8xf32>
    %569 = arith.addf %551, %568 : vector<8x8xf32>
    %c97 = arith.constant 97 : index
    %570 = memref.load %arg2[%c97] : memref<432xf32, #tpu.memory_space<smem>>
    %571 = vector.broadcast %570 : f32 to vector<8x8xf32>
    %572 = arith.mulf %571, %561 : vector<8x8xf32>
    %573 = arith.addf %555, %572 : vector<8x8xf32>
    %c133 = arith.constant 133 : index
    %574 = memref.load %arg2[%c133] : memref<432xf32, #tpu.memory_space<smem>>
    %575 = vector.broadcast %574 : f32 to vector<8x8xf32>
    %576 = arith.mulf %575, %561 : vector<8x8xf32>
    %577 = arith.addf %559, %576 : vector<8x8xf32>
    %c3_148 = arith.constant 3 : index
    %c0_149 = arith.constant 0 : index
    %c0_150 = arith.constant 0 : index
    %578 = vector.load %arg12[%c3_148, %c0_149, %c0_150] : memref<4x8x8xf32, #tpu.memory_space<vmem>>, vector<1x8x8xf32>
    %579 = vector.shape_cast %578 : vector<1x8x8xf32> to vector<8x8xf32>
    %c34 = arith.constant 34 : index
    %580 = memref.load %arg2[%c34] : memref<432xf32, #tpu.memory_space<smem>>
    %581 = vector.broadcast %580 : f32 to vector<8x8xf32>
    %582 = arith.mulf %581, %579 : vector<8x8xf32>
    %583 = arith.addf %565, %582 : vector<8x8xf32>
    %c70 = arith.constant 70 : index
    %584 = memref.load %arg2[%c70] : memref<432xf32, #tpu.memory_space<smem>>
    %585 = vector.broadcast %584 : f32 to vector<8x8xf32>
    %586 = arith.mulf %585, %579 : vector<8x8xf32>
    %587 = arith.addf %569, %586 : vector<8x8xf32>
    %c106 = arith.constant 106 : index
    %588 = memref.load %arg2[%c106] : memref<432xf32, #tpu.memory_space<smem>>
    %589 = vector.broadcast %588 : f32 to vector<8x8xf32>
    %590 = arith.mulf %589, %579 : vector<8x8xf32>
    %591 = arith.addf %573, %590 : vector<8x8xf32>
    %c142 = arith.constant 142 : index
    %592 = memref.load %arg2[%c142] : memref<432xf32, #tpu.memory_space<smem>>
    %593 = vector.broadcast %592 : f32 to vector<8x8xf32>
    %594 = arith.mulf %593, %579 : vector<8x8xf32>
    %595 = arith.addf %577, %594 : vector<8x8xf32>
    %c0_151 = arith.constant 0 : index
    %c0_152 = arith.constant 0 : index
    %c1_153 = arith.constant 1 : index
    %596 = vector.load %arg11[%c0_151, %c0_152, %c1_153] : memref<4x8x9xf32, #tpu.memory_space<vmem>>, vector<1x8x8xf32>
    %597 = vector.shape_cast %596 : vector<1x8x8xf32> to vector<8x8xf32>
    %c8 = arith.constant 8 : index
    %598 = memref.load %arg2[%c8] : memref<432xf32, #tpu.memory_space<smem>>
    %599 = vector.broadcast %598 : f32 to vector<8x8xf32>
    %600 = arith.mulf %599, %597 : vector<8x8xf32>
    %601 = arith.addf %583, %600 : vector<8x8xf32>
    %c44 = arith.constant 44 : index
    %602 = memref.load %arg2[%c44] : memref<432xf32, #tpu.memory_space<smem>>
    %603 = vector.broadcast %602 : f32 to vector<8x8xf32>
    %604 = arith.mulf %603, %597 : vector<8x8xf32>
    %605 = arith.addf %587, %604 : vector<8x8xf32>
    %c80 = arith.constant 80 : index
    %606 = memref.load %arg2[%c80] : memref<432xf32, #tpu.memory_space<smem>>
    %607 = vector.broadcast %606 : f32 to vector<8x8xf32>
    %608 = arith.mulf %607, %597 : vector<8x8xf32>
    %609 = arith.addf %591, %608 : vector<8x8xf32>
    %c116 = arith.constant 116 : index
    %610 = memref.load %arg2[%c116] : memref<432xf32, #tpu.memory_space<smem>>
    %611 = vector.broadcast %610 : f32 to vector<8x8xf32>
    %612 = arith.mulf %611, %597 : vector<8x8xf32>
    %613 = arith.addf %595, %612 : vector<8x8xf32>
    %c1_154 = arith.constant 1 : index
    %c0_155 = arith.constant 0 : index
    %c1_156 = arith.constant 1 : index
    %614 = vector.load %arg11[%c1_154, %c0_155, %c1_156] : memref<4x8x9xf32, #tpu.memory_space<vmem>>, vector<1x8x8xf32>
    %615 = vector.shape_cast %614 : vector<1x8x8xf32> to vector<8x8xf32>
    %c17 = arith.constant 17 : index
    %616 = memref.load %arg2[%c17] : memref<432xf32, #tpu.memory_space<smem>>
    %617 = vector.broadcast %616 : f32 to vector<8x8xf32>
    %618 = arith.mulf %617, %615 : vector<8x8xf32>
    %619 = arith.addf %601, %618 : vector<8x8xf32>
    %c53 = arith.constant 53 : index
    %620 = memref.load %arg2[%c53] : memref<432xf32, #tpu.memory_space<smem>>
    %621 = vector.broadcast %620 : f32 to vector<8x8xf32>
    %622 = arith.mulf %621, %615 : vector<8x8xf32>
    %623 = arith.addf %605, %622 : vector<8x8xf32>
    %c89 = arith.constant 89 : index
    %624 = memref.load %arg2[%c89] : memref<432xf32, #tpu.memory_space<smem>>
    %625 = vector.broadcast %624 : f32 to vector<8x8xf32>
    %626 = arith.mulf %625, %615 : vector<8x8xf32>
    %627 = arith.addf %609, %626 : vector<8x8xf32>
    %c125 = arith.constant 125 : index
    %628 = memref.load %arg2[%c125] : memref<432xf32, #tpu.memory_space<smem>>
    %629 = vector.broadcast %628 : f32 to vector<8x8xf32>
    %630 = arith.mulf %629, %615 : vector<8x8xf32>
    %631 = arith.addf %613, %630 : vector<8x8xf32>
    %c2_157 = arith.constant 2 : index
    %c0_158 = arith.constant 0 : index
    %c1_159 = arith.constant 1 : index
    %632 = vector.load %arg11[%c2_157, %c0_158, %c1_159] : memref<4x8x9xf32, #tpu.memory_space<vmem>>, vector<1x8x8xf32>
    %633 = vector.shape_cast %632 : vector<1x8x8xf32> to vector<8x8xf32>
    %c26 = arith.constant 26 : index
    %634 = memref.load %arg2[%c26] : memref<432xf32, #tpu.memory_space<smem>>
    %635 = vector.broadcast %634 : f32 to vector<8x8xf32>
    %636 = arith.mulf %635, %633 : vector<8x8xf32>
    %637 = arith.addf %619, %636 : vector<8x8xf32>
    %c62 = arith.constant 62 : index
    %638 = memref.load %arg2[%c62] : memref<432xf32, #tpu.memory_space<smem>>
    %639 = vector.broadcast %638 : f32 to vector<8x8xf32>
    %640 = arith.mulf %639, %633 : vector<8x8xf32>
    %641 = arith.addf %623, %640 : vector<8x8xf32>
    %c98 = arith.constant 98 : index
    %642 = memref.load %arg2[%c98] : memref<432xf32, #tpu.memory_space<smem>>
    %643 = vector.broadcast %642 : f32 to vector<8x8xf32>
    %644 = arith.mulf %643, %633 : vector<8x8xf32>
    %645 = arith.addf %627, %644 : vector<8x8xf32>
    %c134 = arith.constant 134 : index
    %646 = memref.load %arg2[%c134] : memref<432xf32, #tpu.memory_space<smem>>
    %647 = vector.broadcast %646 : f32 to vector<8x8xf32>
    %648 = arith.mulf %647, %633 : vector<8x8xf32>
    %649 = arith.addf %631, %648 : vector<8x8xf32>
    %c3_160 = arith.constant 3 : index
    %c0_161 = arith.constant 0 : index
    %c1_162 = arith.constant 1 : index
    %650 = vector.load %arg11[%c3_160, %c0_161, %c1_162] : memref<4x8x9xf32, #tpu.memory_space<vmem>>, vector<1x8x8xf32>
    %651 = vector.shape_cast %650 : vector<1x8x8xf32> to vector<8x8xf32>
    %c35 = arith.constant 35 : index
    %652 = memref.load %arg2[%c35] : memref<432xf32, #tpu.memory_space<smem>>
    %653 = vector.broadcast %652 : f32 to vector<8x8xf32>
    %654 = arith.mulf %653, %651 : vector<8x8xf32>
    %655 = arith.addf %637, %654 : vector<8x8xf32>
    %c71 = arith.constant 71 : index
    %656 = memref.load %arg2[%c71] : memref<432xf32, #tpu.memory_space<smem>>
    %657 = vector.broadcast %656 : f32 to vector<8x8xf32>
    %658 = arith.mulf %657, %651 : vector<8x8xf32>
    %659 = arith.addf %641, %658 : vector<8x8xf32>
    %c107 = arith.constant 107 : index
    %660 = memref.load %arg2[%c107] : memref<432xf32, #tpu.memory_space<smem>>
    %661 = vector.broadcast %660 : f32 to vector<8x8xf32>
    %662 = arith.mulf %661, %651 : vector<8x8xf32>
    %663 = arith.addf %645, %662 : vector<8x8xf32>
    %c143 = arith.constant 143 : index
    %664 = memref.load %arg2[%c143] : memref<432xf32, #tpu.memory_space<smem>>
    %665 = vector.broadcast %664 : f32 to vector<8x8xf32>
    %666 = arith.mulf %665, %651 : vector<8x8xf32>
    %667 = arith.addf %649, %666 : vector<8x8xf32>
    %668 = arith.truncf %655 : vector<8x8xf32> to vector<8x8xbf16>
    %c0_163 = arith.constant 0 : index
    %c0_164 = arith.constant 0 : index
    %c0_165 = arith.constant 0 : index
    %c0_166 = arith.constant 0 : index
    %669 = vector.load %arg9[%c0_163, %c0_164, %c0_165, %c0_166] : memref<1x16x8x8xbf16, #tpu.memory_space<vmem>>, vector<1x1x8x8xbf16>
    %670 = vector.shape_cast %669 : vector<1x1x8x8xbf16> to vector<8x8xbf16>
    %671 = vector.shape_cast %668 : vector<8x8xbf16> to vector<1x1x8x8xbf16>
    tpu.vector_store %arg9[%c0_163, %c0_164, %c0_165, %c0_166], %671 {strides = array<i32>} : memref<1x16x8x8xbf16, #tpu.memory_space<vmem>>, vector<1x1x8x8xbf16>,
    %672 = vector.shape_cast %655 : vector<8x8xf32> to vector<1x8x8xf32>
    %cst_167 = arith.constant dense<0.000000e+00> : vector<1xf32>
    %673 = vector.multi_reduction <add>, %672, %cst_167 [1, 2] : vector<1x8x8xf32> to vector<1xf32>
    %674 = vector.shape_cast %673 : vector<1xf32> to vector<1x1x1xf32>
    %675 = vector.extract %674[0, 0, 0] : f32 from vector<1x1x1xf32>
    %676 = arith.mulf %655, %655 : vector<8x8xf32>
    %677 = vector.shape_cast %676 : vector<8x8xf32> to vector<1x8x8xf32>
    %cst_168 = arith.constant dense<0.000000e+00> : vector<1xf32>
    %678 = vector.multi_reduction <add>, %677, %cst_168 [1, 2] : vector<1x8x8xf32> to vector<1xf32>
    %679 = vector.shape_cast %678 : vector<1xf32> to vector<1x1x1xf32>
    %680 = vector.extract %679[0, 0, 0] : f32 from vector<1x1x1xf32>
    %681 = arith.truncf %659 : vector<8x8xf32> to vector<8x8xbf16>
    %c0_169 = arith.constant 0 : index
    %c1_170 = arith.constant 1 : index
    %c0_171 = arith.constant 0 : index
    %c0_172 = arith.constant 0 : index
    %682 = vector.load %arg9[%c0_169, %c1_170, %c0_171, %c0_172] : memref<1x16x8x8xbf16, #tpu.memory_space<vmem>>, vector<1x1x8x8xbf16>
    %683 = vector.shape_cast %682 : vector<1x1x8x8xbf16> to vector<8x8xbf16>
    %684 = vector.shape_cast %681 : vector<8x8xbf16> to vector<1x1x8x8xbf16>
    tpu.vector_store %arg9[%c0_169, %c1_170, %c0_171, %c0_172], %684 {strides = array<i32>} : memref<1x16x8x8xbf16, #tpu.memory_space<vmem>>, vector<1x1x8x8xbf16>,
    %685 = vector.shape_cast %659 : vector<8x8xf32> to vector<1x8x8xf32>
    %cst_173 = arith.constant dense<0.000000e+00> : vector<1xf32>
    %686 = vector.multi_reduction <add>, %685, %cst_173 [1, 2] : vector<1x8x8xf32> to vector<1xf32>
    %687 = vector.shape_cast %686 : vector<1xf32> to vector<1x1x1xf32>
    %688 = vector.extract %687[0, 0, 0] : f32 from vector<1x1x1xf32>
    %689 = arith.mulf %659, %659 : vector<8x8xf32>
    %690 = vector.shape_cast %689 : vector<8x8xf32> to vector<1x8x8xf32>
    %cst_174 = arith.constant dense<0.000000e+00> : vector<1xf32>
    %691 = vector.multi_reduction <add>, %690, %cst_174 [1, 2] : vector<1x8x8xf32> to vector<1xf32>
    %692 = vector.shape_cast %691 : vector<1xf32> to vector<1x1x1xf32>
    %693 = vector.extract %692[0, 0, 0] : f32 from vector<1x1x1xf32>
    %694 = arith.truncf %663 : vector<8x8xf32> to vector<8x8xbf16>
    %c0_175 = arith.constant 0 : index
    %c2_176 = arith.constant 2 : index
    %c0_177 = arith.constant 0 : index
    %c0_178 = arith.constant 0 : index
    %695 = vector.load %arg9[%c0_175, %c2_176, %c0_177, %c0_178] : memref<1x16x8x8xbf16, #tpu.memory_space<vmem>>, vector<1x1x8x8xbf16>
    %696 = vector.shape_cast %695 : vector<1x1x8x8xbf16> to vector<8x8xbf16>
    %697 = vector.shape_cast %694 : vector<8x8xbf16> to vector<1x1x8x8xbf16>
    tpu.vector_store %arg9[%c0_175, %c2_176, %c0_177, %c0_178], %697 {strides = array<i32>} : memref<1x16x8x8xbf16, #tpu.memory_space<vmem>>, vector<1x1x8x8xbf16>,
    %698 = vector.shape_cast %663 : vector<8x8xf32> to vector<1x8x8xf32>
    %cst_179 = arith.constant dense<0.000000e+00> : vector<1xf32>
    %699 = vector.multi_reduction <add>, %698, %cst_179 [1, 2] : vector<1x8x8xf32> to vector<1xf32>
    %700 = vector.shape_cast %699 : vector<1xf32> to vector<1x1x1xf32>
    %701 = vector.extract %700[0, 0, 0] : f32 from vector<1x1x1xf32>
    %702 = arith.mulf %663, %663 : vector<8x8xf32>
    %703 = vector.shape_cast %702 : vector<8x8xf32> to vector<1x8x8xf32>
    %cst_180 = arith.constant dense<0.000000e+00> : vector<1xf32>
    %704 = vector.multi_reduction <add>, %703, %cst_180 [1, 2] : vector<1x8x8xf32> to vector<1xf32>
    %705 = vector.shape_cast %704 : vector<1xf32> to vector<1x1x1xf32>
    %706 = vector.extract %705[0, 0, 0] : f32 from vector<1x1x1xf32>
    %707 = arith.truncf %667 : vector<8x8xf32> to vector<8x8xbf16>
    %c0_181 = arith.constant 0 : index
    %c3_182 = arith.constant 3 : index
    %c0_183 = arith.constant 0 : index
    %c0_184 = arith.constant 0 : index
    %708 = vector.load %arg9[%c0_181, %c3_182, %c0_183, %c0_184] : memref<1x16x8x8xbf16, #tpu.memory_space<vmem>>, vector<1x1x8x8xbf16>
    %709 = vector.shape_cast %708 : vector<1x1x8x8xbf16> to vector<8x8xbf16>
    %710 = vector.shape_cast %707 : vector<8x8xbf16> to vector<1x1x8x8xbf16>
    tpu.vector_store %arg9[%c0_181, %c3_182, %c0_183, %c0_184], %710 {strides = array<i32>} : memref<1x16x8x8xbf16, #tpu.memory_space<vmem>>, vector<1x1x8x8xbf16>,
    %711 = vector.shape_cast %667 : vector<8x8xf32> to vector<1x8x8xf32>
    %cst_185 = arith.constant dense<0.000000e+00> : vector<1xf32>
    %712 = vector.multi_reduction <add>, %711, %cst_185 [1, 2] : vector<1x8x8xf32> to vector<1xf32>
    %713 = vector.shape_cast %712 : vector<1xf32> to vector<1x1x1xf32>
    %714 = vector.extract %713[0, 0, 0] : f32 from vector<1x1x1xf32>
    %715 = arith.mulf %667, %667 : vector<8x8xf32>
    %716 = vector.shape_cast %715 : vector<8x8xf32> to vector<1x8x8xf32>
    %cst_186 = arith.constant dense<0.000000e+00> : vector<1xf32>
    %717 = vector.multi_reduction <add>, %716, %cst_186 [1, 2] : vector<1x8x8xf32> to vector<1xf32>
    %718 = vector.shape_cast %717 : vector<1xf32> to vector<1x1x1xf32>
    %719 = vector.extract %718[0, 0, 0] : f32 from vector<1x1x1xf32>
    %cst_187 = arith.constant 0.000000e+00 : f32
    %720 = vector.broadcast %cst_187 : f32 to vector<8x8xf32>
    %cst_188 = arith.constant 0.000000e+00 : f32
    %721 = vector.broadcast %cst_188 : f32 to vector<8x8xf32>
    %cst_189 = arith.constant 0.000000e+00 : f32
    %722 = vector.broadcast %cst_189 : f32 to vector<8x8xf32>
    %cst_190 = arith.constant 0.000000e+00 : f32
    %723 = vector.broadcast %cst_190 : f32 to vector<8x8xf32>
    %c0_191 = arith.constant 0 : index
    %c0_192 = arith.constant 0 : index
    %c0_193 = arith.constant 0 : index
    %c0_194 = arith.constant 0 : index
    %724 = vector.load %arg3[%c0_191, %c0_192, %c0_193, %c0_194] : memref<1x4x8x9xf32, #tpu.memory_space<vmem>>, vector<1x1x8x8xf32>
    %725 = vector.shape_cast %724 : vector<1x1x8x8xf32> to vector<8x8xf32>
    %c144 = arith.constant 144 : index
    %726 = memref.load %arg2[%c144] : memref<432xf32, #tpu.memory_space<smem>>
    %727 = vector.broadcast %726 : f32 to vector<8x8xf32>
    %728 = arith.mulf %727, %725 : vector<8x8xf32>
    %729 = arith.addf %720, %728 : vector<8x8xf32>
    %c180 = arith.constant 180 : index
    %730 = memref.load %arg2[%c180] : memref<432xf32, #tpu.memory_space<smem>>
    %731 = vector.broadcast %730 : f32 to vector<8x8xf32>
    %732 = arith.mulf %731, %725 : vector<8x8xf32>
    %733 = arith.addf %721, %732 : vector<8x8xf32>
    %c216 = arith.constant 216 : index
    %734 = memref.load %arg2[%c216] : memref<432xf32, #tpu.memory_space<smem>>
    %735 = vector.broadcast %734 : f32 to vector<8x8xf32>
    %736 = arith.mulf %735, %725 : vector<8x8xf32>
    %737 = arith.addf %722, %736 : vector<8x8xf32>
    %c252 = arith.constant 252 : index
    %738 = memref.load %arg2[%c252] : memref<432xf32, #tpu.memory_space<smem>>
    %739 = vector.broadcast %738 : f32 to vector<8x8xf32>
    %740 = arith.mulf %739, %725 : vector<8x8xf32>
    %741 = arith.addf %723, %740 : vector<8x8xf32>
    %c0_195 = arith.constant 0 : index
    %c1_196 = arith.constant 1 : index
    %c0_197 = arith.constant 0 : index
    %c0_198 = arith.constant 0 : index
    %742 = vector.load %arg3[%c0_195, %c1_196, %c0_197, %c0_198] : memref<1x4x8x9xf32, #tpu.memory_space<vmem>>, vector<1x1x8x8xf32>
    %743 = vector.shape_cast %742 : vector<1x1x8x8xf32> to vector<8x8xf32>
    %c153 = arith.constant 153 : index
    %744 = memref.load %arg2[%c153] : memref<432xf32, #tpu.memory_space<smem>>
    %745 = vector.broadcast %744 : f32 to vector<8x8xf32>
    %746 = arith.mulf %745, %743 : vector<8x8xf32>
    %747 = arith.addf %729, %746 : vector<8x8xf32>
    %c189 = arith.constant 189 : index
    %748 = memref.load %arg2[%c189] : memref<432xf32, #tpu.memory_space<smem>>
    %749 = vector.broadcast %748 : f32 to vector<8x8xf32>
    %750 = arith.mulf %749, %743 : vector<8x8xf32>
    %751 = arith.addf %733, %750 : vector<8x8xf32>
    %c225 = arith.constant 225 : index
    %752 = memref.load %arg2[%c225] : memref<432xf32, #tpu.memory_space<smem>>
    %753 = vector.broadcast %752 : f32 to vector<8x8xf32>
    %754 = arith.mulf %753, %743 : vector<8x8xf32>
    %755 = arith.addf %737, %754 : vector<8x8xf32>
    %c261 = arith.constant 261 : index
    %756 = memref.load %arg2[%c261] : memref<432xf32, #tpu.memory_space<smem>>
    %757 = vector.broadcast %756 : f32 to vector<8x8xf32>
    %758 = arith.mulf %757, %743 : vector<8x8xf32>
    %759 = arith.addf %741, %758 : vector<8x8xf32>
    %c0_199 = arith.constant 0 : index
    %c2_200 = arith.constant 2 : index
    %c0_201 = arith.constant 0 : index
    %c0_202 = arith.constant 0 : index
    %760 = vector.load %arg3[%c0_199, %c2_200, %c0_201, %c0_202] : memref<1x4x8x9xf32, #tpu.memory_space<vmem>>, vector<1x1x8x8xf32>
    %761 = vector.shape_cast %760 : vector<1x1x8x8xf32> to vector<8x8xf32>
    %c162 = arith.constant 162 : index
    %762 = memref.load %arg2[%c162] : memref<432xf32, #tpu.memory_space<smem>>
    %763 = vector.broadcast %762 : f32 to vector<8x8xf32>
    %764 = arith.mulf %763, %761 : vector<8x8xf32>
    %765 = arith.addf %747, %764 : vector<8x8xf32>
    %c198 = arith.constant 198 : index
    %766 = memref.load %arg2[%c198] : memref<432xf32, #tpu.memory_space<smem>>
    %767 = vector.broadcast %766 : f32 to vector<8x8xf32>
    %768 = arith.mulf %767, %761 : vector<8x8xf32>
    %769 = arith.addf %751, %768 : vector<8x8xf32>
    %c234 = arith.constant 234 : index
    %770 = memref.load %arg2[%c234] : memref<432xf32, #tpu.memory_space<smem>>
    %771 = vector.broadcast %770 : f32 to vector<8x8xf32>
    %772 = arith.mulf %771, %761 : vector<8x8xf32>
    %773 = arith.addf %755, %772 : vector<8x8xf32>
    %c270 = arith.constant 270 : index
    %774 = memref.load %arg2[%c270] : memref<432xf32, #tpu.memory_space<smem>>
    %775 = vector.broadcast %774 : f32 to vector<8x8xf32>
    %776 = arith.mulf %775, %761 : vector<8x8xf32>
    %777 = arith.addf %759, %776 : vector<8x8xf32>
    %c0_203 = arith.constant 0 : index
    %c3_204 = arith.constant 3 : index
    %c0_205 = arith.constant 0 : index
    %c0_206 = arith.constant 0 : index
    %778 = vector.load %arg3[%c0_203, %c3_204, %c0_205, %c0_206] : memref<1x4x8x9xf32, #tpu.memory_space<vmem>>, vector<1x1x8x8xf32>
    %779 = vector.shape_cast %778 : vector<1x1x8x8xf32> to vector<8x8xf32>
    %c171 = arith.constant 171 : index
    %780 = memref.load %arg2[%c171] : memref<432xf32, #tpu.memory_space<smem>>
    %781 = vector.broadcast %780 : f32 to vector<8x8xf32>
    %782 = arith.mulf %781, %779 : vector<8x8xf32>
    %783 = arith.addf %765, %782 : vector<8x8xf32>
    %c207 = arith.constant 207 : index
    %784 = memref.load %arg2[%c207] : memref<432xf32, #tpu.memory_space<smem>>
    %785 = vector.broadcast %784 : f32 to vector<8x8xf32>
    %786 = arith.mulf %785, %779 : vector<8x8xf32>
    %787 = arith.addf %769, %786 : vector<8x8xf32>
    %c243 = arith.constant 243 : index
    %788 = memref.load %arg2[%c243] : memref<432xf32, #tpu.memory_space<smem>>
    %789 = vector.broadcast %788 : f32 to vector<8x8xf32>
    %790 = arith.mulf %789, %779 : vector<8x8xf32>
    %791 = arith.addf %773, %790 : vector<8x8xf32>
    %c279 = arith.constant 279 : index
    %792 = memref.load %arg2[%c279] : memref<432xf32, #tpu.memory_space<smem>>
    %793 = vector.broadcast %792 : f32 to vector<8x8xf32>
    %794 = arith.mulf %793, %779 : vector<8x8xf32>
    %795 = arith.addf %777, %794 : vector<8x8xf32>
    %c0_207 = arith.constant 0 : index
    %c0_208 = arith.constant 0 : index
    %c0_209 = arith.constant 0 : index
    %c0_210 = arith.constant 0 : index
    %796 = vector.load %arg4[%c0_207, %c0_208, %c0_209, %c0_210] : memref<1x4x8x8xf32, #tpu.memory_space<vmem>>, vector<1x1x8x8xf32>
    %797 = vector.shape_cast %796 : vector<1x1x8x8xf32> to vector<8x8xf32>
    %c145 = arith.constant 145 : index
    %798 = memref.load %arg2[%c145] : memref<432xf32, #tpu.memory_space<smem>>
    %799 = vector.broadcast %798 : f32 to vector<8x8xf32>
    %800 = arith.mulf %799, %797 : vector<8x8xf32>
    %801 = arith.addf %783, %800 : vector<8x8xf32>
    %c181 = arith.constant 181 : index
    %802 = memref.load %arg2[%c181] : memref<432xf32, #tpu.memory_space<smem>>
    %803 = vector.broadcast %802 : f32 to vector<8x8xf32>
    %804 = arith.mulf %803, %797 : vector<8x8xf32>
    %805 = arith.addf %787, %804 : vector<8x8xf32>
    %c217 = arith.constant 217 : index
    %806 = memref.load %arg2[%c217] : memref<432xf32, #tpu.memory_space<smem>>
    %807 = vector.broadcast %806 : f32 to vector<8x8xf32>
    %808 = arith.mulf %807, %797 : vector<8x8xf32>
    %809 = arith.addf %791, %808 : vector<8x8xf32>
    %c253 = arith.constant 253 : index
    %810 = memref.load %arg2[%c253] : memref<432xf32, #tpu.memory_space<smem>>
    %811 = vector.broadcast %810 : f32 to vector<8x8xf32>
    %812 = arith.mulf %811, %797 : vector<8x8xf32>
    %813 = arith.addf %795, %812 : vector<8x8xf32>
    %c0_211 = arith.constant 0 : index
    %c1_212 = arith.constant 1 : index
    %c0_213 = arith.constant 0 : index
    %c0_214 = arith.constant 0 : index
    %814 = vector.load %arg4[%c0_211, %c1_212, %c0_213, %c0_214] : memref<1x4x8x8xf32, #tpu.memory_space<vmem>>, vector<1x1x8x8xf32>
    %815 = vector.shape_cast %814 : vector<1x1x8x8xf32> to vector<8x8xf32>
    %c154 = arith.constant 154 : index
    %816 = memref.load %arg2[%c154] : memref<432xf32, #tpu.memory_space<smem>>
    %817 = vector.broadcast %816 : f32 to vector<8x8xf32>
    %818 = arith.mulf %817, %815 : vector<8x8xf32>
    %819 = arith.addf %801, %818 : vector<8x8xf32>
    %c190 = arith.constant 190 : index
    %820 = memref.load %arg2[%c190] : memref<432xf32, #tpu.memory_space<smem>>
    %821 = vector.broadcast %820 : f32 to vector<8x8xf32>
    %822 = arith.mulf %821, %815 : vector<8x8xf32>
    %823 = arith.addf %805, %822 : vector<8x8xf32>
    %c226 = arith.constant 226 : index
    %824 = memref.load %arg2[%c226] : memref<432xf32, #tpu.memory_space<smem>>
    %825 = vector.broadcast %824 : f32 to vector<8x8xf32>
    %826 = arith.mulf %825, %815 : vector<8x8xf32>
    %827 = arith.addf %809, %826 : vector<8x8xf32>
    %c262 = arith.constant 262 : index
    %828 = memref.load %arg2[%c262] : memref<432xf32, #tpu.memory_space<smem>>
    %829 = vector.broadcast %828 : f32 to vector<8x8xf32>
    %830 = arith.mulf %829, %815 : vector<8x8xf32>
    %831 = arith.addf %813, %830 : vector<8x8xf32>
    %c0_215 = arith.constant 0 : index
    %c2_216 = arith.constant 2 : index
    %c0_217 = arith.constant 0 : index
    %c0_218 = arith.constant 0 : index
    %832 = vector.load %arg4[%c0_215, %c2_216, %c0_217, %c0_218] : memref<1x4x8x8xf32, #tpu.memory_space<vmem>>, vector<1x1x8x8xf32>
    %833 = vector.shape_cast %832 : vector<1x1x8x8xf32> to vector<8x8xf32>
    %c163 = arith.constant 163 : index
    %834 = memref.load %arg2[%c163] : memref<432xf32, #tpu.memory_space<smem>>
    %835 = vector.broadcast %834 : f32 to vector<8x8xf32>
    %836 = arith.mulf %835, %833 : vector<8x8xf32>
    %837 = arith.addf %819, %836 : vector<8x8xf32>
    %c199 = arith.constant 199 : index
    %838 = memref.load %arg2[%c199] : memref<432xf32, #tpu.memory_space<smem>>
    %839 = vector.broadcast %838 : f32 to vector<8x8xf32>
    %840 = arith.mulf %839, %833 : vector<8x8xf32>
    %841 = arith.addf %823, %840 : vector<8x8xf32>
    %c235 = arith.constant 235 : index
    %842 = memref.load %arg2[%c235] : memref<432xf32, #tpu.memory_space<smem>>
    %843 = vector.broadcast %842 : f32 to vector<8x8xf32>
    %844 = arith.mulf %843, %833 : vector<8x8xf32>
    %845 = arith.addf %827, %844 : vector<8x8xf32>
    %c271 = arith.constant 271 : index
    %846 = memref.load %arg2[%c271] : memref<432xf32, #tpu.memory_space<smem>>
    %847 = vector.broadcast %846 : f32 to vector<8x8xf32>
    %848 = arith.mulf %847, %833 : vector<8x8xf32>
    %849 = arith.addf %831, %848 : vector<8x8xf32>
    %c0_219 = arith.constant 0 : index
    %c3_220 = arith.constant 3 : index
    %c0_221 = arith.constant 0 : index
    %c0_222 = arith.constant 0 : index
    %850 = vector.load %arg4[%c0_219, %c3_220, %c0_221, %c0_222] : memref<1x4x8x8xf32, #tpu.memory_space<vmem>>, vector<1x1x8x8xf32>
    %851 = vector.shape_cast %850 : vector<1x1x8x8xf32> to vector<8x8xf32>
    %c172 = arith.constant 172 : index
    %852 = memref.load %arg2[%c172] : memref<432xf32, #tpu.memory_space<smem>>
    %853 = vector.broadcast %852 : f32 to vector<8x8xf32>
    %854 = arith.mulf %853, %851 : vector<8x8xf32>
    %855 = arith.addf %837, %854 : vector<8x8xf32>
    %c208 = arith.constant 208 : index
    %856 = memref.load %arg2[%c208] : memref<432xf32, #tpu.memory_space<smem>>
    %857 = vector.broadcast %856 : f32 to vector<8x8xf32>
    %858 = arith.mulf %857, %851 : vector<8x8xf32>
    %859 = arith.addf %841, %858 : vector<8x8xf32>
    %c244 = arith.constant 244 : index
    %860 = memref.load %arg2[%c244] : memref<432xf32, #tpu.memory_space<smem>>
    %861 = vector.broadcast %860 : f32 to vector<8x8xf32>
    %862 = arith.mulf %861, %851 : vector<8x8xf32>
    %863 = arith.addf %845, %862 : vector<8x8xf32>
    %c280 = arith.constant 280 : index
    %864 = memref.load %arg2[%c280] : memref<432xf32, #tpu.memory_space<smem>>
    %865 = vector.broadcast %864 : f32 to vector<8x8xf32>
    %866 = arith.mulf %865, %851 : vector<8x8xf32>
    %867 = arith.addf %849, %866 : vector<8x8xf32>
    %c0_223 = arith.constant 0 : index
    %c0_224 = arith.constant 0 : index
    %c0_225 = arith.constant 0 : index
    %c1_226 = arith.constant 1 : index
    %868 = vector.load %arg3[%c0_223, %c0_224, %c0_225, %c1_226] : memref<1x4x8x9xf32, #tpu.memory_space<vmem>>, vector<1x1x8x8xf32>
    %869 = vector.shape_cast %868 : vector<1x1x8x8xf32> to vector<8x8xf32>
    %c146 = arith.constant 146 : index
    %870 = memref.load %arg2[%c146] : memref<432xf32, #tpu.memory_space<smem>>
    %871 = vector.broadcast %870 : f32 to vector<8x8xf32>
    %872 = arith.mulf %871, %869 : vector<8x8xf32>
    %873 = arith.addf %855, %872 : vector<8x8xf32>
    %c182 = arith.constant 182 : index
    %874 = memref.load %arg2[%c182] : memref<432xf32, #tpu.memory_space<smem>>
    %875 = vector.broadcast %874 : f32 to vector<8x8xf32>
    %876 = arith.mulf %875, %869 : vector<8x8xf32>
    %877 = arith.addf %859, %876 : vector<8x8xf32>
    %c218 = arith.constant 218 : index
    %878 = memref.load %arg2[%c218] : memref<432xf32, #tpu.memory_space<smem>>
    %879 = vector.broadcast %878 : f32 to vector<8x8xf32>
    %880 = arith.mulf %879, %869 : vector<8x8xf32>
    %881 = arith.addf %863, %880 : vector<8x8xf32>
    %c254 = arith.constant 254 : index
    %882 = memref.load %arg2[%c254] : memref<432xf32, #tpu.memory_space<smem>>
    %883 = vector.broadcast %882 : f32 to vector<8x8xf32>
    %884 = arith.mulf %883, %869 : vector<8x8xf32>
    %885 = arith.addf %867, %884 : vector<8x8xf32>
    %c0_227 = arith.constant 0 : index
    %c1_228 = arith.constant 1 : index
    %c0_229 = arith.constant 0 : index
    %c1_230 = arith.constant 1 : index
    %886 = vector.load %arg3[%c0_227, %c1_228, %c0_229, %c1_230] : memref<1x4x8x9xf32, #tpu.memory_space<vmem>>, vector<1x1x8x8xf32>
    %887 = vector.shape_cast %886 : vector<1x1x8x8xf32> to vector<8x8xf32>
    %c155 = arith.constant 155 : index
    %888 = memref.load %arg2[%c155] : memref<432xf32, #tpu.memory_space<smem>>
    %889 = vector.broadcast %888 : f32 to vector<8x8xf32>
    %890 = arith.mulf %889, %887 : vector<8x8xf32>
    %891 = arith.addf %873, %890 : vector<8x8xf32>
    %c191 = arith.constant 191 : index
    %892 = memref.load %arg2[%c191] : memref<432xf32, #tpu.memory_space<smem>>
    %893 = vector.broadcast %892 : f32 to vector<8x8xf32>
    %894 = arith.mulf %893, %887 : vector<8x8xf32>
    %895 = arith.addf %877, %894 : vector<8x8xf32>
    %c227 = arith.constant 227 : index
    %896 = memref.load %arg2[%c227] : memref<432xf32, #tpu.memory_space<smem>>
    %897 = vector.broadcast %896 : f32 to vector<8x8xf32>
    %898 = arith.mulf %897, %887 : vector<8x8xf32>
    %899 = arith.addf %881, %898 : vector<8x8xf32>
    %c263 = arith.constant 263 : index
    %900 = memref.load %arg2[%c263] : memref<432xf32, #tpu.memory_space<smem>>
    %901 = vector.broadcast %900 : f32 to vector<8x8xf32>
    %902 = arith.mulf %901, %887 : vector<8x8xf32>
    %903 = arith.addf %885, %902 : vector<8x8xf32>
    %c0_231 = arith.constant 0 : index
    %c2_232 = arith.constant 2 : index
    %c0_233 = arith.constant 0 : index
    %c1_234 = arith.constant 1 : index
    %904 = vector.load %arg3[%c0_231, %c2_232, %c0_233, %c1_234] : memref<1x4x8x9xf32, #tpu.memory_space<vmem>>, vector<1x1x8x8xf32>
    %905 = vector.shape_cast %904 : vector<1x1x8x8xf32> to vector<8x8xf32>
    %c164 = arith.constant 164 : index
    %906 = memref.load %arg2[%c164] : memref<432xf32, #tpu.memory_space<smem>>
    %907 = vector.broadcast %906 : f32 to vector<8x8xf32>
    %908 = arith.mulf %907, %905 : vector<8x8xf32>
    %909 = arith.addf %891, %908 : vector<8x8xf32>
    %c200 = arith.constant 200 : index
    %910 = memref.load %arg2[%c200] : memref<432xf32, #tpu.memory_space<smem>>
    %911 = vector.broadcast %910 : f32 to vector<8x8xf32>
    %912 = arith.mulf %911, %905 : vector<8x8xf32>
    %913 = arith.addf %895, %912 : vector<8x8xf32>
    %c236 = arith.constant 236 : index
    %914 = memref.load %arg2[%c236] : memref<432xf32, #tpu.memory_space<smem>>
    %915 = vector.broadcast %914 : f32 to vector<8x8xf32>
    %916 = arith.mulf %915, %905 : vector<8x8xf32>
    %917 = arith.addf %899, %916 : vector<8x8xf32>
    %c272 = arith.constant 272 : index
    %918 = memref.load %arg2[%c272] : memref<432xf32, #tpu.memory_space<smem>>
    %919 = vector.broadcast %918 : f32 to vector<8x8xf32>
    %920 = arith.mulf %919, %905 : vector<8x8xf32>
    %921 = arith.addf %903, %920 : vector<8x8xf32>
    %c0_235 = arith.constant 0 : index
    %c3_236 = arith.constant 3 : index
    %c0_237 = arith.constant 0 : index
    %c1_238 = arith.constant 1 : index
    %922 = vector.load %arg3[%c0_235, %c3_236, %c0_237, %c1_238] : memref<1x4x8x9xf32, #tpu.memory_space<vmem>>, vector<1x1x8x8xf32>
    %923 = vector.shape_cast %922 : vector<1x1x8x8xf32> to vector<8x8xf32>
    %c173 = arith.constant 173 : index
    %924 = memref.load %arg2[%c173] : memref<432xf32, #tpu.memory_space<smem>>
    %925 = vector.broadcast %924 : f32 to vector<8x8xf32>
    %926 = arith.mulf %925, %923 : vector<8x8xf32>
    %927 = arith.addf %909, %926 : vector<8x8xf32>
    %c209 = arith.constant 209 : index
    %928 = memref.load %arg2[%c209] : memref<432xf32, #tpu.memory_space<smem>>
    %929 = vector.broadcast %928 : f32 to vector<8x8xf32>
    %930 = arith.mulf %929, %923 : vector<8x8xf32>
    %931 = arith.addf %913, %930 : vector<8x8xf32>
    %c245 = arith.constant 245 : index
    %932 = memref.load %arg2[%c245] : memref<432xf32, #tpu.memory_space<smem>>
    %933 = vector.broadcast %932 : f32 to vector<8x8xf32>
    %934 = arith.mulf %933, %923 : vector<8x8xf32>
    %935 = arith.addf %917, %934 : vector<8x8xf32>
    %c281 = arith.constant 281 : index
    %936 = memref.load %arg2[%c281] : memref<432xf32, #tpu.memory_space<smem>>
    %937 = vector.broadcast %936 : f32 to vector<8x8xf32>
    %938 = arith.mulf %937, %923 : vector<8x8xf32>
    %939 = arith.addf %921, %938 : vector<8x8xf32>
    %c0_239 = arith.constant 0 : index
    %c0_240 = arith.constant 0 : index
    %c0_241 = arith.constant 0 : index
    %c0_242 = arith.constant 0 : index
    %940 = vector.load %arg5[%c0_239, %c0_240, %c0_241, %c0_242] : memref<1x4x8x9xf32, #tpu.memory_space<vmem>>, vector<1x1x8x8xf32>
    %941 = vector.shape_cast %940 : vector<1x1x8x8xf32> to vector<8x8xf32>
    %c147 = arith.constant 147 : index
    %942 = memref.load %arg2[%c147] : memref<432xf32, #tpu.memory_space<smem>>
    %943 = vector.broadcast %942 : f32 to vector<8x8xf32>
    %944 = arith.mulf %943, %941 : vector<8x8xf32>
    %945 = arith.addf %927, %944 : vector<8x8xf32>
    %c183 = arith.constant 183 : index
    %946 = memref.load %arg2[%c183] : memref<432xf32, #tpu.memory_space<smem>>
    %947 = vector.broadcast %946 : f32 to vector<8x8xf32>
    %948 = arith.mulf %947, %941 : vector<8x8xf32>
    %949 = arith.addf %931, %948 : vector<8x8xf32>
    %c219 = arith.constant 219 : index
    %950 = memref.load %arg2[%c219] : memref<432xf32, #tpu.memory_space<smem>>
    %951 = vector.broadcast %950 : f32 to vector<8x8xf32>
    %952 = arith.mulf %951, %941 : vector<8x8xf32>
    %953 = arith.addf %935, %952 : vector<8x8xf32>
    %c255 = arith.constant 255 : index
    %954 = memref.load %arg2[%c255] : memref<432xf32, #tpu.memory_space<smem>>
    %955 = vector.broadcast %954 : f32 to vector<8x8xf32>
    %956 = arith.mulf %955, %941 : vector<8x8xf32>
    %957 = arith.addf %939, %956 : vector<8x8xf32>
    %c0_243 = arith.constant 0 : index
    %c1_244 = arith.constant 1 : index
    %c0_245 = arith.constant 0 : index
    %c0_246 = arith.constant 0 : index
    %958 = vector.load %arg5[%c0_243, %c1_244, %c0_245, %c0_246] : memref<1x4x8x9xf32, #tpu.memory_space<vmem>>, vector<1x1x8x8xf32>
    %959 = vector.shape_cast %958 : vector<1x1x8x8xf32> to vector<8x8xf32>
    %c156 = arith.constant 156 : index
    %960 = memref.load %arg2[%c156] : memref<432xf32, #tpu.memory_space<smem>>
    %961 = vector.broadcast %960 : f32 to vector<8x8xf32>
    %962 = arith.mulf %961, %959 : vector<8x8xf32>
    %963 = arith.addf %945, %962 : vector<8x8xf32>
    %c192 = arith.constant 192 : index
    %964 = memref.load %arg2[%c192] : memref<432xf32, #tpu.memory_space<smem>>
    %965 = vector.broadcast %964 : f32 to vector<8x8xf32>
    %966 = arith.mulf %965, %959 : vector<8x8xf32>
    %967 = arith.addf %949, %966 : vector<8x8xf32>
    %c228 = arith.constant 228 : index
    %968 = memref.load %arg2[%c228] : memref<432xf32, #tpu.memory_space<smem>>
    %969 = vector.broadcast %968 : f32 to vector<8x8xf32>
    %970 = arith.mulf %969, %959 : vector<8x8xf32>
    %971 = arith.addf %953, %970 : vector<8x8xf32>
    %c264 = arith.constant 264 : index
    %972 = memref.load %arg2[%c264] : memref<432xf32, #tpu.memory_space<smem>>
    %973 = vector.broadcast %972 : f32 to vector<8x8xf32>
    %974 = arith.mulf %973, %959 : vector<8x8xf32>
    %975 = arith.addf %957, %974 : vector<8x8xf32>
    %c0_247 = arith.constant 0 : index
    %c2_248 = arith.constant 2 : index
    %c0_249 = arith.constant 0 : index
    %c0_250 = arith.constant 0 : index
    %976 = vector.load %arg5[%c0_247, %c2_248, %c0_249, %c0_250] : memref<1x4x8x9xf32, #tpu.memory_space<vmem>>, vector<1x1x8x8xf32>
    %977 = vector.shape_cast %976 : vector<1x1x8x8xf32> to vector<8x8xf32>
    %c165 = arith.constant 165 : index
    %978 = memref.load %arg2[%c165] : memref<432xf32, #tpu.memory_space<smem>>
    %979 = vector.broadcast %978 : f32 to vector<8x8xf32>
    %980 = arith.mulf %979, %977 : vector<8x8xf32>
    %981 = arith.addf %963, %980 : vector<8x8xf32>
    %c201 = arith.constant 201 : index
    %982 = memref.load %arg2[%c201] : memref<432xf32, #tpu.memory_space<smem>>
    %983 = vector.broadcast %982 : f32 to vector<8x8xf32>
    %984 = arith.mulf %983, %977 : vector<8x8xf32>
    %985 = arith.addf %967, %984 : vector<8x8xf32>
    %c237 = arith.constant 237 : index
    %986 = memref.load %arg2[%c237] : memref<432xf32, #tpu.memory_space<smem>>
    %987 = vector.broadcast %986 : f32 to vector<8x8xf32>
    %988 = arith.mulf %987, %977 : vector<8x8xf32>
    %989 = arith.addf %971, %988 : vector<8x8xf32>
    %c273 = arith.constant 273 : index
    %990 = memref.load %arg2[%c273] : memref<432xf32, #tpu.memory_space<smem>>
    %991 = vector.broadcast %990 : f32 to vector<8x8xf32>
    %992 = arith.mulf %991, %977 : vector<8x8xf32>
    %993 = arith.addf %975, %992 : vector<8x8xf32>
    %c0_251 = arith.constant 0 : index
    %c3_252 = arith.constant 3 : index
    %c0_253 = arith.constant 0 : index
    %c0_254 = arith.constant 0 : index
    %994 = vector.load %arg5[%c0_251, %c3_252, %c0_253, %c0_254] : memref<1x4x8x9xf32, #tpu.memory_space<vmem>>, vector<1x1x8x8xf32>
    %995 = vector.shape_cast %994 : vector<1x1x8x8xf32> to vector<8x8xf32>
    %c174 = arith.constant 174 : index
    %996 = memref.load %arg2[%c174] : memref<432xf32, #tpu.memory_space<smem>>
    %997 = vector.broadcast %996 : f32 to vector<8x8xf32>
    %998 = arith.mulf %997, %995 : vector<8x8xf32>
    %999 = arith.addf %981, %998 : vector<8x8xf32>
    %c210 = arith.constant 210 : index
    %1000 = memref.load %arg2[%c210] : memref<432xf32, #tpu.memory_space<smem>>
    %1001 = vector.broadcast %1000 : f32 to vector<8x8xf32>
    %1002 = arith.mulf %1001, %995 : vector<8x8xf32>
    %1003 = arith.addf %985, %1002 : vector<8x8xf32>
    %c246 = arith.constant 246 : index
    %1004 = memref.load %arg2[%c246] : memref<432xf32, #tpu.memory_space<smem>>
    %1005 = vector.broadcast %1004 : f32 to vector<8x8xf32>
    %1006 = arith.mulf %1005, %995 : vector<8x8xf32>
    %1007 = arith.addf %989, %1006 : vector<8x8xf32>
    %c282 = arith.constant 282 : index
    %1008 = memref.load %arg2[%c282] : memref<432xf32, #tpu.memory_space<smem>>
    %1009 = vector.broadcast %1008 : f32 to vector<8x8xf32>
    %1010 = arith.mulf %1009, %995 : vector<8x8xf32>
    %1011 = arith.addf %993, %1010 : vector<8x8xf32>
    %c0_255 = arith.constant 0 : index
    %c0_256 = arith.constant 0 : index
    %c0_257 = arith.constant 0 : index
    %c0_258 = arith.constant 0 : index
    %1012 = vector.load %arg6[%c0_255, %c0_256, %c0_257, %c0_258] : memref<1x4x8x8xf32, #tpu.memory_space<vmem>>, vector<1x1x8x8xf32>
    %1013 = vector.shape_cast %1012 : vector<1x1x8x8xf32> to vector<8x8xf32>
    %c148 = arith.constant 148 : index
    %1014 = memref.load %arg2[%c148] : memref<432xf32, #tpu.memory_space<smem>>
    %1015 = vector.broadcast %1014 : f32 to vector<8x8xf32>
    %1016 = arith.mulf %1015, %1013 : vector<8x8xf32>
    %1017 = arith.addf %999, %1016 : vector<8x8xf32>
    %c184 = arith.constant 184 : index
    %1018 = memref.load %arg2[%c184] : memref<432xf32, #tpu.memory_space<smem>>
    %1019 = vector.broadcast %1018 : f32 to vector<8x8xf32>
    %1020 = arith.mulf %1019, %1013 : vector<8x8xf32>
    %1021 = arith.addf %1003, %1020 : vector<8x8xf32>
    %c220 = arith.constant 220 : index
    %1022 = memref.load %arg2[%c220] : memref<432xf32, #tpu.memory_space<smem>>
    %1023 = vector.broadcast %1022 : f32 to vector<8x8xf32>
    %1024 = arith.mulf %1023, %1013 : vector<8x8xf32>
    %1025 = arith.addf %1007, %1024 : vector<8x8xf32>
    %c256 = arith.constant 256 : index
    %1026 = memref.load %arg2[%c256] : memref<432xf32, #tpu.memory_space<smem>>
    %1027 = vector.broadcast %1026 : f32 to vector<8x8xf32>
    %1028 = arith.mulf %1027, %1013 : vector<8x8xf32>
    %1029 = arith.addf %1011, %1028 : vector<8x8xf32>
    %c0_259 = arith.constant 0 : index
    %c1_260 = arith.constant 1 : index
    %c0_261 = arith.constant 0 : index
    %c0_262 = arith.constant 0 : index
    %1030 = vector.load %arg6[%c0_259, %c1_260, %c0_261, %c0_262] : memref<1x4x8x8xf32, #tpu.memory_space<vmem>>, vector<1x1x8x8xf32>
    %1031 = vector.shape_cast %1030 : vector<1x1x8x8xf32> to vector<8x8xf32>
    %c157 = arith.constant 157 : index
    %1032 = memref.load %arg2[%c157] : memref<432xf32, #tpu.memory_space<smem>>
    %1033 = vector.broadcast %1032 : f32 to vector<8x8xf32>
    %1034 = arith.mulf %1033, %1031 : vector<8x8xf32>
    %1035 = arith.addf %1017, %1034 : vector<8x8xf32>
    %c193 = arith.constant 193 : index
    %1036 = memref.load %arg2[%c193] : memref<432xf32, #tpu.memory_space<smem>>
    %1037 = vector.broadcast %1036 : f32 to vector<8x8xf32>
    %1038 = arith.mulf %1037, %1031 : vector<8x8xf32>
    %1039 = arith.addf %1021, %1038 : vector<8x8xf32>
    %c229 = arith.constant 229 : index
    %1040 = memref.load %arg2[%c229] : memref<432xf32, #tpu.memory_space<smem>>
    %1041 = vector.broadcast %1040 : f32 to vector<8x8xf32>
    %1042 = arith.mulf %1041, %1031 : vector<8x8xf32>
    %1043 = arith.addf %1025, %1042 : vector<8x8xf32>
    %c265 = arith.constant 265 : index
    %1044 = memref.load %arg2[%c265] : memref<432xf32, #tpu.memory_space<smem>>
    %1045 = vector.broadcast %1044 : f32 to vector<8x8xf32>
    %1046 = arith.mulf %1045, %1031 : vector<8x8xf32>
    %1047 = arith.addf %1029, %1046 : vector<8x8xf32>
    %c0_263 = arith.constant 0 : index
    %c2_264 = arith.constant 2 : index
    %c0_265 = arith.constant 0 : index
    %c0_266 = arith.constant 0 : index
    %1048 = vector.load %arg6[%c0_263, %c2_264, %c0_265, %c0_266] : memref<1x4x8x8xf32, #tpu.memory_space<vmem>>, vector<1x1x8x8xf32>
    %1049 = vector.shape_cast %1048 : vector<1x1x8x8xf32> to vector<8x8xf32>
    %c166 = arith.constant 166 : index
    %1050 = memref.load %arg2[%c166] : memref<432xf32, #tpu.memory_space<smem>>
    %1051 = vector.broadcast %1050 : f32 to vector<8x8xf32>
    %1052 = arith.mulf %1051, %1049 : vector<8x8xf32>
    %1053 = arith.addf %1035, %1052 : vector<8x8xf32>
    %c202 = arith.constant 202 : index
    %1054 = memref.load %arg2[%c202] : memref<432xf32, #tpu.memory_space<smem>>
    %1055 = vector.broadcast %1054 : f32 to vector<8x8xf32>
    %1056 = arith.mulf %1055, %1049 : vector<8x8xf32>
    %1057 = arith.addf %1039, %1056 : vector<8x8xf32>
    %c238 = arith.constant 238 : index
    %1058 = memref.load %arg2[%c238] : memref<432xf32, #tpu.memory_space<smem>>
    %1059 = vector.broadcast %1058 : f32 to vector<8x8xf32>
    %1060 = arith.mulf %1059, %1049 : vector<8x8xf32>
    %1061 = arith.addf %1043, %1060 : vector<8x8xf32>
    %c274 = arith.constant 274 : index
    %1062 = memref.load %arg2[%c274] : memref<432xf32, #tpu.memory_space<smem>>
    %1063 = vector.broadcast %1062 : f32 to vector<8x8xf32>
    %1064 = arith.mulf %1063, %1049 : vector<8x8xf32>
    %1065 = arith.addf %1047, %1064 : vector<8x8xf32>
    %c0_267 = arith.constant 0 : index
    %c3_268 = arith.constant 3 : index
    %c0_269 = arith.constant 0 : index
    %c0_270 = arith.constant 0 : index
    %1066 = vector.load %arg6[%c0_267, %c3_268, %c0_269, %c0_270] : memref<1x4x8x8xf32, #tpu.memory_space<vmem>>, vector<1x1x8x8xf32>
    %1067 = vector.shape_cast %1066 : vector<1x1x8x8xf32> to vector<8x8xf32>
    %c175 = arith.constant 175 : index
    %1068 = memref.load %arg2[%c175] : memref<432xf32, #tpu.memory_space<smem>>
    %1069 = vector.broadcast %1068 : f32 to vector<8x8xf32>
    %1070 = arith.mulf %1069, %1067 : vector<8x8xf32>
    %1071 = arith.addf %1053, %1070 : vector<8x8xf32>
    %c211 = arith.constant 211 : index
    %1072 = memref.load %arg2[%c211] : memref<432xf32, #tpu.memory_space<smem>>
    %1073 = vector.broadcast %1072 : f32 to vector<8x8xf32>
    %1074 = arith.mulf %1073, %1067 : vector<8x8xf32>
    %1075 = arith.addf %1057, %1074 : vector<8x8xf32>
    %c247 = arith.constant 247 : index
    %1076 = memref.load %arg2[%c247] : memref<432xf32, #tpu.memory_space<smem>>
    %1077 = vector.broadcast %1076 : f32 to vector<8x8xf32>
    %1078 = arith.mulf %1077, %1067 : vector<8x8xf32>
    %1079 = arith.addf %1061, %1078 : vector<8x8xf32>
    %c283 = arith.constant 283 : index
    %1080 = memref.load %arg2[%c283] : memref<432xf32, #tpu.memory_space<smem>>
    %1081 = vector.broadcast %1080 : f32 to vector<8x8xf32>
    %1082 = arith.mulf %1081, %1067 : vector<8x8xf32>
    %1083 = arith.addf %1065, %1082 : vector<8x8xf32>
    %c0_271 = arith.constant 0 : index
    %c0_272 = arith.constant 0 : index
    %c0_273 = arith.constant 0 : index
    %c1_274 = arith.constant 1 : index
    %1084 = vector.load %arg5[%c0_271, %c0_272, %c0_273, %c1_274] : memref<1x4x8x9xf32, #tpu.memory_space<vmem>>, vector<1x1x8x8xf32>
    %1085 = vector.shape_cast %1084 : vector<1x1x8x8xf32> to vector<8x8xf32>
    %c149 = arith.constant 149 : index
    %1086 = memref.load %arg2[%c149] : memref<432xf32, #tpu.memory_space<smem>>
    %1087 = vector.broadcast %1086 : f32 to vector<8x8xf32>
    %1088 = arith.mulf %1087, %1085 : vector<8x8xf32>
    %1089 = arith.addf %1071, %1088 : vector<8x8xf32>
    %c185 = arith.constant 185 : index
    %1090 = memref.load %arg2[%c185] : memref<432xf32, #tpu.memory_space<smem>>
    %1091 = vector.broadcast %1090 : f32 to vector<8x8xf32>
    %1092 = arith.mulf %1091, %1085 : vector<8x8xf32>
    %1093 = arith.addf %1075, %1092 : vector<8x8xf32>
    %c221 = arith.constant 221 : index
    %1094 = memref.load %arg2[%c221] : memref<432xf32, #tpu.memory_space<smem>>
    %1095 = vector.broadcast %1094 : f32 to vector<8x8xf32>
    %1096 = arith.mulf %1095, %1085 : vector<8x8xf32>
    %1097 = arith.addf %1079, %1096 : vector<8x8xf32>
    %c257 = arith.constant 257 : index
    %1098 = memref.load %arg2[%c257] : memref<432xf32, #tpu.memory_space<smem>>
    %1099 = vector.broadcast %1098 : f32 to vector<8x8xf32>
    %1100 = arith.mulf %1099, %1085 : vector<8x8xf32>
    %1101 = arith.addf %1083, %1100 : vector<8x8xf32>
    %c0_275 = arith.constant 0 : index
    %c1_276 = arith.constant 1 : index
    %c0_277 = arith.constant 0 : index
    %c1_278 = arith.constant 1 : index
    %1102 = vector.load %arg5[%c0_275, %c1_276, %c0_277, %c1_278] : memref<1x4x8x9xf32, #tpu.memory_space<vmem>>, vector<1x1x8x8xf32>
    %1103 = vector.shape_cast %1102 : vector<1x1x8x8xf32> to vector<8x8xf32>
    %c158 = arith.constant 158 : index
    %1104 = memref.load %arg2[%c158] : memref<432xf32, #tpu.memory_space<smem>>
    %1105 = vector.broadcast %1104 : f32 to vector<8x8xf32>
    %1106 = arith.mulf %1105, %1103 : vector<8x8xf32>
    %1107 = arith.addf %1089, %1106 : vector<8x8xf32>
    %c194 = arith.constant 194 : index
    %1108 = memref.load %arg2[%c194] : memref<432xf32, #tpu.memory_space<smem>>
    %1109 = vector.broadcast %1108 : f32 to vector<8x8xf32>
    %1110 = arith.mulf %1109, %1103 : vector<8x8xf32>
    %1111 = arith.addf %1093, %1110 : vector<8x8xf32>
    %c230 = arith.constant 230 : index
    %1112 = memref.load %arg2[%c230] : memref<432xf32, #tpu.memory_space<smem>>
    %1113 = vector.broadcast %1112 : f32 to vector<8x8xf32>
    %1114 = arith.mulf %1113, %1103 : vector<8x8xf32>
    %1115 = arith.addf %1097, %1114 : vector<8x8xf32>
    %c266 = arith.constant 266 : index
    %1116 = memref.load %arg2[%c266] : memref<432xf32, #tpu.memory_space<smem>>
    %1117 = vector.broadcast %1116 : f32 to vector<8x8xf32>
    %1118 = arith.mulf %1117, %1103 : vector<8x8xf32>
    %1119 = arith.addf %1101, %1118 : vector<8x8xf32>
    %c0_279 = arith.constant 0 : index
    %c2_280 = arith.constant 2 : index
    %c0_281 = arith.constant 0 : index
    %c1_282 = arith.constant 1 : index
    %1120 = vector.load %arg5[%c0_279, %c2_280, %c0_281, %c1_282] : memref<1x4x8x9xf32, #tpu.memory_space<vmem>>, vector<1x1x8x8xf32>
    %1121 = vector.shape_cast %1120 : vector<1x1x8x8xf32> to vector<8x8xf32>
    %c167 = arith.constant 167 : index
    %1122 = memref.load %arg2[%c167] : memref<432xf32, #tpu.memory_space<smem>>
    %1123 = vector.broadcast %1122 : f32 to vector<8x8xf32>
    %1124 = arith.mulf %1123, %1121 : vector<8x8xf32>
    %1125 = arith.addf %1107, %1124 : vector<8x8xf32>
    %c203 = arith.constant 203 : index
    %1126 = memref.load %arg2[%c203] : memref<432xf32, #tpu.memory_space<smem>>
    %1127 = vector.broadcast %1126 : f32 to vector<8x8xf32>
    %1128 = arith.mulf %1127, %1121 : vector<8x8xf32>
    %1129 = arith.addf %1111, %1128 : vector<8x8xf32>
    %c239 = arith.constant 239 : index
    %1130 = memref.load %arg2[%c239] : memref<432xf32, #tpu.memory_space<smem>>
    %1131 = vector.broadcast %1130 : f32 to vector<8x8xf32>
    %1132 = arith.mulf %1131, %1121 : vector<8x8xf32>
    %1133 = arith.addf %1115, %1132 : vector<8x8xf32>
    %c275 = arith.constant 275 : index
    %1134 = memref.load %arg2[%c275] : memref<432xf32, #tpu.memory_space<smem>>
    %1135 = vector.broadcast %1134 : f32 to vector<8x8xf32>
    %1136 = arith.mulf %1135, %1121 : vector<8x8xf32>
    %1137 = arith.addf %1119, %1136 : vector<8x8xf32>
    %c0_283 = arith.constant 0 : index
    %c3_284 = arith.constant 3 : index
    %c0_285 = arith.constant 0 : index
    %c1_286 = arith.constant 1 : index
    %1138 = vector.load %arg5[%c0_283, %c3_284, %c0_285, %c1_286] : memref<1x4x8x9xf32, #tpu.memory_space<vmem>>, vector<1x1x8x8xf32>
    %1139 = vector.shape_cast %1138 : vector<1x1x8x8xf32> to vector<8x8xf32>
    %c176 = arith.constant 176 : index
    %1140 = memref.load %arg2[%c176] : memref<432xf32, #tpu.memory_space<smem>>
    %1141 = vector.broadcast %1140 : f32 to vector<8x8xf32>
    %1142 = arith.mulf %1141, %1139 : vector<8x8xf32>
    %1143 = arith.addf %1125, %1142 : vector<8x8xf32>
    %c212 = arith.constant 212 : index
    %1144 = memref.load %arg2[%c212] : memref<432xf32, #tpu.memory_space<smem>>
    %1145 = vector.broadcast %1144 : f32 to vector<8x8xf32>
    %1146 = arith.mulf %1145, %1139 : vector<8x8xf32>
    %1147 = arith.addf %1129, %1146 : vector<8x8xf32>
    %c248 = arith.constant 248 : index
    %1148 = memref.load %arg2[%c248] : memref<432xf32, #tpu.memory_space<smem>>
    %1149 = vector.broadcast %1148 : f32 to vector<8x8xf32>
    %1150 = arith.mulf %1149, %1139 : vector<8x8xf32>
    %1151 = arith.addf %1133, %1150 : vector<8x8xf32>
    %c284 = arith.constant 284 : index
    %1152 = memref.load %arg2[%c284] : memref<432xf32, #tpu.memory_space<smem>>
    %1153 = vector.broadcast %1152 : f32 to vector<8x8xf32>
    %1154 = arith.mulf %1153, %1139 : vector<8x8xf32>
    %1155 = arith.addf %1137, %1154 : vector<8x8xf32>
    %c0_287 = arith.constant 0 : index
    %c0_288 = arith.constant 0 : index
    %c0_289 = arith.constant 0 : index
    %1156 = vector.load %arg11[%c0_287, %c0_288, %c0_289] : memref<4x8x9xf32, #tpu.memory_space<vmem>>, vector<1x8x8xf32>
    %1157 = vector.shape_cast %1156 : vector<1x8x8xf32> to vector<8x8xf32>
    %c150 = arith.constant 150 : index
    %1158 = memref.load %arg2[%c150] : memref<432xf32, #tpu.memory_space<smem>>
    %1159 = vector.broadcast %1158 : f32 to vector<8x8xf32>
    %1160 = arith.mulf %1159, %1157 : vector<8x8xf32>
    %1161 = arith.addf %1143, %1160 : vector<8x8xf32>
    %c186 = arith.constant 186 : index
    %1162 = memref.load %arg2[%c186] : memref<432xf32, #tpu.memory_space<smem>>
    %1163 = vector.broadcast %1162 : f32 to vector<8x8xf32>
    %1164 = arith.mulf %1163, %1157 : vector<8x8xf32>
    %1165 = arith.addf %1147, %1164 : vector<8x8xf32>
    %c222 = arith.constant 222 : index
    %1166 = memref.load %arg2[%c222] : memref<432xf32, #tpu.memory_space<smem>>
    %1167 = vector.broadcast %1166 : f32 to vector<8x8xf32>
    %1168 = arith.mulf %1167, %1157 : vector<8x8xf32>
    %1169 = arith.addf %1151, %1168 : vector<8x8xf32>
    %c258 = arith.constant 258 : index
    %1170 = memref.load %arg2[%c258] : memref<432xf32, #tpu.memory_space<smem>>
    %1171 = vector.broadcast %1170 : f32 to vector<8x8xf32>
    %1172 = arith.mulf %1171, %1157 : vector<8x8xf32>
    %1173 = arith.addf %1155, %1172 : vector<8x8xf32>
    %c1_290 = arith.constant 1 : index
    %c0_291 = arith.constant 0 : index
    %c0_292 = arith.constant 0 : index
    %1174 = vector.load %arg11[%c1_290, %c0_291, %c0_292] : memref<4x8x9xf32, #tpu.memory_space<vmem>>, vector<1x8x8xf32>
    %1175 = vector.shape_cast %1174 : vector<1x8x8xf32> to vector<8x8xf32>
    %c159 = arith.constant 159 : index
    %1176 = memref.load %arg2[%c159] : memref<432xf32, #tpu.memory_space<smem>>
    %1177 = vector.broadcast %1176 : f32 to vector<8x8xf32>
    %1178 = arith.mulf %1177, %1175 : vector<8x8xf32>
    %1179 = arith.addf %1161, %1178 : vector<8x8xf32>
    %c195 = arith.constant 195 : index
    %1180 = memref.load %arg2[%c195] : memref<432xf32, #tpu.memory_space<smem>>
    %1181 = vector.broadcast %1180 : f32 to vector<8x8xf32>
    %1182 = arith.mulf %1181, %1175 : vector<8x8xf32>
    %1183 = arith.addf %1165, %1182 : vector<8x8xf32>
    %c231 = arith.constant 231 : index
    %1184 = memref.load %arg2[%c231] : memref<432xf32, #tpu.memory_space<smem>>
    %1185 = vector.broadcast %1184 : f32 to vector<8x8xf32>
    %1186 = arith.mulf %1185, %1175 : vector<8x8xf32>
    %1187 = arith.addf %1169, %1186 : vector<8x8xf32>
    %c267 = arith.constant 267 : index
    %1188 = memref.load %arg2[%c267] : memref<432xf32, #tpu.memory_space<smem>>
    %1189 = vector.broadcast %1188 : f32 to vector<8x8xf32>
    %1190 = arith.mulf %1189, %1175 : vector<8x8xf32>
    %1191 = arith.addf %1173, %1190 : vector<8x8xf32>
    %c2_293 = arith.constant 2 : index
    %c0_294 = arith.constant 0 : index
    %c0_295 = arith.constant 0 : index
    %1192 = vector.load %arg11[%c2_293, %c0_294, %c0_295] : memref<4x8x9xf32, #tpu.memory_space<vmem>>, vector<1x8x8xf32>
    %1193 = vector.shape_cast %1192 : vector<1x8x8xf32> to vector<8x8xf32>
    %c168 = arith.constant 168 : index
    %1194 = memref.load %arg2[%c168] : memref<432xf32, #tpu.memory_space<smem>>
    %1195 = vector.broadcast %1194 : f32 to vector<8x8xf32>
    %1196 = arith.mulf %1195, %1193 : vector<8x8xf32>
    %1197 = arith.addf %1179, %1196 : vector<8x8xf32>
    %c204 = arith.constant 204 : index
    %1198 = memref.load %arg2[%c204] : memref<432xf32, #tpu.memory_space<smem>>
    %1199 = vector.broadcast %1198 : f32 to vector<8x8xf32>
    %1200 = arith.mulf %1199, %1193 : vector<8x8xf32>
    %1201 = arith.addf %1183, %1200 : vector<8x8xf32>
    %c240 = arith.constant 240 : index
    %1202 = memref.load %arg2[%c240] : memref<432xf32, #tpu.memory_space<smem>>
    %1203 = vector.broadcast %1202 : f32 to vector<8x8xf32>
    %1204 = arith.mulf %1203, %1193 : vector<8x8xf32>
    %1205 = arith.addf %1187, %1204 : vector<8x8xf32>
    %c276 = arith.constant 276 : index
    %1206 = memref.load %arg2[%c276] : memref<432xf32, #tpu.memory_space<smem>>
    %1207 = vector.broadcast %1206 : f32 to vector<8x8xf32>
    %1208 = arith.mulf %1207, %1193 : vector<8x8xf32>
    %1209 = arith.addf %1191, %1208 : vector<8x8xf32>
    %c3_296 = arith.constant 3 : index
    %c0_297 = arith.constant 0 : index
    %c0_298 = arith.constant 0 : index
    %1210 = vector.load %arg11[%c3_296, %c0_297, %c0_298] : memref<4x8x9xf32, #tpu.memory_space<vmem>>, vector<1x8x8xf32>
    %1211 = vector.shape_cast %1210 : vector<1x8x8xf32> to vector<8x8xf32>
    %c177 = arith.constant 177 : index
    %1212 = memref.load %arg2[%c177] : memref<432xf32, #tpu.memory_space<smem>>
    %1213 = vector.broadcast %1212 : f32 to vector<8x8xf32>
    %1214 = arith.mulf %1213, %1211 : vector<8x8xf32>
    %1215 = arith.addf %1197, %1214 : vector<8x8xf32>
    %c213 = arith.constant 213 : index
    %1216 = memref.load %arg2[%c213] : memref<432xf32, #tpu.memory_space<smem>>
    %1217 = vector.broadcast %1216 : f32 to vector<8x8xf32>
    %1218 = arith.mulf %1217, %1211 : vector<8x8xf32>
    %1219 = arith.addf %1201, %1218 : vector<8x8xf32>
    %c249 = arith.constant 249 : index
    %1220 = memref.load %arg2[%c249] : memref<432xf32, #tpu.memory_space<smem>>
    %1221 = vector.broadcast %1220 : f32 to vector<8x8xf32>
    %1222 = arith.mulf %1221, %1211 : vector<8x8xf32>
    %1223 = arith.addf %1205, %1222 : vector<8x8xf32>
    %c285 = arith.constant 285 : index
    %1224 = memref.load %arg2[%c285] : memref<432xf32, #tpu.memory_space<smem>>
    %1225 = vector.broadcast %1224 : f32 to vector<8x8xf32>
    %1226 = arith.mulf %1225, %1211 : vector<8x8xf32>
    %1227 = arith.addf %1209, %1226 : vector<8x8xf32>
    %c0_299 = arith.constant 0 : index
    %c0_300 = arith.constant 0 : index
    %c0_301 = arith.constant 0 : index
    %1228 = vector.load %arg12[%c0_299, %c0_300, %c0_301] : memref<4x8x8xf32, #tpu.memory_space<vmem>>, vector<1x8x8xf32>
    %1229 = vector.shape_cast %1228 : vector<1x8x8xf32> to vector<8x8xf32>
    %c151 = arith.constant 151 : index
    %1230 = memref.load %arg2[%c151] : memref<432xf32, #tpu.memory_space<smem>>
    %1231 = vector.broadcast %1230 : f32 to vector<8x8xf32>
    %1232 = arith.mulf %1231, %1229 : vector<8x8xf32>
    %1233 = arith.addf %1215, %1232 : vector<8x8xf32>
    %c187 = arith.constant 187 : index
    %1234 = memref.load %arg2[%c187] : memref<432xf32, #tpu.memory_space<smem>>
    %1235 = vector.broadcast %1234 : f32 to vector<8x8xf32>
    %1236 = arith.mulf %1235, %1229 : vector<8x8xf32>
    %1237 = arith.addf %1219, %1236 : vector<8x8xf32>
    %c223 = arith.constant 223 : index
    %1238 = memref.load %arg2[%c223] : memref<432xf32, #tpu.memory_space<smem>>
    %1239 = vector.broadcast %1238 : f32 to vector<8x8xf32>
    %1240 = arith.mulf %1239, %1229 : vector<8x8xf32>
    %1241 = arith.addf %1223, %1240 : vector<8x8xf32>
    %c259 = arith.constant 259 : index
    %1242 = memref.load %arg2[%c259] : memref<432xf32, #tpu.memory_space<smem>>
    %1243 = vector.broadcast %1242 : f32 to vector<8x8xf32>
    %1244 = arith.mulf %1243, %1229 : vector<8x8xf32>
    %1245 = arith.addf %1227, %1244 : vector<8x8xf32>
    %c1_302 = arith.constant 1 : index
    %c0_303 = arith.constant 0 : index
    %c0_304 = arith.constant 0 : index
    %1246 = vector.load %arg12[%c1_302, %c0_303, %c0_304] : memref<4x8x8xf32, #tpu.memory_space<vmem>>, vector<1x8x8xf32>
    %1247 = vector.shape_cast %1246 : vector<1x8x8xf32> to vector<8x8xf32>
    %c160 = arith.constant 160 : index
    %1248 = memref.load %arg2[%c160] : memref<432xf32, #tpu.memory_space<smem>>
    %1249 = vector.broadcast %1248 : f32 to vector<8x8xf32>
    %1250 = arith.mulf %1249, %1247 : vector<8x8xf32>
    %1251 = arith.addf %1233, %1250 : vector<8x8xf32>
    %c196 = arith.constant 196 : index
    %1252 = memref.load %arg2[%c196] : memref<432xf32, #tpu.memory_space<smem>>
    %1253 = vector.broadcast %1252 : f32 to vector<8x8xf32>
    %1254 = arith.mulf %1253, %1247 : vector<8x8xf32>
    %1255 = arith.addf %1237, %1254 : vector<8x8xf32>
    %c232 = arith.constant 232 : index
    %1256 = memref.load %arg2[%c232] : memref<432xf32, #tpu.memory_space<smem>>
    %1257 = vector.broadcast %1256 : f32 to vector<8x8xf32>
    %1258 = arith.mulf %1257, %1247 : vector<8x8xf32>
    %1259 = arith.addf %1241, %1258 : vector<8x8xf32>
    %c268 = arith.constant 268 : index
    %1260 = memref.load %arg2[%c268] : memref<432xf32, #tpu.memory_space<smem>>
    %1261 = vector.broadcast %1260 : f32 to vector<8x8xf32>
    %1262 = arith.mulf %1261, %1247 : vector<8x8xf32>
    %1263 = arith.addf %1245, %1262 : vector<8x8xf32>
    %c2_305 = arith.constant 2 : index
    %c0_306 = arith.constant 0 : index
    %c0_307 = arith.constant 0 : index
    %1264 = vector.load %arg12[%c2_305, %c0_306, %c0_307] : memref<4x8x8xf32, #tpu.memory_space<vmem>>, vector<1x8x8xf32>
    %1265 = vector.shape_cast %1264 : vector<1x8x8xf32> to vector<8x8xf32>
    %c169 = arith.constant 169 : index
    %1266 = memref.load %arg2[%c169] : memref<432xf32, #tpu.memory_space<smem>>
    %1267 = vector.broadcast %1266 : f32 to vector<8x8xf32>
    %1268 = arith.mulf %1267, %1265 : vector<8x8xf32>
    %1269 = arith.addf %1251, %1268 : vector<8x8xf32>
    %c205 = arith.constant 205 : index
    %1270 = memref.load %arg2[%c205] : memref<432xf32, #tpu.memory_space<smem>>
    %1271 = vector.broadcast %1270 : f32 to vector<8x8xf32>
    %1272 = arith.mulf %1271, %1265 : vector<8x8xf32>
    %1273 = arith.addf %1255, %1272 : vector<8x8xf32>
    %c241 = arith.constant 241 : index
    %1274 = memref.load %arg2[%c241] : memref<432xf32, #tpu.memory_space<smem>>
    %1275 = vector.broadcast %1274 : f32 to vector<8x8xf32>
    %1276 = arith.mulf %1275, %1265 : vector<8x8xf32>
    %1277 = arith.addf %1259, %1276 : vector<8x8xf32>
    %c277 = arith.constant 277 : index
    %1278 = memref.load %arg2[%c277] : memref<432xf32, #tpu.memory_space<smem>>
    %1279 = vector.broadcast %1278 : f32 to vector<8x8xf32>
    %1280 = arith.mulf %1279, %1265 : vector<8x8xf32>
    %1281 = arith.addf %1263, %1280 : vector<8x8xf32>
    %c3_308 = arith.constant 3 : index
    %c0_309 = arith.constant 0 : index
    %c0_310 = arith.constant 0 : index
    %1282 = vector.load %arg12[%c3_308, %c0_309, %c0_310] : memref<4x8x8xf32, #tpu.memory_space<vmem>>, vector<1x8x8xf32>
    %1283 = vector.shape_cast %1282 : vector<1x8x8xf32> to vector<8x8xf32>
    %c178 = arith.constant 178 : index
    %1284 = memref.load %arg2[%c178] : memref<432xf32, #tpu.memory_space<smem>>
    %1285 = vector.broadcast %1284 : f32 to vector<8x8xf32>
    %1286 = arith.mulf %1285, %1283 : vector<8x8xf32>
    %1287 = arith.addf %1269, %1286 : vector<8x8xf32>
    %c214 = arith.constant 214 : index
    %1288 = memref.load %arg2[%c214] : memref<432xf32, #tpu.memory_space<smem>>
    %1289 = vector.broadcast %1288 : f32 to vector<8x8xf32>
    %1290 = arith.mulf %1289, %1283 : vector<8x8xf32>
    %1291 = arith.addf %1273, %1290 : vector<8x8xf32>
    %c250 = arith.constant 250 : index
    %1292 = memref.load %arg2[%c250] : memref<432xf32, #tpu.memory_space<smem>>
    %1293 = vector.broadcast %1292 : f32 to vector<8x8xf32>
    %1294 = arith.mulf %1293, %1283 : vector<8x8xf32>
    %1295 = arith.addf %1277, %1294 : vector<8x8xf32>
    %c286 = arith.constant 286 : index
    %1296 = memref.load %arg2[%c286] : memref<432xf32, #tpu.memory_space<smem>>
    %1297 = vector.broadcast %1296 : f32 to vector<8x8xf32>
    %1298 = arith.mulf %1297, %1283 : vector<8x8xf32>
    %1299 = arith.addf %1281, %1298 : vector<8x8xf32>
    %c0_311 = arith.constant 0 : index
    %c0_312 = arith.constant 0 : index
    %c1_313 = arith.constant 1 : index
    %1300 = vector.load %arg11[%c0_311, %c0_312, %c1_313] : memref<4x8x9xf32, #tpu.memory_space<vmem>>, vector<1x8x8xf32>
    %1301 = vector.shape_cast %1300 : vector<1x8x8xf32> to vector<8x8xf32>
    %c152 = arith.constant 152 : index
    %1302 = memref.load %arg2[%c152] : memref<432xf32, #tpu.memory_space<smem>>
    %1303 = vector.broadcast %1302 : f32 to vector<8x8xf32>
    %1304 = arith.mulf %1303, %1301 : vector<8x8xf32>
    %1305 = arith.addf %1287, %1304 : vector<8x8xf32>
    %c188 = arith.constant 188 : index
    %1306 = memref.load %arg2[%c188] : memref<432xf32, #tpu.memory_space<smem>>
    %1307 = vector.broadcast %1306 : f32 to vector<8x8xf32>
    %1308 = arith.mulf %1307, %1301 : vector<8x8xf32>
    %1309 = arith.addf %1291, %1308 : vector<8x8xf32>
    %c224 = arith.constant 224 : index
    %1310 = memref.load %arg2[%c224] : memref<432xf32, #tpu.memory_space<smem>>
    %1311 = vector.broadcast %1310 : f32 to vector<8x8xf32>
    %1312 = arith.mulf %1311, %1301 : vector<8x8xf32>
    %1313 = arith.addf %1295, %1312 : vector<8x8xf32>
    %c260 = arith.constant 260 : index
    %1314 = memref.load %arg2[%c260] : memref<432xf32, #tpu.memory_space<smem>>
    %1315 = vector.broadcast %1314 : f32 to vector<8x8xf32>
    %1316 = arith.mulf %1315, %1301 : vector<8x8xf32>
    %1317 = arith.addf %1299, %1316 : vector<8x8xf32>
    %c1_314 = arith.constant 1 : index
    %c0_315 = arith.constant 0 : index
    %c1_316 = arith.constant 1 : index
    %1318 = vector.load %arg11[%c1_314, %c0_315, %c1_316] : memref<4x8x9xf32, #tpu.memory_space<vmem>>, vector<1x8x8xf32>
    %1319 = vector.shape_cast %1318 : vector<1x8x8xf32> to vector<8x8xf32>
    %c161 = arith.constant 161 : index
    %1320 = memref.load %arg2[%c161] : memref<432xf32, #tpu.memory_space<smem>>
    %1321 = vector.broadcast %1320 : f32 to vector<8x8xf32>
    %1322 = arith.mulf %1321, %1319 : vector<8x8xf32>
    %1323 = arith.addf %1305, %1322 : vector<8x8xf32>
    %c197 = arith.constant 197 : index
    %1324 = memref.load %arg2[%c197] : memref<432xf32, #tpu.memory_space<smem>>
    %1325 = vector.broadcast %1324 : f32 to vector<8x8xf32>
    %1326 = arith.mulf %1325, %1319 : vector<8x8xf32>
    %1327 = arith.addf %1309, %1326 : vector<8x8xf32>
    %c233 = arith.constant 233 : index
    %1328 = memref.load %arg2[%c233] : memref<432xf32, #tpu.memory_space<smem>>
    %1329 = vector.broadcast %1328 : f32 to vector<8x8xf32>
    %1330 = arith.mulf %1329, %1319 : vector<8x8xf32>
    %1331 = arith.addf %1313, %1330 : vector<8x8xf32>
    %c269 = arith.constant 269 : index
    %1332 = memref.load %arg2[%c269] : memref<432xf32, #tpu.memory_space<smem>>
    %1333 = vector.broadcast %1332 : f32 to vector<8x8xf32>
    %1334 = arith.mulf %1333, %1319 : vector<8x8xf32>
    %1335 = arith.addf %1317, %1334 : vector<8x8xf32>
    %c2_317 = arith.constant 2 : index
    %c0_318 = arith.constant 0 : index
    %c1_319 = arith.constant 1 : index
    %1336 = vector.load %arg11[%c2_317, %c0_318, %c1_319] : memref<4x8x9xf32, #tpu.memory_space<vmem>>, vector<1x8x8xf32>
    %1337 = vector.shape_cast %1336 : vector<1x8x8xf32> to vector<8x8xf32>
    %c170 = arith.constant 170 : index
    %1338 = memref.load %arg2[%c170] : memref<432xf32, #tpu.memory_space<smem>>
    %1339 = vector.broadcast %1338 : f32 to vector<8x8xf32>
    %1340 = arith.mulf %1339, %1337 : vector<8x8xf32>
    %1341 = arith.addf %1323, %1340 : vector<8x8xf32>
    %c206 = arith.constant 206 : index
    %1342 = memref.load %arg2[%c206] : memref<432xf32, #tpu.memory_space<smem>>
    %1343 = vector.broadcast %1342 : f32 to vector<8x8xf32>
    %1344 = arith.mulf %1343, %1337 : vector<8x8xf32>
    %1345 = arith.addf %1327, %1344 : vector<8x8xf32>
    %c242 = arith.constant 242 : index
    %1346 = memref.load %arg2[%c242] : memref<432xf32, #tpu.memory_space<smem>>
    %1347 = vector.broadcast %1346 : f32 to vector<8x8xf32>
    %1348 = arith.mulf %1347, %1337 : vector<8x8xf32>
    %1349 = arith.addf %1331, %1348 : vector<8x8xf32>
    %c278 = arith.constant 278 : index
    %1350 = memref.load %arg2[%c278] : memref<432xf32, #tpu.memory_space<smem>>
    %1351 = vector.broadcast %1350 : f32 to vector<8x8xf32>
    %1352 = arith.mulf %1351, %1337 : vector<8x8xf32>
    %1353 = arith.addf %1335, %1352 : vector<8x8xf32>
    %c3_320 = arith.constant 3 : index
    %c0_321 = arith.constant 0 : index
    %c1_322 = arith.constant 1 : index
    %1354 = vector.load %arg11[%c3_320, %c0_321, %c1_322] : memref<4x8x9xf32, #tpu.memory_space<vmem>>, vector<1x8x8xf32>
    %1355 = vector.shape_cast %1354 : vector<1x8x8xf32> to vector<8x8xf32>
    %c179 = arith.constant 179 : index
    %1356 = memref.load %arg2[%c179] : memref<432xf32, #tpu.memory_space<smem>>
    %1357 = vector.broadcast %1356 : f32 to vector<8x8xf32>
    %1358 = arith.mulf %1357, %1355 : vector<8x8xf32>
    %1359 = arith.addf %1341, %1358 : vector<8x8xf32>
    %c215 = arith.constant 215 : index
    %1360 = memref.load %arg2[%c215] : memref<432xf32, #tpu.memory_space<smem>>
    %1361 = vector.broadcast %1360 : f32 to vector<8x8xf32>
    %1362 = arith.mulf %1361, %1355 : vector<8x8xf32>
    %1363 = arith.addf %1345, %1362 : vector<8x8xf32>
    %c251 = arith.constant 251 : index
    %1364 = memref.load %arg2[%c251] : memref<432xf32, #tpu.memory_space<smem>>
    %1365 = vector.broadcast %1364 : f32 to vector<8x8xf32>
    %1366 = arith.mulf %1365, %1355 : vector<8x8xf32>
    %1367 = arith.addf %1349, %1366 : vector<8x8xf32>
    %c287 = arith.constant 287 : index
    %1368 = memref.load %arg2[%c287] : memref<432xf32, #tpu.memory_space<smem>>
    %1369 = vector.broadcast %1368 : f32 to vector<8x8xf32>
    %1370 = arith.mulf %1369, %1355 : vector<8x8xf32>
    %1371 = arith.addf %1353, %1370 : vector<8x8xf32>
    %1372 = arith.truncf %1359 : vector<8x8xf32> to vector<8x8xbf16>
    %c0_323 = arith.constant 0 : index
    %c4_324 = arith.constant 4 : index
    %c0_325 = arith.constant 0 : index
    %c0_326 = arith.constant 0 : index
    %1373 = vector.load %arg9[%c0_323, %c4_324, %c0_325, %c0_326] : memref<1x16x8x8xbf16, #tpu.memory_space<vmem>>, vector<1x1x8x8xbf16>
    %1374 = vector.shape_cast %1373 : vector<1x1x8x8xbf16> to vector<8x8xbf16>
    %1375 = vector.shape_cast %1372 : vector<8x8xbf16> to vector<1x1x8x8xbf16>
    tpu.vector_store %arg9[%c0_323, %c4_324, %c0_325, %c0_326], %1375 {strides = array<i32>} : memref<1x16x8x8xbf16, #tpu.memory_space<vmem>>, vector<1x1x8x8xbf16>,
    %1376 = vector.shape_cast %1359 : vector<8x8xf32> to vector<1x8x8xf32>
    %cst_327 = arith.constant dense<0.000000e+00> : vector<1xf32>
    %1377 = vector.multi_reduction <add>, %1376, %cst_327 [1, 2] : vector<1x8x8xf32> to vector<1xf32>
    %1378 = vector.shape_cast %1377 : vector<1xf32> to vector<1x1x1xf32>
    %1379 = vector.extract %1378[0, 0, 0] : f32 from vector<1x1x1xf32>
    %1380 = arith.mulf %1359, %1359 : vector<8x8xf32>
    %1381 = vector.shape_cast %1380 : vector<8x8xf32> to vector<1x8x8xf32>
    %cst_328 = arith.constant dense<0.000000e+00> : vector<1xf32>
    %1382 = vector.multi_reduction <add>, %1381, %cst_328 [1, 2] : vector<1x8x8xf32> to vector<1xf32>
    %1383 = vector.shape_cast %1382 : vector<1xf32> to vector<1x1x1xf32>
    %1384 = vector.extract %1383[0, 0, 0] : f32 from vector<1x1x1xf32>
    %1385 = arith.truncf %1363 : vector<8x8xf32> to vector<8x8xbf16>
    %c0_329 = arith.constant 0 : index
    %c5_330 = arith.constant 5 : index
    %c0_331 = arith.constant 0 : index
    %c0_332 = arith.constant 0 : index
    %1386 = vector.load %arg9[%c0_329, %c5_330, %c0_331, %c0_332] : memref<1x16x8x8xbf16, #tpu.memory_space<vmem>>, vector<1x1x8x8xbf16>
    %1387 = vector.shape_cast %1386 : vector<1x1x8x8xbf16> to vector<8x8xbf16>
    %1388 = vector.shape_cast %1385 : vector<8x8xbf16> to vector<1x1x8x8xbf16>
    tpu.vector_store %arg9[%c0_329, %c5_330, %c0_331, %c0_332], %1388 {strides = array<i32>} : memref<1x16x8x8xbf16, #tpu.memory_space<vmem>>, vector<1x1x8x8xbf16>,
    %1389 = vector.shape_cast %1363 : vector<8x8xf32> to vector<1x8x8xf32>
    %cst_333 = arith.constant dense<0.000000e+00> : vector<1xf32>
    %1390 = vector.multi_reduction <add>, %1389, %cst_333 [1, 2] : vector<1x8x8xf32> to vector<1xf32>
    %1391 = vector.shape_cast %1390 : vector<1xf32> to vector<1x1x1xf32>
    %1392 = vector.extract %1391[0, 0, 0] : f32 from vector<1x1x1xf32>
    %1393 = arith.mulf %1363, %1363 : vector<8x8xf32>
    %1394 = vector.shape_cast %1393 : vector<8x8xf32> to vector<1x8x8xf32>
    %cst_334 = arith.constant dense<0.000000e+00> : vector<1xf32>
    %1395 = vector.multi_reduction <add>, %1394, %cst_334 [1, 2] : vector<1x8x8xf32> to vector<1xf32>
    %1396 = vector.shape_cast %1395 : vector<1xf32> to vector<1x1x1xf32>
    %1397 = vector.extract %1396[0, 0, 0] : f32 from vector<1x1x1xf32>
    %1398 = arith.truncf %1367 : vector<8x8xf32> to vector<8x8xbf16>
    %c0_335 = arith.constant 0 : index
    %c6_336 = arith.constant 6 : index
    %c0_337 = arith.constant 0 : index
    %c0_338 = arith.constant 0 : index
    %1399 = vector.load %arg9[%c0_335, %c6_336, %c0_337, %c0_338] : memref<1x16x8x8xbf16, #tpu.memory_space<vmem>>, vector<1x1x8x8xbf16>
    %1400 = vector.shape_cast %1399 : vector<1x1x8x8xbf16> to vector<8x8xbf16>
    %1401 = vector.shape_cast %1398 : vector<8x8xbf16> to vector<1x1x8x8xbf16>
    tpu.vector_store %arg9[%c0_335, %c6_336, %c0_337, %c0_338], %1401 {strides = array<i32>} : memref<1x16x8x8xbf16, #tpu.memory_space<vmem>>, vector<1x1x8x8xbf16>,
    %1402 = vector.shape_cast %1367 : vector<8x8xf32> to vector<1x8x8xf32>
    %cst_339 = arith.constant dense<0.000000e+00> : vector<1xf32>
    %1403 = vector.multi_reduction <add>, %1402, %cst_339 [1, 2] : vector<1x8x8xf32> to vector<1xf32>
    %1404 = vector.shape_cast %1403 : vector<1xf32> to vector<1x1x1xf32>
    %1405 = vector.extract %1404[0, 0, 0] : f32 from vector<1x1x1xf32>
    %1406 = arith.mulf %1367, %1367 : vector<8x8xf32>
    %1407 = vector.shape_cast %1406 : vector<8x8xf32> to vector<1x8x8xf32>
    %cst_340 = arith.constant dense<0.000000e+00> : vector<1xf32>
    %1408 = vector.multi_reduction <add>, %1407, %cst_340 [1, 2] : vector<1x8x8xf32> to vector<1xf32>
    %1409 = vector.shape_cast %1408 : vector<1xf32> to vector<1x1x1xf32>
    %1410 = vector.extract %1409[0, 0, 0] : f32 from vector<1x1x1xf32>
    %1411 = arith.truncf %1371 : vector<8x8xf32> to vector<8x8xbf16>
    %c0_341 = arith.constant 0 : index
    %c7_342 = arith.constant 7 : index
    %c0_343 = arith.constant 0 : index
    %c0_344 = arith.constant 0 : index
    %1412 = vector.load %arg9[%c0_341, %c7_342, %c0_343, %c0_344] : memref<1x16x8x8xbf16, #tpu.memory_space<vmem>>, vector<1x1x8x8xbf16>
    %1413 = vector.shape_cast %1412 : vector<1x1x8x8xbf16> to vector<8x8xbf16>
    %1414 = vector.shape_cast %1411 : vector<8x8xbf16> to vector<1x1x8x8xbf16>
    tpu.vector_store %arg9[%c0_341, %c7_342, %c0_343, %c0_344], %1414 {strides = array<i32>} : memref<1x16x8x8xbf16, #tpu.memory_space<vmem>>, vector<1x1x8x8xbf16>,
    %1415 = vector.shape_cast %1371 : vector<8x8xf32> to vector<1x8x8xf32>
    %cst_345 = arith.constant dense<0.000000e+00> : vector<1xf32>
    %1416 = vector.multi_reduction <add>, %1415, %cst_345 [1, 2] : vector<1x8x8xf32> to vector<1xf32>
    %1417 = vector.shape_cast %1416 : vector<1xf32> to vector<1x1x1xf32>
    %1418 = vector.extract %1417[0, 0, 0] : f32 from vector<1x1x1xf32>
    %1419 = arith.mulf %1371, %1371 : vector<8x8xf32>
    %1420 = vector.shape_cast %1419 : vector<8x8xf32> to vector<1x8x8xf32>
    %cst_346 = arith.constant dense<0.000000e+00> : vector<1xf32>
    %1421 = vector.multi_reduction <add>, %1420, %cst_346 [1, 2] : vector<1x8x8xf32> to vector<1xf32>
    %1422 = vector.shape_cast %1421 : vector<1xf32> to vector<1x1x1xf32>
    %1423 = vector.extract %1422[0, 0, 0] : f32 from vector<1x1x1xf32>
    %cst_347 = arith.constant 0.000000e+00 : f32
    %1424 = vector.broadcast %cst_347 : f32 to vector<8x8xf32>
    %cst_348 = arith.constant 0.000000e+00 : f32
    %1425 = vector.broadcast %cst_348 : f32 to vector<8x8xf32>
    %cst_349 = arith.constant 0.000000e+00 : f32
    %1426 = vector.broadcast %cst_349 : f32 to vector<8x8xf32>
    %cst_350 = arith.constant 0.000000e+00 : f32
    %1427 = vector.broadcast %cst_350 : f32 to vector<8x8xf32>
    %c0_351 = arith.constant 0 : index
    %c0_352 = arith.constant 0 : index
    %c0_353 = arith.constant 0 : index
    %c0_354 = arith.constant 0 : index
    %1428 = vector.load %arg3[%c0_351, %c0_352, %c0_353, %c0_354] : memref<1x4x8x9xf32, #tpu.memory_space<vmem>>, vector<1x1x8x8xf32>
    %1429 = vector.shape_cast %1428 : vector<1x1x8x8xf32> to vector<8x8xf32>
    %c288 = arith.constant 288 : index
    %1430 = memref.load %arg2[%c288] : memref<432xf32, #tpu.memory_space<smem>>
    %1431 = vector.broadcast %1430 : f32 to vector<8x8xf32>
    %1432 = arith.mulf %1431, %1429 : vector<8x8xf32>
    %1433 = arith.addf %1424, %1432 : vector<8x8xf32>
    %c324 = arith.constant 324 : index
    %1434 = memref.load %arg2[%c324] : memref<432xf32, #tpu.memory_space<smem>>
    %1435 = vector.broadcast %1434 : f32 to vector<8x8xf32>
    %1436 = arith.mulf %1435, %1429 : vector<8x8xf32>
    %1437 = arith.addf %1425, %1436 : vector<8x8xf32>
    %c360 = arith.constant 360 : index
    %1438 = memref.load %arg2[%c360] : memref<432xf32, #tpu.memory_space<smem>>
    %1439 = vector.broadcast %1438 : f32 to vector<8x8xf32>
    %1440 = arith.mulf %1439, %1429 : vector<8x8xf32>
    %1441 = arith.addf %1426, %1440 : vector<8x8xf32>
    %c396 = arith.constant 396 : index
    %1442 = memref.load %arg2[%c396] : memref<432xf32, #tpu.memory_space<smem>>
    %1443 = vector.broadcast %1442 : f32 to vector<8x8xf32>
    %1444 = arith.mulf %1443, %1429 : vector<8x8xf32>
    %1445 = arith.addf %1427, %1444 : vector<8x8xf32>
    %c0_355 = arith.constant 0 : index
    %c1_356 = arith.constant 1 : index
    %c0_357 = arith.constant 0 : index
    %c0_358 = arith.constant 0 : index
    %1446 = vector.load %arg3[%c0_355, %c1_356, %c0_357, %c0_358] : memref<1x4x8x9xf32, #tpu.memory_space<vmem>>, vector<1x1x8x8xf32>
    %1447 = vector.shape_cast %1446 : vector<1x1x8x8xf32> to vector<8x8xf32>
    %c297 = arith.constant 297 : index
    %1448 = memref.load %arg2[%c297] : memref<432xf32, #tpu.memory_space<smem>>
    %1449 = vector.broadcast %1448 : f32 to vector<8x8xf32>
    %1450 = arith.mulf %1449, %1447 : vector<8x8xf32>
    %1451 = arith.addf %1433, %1450 : vector<8x8xf32>
    %c333 = arith.constant 333 : index
    %1452 = memref.load %arg2[%c333] : memref<432xf32, #tpu.memory_space<smem>>
    %1453 = vector.broadcast %1452 : f32 to vector<8x8xf32>
    %1454 = arith.mulf %1453, %1447 : vector<8x8xf32>
    %1455 = arith.addf %1437, %1454 : vector<8x8xf32>
    %c369 = arith.constant 369 : index
    %1456 = memref.load %arg2[%c369] : memref<432xf32, #tpu.memory_space<smem>>
    %1457 = vector.broadcast %1456 : f32 to vector<8x8xf32>
    %1458 = arith.mulf %1457, %1447 : vector<8x8xf32>
    %1459 = arith.addf %1441, %1458 : vector<8x8xf32>
    %c405 = arith.constant 405 : index
    %1460 = memref.load %arg2[%c405] : memref<432xf32, #tpu.memory_space<smem>>
    %1461 = vector.broadcast %1460 : f32 to vector<8x8xf32>
    %1462 = arith.mulf %1461, %1447 : vector<8x8xf32>
    %1463 = arith.addf %1445, %1462 : vector<8x8xf32>
    %c0_359 = arith.constant 0 : index
    %c2_360 = arith.constant 2 : index
    %c0_361 = arith.constant 0 : index
    %c0_362 = arith.constant 0 : index
    %1464 = vector.load %arg3[%c0_359, %c2_360, %c0_361, %c0_362] : memref<1x4x8x9xf32, #tpu.memory_space<vmem>>, vector<1x1x8x8xf32>
    %1465 = vector.shape_cast %1464 : vector<1x1x8x8xf32> to vector<8x8xf32>
    %c306 = arith.constant 306 : index
    %1466 = memref.load %arg2[%c306] : memref<432xf32, #tpu.memory_space<smem>>
    %1467 = vector.broadcast %1466 : f32 to vector<8x8xf32>
    %1468 = arith.mulf %1467, %1465 : vector<8x8xf32>
    %1469 = arith.addf %1451, %1468 : vector<8x8xf32>
    %c342 = arith.constant 342 : index
    %1470 = memref.load %arg2[%c342] : memref<432xf32, #tpu.memory_space<smem>>
    %1471 = vector.broadcast %1470 : f32 to vector<8x8xf32>
    %1472 = arith.mulf %1471, %1465 : vector<8x8xf32>
    %1473 = arith.addf %1455, %1472 : vector<8x8xf32>
    %c378 = arith.constant 378 : index
    %1474 = memref.load %arg2[%c378] : memref<432xf32, #tpu.memory_space<smem>>
    %1475 = vector.broadcast %1474 : f32 to vector<8x8xf32>
    %1476 = arith.mulf %1475, %1465 : vector<8x8xf32>
    %1477 = arith.addf %1459, %1476 : vector<8x8xf32>
    %c414 = arith.constant 414 : index
    %1478 = memref.load %arg2[%c414] : memref<432xf32, #tpu.memory_space<smem>>
    %1479 = vector.broadcast %1478 : f32 to vector<8x8xf32>
    %1480 = arith.mulf %1479, %1465 : vector<8x8xf32>
    %1481 = arith.addf %1463, %1480 : vector<8x8xf32>
    %c0_363 = arith.constant 0 : index
    %c3_364 = arith.constant 3 : index
    %c0_365 = arith.constant 0 : index
    %c0_366 = arith.constant 0 : index
    %1482 = vector.load %arg3[%c0_363, %c3_364, %c0_365, %c0_366] : memref<1x4x8x9xf32, #tpu.memory_space<vmem>>, vector<1x1x8x8xf32>
    %1483 = vector.shape_cast %1482 : vector<1x1x8x8xf32> to vector<8x8xf32>
    %c315 = arith.constant 315 : index
    %1484 = memref.load %arg2[%c315] : memref<432xf32, #tpu.memory_space<smem>>
    %1485 = vector.broadcast %1484 : f32 to vector<8x8xf32>
    %1486 = arith.mulf %1485, %1483 : vector<8x8xf32>
    %1487 = arith.addf %1469, %1486 : vector<8x8xf32>
    %c351 = arith.constant 351 : index
    %1488 = memref.load %arg2[%c351] : memref<432xf32, #tpu.memory_space<smem>>
    %1489 = vector.broadcast %1488 : f32 to vector<8x8xf32>
    %1490 = arith.mulf %1489, %1483 : vector<8x8xf32>
    %1491 = arith.addf %1473, %1490 : vector<8x8xf32>
    %c387 = arith.constant 387 : index
    %1492 = memref.load %arg2[%c387] : memref<432xf32, #tpu.memory_space<smem>>
    %1493 = vector.broadcast %1492 : f32 to vector<8x8xf32>
    %1494 = arith.mulf %1493, %1483 : vector<8x8xf32>
    %1495 = arith.addf %1477, %1494 : vector<8x8xf32>
    %c423 = arith.constant 423 : index
    %1496 = memref.load %arg2[%c423] : memref<432xf32, #tpu.memory_space<smem>>
    %1497 = vector.broadcast %1496 : f32 to vector<8x8xf32>
    %1498 = arith.mulf %1497, %1483 : vector<8x8xf32>
    %1499 = arith.addf %1481, %1498 : vector<8x8xf32>
    %c0_367 = arith.constant 0 : index
    %c0_368 = arith.constant 0 : index
    %c0_369 = arith.constant 0 : index
    %c0_370 = arith.constant 0 : index
    %1500 = vector.load %arg4[%c0_367, %c0_368, %c0_369, %c0_370] : memref<1x4x8x8xf32, #tpu.memory_space<vmem>>, vector<1x1x8x8xf32>
    %1501 = vector.shape_cast %1500 : vector<1x1x8x8xf32> to vector<8x8xf32>
    %c289 = arith.constant 289 : index
    %1502 = memref.load %arg2[%c289] : memref<432xf32, #tpu.memory_space<smem>>
    %1503 = vector.broadcast %1502 : f32 to vector<8x8xf32>
    %1504 = arith.mulf %1503, %1501 : vector<8x8xf32>
    %1505 = arith.addf %1487, %1504 : vector<8x8xf32>
    %c325 = arith.constant 325 : index
    %1506 = memref.load %arg2[%c325] : memref<432xf32, #tpu.memory_space<smem>>
    %1507 = vector.broadcast %1506 : f32 to vector<8x8xf32>
    %1508 = arith.mulf %1507, %1501 : vector<8x8xf32>
    %1509 = arith.addf %1491, %1508 : vector<8x8xf32>
    %c361 = arith.constant 361 : index
    %1510 = memref.load %arg2[%c361] : memref<432xf32, #tpu.memory_space<smem>>
    %1511 = vector.broadcast %1510 : f32 to vector<8x8xf32>
    %1512 = arith.mulf %1511, %1501 : vector<8x8xf32>
    %1513 = arith.addf %1495, %1512 : vector<8x8xf32>
    %c397 = arith.constant 397 : index
    %1514 = memref.load %arg2[%c397] : memref<432xf32, #tpu.memory_space<smem>>
    %1515 = vector.broadcast %1514 : f32 to vector<8x8xf32>
    %1516 = arith.mulf %1515, %1501 : vector<8x8xf32>
    %1517 = arith.addf %1499, %1516 : vector<8x8xf32>
    %c0_371 = arith.constant 0 : index
    %c1_372 = arith.constant 1 : index
    %c0_373 = arith.constant 0 : index
    %c0_374 = arith.constant 0 : index
    %1518 = vector.load %arg4[%c0_371, %c1_372, %c0_373, %c0_374] : memref<1x4x8x8xf32, #tpu.memory_space<vmem>>, vector<1x1x8x8xf32>
    %1519 = vector.shape_cast %1518 : vector<1x1x8x8xf32> to vector<8x8xf32>
    %c298 = arith.constant 298 : index
    %1520 = memref.load %arg2[%c298] : memref<432xf32, #tpu.memory_space<smem>>
    %1521 = vector.broadcast %1520 : f32 to vector<8x8xf32>
    %1522 = arith.mulf %1521, %1519 : vector<8x8xf32>
    %1523 = arith.addf %1505, %1522 : vector<8x8xf32>
    %c334 = arith.constant 334 : index
    %1524 = memref.load %arg2[%c334] : memref<432xf32, #tpu.memory_space<smem>>
    %1525 = vector.broadcast %1524 : f32 to vector<8x8xf32>
    %1526 = arith.mulf %1525, %1519 : vector<8x8xf32>
    %1527 = arith.addf %1509, %1526 : vector<8x8xf32>
    %c370 = arith.constant 370 : index
    %1528 = memref.load %arg2[%c370] : memref<432xf32, #tpu.memory_space<smem>>
    %1529 = vector.broadcast %1528 : f32 to vector<8x8xf32>
    %1530 = arith.mulf %1529, %1519 : vector<8x8xf32>
    %1531 = arith.addf %1513, %1530 : vector<8x8xf32>
    %c406 = arith.constant 406 : index
    %1532 = memref.load %arg2[%c406] : memref<432xf32, #tpu.memory_space<smem>>
    %1533 = vector.broadcast %1532 : f32 to vector<8x8xf32>
    %1534 = arith.mulf %1533, %1519 : vector<8x8xf32>
    %1535 = arith.addf %1517, %1534 : vector<8x8xf32>
    %c0_375 = arith.constant 0 : index
    %c2_376 = arith.constant 2 : index
    %c0_377 = arith.constant 0 : index
    %c0_378 = arith.constant 0 : index
    %1536 = vector.load %arg4[%c0_375, %c2_376, %c0_377, %c0_378] : memref<1x4x8x8xf32, #tpu.memory_space<vmem>>, vector<1x1x8x8xf32>
    %1537 = vector.shape_cast %1536 : vector<1x1x8x8xf32> to vector<8x8xf32>
    %c307 = arith.constant 307 : index
    %1538 = memref.load %arg2[%c307] : memref<432xf32, #tpu.memory_space<smem>>
    %1539 = vector.broadcast %1538 : f32 to vector<8x8xf32>
    %1540 = arith.mulf %1539, %1537 : vector<8x8xf32>
    %1541 = arith.addf %1523, %1540 : vector<8x8xf32>
    %c343 = arith.constant 343 : index
    %1542 = memref.load %arg2[%c343] : memref<432xf32, #tpu.memory_space<smem>>
    %1543 = vector.broadcast %1542 : f32 to vector<8x8xf32>
    %1544 = arith.mulf %1543, %1537 : vector<8x8xf32>
    %1545 = arith.addf %1527, %1544 : vector<8x8xf32>
    %c379 = arith.constant 379 : index
    %1546 = memref.load %arg2[%c379] : memref<432xf32, #tpu.memory_space<smem>>
    %1547 = vector.broadcast %1546 : f32 to vector<8x8xf32>
    %1548 = arith.mulf %1547, %1537 : vector<8x8xf32>
    %1549 = arith.addf %1531, %1548 : vector<8x8xf32>
    %c415 = arith.constant 415 : index
    %1550 = memref.load %arg2[%c415] : memref<432xf32, #tpu.memory_space<smem>>
    %1551 = vector.broadcast %1550 : f32 to vector<8x8xf32>
    %1552 = arith.mulf %1551, %1537 : vector<8x8xf32>
    %1553 = arith.addf %1535, %1552 : vector<8x8xf32>
    %c0_379 = arith.constant 0 : index
    %c3_380 = arith.constant 3 : index
    %c0_381 = arith.constant 0 : index
    %c0_382 = arith.constant 0 : index
    %1554 = vector.load %arg4[%c0_379, %c3_380, %c0_381, %c0_382] : memref<1x4x8x8xf32, #tpu.memory_space<vmem>>, vector<1x1x8x8xf32>
    %1555 = vector.shape_cast %1554 : vector<1x1x8x8xf32> to vector<8x8xf32>
    %c316 = arith.constant 316 : index
    %1556 = memref.load %arg2[%c316] : memref<432xf32, #tpu.memory_space<smem>>
    %1557 = vector.broadcast %1556 : f32 to vector<8x8xf32>
    %1558 = arith.mulf %1557, %1555 : vector<8x8xf32>
    %1559 = arith.addf %1541, %1558 : vector<8x8xf32>
    %c352 = arith.constant 352 : index
    %1560 = memref.load %arg2[%c352] : memref<432xf32, #tpu.memory_space<smem>>
    %1561 = vector.broadcast %1560 : f32 to vector<8x8xf32>
    %1562 = arith.mulf %1561, %1555 : vector<8x8xf32>
    %1563 = arith.addf %1545, %1562 : vector<8x8xf32>
    %c388 = arith.constant 388 : index
    %1564 = memref.load %arg2[%c388] : memref<432xf32, #tpu.memory_space<smem>>
    %1565 = vector.broadcast %1564 : f32 to vector<8x8xf32>
    %1566 = arith.mulf %1565, %1555 : vector<8x8xf32>
    %1567 = arith.addf %1549, %1566 : vector<8x8xf32>
    %c424 = arith.constant 424 : index
    %1568 = memref.load %arg2[%c424] : memref<432xf32, #tpu.memory_space<smem>>
    %1569 = vector.broadcast %1568 : f32 to vector<8x8xf32>
    %1570 = arith.mulf %1569, %1555 : vector<8x8xf32>
    %1571 = arith.addf %1553, %1570 : vector<8x8xf32>
    %c0_383 = arith.constant 0 : index
    %c0_384 = arith.constant 0 : index
    %c0_385 = arith.constant 0 : index
    %c1_386 = arith.constant 1 : index
    %1572 = vector.load %arg3[%c0_383, %c0_384, %c0_385, %c1_386] : memref<1x4x8x9xf32, #tpu.memory_space<vmem>>, vector<1x1x8x8xf32>
    %1573 = vector.shape_cast %1572 : vector<1x1x8x8xf32> to vector<8x8xf32>
    %c290 = arith.constant 290 : index
    %1574 = memref.load %arg2[%c290] : memref<432xf32, #tpu.memory_space<smem>>
    %1575 = vector.broadcast %1574 : f32 to vector<8x8xf32>
    %1576 = arith.mulf %1575, %1573 : vector<8x8xf32>
    %1577 = arith.addf %1559, %1576 : vector<8x8xf32>
    %c326 = arith.constant 326 : index
    %1578 = memref.load %arg2[%c326] : memref<432xf32, #tpu.memory_space<smem>>
    %1579 = vector.broadcast %1578 : f32 to vector<8x8xf32>
    %1580 = arith.mulf %1579, %1573 : vector<8x8xf32>
    %1581 = arith.addf %1563, %1580 : vector<8x8xf32>
    %c362 = arith.constant 362 : index
    %1582 = memref.load %arg2[%c362] : memref<432xf32, #tpu.memory_space<smem>>
    %1583 = vector.broadcast %1582 : f32 to vector<8x8xf32>
    %1584 = arith.mulf %1583, %1573 : vector<8x8xf32>
    %1585 = arith.addf %1567, %1584 : vector<8x8xf32>
    %c398 = arith.constant 398 : index
    %1586 = memref.load %arg2[%c398] : memref<432xf32, #tpu.memory_space<smem>>
    %1587 = vector.broadcast %1586 : f32 to vector<8x8xf32>
    %1588 = arith.mulf %1587, %1573 : vector<8x8xf32>
    %1589 = arith.addf %1571, %1588 : vector<8x8xf32>
    %c0_387 = arith.constant 0 : index
    %c1_388 = arith.constant 1 : index
    %c0_389 = arith.constant 0 : index
    %c1_390 = arith.constant 1 : index
    %1590 = vector.load %arg3[%c0_387, %c1_388, %c0_389, %c1_390] : memref<1x4x8x9xf32, #tpu.memory_space<vmem>>, vector<1x1x8x8xf32>
    %1591 = vector.shape_cast %1590 : vector<1x1x8x8xf32> to vector<8x8xf32>
    %c299 = arith.constant 299 : index
    %1592 = memref.load %arg2[%c299] : memref<432xf32, #tpu.memory_space<smem>>
    %1593 = vector.broadcast %1592 : f32 to vector<8x8xf32>
    %1594 = arith.mulf %1593, %1591 : vector<8x8xf32>
    %1595 = arith.addf %1577, %1594 : vector<8x8xf32>
    %c335 = arith.constant 335 : index
    %1596 = memref.load %arg2[%c335] : memref<432xf32, #tpu.memory_space<smem>>
    %1597 = vector.broadcast %1596 : f32 to vector<8x8xf32>
    %1598 = arith.mulf %1597, %1591 : vector<8x8xf32>
    %1599 = arith.addf %1581, %1598 : vector<8x8xf32>
    %c371 = arith.constant 371 : index
    %1600 = memref.load %arg2[%c371] : memref<432xf32, #tpu.memory_space<smem>>
    %1601 = vector.broadcast %1600 : f32 to vector<8x8xf32>
    %1602 = arith.mulf %1601, %1591 : vector<8x8xf32>
    %1603 = arith.addf %1585, %1602 : vector<8x8xf32>
    %c407 = arith.constant 407 : index
    %1604 = memref.load %arg2[%c407] : memref<432xf32, #tpu.memory_space<smem>>
    %1605 = vector.broadcast %1604 : f32 to vector<8x8xf32>
    %1606 = arith.mulf %1605, %1591 : vector<8x8xf32>
    %1607 = arith.addf %1589, %1606 : vector<8x8xf32>
    %c0_391 = arith.constant 0 : index
    %c2_392 = arith.constant 2 : index
    %c0_393 = arith.constant 0 : index
    %c1_394 = arith.constant 1 : index
    %1608 = vector.load %arg3[%c0_391, %c2_392, %c0_393, %c1_394] : memref<1x4x8x9xf32, #tpu.memory_space<vmem>>, vector<1x1x8x8xf32>
    %1609 = vector.shape_cast %1608 : vector<1x1x8x8xf32> to vector<8x8xf32>
    %c308 = arith.constant 308 : index
    %1610 = memref.load %arg2[%c308] : memref<432xf32, #tpu.memory_space<smem>>
    %1611 = vector.broadcast %1610 : f32 to vector<8x8xf32>
    %1612 = arith.mulf %1611, %1609 : vector<8x8xf32>
    %1613 = arith.addf %1595, %1612 : vector<8x8xf32>
    %c344 = arith.constant 344 : index
    %1614 = memref.load %arg2[%c344] : memref<432xf32, #tpu.memory_space<smem>>
    %1615 = vector.broadcast %1614 : f32 to vector<8x8xf32>
    %1616 = arith.mulf %1615, %1609 : vector<8x8xf32>
    %1617 = arith.addf %1599, %1616 : vector<8x8xf32>
    %c380 = arith.constant 380 : index
    %1618 = memref.load %arg2[%c380] : memref<432xf32, #tpu.memory_space<smem>>
    %1619 = vector.broadcast %1618 : f32 to vector<8x8xf32>
    %1620 = arith.mulf %1619, %1609 : vector<8x8xf32>
    %1621 = arith.addf %1603, %1620 : vector<8x8xf32>
    %c416 = arith.constant 416 : index
    %1622 = memref.load %arg2[%c416] : memref<432xf32, #tpu.memory_space<smem>>
    %1623 = vector.broadcast %1622 : f32 to vector<8x8xf32>
    %1624 = arith.mulf %1623, %1609 : vector<8x8xf32>
    %1625 = arith.addf %1607, %1624 : vector<8x8xf32>
    %c0_395 = arith.constant 0 : index
    %c3_396 = arith.constant 3 : index
    %c0_397 = arith.constant 0 : index
    %c1_398 = arith.constant 1 : index
    %1626 = vector.load %arg3[%c0_395, %c3_396, %c0_397, %c1_398] : memref<1x4x8x9xf32, #tpu.memory_space<vmem>>, vector<1x1x8x8xf32>
    %1627 = vector.shape_cast %1626 : vector<1x1x8x8xf32> to vector<8x8xf32>
    %c317 = arith.constant 317 : index
    %1628 = memref.load %arg2[%c317] : memref<432xf32, #tpu.memory_space<smem>>
    %1629 = vector.broadcast %1628 : f32 to vector<8x8xf32>
    %1630 = arith.mulf %1629, %1627 : vector<8x8xf32>
    %1631 = arith.addf %1613, %1630 : vector<8x8xf32>
    %c353 = arith.constant 353 : index
    %1632 = memref.load %arg2[%c353] : memref<432xf32, #tpu.memory_space<smem>>
    %1633 = vector.broadcast %1632 : f32 to vector<8x8xf32>
    %1634 = arith.mulf %1633, %1627 : vector<8x8xf32>
    %1635 = arith.addf %1617, %1634 : vector<8x8xf32>
    %c389 = arith.constant 389 : index
    %1636 = memref.load %arg2[%c389] : memref<432xf32, #tpu.memory_space<smem>>
    %1637 = vector.broadcast %1636 : f32 to vector<8x8xf32>
    %1638 = arith.mulf %1637, %1627 : vector<8x8xf32>
    %1639 = arith.addf %1621, %1638 : vector<8x8xf32>
    %c425 = arith.constant 425 : index
    %1640 = memref.load %arg2[%c425] : memref<432xf32, #tpu.memory_space<smem>>
    %1641 = vector.broadcast %1640 : f32 to vector<8x8xf32>
    %1642 = arith.mulf %1641, %1627 : vector<8x8xf32>
    %1643 = arith.addf %1625, %1642 : vector<8x8xf32>
    %c0_399 = arith.constant 0 : index
    %c0_400 = arith.constant 0 : index
    %c0_401 = arith.constant 0 : index
    %c0_402 = arith.constant 0 : index
    %1644 = vector.load %arg5[%c0_399, %c0_400, %c0_401, %c0_402] : memref<1x4x8x9xf32, #tpu.memory_space<vmem>>, vector<1x1x8x8xf32>
    %1645 = vector.shape_cast %1644 : vector<1x1x8x8xf32> to vector<8x8xf32>
    %c291 = arith.constant 291 : index
    %1646 = memref.load %arg2[%c291] : memref<432xf32, #tpu.memory_space<smem>>
    %1647 = vector.broadcast %1646 : f32 to vector<8x8xf32>
    %1648 = arith.mulf %1647, %1645 : vector<8x8xf32>
    %1649 = arith.addf %1631, %1648 : vector<8x8xf32>
    %c327 = arith.constant 327 : index
    %1650 = memref.load %arg2[%c327] : memref<432xf32, #tpu.memory_space<smem>>
    %1651 = vector.broadcast %1650 : f32 to vector<8x8xf32>
    %1652 = arith.mulf %1651, %1645 : vector<8x8xf32>
    %1653 = arith.addf %1635, %1652 : vector<8x8xf32>
    %c363 = arith.constant 363 : index
    %1654 = memref.load %arg2[%c363] : memref<432xf32, #tpu.memory_space<smem>>
    %1655 = vector.broadcast %1654 : f32 to vector<8x8xf32>
    %1656 = arith.mulf %1655, %1645 : vector<8x8xf32>
    %1657 = arith.addf %1639, %1656 : vector<8x8xf32>
    %c399 = arith.constant 399 : index
    %1658 = memref.load %arg2[%c399] : memref<432xf32, #tpu.memory_space<smem>>
    %1659 = vector.broadcast %1658 : f32 to vector<8x8xf32>
    %1660 = arith.mulf %1659, %1645 : vector<8x8xf32>
    %1661 = arith.addf %1643, %1660 : vector<8x8xf32>
    %c0_403 = arith.constant 0 : index
    %c1_404 = arith.constant 1 : index
    %c0_405 = arith.constant 0 : index
    %c0_406 = arith.constant 0 : index
    %1662 = vector.load %arg5[%c0_403, %c1_404, %c0_405, %c0_406] : memref<1x4x8x9xf32, #tpu.memory_space<vmem>>, vector<1x1x8x8xf32>
    %1663 = vector.shape_cast %1662 : vector<1x1x8x8xf32> to vector<8x8xf32>
    %c300 = arith.constant 300 : index
    %1664 = memref.load %arg2[%c300] : memref<432xf32, #tpu.memory_space<smem>>
    %1665 = vector.broadcast %1664 : f32 to vector<8x8xf32>
    %1666 = arith.mulf %1665, %1663 : vector<8x8xf32>
    %1667 = arith.addf %1649, %1666 : vector<8x8xf32>
    %c336 = arith.constant 336 : index
    %1668 = memref.load %arg2[%c336] : memref<432xf32, #tpu.memory_space<smem>>
    %1669 = vector.broadcast %1668 : f32 to vector<8x8xf32>
    %1670 = arith.mulf %1669, %1663 : vector<8x8xf32>
    %1671 = arith.addf %1653, %1670 : vector<8x8xf32>
    %c372 = arith.constant 372 : index
    %1672 = memref.load %arg2[%c372] : memref<432xf32, #tpu.memory_space<smem>>
    %1673 = vector.broadcast %1672 : f32 to vector<8x8xf32>
    %1674 = arith.mulf %1673, %1663 : vector<8x8xf32>
    %1675 = arith.addf %1657, %1674 : vector<8x8xf32>
    %c408 = arith.constant 408 : index
    %1676 = memref.load %arg2[%c408] : memref<432xf32, #tpu.memory_space<smem>>
    %1677 = vector.broadcast %1676 : f32 to vector<8x8xf32>
    %1678 = arith.mulf %1677, %1663 : vector<8x8xf32>
    %1679 = arith.addf %1661, %1678 : vector<8x8xf32>
    %c0_407 = arith.constant 0 : index
    %c2_408 = arith.constant 2 : index
    %c0_409 = arith.constant 0 : index
    %c0_410 = arith.constant 0 : index
    %1680 = vector.load %arg5[%c0_407, %c2_408, %c0_409, %c0_410] : memref<1x4x8x9xf32, #tpu.memory_space<vmem>>, vector<1x1x8x8xf32>
    %1681 = vector.shape_cast %1680 : vector<1x1x8x8xf32> to vector<8x8xf32>
    %c309 = arith.constant 309 : index
    %1682 = memref.load %arg2[%c309] : memref<432xf32, #tpu.memory_space<smem>>
    %1683 = vector.broadcast %1682 : f32 to vector<8x8xf32>
    %1684 = arith.mulf %1683, %1681 : vector<8x8xf32>
    %1685 = arith.addf %1667, %1684 : vector<8x8xf32>
    %c345 = arith.constant 345 : index
    %1686 = memref.load %arg2[%c345] : memref<432xf32, #tpu.memory_space<smem>>
    %1687 = vector.broadcast %1686 : f32 to vector<8x8xf32>
    %1688 = arith.mulf %1687, %1681 : vector<8x8xf32>
    %1689 = arith.addf %1671, %1688 : vector<8x8xf32>
    %c381 = arith.constant 381 : index
    %1690 = memref.load %arg2[%c381] : memref<432xf32, #tpu.memory_space<smem>>
    %1691 = vector.broadcast %1690 : f32 to vector<8x8xf32>
    %1692 = arith.mulf %1691, %1681 : vector<8x8xf32>
    %1693 = arith.addf %1675, %1692 : vector<8x8xf32>
    %c417 = arith.constant 417 : index
    %1694 = memref.load %arg2[%c417] : memref<432xf32, #tpu.memory_space<smem>>
    %1695 = vector.broadcast %1694 : f32 to vector<8x8xf32>
    %1696 = arith.mulf %1695, %1681 : vector<8x8xf32>
    %1697 = arith.addf %1679, %1696 : vector<8x8xf32>
    %c0_411 = arith.constant 0 : index
    %c3_412 = arith.constant 3 : index
    %c0_413 = arith.constant 0 : index
    %c0_414 = arith.constant 0 : index
    %1698 = vector.load %arg5[%c0_411, %c3_412, %c0_413, %c0_414] : memref<1x4x8x9xf32, #tpu.memory_space<vmem>>, vector<1x1x8x8xf32>
    %1699 = vector.shape_cast %1698 : vector<1x1x8x8xf32> to vector<8x8xf32>
    %c318 = arith.constant 318 : index
    %1700 = memref.load %arg2[%c318] : memref<432xf32, #tpu.memory_space<smem>>
    %1701 = vector.broadcast %1700 : f32 to vector<8x8xf32>
    %1702 = arith.mulf %1701, %1699 : vector<8x8xf32>
    %1703 = arith.addf %1685, %1702 : vector<8x8xf32>
    %c354 = arith.constant 354 : index
    %1704 = memref.load %arg2[%c354] : memref<432xf32, #tpu.memory_space<smem>>
    %1705 = vector.broadcast %1704 : f32 to vector<8x8xf32>
    %1706 = arith.mulf %1705, %1699 : vector<8x8xf32>
    %1707 = arith.addf %1689, %1706 : vector<8x8xf32>
    %c390 = arith.constant 390 : index
    %1708 = memref.load %arg2[%c390] : memref<432xf32, #tpu.memory_space<smem>>
    %1709 = vector.broadcast %1708 : f32 to vector<8x8xf32>
    %1710 = arith.mulf %1709, %1699 : vector<8x8xf32>
    %1711 = arith.addf %1693, %1710 : vector<8x8xf32>
    %c426 = arith.constant 426 : index
    %1712 = memref.load %arg2[%c426] : memref<432xf32, #tpu.memory_space<smem>>
    %1713 = vector.broadcast %1712 : f32 to vector<8x8xf32>
    %1714 = arith.mulf %1713, %1699 : vector<8x8xf32>
    %1715 = arith.addf %1697, %1714 : vector<8x8xf32>
    %c0_415 = arith.constant 0 : index
    %c0_416 = arith.constant 0 : index
    %c0_417 = arith.constant 0 : index
    %c0_418 = arith.constant 0 : index
    %1716 = vector.load %arg6[%c0_415, %c0_416, %c0_417, %c0_418] : memref<1x4x8x8xf32, #tpu.memory_space<vmem>>, vector<1x1x8x8xf32>
    %1717 = vector.shape_cast %1716 : vector<1x1x8x8xf32> to vector<8x8xf32>
    %c292 = arith.constant 292 : index
    %1718 = memref.load %arg2[%c292] : memref<432xf32, #tpu.memory_space<smem>>
    %1719 = vector.broadcast %1718 : f32 to vector<8x8xf32>
    %1720 = arith.mulf %1719, %1717 : vector<8x8xf32>
    %1721 = arith.addf %1703, %1720 : vector<8x8xf32>
    %c328 = arith.constant 328 : index
    %1722 = memref.load %arg2[%c328] : memref<432xf32, #tpu.memory_space<smem>>
    %1723 = vector.broadcast %1722 : f32 to vector<8x8xf32>
    %1724 = arith.mulf %1723, %1717 : vector<8x8xf32>
    %1725 = arith.addf %1707, %1724 : vector<8x8xf32>
    %c364 = arith.constant 364 : index
    %1726 = memref.load %arg2[%c364] : memref<432xf32, #tpu.memory_space<smem>>
    %1727 = vector.broadcast %1726 : f32 to vector<8x8xf32>
    %1728 = arith.mulf %1727, %1717 : vector<8x8xf32>
    %1729 = arith.addf %1711, %1728 : vector<8x8xf32>
    %c400 = arith.constant 400 : index
    %1730 = memref.load %arg2[%c400] : memref<432xf32, #tpu.memory_space<smem>>
    %1731 = vector.broadcast %1730 : f32 to vector<8x8xf32>
    %1732 = arith.mulf %1731, %1717 : vector<8x8xf32>
    %1733 = arith.addf %1715, %1732 : vector<8x8xf32>
    %c0_419 = arith.constant 0 : index
    %c1_420 = arith.constant 1 : index
    %c0_421 = arith.constant 0 : index
    %c0_422 = arith.constant 0 : index
    %1734 = vector.load %arg6[%c0_419, %c1_420, %c0_421, %c0_422] : memref<1x4x8x8xf32, #tpu.memory_space<vmem>>, vector<1x1x8x8xf32>
    %1735 = vector.shape_cast %1734 : vector<1x1x8x8xf32> to vector<8x8xf32>
    %c301 = arith.constant 301 : index
    %1736 = memref.load %arg2[%c301] : memref<432xf32, #tpu.memory_space<smem>>
    %1737 = vector.broadcast %1736 : f32 to vector<8x8xf32>
    %1738 = arith.mulf %1737, %1735 : vector<8x8xf32>
    %1739 = arith.addf %1721, %1738 : vector<8x8xf32>
    %c337 = arith.constant 337 : index
    %1740 = memref.load %arg2[%c337] : memref<432xf32, #tpu.memory_space<smem>>
    %1741 = vector.broadcast %1740 : f32 to vector<8x8xf32>
    %1742 = arith.mulf %1741, %1735 : vector<8x8xf32>
    %1743 = arith.addf %1725, %1742 : vector<8x8xf32>
    %c373 = arith.constant 373 : index
    %1744 = memref.load %arg2[%c373] : memref<432xf32, #tpu.memory_space<smem>>
    %1745 = vector.broadcast %1744 : f32 to vector<8x8xf32>
    %1746 = arith.mulf %1745, %1735 : vector<8x8xf32>
    %1747 = arith.addf %1729, %1746 : vector<8x8xf32>
    %c409 = arith.constant 409 : index
    %1748 = memref.load %arg2[%c409] : memref<432xf32, #tpu.memory_space<smem>>
    %1749 = vector.broadcast %1748 : f32 to vector<8x8xf32>
    %1750 = arith.mulf %1749, %1735 : vector<8x8xf32>
    %1751 = arith.addf %1733, %1750 : vector<8x8xf32>
    %c0_423 = arith.constant 0 : index
    %c2_424 = arith.constant 2 : index
    %c0_425 = arith.constant 0 : index
    %c0_426 = arith.constant 0 : index
    %1752 = vector.load %arg6[%c0_423, %c2_424, %c0_425, %c0_426] : memref<1x4x8x8xf32, #tpu.memory_space<vmem>>, vector<1x1x8x8xf32>
    %1753 = vector.shape_cast %1752 : vector<1x1x8x8xf32> to vector<8x8xf32>
    %c310 = arith.constant 310 : index
    %1754 = memref.load %arg2[%c310] : memref<432xf32, #tpu.memory_space<smem>>
    %1755 = vector.broadcast %1754 : f32 to vector<8x8xf32>
    %1756 = arith.mulf %1755, %1753 : vector<8x8xf32>
    %1757 = arith.addf %1739, %1756 : vector<8x8xf32>
    %c346 = arith.constant 346 : index
    %1758 = memref.load %arg2[%c346] : memref<432xf32, #tpu.memory_space<smem>>
    %1759 = vector.broadcast %1758 : f32 to vector<8x8xf32>
    %1760 = arith.mulf %1759, %1753 : vector<8x8xf32>
    %1761 = arith.addf %1743, %1760 : vector<8x8xf32>
    %c382 = arith.constant 382 : index
    %1762 = memref.load %arg2[%c382] : memref<432xf32, #tpu.memory_space<smem>>
    %1763 = vector.broadcast %1762 : f32 to vector<8x8xf32>
    %1764 = arith.mulf %1763, %1753 : vector<8x8xf32>
    %1765 = arith.addf %1747, %1764 : vector<8x8xf32>
    %c418 = arith.constant 418 : index
    %1766 = memref.load %arg2[%c418] : memref<432xf32, #tpu.memory_space<smem>>
    %1767 = vector.broadcast %1766 : f32 to vector<8x8xf32>
    %1768 = arith.mulf %1767, %1753 : vector<8x8xf32>
    %1769 = arith.addf %1751, %1768 : vector<8x8xf32>
    %c0_427 = arith.constant 0 : index
    %c3_428 = arith.constant 3 : index
    %c0_429 = arith.constant 0 : index
    %c0_430 = arith.constant 0 : index
    %1770 = vector.load %arg6[%c0_427, %c3_428, %c0_429, %c0_430] : memref<1x4x8x8xf32, #tpu.memory_space<vmem>>, vector<1x1x8x8xf32>
    %1771 = vector.shape_cast %1770 : vector<1x1x8x8xf32> to vector<8x8xf32>
    %c319 = arith.constant 319 : index
    %1772 = memref.load %arg2[%c319] : memref<432xf32, #tpu.memory_space<smem>>
    %1773 = vector.broadcast %1772 : f32 to vector<8x8xf32>
    %1774 = arith.mulf %1773, %1771 : vector<8x8xf32>
    %1775 = arith.addf %1757, %1774 : vector<8x8xf32>
    %c355 = arith.constant 355 : index
    %1776 = memref.load %arg2[%c355] : memref<432xf32, #tpu.memory_space<smem>>
    %1777 = vector.broadcast %1776 : f32 to vector<8x8xf32>
    %1778 = arith.mulf %1777, %1771 : vector<8x8xf32>
    %1779 = arith.addf %1761, %1778 : vector<8x8xf32>
    %c391 = arith.constant 391 : index
    %1780 = memref.load %arg2[%c391] : memref<432xf32, #tpu.memory_space<smem>>
    %1781 = vector.broadcast %1780 : f32 to vector<8x8xf32>
    %1782 = arith.mulf %1781, %1771 : vector<8x8xf32>
    %1783 = arith.addf %1765, %1782 : vector<8x8xf32>
    %c427 = arith.constant 427 : index
    %1784 = memref.load %arg2[%c427] : memref<432xf32, #tpu.memory_space<smem>>
    %1785 = vector.broadcast %1784 : f32 to vector<8x8xf32>
    %1786 = arith.mulf %1785, %1771 : vector<8x8xf32>
    %1787 = arith.addf %1769, %1786 : vector<8x8xf32>
    %c0_431 = arith.constant 0 : index
    %c0_432 = arith.constant 0 : index
    %c0_433 = arith.constant 0 : index
    %c1_434 = arith.constant 1 : index
    %1788 = vector.load %arg5[%c0_431, %c0_432, %c0_433, %c1_434] : memref<1x4x8x9xf32, #tpu.memory_space<vmem>>, vector<1x1x8x8xf32>
    %1789 = vector.shape_cast %1788 : vector<1x1x8x8xf32> to vector<8x8xf32>
    %c293 = arith.constant 293 : index
    %1790 = memref.load %arg2[%c293] : memref<432xf32, #tpu.memory_space<smem>>
    %1791 = vector.broadcast %1790 : f32 to vector<8x8xf32>
    %1792 = arith.mulf %1791, %1789 : vector<8x8xf32>
    %1793 = arith.addf %1775, %1792 : vector<8x8xf32>
    %c329 = arith.constant 329 : index
    %1794 = memref.load %arg2[%c329] : memref<432xf32, #tpu.memory_space<smem>>
    %1795 = vector.broadcast %1794 : f32 to vector<8x8xf32>
    %1796 = arith.mulf %1795, %1789 : vector<8x8xf32>
    %1797 = arith.addf %1779, %1796 : vector<8x8xf32>
    %c365 = arith.constant 365 : index
    %1798 = memref.load %arg2[%c365] : memref<432xf32, #tpu.memory_space<smem>>
    %1799 = vector.broadcast %1798 : f32 to vector<8x8xf32>
    %1800 = arith.mulf %1799, %1789 : vector<8x8xf32>
    %1801 = arith.addf %1783, %1800 : vector<8x8xf32>
    %c401 = arith.constant 401 : index
    %1802 = memref.load %arg2[%c401] : memref<432xf32, #tpu.memory_space<smem>>
    %1803 = vector.broadcast %1802 : f32 to vector<8x8xf32>
    %1804 = arith.mulf %1803, %1789 : vector<8x8xf32>
    %1805 = arith.addf %1787, %1804 : vector<8x8xf32>
    %c0_435 = arith.constant 0 : index
    %c1_436 = arith.constant 1 : index
    %c0_437 = arith.constant 0 : index
    %c1_438 = arith.constant 1 : index
    %1806 = vector.load %arg5[%c0_435, %c1_436, %c0_437, %c1_438] : memref<1x4x8x9xf32, #tpu.memory_space<vmem>>, vector<1x1x8x8xf32>
    %1807 = vector.shape_cast %1806 : vector<1x1x8x8xf32> to vector<8x8xf32>
    %c302 = arith.constant 302 : index
    %1808 = memref.load %arg2[%c302] : memref<432xf32, #tpu.memory_space<smem>>
    %1809 = vector.broadcast %1808 : f32 to vector<8x8xf32>
    %1810 = arith.mulf %1809, %1807 : vector<8x8xf32>
    %1811 = arith.addf %1793, %1810 : vector<8x8xf32>
    %c338 = arith.constant 338 : index
    %1812 = memref.load %arg2[%c338] : memref<432xf32, #tpu.memory_space<smem>>
    %1813 = vector.broadcast %1812 : f32 to vector<8x8xf32>
    %1814 = arith.mulf %1813, %1807 : vector<8x8xf32>
    %1815 = arith.addf %1797, %1814 : vector<8x8xf32>
    %c374 = arith.constant 374 : index
    %1816 = memref.load %arg2[%c374] : memref<432xf32, #tpu.memory_space<smem>>
    %1817 = vector.broadcast %1816 : f32 to vector<8x8xf32>
    %1818 = arith.mulf %1817, %1807 : vector<8x8xf32>
    %1819 = arith.addf %1801, %1818 : vector<8x8xf32>
    %c410 = arith.constant 410 : index
    %1820 = memref.load %arg2[%c410] : memref<432xf32, #tpu.memory_space<smem>>
    %1821 = vector.broadcast %1820 : f32 to vector<8x8xf32>
    %1822 = arith.mulf %1821, %1807 : vector<8x8xf32>
    %1823 = arith.addf %1805, %1822 : vector<8x8xf32>
    %c0_439 = arith.constant 0 : index
    %c2_440 = arith.constant 2 : index
    %c0_441 = arith.constant 0 : index
    %c1_442 = arith.constant 1 : index
    %1824 = vector.load %arg5[%c0_439, %c2_440, %c0_441, %c1_442] : memref<1x4x8x9xf32, #tpu.memory_space<vmem>>, vector<1x1x8x8xf32>
    %1825 = vector.shape_cast %1824 : vector<1x1x8x8xf32> to vector<8x8xf32>
    %c311 = arith.constant 311 : index
    %1826 = memref.load %arg2[%c311] : memref<432xf32, #tpu.memory_space<smem>>
    %1827 = vector.broadcast %1826 : f32 to vector<8x8xf32>
    %1828 = arith.mulf %1827, %1825 : vector<8x8xf32>
    %1829 = arith.addf %1811, %1828 : vector<8x8xf32>
    %c347 = arith.constant 347 : index
    %1830 = memref.load %arg2[%c347] : memref<432xf32, #tpu.memory_space<smem>>
    %1831 = vector.broadcast %1830 : f32 to vector<8x8xf32>
    %1832 = arith.mulf %1831, %1825 : vector<8x8xf32>
    %1833 = arith.addf %1815, %1832 : vector<8x8xf32>
    %c383 = arith.constant 383 : index
    %1834 = memref.load %arg2[%c383] : memref<432xf32, #tpu.memory_space<smem>>
    %1835 = vector.broadcast %1834 : f32 to vector<8x8xf32>
    %1836 = arith.mulf %1835, %1825 : vector<8x8xf32>
    %1837 = arith.addf %1819, %1836 : vector<8x8xf32>
    %c419 = arith.constant 419 : index
    %1838 = memref.load %arg2[%c419] : memref<432xf32, #tpu.memory_space<smem>>
    %1839 = vector.broadcast %1838 : f32 to vector<8x8xf32>
    %1840 = arith.mulf %1839, %1825 : vector<8x8xf32>
    %1841 = arith.addf %1823, %1840 : vector<8x8xf32>
    %c0_443 = arith.constant 0 : index
    %c3_444 = arith.constant 3 : index
    %c0_445 = arith.constant 0 : index
    %c1_446 = arith.constant 1 : index
    %1842 = vector.load %arg5[%c0_443, %c3_444, %c0_445, %c1_446] : memref<1x4x8x9xf32, #tpu.memory_space<vmem>>, vector<1x1x8x8xf32>
    %1843 = vector.shape_cast %1842 : vector<1x1x8x8xf32> to vector<8x8xf32>
    %c320 = arith.constant 320 : index
    %1844 = memref.load %arg2[%c320] : memref<432xf32, #tpu.memory_space<smem>>
    %1845 = vector.broadcast %1844 : f32 to vector<8x8xf32>
    %1846 = arith.mulf %1845, %1843 : vector<8x8xf32>
    %1847 = arith.addf %1829, %1846 : vector<8x8xf32>
    %c356 = arith.constant 356 : index
    %1848 = memref.load %arg2[%c356] : memref<432xf32, #tpu.memory_space<smem>>
    %1849 = vector.broadcast %1848 : f32 to vector<8x8xf32>
    %1850 = arith.mulf %1849, %1843 : vector<8x8xf32>
    %1851 = arith.addf %1833, %1850 : vector<8x8xf32>
    %c392 = arith.constant 392 : index
    %1852 = memref.load %arg2[%c392] : memref<432xf32, #tpu.memory_space<smem>>
    %1853 = vector.broadcast %1852 : f32 to vector<8x8xf32>
    %1854 = arith.mulf %1853, %1843 : vector<8x8xf32>
    %1855 = arith.addf %1837, %1854 : vector<8x8xf32>
    %c428 = arith.constant 428 : index
    %1856 = memref.load %arg2[%c428] : memref<432xf32, #tpu.memory_space<smem>>
    %1857 = vector.broadcast %1856 : f32 to vector<8x8xf32>
    %1858 = arith.mulf %1857, %1843 : vector<8x8xf32>
    %1859 = arith.addf %1841, %1858 : vector<8x8xf32>
    %c0_447 = arith.constant 0 : index
    %c0_448 = arith.constant 0 : index
    %c0_449 = arith.constant 0 : index
    %1860 = vector.load %arg11[%c0_447, %c0_448, %c0_449] : memref<4x8x9xf32, #tpu.memory_space<vmem>>, vector<1x8x8xf32>
    %1861 = vector.shape_cast %1860 : vector<1x8x8xf32> to vector<8x8xf32>
    %c294 = arith.constant 294 : index
    %1862 = memref.load %arg2[%c294] : memref<432xf32, #tpu.memory_space<smem>>
    %1863 = vector.broadcast %1862 : f32 to vector<8x8xf32>
    %1864 = arith.mulf %1863, %1861 : vector<8x8xf32>
    %1865 = arith.addf %1847, %1864 : vector<8x8xf32>
    %c330 = arith.constant 330 : index
    %1866 = memref.load %arg2[%c330] : memref<432xf32, #tpu.memory_space<smem>>
    %1867 = vector.broadcast %1866 : f32 to vector<8x8xf32>
    %1868 = arith.mulf %1867, %1861 : vector<8x8xf32>
    %1869 = arith.addf %1851, %1868 : vector<8x8xf32>
    %c366 = arith.constant 366 : index
    %1870 = memref.load %arg2[%c366] : memref<432xf32, #tpu.memory_space<smem>>
    %1871 = vector.broadcast %1870 : f32 to vector<8x8xf32>
    %1872 = arith.mulf %1871, %1861 : vector<8x8xf32>
    %1873 = arith.addf %1855, %1872 : vector<8x8xf32>
    %c402 = arith.constant 402 : index
    %1874 = memref.load %arg2[%c402] : memref<432xf32, #tpu.memory_space<smem>>
    %1875 = vector.broadcast %1874 : f32 to vector<8x8xf32>
    %1876 = arith.mulf %1875, %1861 : vector<8x8xf32>
    %1877 = arith.addf %1859, %1876 : vector<8x8xf32>
    %c1_450 = arith.constant 1 : index
    %c0_451 = arith.constant 0 : index
    %c0_452 = arith.constant 0 : index
    %1878 = vector.load %arg11[%c1_450, %c0_451, %c0_452] : memref<4x8x9xf32, #tpu.memory_space<vmem>>, vector<1x8x8xf32>
    %1879 = vector.shape_cast %1878 : vector<1x8x8xf32> to vector<8x8xf32>
    %c303 = arith.constant 303 : index
    %1880 = memref.load %arg2[%c303] : memref<432xf32, #tpu.memory_space<smem>>
    %1881 = vector.broadcast %1880 : f32 to vector<8x8xf32>
    %1882 = arith.mulf %1881, %1879 : vector<8x8xf32>
    %1883 = arith.addf %1865, %1882 : vector<8x8xf32>
    %c339 = arith.constant 339 : index
    %1884 = memref.load %arg2[%c339] : memref<432xf32, #tpu.memory_space<smem>>
    %1885 = vector.broadcast %1884 : f32 to vector<8x8xf32>
    %1886 = arith.mulf %1885, %1879 : vector<8x8xf32>
    %1887 = arith.addf %1869, %1886 : vector<8x8xf32>
    %c375 = arith.constant 375 : index
    %1888 = memref.load %arg2[%c375] : memref<432xf32, #tpu.memory_space<smem>>
    %1889 = vector.broadcast %1888 : f32 to vector<8x8xf32>
    %1890 = arith.mulf %1889, %1879 : vector<8x8xf32>
    %1891 = arith.addf %1873, %1890 : vector<8x8xf32>
    %c411 = arith.constant 411 : index
    %1892 = memref.load %arg2[%c411] : memref<432xf32, #tpu.memory_space<smem>>
    %1893 = vector.broadcast %1892 : f32 to vector<8x8xf32>
    %1894 = arith.mulf %1893, %1879 : vector<8x8xf32>
    %1895 = arith.addf %1877, %1894 : vector<8x8xf32>
    %c2_453 = arith.constant 2 : index
    %c0_454 = arith.constant 0 : index
    %c0_455 = arith.constant 0 : index
    %1896 = vector.load %arg11[%c2_453, %c0_454, %c0_455] : memref<4x8x9xf32, #tpu.memory_space<vmem>>, vector<1x8x8xf32>
    %1897 = vector.shape_cast %1896 : vector<1x8x8xf32> to vector<8x8xf32>
    %c312 = arith.constant 312 : index
    %1898 = memref.load %arg2[%c312] : memref<432xf32, #tpu.memory_space<smem>>
    %1899 = vector.broadcast %1898 : f32 to vector<8x8xf32>
    %1900 = arith.mulf %1899, %1897 : vector<8x8xf32>
    %1901 = arith.addf %1883, %1900 : vector<8x8xf32>
    %c348 = arith.constant 348 : index
    %1902 = memref.load %arg2[%c348] : memref<432xf32, #tpu.memory_space<smem>>
    %1903 = vector.broadcast %1902 : f32 to vector<8x8xf32>
    %1904 = arith.mulf %1903, %1897 : vector<8x8xf32>
    %1905 = arith.addf %1887, %1904 : vector<8x8xf32>
    %c384 = arith.constant 384 : index
    %1906 = memref.load %arg2[%c384] : memref<432xf32, #tpu.memory_space<smem>>
    %1907 = vector.broadcast %1906 : f32 to vector<8x8xf32>
    %1908 = arith.mulf %1907, %1897 : vector<8x8xf32>
    %1909 = arith.addf %1891, %1908 : vector<8x8xf32>
    %c420 = arith.constant 420 : index
    %1910 = memref.load %arg2[%c420] : memref<432xf32, #tpu.memory_space<smem>>
    %1911 = vector.broadcast %1910 : f32 to vector<8x8xf32>
    %1912 = arith.mulf %1911, %1897 : vector<8x8xf32>
    %1913 = arith.addf %1895, %1912 : vector<8x8xf32>
    %c3_456 = arith.constant 3 : index
    %c0_457 = arith.constant 0 : index
    %c0_458 = arith.constant 0 : index
    %1914 = vector.load %arg11[%c3_456, %c0_457, %c0_458] : memref<4x8x9xf32, #tpu.memory_space<vmem>>, vector<1x8x8xf32>
    %1915 = vector.shape_cast %1914 : vector<1x8x8xf32> to vector<8x8xf32>
    %c321 = arith.constant 321 : index
    %1916 = memref.load %arg2[%c321] : memref<432xf32, #tpu.memory_space<smem>>
    %1917 = vector.broadcast %1916 : f32 to vector<8x8xf32>
    %1918 = arith.mulf %1917, %1915 : vector<8x8xf32>
    %1919 = arith.addf %1901, %1918 : vector<8x8xf32>
    %c357 = arith.constant 357 : index
    %1920 = memref.load %arg2[%c357] : memref<432xf32, #tpu.memory_space<smem>>
    %1921 = vector.broadcast %1920 : f32 to vector<8x8xf32>
    %1922 = arith.mulf %1921, %1915 : vector<8x8xf32>
    %1923 = arith.addf %1905, %1922 : vector<8x8xf32>
    %c393 = arith.constant 393 : index
    %1924 = memref.load %arg2[%c393] : memref<432xf32, #tpu.memory_space<smem>>
    %1925 = vector.broadcast %1924 : f32 to vector<8x8xf32>
    %1926 = arith.mulf %1925, %1915 : vector<8x8xf32>
    %1927 = arith.addf %1909, %1926 : vector<8x8xf32>
    %c429 = arith.constant 429 : index
    %1928 = memref.load %arg2[%c429] : memref<432xf32, #tpu.memory_space<smem>>
    %1929 = vector.broadcast %1928 : f32 to vector<8x8xf32>
    %1930 = arith.mulf %1929, %1915 : vector<8x8xf32>
    %1931 = arith.addf %1913, %1930 : vector<8x8xf32>
    %c0_459 = arith.constant 0 : index
    %c0_460 = arith.constant 0 : index
    %c0_461 = arith.constant 0 : index
    %1932 = vector.load %arg12[%c0_459, %c0_460, %c0_461] : memref<4x8x8xf32, #tpu.memory_space<vmem>>, vector<1x8x8xf32>
    %1933 = vector.shape_cast %1932 : vector<1x8x8xf32> to vector<8x8xf32>
    %c295 = arith.constant 295 : index
    %1934 = memref.load %arg2[%c295] : memref<432xf32, #tpu.memory_space<smem>>
    %1935 = vector.broadcast %1934 : f32 to vector<8x8xf32>
    %1936 = arith.mulf %1935, %1933 : vector<8x8xf32>
    %1937 = arith.addf %1919, %1936 : vector<8x8xf32>
    %c331 = arith.constant 331 : index
    %1938 = memref.load %arg2[%c331] : memref<432xf32, #tpu.memory_space<smem>>
    %1939 = vector.broadcast %1938 : f32 to vector<8x8xf32>
    %1940 = arith.mulf %1939, %1933 : vector<8x8xf32>
    %1941 = arith.addf %1923, %1940 : vector<8x8xf32>
    %c367 = arith.constant 367 : index
    %1942 = memref.load %arg2[%c367] : memref<432xf32, #tpu.memory_space<smem>>
    %1943 = vector.broadcast %1942 : f32 to vector<8x8xf32>
    %1944 = arith.mulf %1943, %1933 : vector<8x8xf32>
    %1945 = arith.addf %1927, %1944 : vector<8x8xf32>
    %c403 = arith.constant 403 : index
    %1946 = memref.load %arg2[%c403] : memref<432xf32, #tpu.memory_space<smem>>
    %1947 = vector.broadcast %1946 : f32 to vector<8x8xf32>
    %1948 = arith.mulf %1947, %1933 : vector<8x8xf32>
    %1949 = arith.addf %1931, %1948 : vector<8x8xf32>
    %c1_462 = arith.constant 1 : index
    %c0_463 = arith.constant 0 : index
    %c0_464 = arith.constant 0 : index
    %1950 = vector.load %arg12[%c1_462, %c0_463, %c0_464] : memref<4x8x8xf32, #tpu.memory_space<vmem>>, vector<1x8x8xf32>
    %1951 = vector.shape_cast %1950 : vector<1x8x8xf32> to vector<8x8xf32>
    %c304 = arith.constant 304 : index
    %1952 = memref.load %arg2[%c304] : memref<432xf32, #tpu.memory_space<smem>>
    %1953 = vector.broadcast %1952 : f32 to vector<8x8xf32>
    %1954 = arith.mulf %1953, %1951 : vector<8x8xf32>
    %1955 = arith.addf %1937, %1954 : vector<8x8xf32>
    %c340 = arith.constant 340 : index
    %1956 = memref.load %arg2[%c340] : memref<432xf32, #tpu.memory_space<smem>>
    %1957 = vector.broadcast %1956 : f32 to vector<8x8xf32>
    %1958 = arith.mulf %1957, %1951 : vector<8x8xf32>
    %1959 = arith.addf %1941, %1958 : vector<8x8xf32>
    %c376 = arith.constant 376 : index
    %1960 = memref.load %arg2[%c376] : memref<432xf32, #tpu.memory_space<smem>>
    %1961 = vector.broadcast %1960 : f32 to vector<8x8xf32>
    %1962 = arith.mulf %1961, %1951 : vector<8x8xf32>
    %1963 = arith.addf %1945, %1962 : vector<8x8xf32>
    %c412 = arith.constant 412 : index
    %1964 = memref.load %arg2[%c412] : memref<432xf32, #tpu.memory_space<smem>>
    %1965 = vector.broadcast %1964 : f32 to vector<8x8xf32>
    %1966 = arith.mulf %1965, %1951 : vector<8x8xf32>
    %1967 = arith.addf %1949, %1966 : vector<8x8xf32>
    %c2_465 = arith.constant 2 : index
    %c0_466 = arith.constant 0 : index
    %c0_467 = arith.constant 0 : index
    %1968 = vector.load %arg12[%c2_465, %c0_466, %c0_467] : memref<4x8x8xf32, #tpu.memory_space<vmem>>, vector<1x8x8xf32>
    %1969 = vector.shape_cast %1968 : vector<1x8x8xf32> to vector<8x8xf32>
    %c313 = arith.constant 313 : index
    %1970 = memref.load %arg2[%c313] : memref<432xf32, #tpu.memory_space<smem>>
    %1971 = vector.broadcast %1970 : f32 to vector<8x8xf32>
    %1972 = arith.mulf %1971, %1969 : vector<8x8xf32>
    %1973 = arith.addf %1955, %1972 : vector<8x8xf32>
    %c349 = arith.constant 349 : index
    %1974 = memref.load %arg2[%c349] : memref<432xf32, #tpu.memory_space<smem>>
    %1975 = vector.broadcast %1974 : f32 to vector<8x8xf32>
    %1976 = arith.mulf %1975, %1969 : vector<8x8xf32>
    %1977 = arith.addf %1959, %1976 : vector<8x8xf32>
    %c385 = arith.constant 385 : index
    %1978 = memref.load %arg2[%c385] : memref<432xf32, #tpu.memory_space<smem>>
    %1979 = vector.broadcast %1978 : f32 to vector<8x8xf32>
    %1980 = arith.mulf %1979, %1969 : vector<8x8xf32>
    %1981 = arith.addf %1963, %1980 : vector<8x8xf32>
    %c421 = arith.constant 421 : index
    %1982 = memref.load %arg2[%c421] : memref<432xf32, #tpu.memory_space<smem>>
    %1983 = vector.broadcast %1982 : f32 to vector<8x8xf32>
    %1984 = arith.mulf %1983, %1969 : vector<8x8xf32>
    %1985 = arith.addf %1967, %1984 : vector<8x8xf32>
    %c3_468 = arith.constant 3 : index
    %c0_469 = arith.constant 0 : index
    %c0_470 = arith.constant 0 : index
    %1986 = vector.load %arg12[%c3_468, %c0_469, %c0_470] : memref<4x8x8xf32, #tpu.memory_space<vmem>>, vector<1x8x8xf32>
    %1987 = vector.shape_cast %1986 : vector<1x8x8xf32> to vector<8x8xf32>
    %c322 = arith.constant 322 : index
    %1988 = memref.load %arg2[%c322] : memref<432xf32, #tpu.memory_space<smem>>
    %1989 = vector.broadcast %1988 : f32 to vector<8x8xf32>
    %1990 = arith.mulf %1989, %1987 : vector<8x8xf32>
    %1991 = arith.addf %1973, %1990 : vector<8x8xf32>
    %c358 = arith.constant 358 : index
    %1992 = memref.load %arg2[%c358] : memref<432xf32, #tpu.memory_space<smem>>
    %1993 = vector.broadcast %1992 : f32 to vector<8x8xf32>
    %1994 = arith.mulf %1993, %1987 : vector<8x8xf32>
    %1995 = arith.addf %1977, %1994 : vector<8x8xf32>
    %c394 = arith.constant 394 : index
    %1996 = memref.load %arg2[%c394] : memref<432xf32, #tpu.memory_space<smem>>
    %1997 = vector.broadcast %1996 : f32 to vector<8x8xf32>
    %1998 = arith.mulf %1997, %1987 : vector<8x8xf32>
    %1999 = arith.addf %1981, %1998 : vector<8x8xf32>
    %c430 = arith.constant 430 : index
    %2000 = memref.load %arg2[%c430] : memref<432xf32, #tpu.memory_space<smem>>
    %2001 = vector.broadcast %2000 : f32 to vector<8x8xf32>
    %2002 = arith.mulf %2001, %1987 : vector<8x8xf32>
    %2003 = arith.addf %1985, %2002 : vector<8x8xf32>
    %c0_471 = arith.constant 0 : index
    %c0_472 = arith.constant 0 : index
    %c1_473 = arith.constant 1 : index
    %2004 = vector.load %arg11[%c0_471, %c0_472, %c1_473] : memref<4x8x9xf32, #tpu.memory_space<vmem>>, vector<1x8x8xf32>
    %2005 = vector.shape_cast %2004 : vector<1x8x8xf32> to vector<8x8xf32>
    %c296 = arith.constant 296 : index
    %2006 = memref.load %arg2[%c296] : memref<432xf32, #tpu.memory_space<smem>>
    %2007 = vector.broadcast %2006 : f32 to vector<8x8xf32>
    %2008 = arith.mulf %2007, %2005 : vector<8x8xf32>
    %2009 = arith.addf %1991, %2008 : vector<8x8xf32>
    %c332 = arith.constant 332 : index
    %2010 = memref.load %arg2[%c332] : memref<432xf32, #tpu.memory_space<smem>>
    %2011 = vector.broadcast %2010 : f32 to vector<8x8xf32>
    %2012 = arith.mulf %2011, %2005 : vector<8x8xf32>
    %2013 = arith.addf %1995, %2012 : vector<8x8xf32>
    %c368 = arith.constant 368 : index
    %2014 = memref.load %arg2[%c368] : memref<432xf32, #tpu.memory_space<smem>>
    %2015 = vector.broadcast %2014 : f32 to vector<8x8xf32>
    %2016 = arith.mulf %2015, %2005 : vector<8x8xf32>
    %2017 = arith.addf %1999, %2016 : vector<8x8xf32>
    %c404 = arith.constant 404 : index
    %2018 = memref.load %arg2[%c404] : memref<432xf32, #tpu.memory_space<smem>>
    %2019 = vector.broadcast %2018 : f32 to vector<8x8xf32>
    %2020 = arith.mulf %2019, %2005 : vector<8x8xf32>
    %2021 = arith.addf %2003, %2020 : vector<8x8xf32>
    %c1_474 = arith.constant 1 : index
    %c0_475 = arith.constant 0 : index
    %c1_476 = arith.constant 1 : index
    %2022 = vector.load %arg11[%c1_474, %c0_475, %c1_476] : memref<4x8x9xf32, #tpu.memory_space<vmem>>, vector<1x8x8xf32>
    %2023 = vector.shape_cast %2022 : vector<1x8x8xf32> to vector<8x8xf32>
    %c305 = arith.constant 305 : index
    %2024 = memref.load %arg2[%c305] : memref<432xf32, #tpu.memory_space<smem>>
    %2025 = vector.broadcast %2024 : f32 to vector<8x8xf32>
    %2026 = arith.mulf %2025, %2023 : vector<8x8xf32>
    %2027 = arith.addf %2009, %2026 : vector<8x8xf32>
    %c341 = arith.constant 341 : index
    %2028 = memref.load %arg2[%c341] : memref<432xf32, #tpu.memory_space<smem>>
    %2029 = vector.broadcast %2028 : f32 to vector<8x8xf32>
    %2030 = arith.mulf %2029, %2023 : vector<8x8xf32>
    %2031 = arith.addf %2013, %2030 : vector<8x8xf32>
    %c377 = arith.constant 377 : index
    %2032 = memref.load %arg2[%c377] : memref<432xf32, #tpu.memory_space<smem>>
    %2033 = vector.broadcast %2032 : f32 to vector<8x8xf32>
    %2034 = arith.mulf %2033, %2023 : vector<8x8xf32>
    %2035 = arith.addf %2017, %2034 : vector<8x8xf32>
    %c413 = arith.constant 413 : index
    %2036 = memref.load %arg2[%c413] : memref<432xf32, #tpu.memory_space<smem>>
    %2037 = vector.broadcast %2036 : f32 to vector<8x8xf32>
    %2038 = arith.mulf %2037, %2023 : vector<8x8xf32>
    %2039 = arith.addf %2021, %2038 : vector<8x8xf32>
    %c2_477 = arith.constant 2 : index
    %c0_478 = arith.constant 0 : index
    %c1_479 = arith.constant 1 : index
    %2040 = vector.load %arg11[%c2_477, %c0_478, %c1_479] : memref<4x8x9xf32, #tpu.memory_space<vmem>>, vector<1x8x8xf32>
    %2041 = vector.shape_cast %2040 : vector<1x8x8xf32> to vector<8x8xf32>
    %c314 = arith.constant 314 : index
    %2042 = memref.load %arg2[%c314] : memref<432xf32, #tpu.memory_space<smem>>
    %2043 = vector.broadcast %2042 : f32 to vector<8x8xf32>
    %2044 = arith.mulf %2043, %2041 : vector<8x8xf32>
    %2045 = arith.addf %2027, %2044 : vector<8x8xf32>
    %c350 = arith.constant 350 : index
    %2046 = memref.load %arg2[%c350] : memref<432xf32, #tpu.memory_space<smem>>
    %2047 = vector.broadcast %2046 : f32 to vector<8x8xf32>
    %2048 = arith.mulf %2047, %2041 : vector<8x8xf32>
    %2049 = arith.addf %2031, %2048 : vector<8x8xf32>
    %c386 = arith.constant 386 : index
    %2050 = memref.load %arg2[%c386] : memref<432xf32, #tpu.memory_space<smem>>
    %2051 = vector.broadcast %2050 : f32 to vector<8x8xf32>
    %2052 = arith.mulf %2051, %2041 : vector<8x8xf32>
    %2053 = arith.addf %2035, %2052 : vector<8x8xf32>
    %c422 = arith.constant 422 : index
    %2054 = memref.load %arg2[%c422] : memref<432xf32, #tpu.memory_space<smem>>
    %2055 = vector.broadcast %2054 : f32 to vector<8x8xf32>
    %2056 = arith.mulf %2055, %2041 : vector<8x8xf32>
    %2057 = arith.addf %2039, %2056 : vector<8x8xf32>
    %c3_480 = arith.constant 3 : index
    %c0_481 = arith.constant 0 : index
    %c1_482 = arith.constant 1 : index
    %2058 = vector.load %arg11[%c3_480, %c0_481, %c1_482] : memref<4x8x9xf32, #tpu.memory_space<vmem>>, vector<1x8x8xf32>
    %2059 = vector.shape_cast %2058 : vector<1x8x8xf32> to vector<8x8xf32>
    %c323 = arith.constant 323 : index
    %2060 = memref.load %arg2[%c323] : memref<432xf32, #tpu.memory_space<smem>>
    %2061 = vector.broadcast %2060 : f32 to vector<8x8xf32>
    %2062 = arith.mulf %2061, %2059 : vector<8x8xf32>
    %2063 = arith.addf %2045, %2062 : vector<8x8xf32>
    %c359 = arith.constant 359 : index
    %2064 = memref.load %arg2[%c359] : memref<432xf32, #tpu.memory_space<smem>>
    %2065 = vector.broadcast %2064 : f32 to vector<8x8xf32>
    %2066 = arith.mulf %2065, %2059 : vector<8x8xf32>
    %2067 = arith.addf %2049, %2066 : vector<8x8xf32>
    %c395 = arith.constant 395 : index
    %2068 = memref.load %arg2[%c395] : memref<432xf32, #tpu.memory_space<smem>>
    %2069 = vector.broadcast %2068 : f32 to vector<8x8xf32>
    %2070 = arith.mulf %2069, %2059 : vector<8x8xf32>
    %2071 = arith.addf %2053, %2070 : vector<8x8xf32>
    %c431 = arith.constant 431 : index
    %2072 = memref.load %arg2[%c431] : memref<432xf32, #tpu.memory_space<smem>>
    %2073 = vector.broadcast %2072 : f32 to vector<8x8xf32>
    %2074 = arith.mulf %2073, %2059 : vector<8x8xf32>
    %2075 = arith.addf %2057, %2074 : vector<8x8xf32>
    %2076 = arith.truncf %2063 : vector<8x8xf32> to vector<8x8xbf16>
    %c0_483 = arith.constant 0 : index
    %c8_484 = arith.constant 8 : index
    %c0_485 = arith.constant 0 : index
    %c0_486 = arith.constant 0 : index
    %2077 = vector.load %arg9[%c0_483, %c8_484, %c0_485, %c0_486] : memref<1x16x8x8xbf16, #tpu.memory_space<vmem>>, vector<1x1x8x8xbf16>
    %2078 = vector.shape_cast %2077 : vector<1x1x8x8xbf16> to vector<8x8xbf16>
    %2079 = vector.shape_cast %2076 : vector<8x8xbf16> to vector<1x1x8x8xbf16>
    tpu.vector_store %arg9[%c0_483, %c8_484, %c0_485, %c0_486], %2079 {strides = array<i32>} : memref<1x16x8x8xbf16, #tpu.memory_space<vmem>>, vector<1x1x8x8xbf16>,
    %2080 = vector.shape_cast %2063 : vector<8x8xf32> to vector<1x8x8xf32>
    %cst_487 = arith.constant dense<0.000000e+00> : vector<1xf32>
    %2081 = vector.multi_reduction <add>, %2080, %cst_487 [1, 2] : vector<1x8x8xf32> to vector<1xf32>
    %2082 = vector.shape_cast %2081 : vector<1xf32> to vector<1x1x1xf32>
    %2083 = vector.extract %2082[0, 0, 0] : f32 from vector<1x1x1xf32>
    %2084 = arith.mulf %2063, %2063 : vector<8x8xf32>
    %2085 = vector.shape_cast %2084 : vector<8x8xf32> to vector<1x8x8xf32>
    %cst_488 = arith.constant dense<0.000000e+00> : vector<1xf32>
    %2086 = vector.multi_reduction <add>, %2085, %cst_488 [1, 2] : vector<1x8x8xf32> to vector<1xf32>
    %2087 = vector.shape_cast %2086 : vector<1xf32> to vector<1x1x1xf32>
    %2088 = vector.extract %2087[0, 0, 0] : f32 from vector<1x1x1xf32>
    %2089 = arith.truncf %2067 : vector<8x8xf32> to vector<8x8xbf16>
    %c0_489 = arith.constant 0 : index
    %c9_490 = arith.constant 9 : index
    %c0_491 = arith.constant 0 : index
    %c0_492 = arith.constant 0 : index
    %2090 = vector.load %arg9[%c0_489, %c9_490, %c0_491, %c0_492] : memref<1x16x8x8xbf16, #tpu.memory_space<vmem>>, vector<1x1x8x8xbf16>
    %2091 = vector.shape_cast %2090 : vector<1x1x8x8xbf16> to vector<8x8xbf16>
    %2092 = vector.shape_cast %2089 : vector<8x8xbf16> to vector<1x1x8x8xbf16>
    tpu.vector_store %arg9[%c0_489, %c9_490, %c0_491, %c0_492], %2092 {strides = array<i32>} : memref<1x16x8x8xbf16, #tpu.memory_space<vmem>>, vector<1x1x8x8xbf16>,
    %2093 = vector.shape_cast %2067 : vector<8x8xf32> to vector<1x8x8xf32>
    %cst_493 = arith.constant dense<0.000000e+00> : vector<1xf32>
    %2094 = vector.multi_reduction <add>, %2093, %cst_493 [1, 2] : vector<1x8x8xf32> to vector<1xf32>
    %2095 = vector.shape_cast %2094 : vector<1xf32> to vector<1x1x1xf32>
    %2096 = vector.extract %2095[0, 0, 0] : f32 from vector<1x1x1xf32>
    %2097 = arith.mulf %2067, %2067 : vector<8x8xf32>
    %2098 = vector.shape_cast %2097 : vector<8x8xf32> to vector<1x8x8xf32>
    %cst_494 = arith.constant dense<0.000000e+00> : vector<1xf32>
    %2099 = vector.multi_reduction <add>, %2098, %cst_494 [1, 2] : vector<1x8x8xf32> to vector<1xf32>
    %2100 = vector.shape_cast %2099 : vector<1xf32> to vector<1x1x1xf32>
    %2101 = vector.extract %2100[0, 0, 0] : f32 from vector<1x1x1xf32>
    %2102 = arith.truncf %2071 : vector<8x8xf32> to vector<8x8xbf16>
    %c0_495 = arith.constant 0 : index
    %c10_496 = arith.constant 10 : index
    %c0_497 = arith.constant 0 : index
    %c0_498 = arith.constant 0 : index
    %2103 = vector.load %arg9[%c0_495, %c10_496, %c0_497, %c0_498] : memref<1x16x8x8xbf16, #tpu.memory_space<vmem>>, vector<1x1x8x8xbf16>
    %2104 = vector.shape_cast %2103 : vector<1x1x8x8xbf16> to vector<8x8xbf16>
    %2105 = vector.shape_cast %2102 : vector<8x8xbf16> to vector<1x1x8x8xbf16>
    tpu.vector_store %arg9[%c0_495, %c10_496, %c0_497, %c0_498], %2105 {strides = array<i32>} : memref<1x16x8x8xbf16, #tpu.memory_space<vmem>>, vector<1x1x8x8xbf16>,
    %2106 = vector.shape_cast %2071 : vector<8x8xf32> to vector<1x8x8xf32>
    %cst_499 = arith.constant dense<0.000000e+00> : vector<1xf32>
    %2107 = vector.multi_reduction <add>, %2106, %cst_499 [1, 2] : vector<1x8x8xf32> to vector<1xf32>
    %2108 = vector.shape_cast %2107 : vector<1xf32> to vector<1x1x1xf32>
    %2109 = vector.extract %2108[0, 0, 0] : f32 from vector<1x1x1xf32>
    %2110 = arith.mulf %2071, %2071 : vector<8x8xf32>
    %2111 = vector.shape_cast %2110 : vector<8x8xf32> to vector<1x8x8xf32>
    %cst_500 = arith.constant dense<0.000000e+00> : vector<1xf32>
    %2112 = vector.multi_reduction <add>, %2111, %cst_500 [1, 2] : vector<1x8x8xf32> to vector<1xf32>
    %2113 = vector.shape_cast %2112 : vector<1xf32> to vector<1x1x1xf32>
    %2114 = vector.extract %2113[0, 0, 0] : f32 from vector<1x1x1xf32>
    %2115 = arith.truncf %2075 : vector<8x8xf32> to vector<8x8xbf16>
    %c0_501 = arith.constant 0 : index
    %c11_502 = arith.constant 11 : index
    %c0_503 = arith.constant 0 : index
    %c0_504 = arith.constant 0 : index
    %2116 = vector.load %arg9[%c0_501, %c11_502, %c0_503, %c0_504] : memref<1x16x8x8xbf16, #tpu.memory_space<vmem>>, vector<1x1x8x8xbf16>
    %2117 = vector.shape_cast %2116 : vector<1x1x8x8xbf16> to vector<8x8xbf16>
    %2118 = vector.shape_cast %2115 : vector<8x8xbf16> to vector<1x1x8x8xbf16>
    tpu.vector_store %arg9[%c0_501, %c11_502, %c0_503, %c0_504], %2118 {strides = array<i32>} : memref<1x16x8x8xbf16, #tpu.memory_space<vmem>>, vector<1x1x8x8xbf16>,
    %2119 = vector.shape_cast %2075 : vector<8x8xf32> to vector<1x8x8xf32>
    %cst_505 = arith.constant dense<0.000000e+00> : vector<1xf32>
    %2120 = vector.multi_reduction <add>, %2119, %cst_505 [1, 2] : vector<1x8x8xf32> to vector<1xf32>
    %2121 = vector.shape_cast %2120 : vector<1xf32> to vector<1x1x1xf32>
    %2122 = vector.extract %2121[0, 0, 0] : f32 from vector<1x1x1xf32>
    %2123 = arith.mulf %2075, %2075 : vector<8x8xf32>
    %2124 = vector.shape_cast %2123 : vector<8x8xf32> to vector<1x8x8xf32>
    %cst_506 = arith.constant dense<0.000000e+00> : vector<1xf32>
    %2125 = vector.multi_reduction <add>, %2124, %cst_506 [1, 2] : vector<1x8x8xf32> to vector<1xf32>
    %2126 = vector.shape_cast %2125 : vector<1xf32> to vector<1x1x1xf32>
    %2127 = vector.extract %2126[0, 0, 0] : f32 from vector<1x1x1xf32>
    %c0_507 = arith.constant 0 : index
    %c0_508 = arith.constant 0 : index
    %c0_509 = arith.constant 0 : index
    %c0_510 = arith.constant 0 : index
    %2128 = vector.load %arg6[%c0_507, %c0_508, %c0_509, %c0_510] : memref<1x4x8x8xf32, #tpu.memory_space<vmem>>, vector<1x4x8x8xf32>
    %2129 = vector.shape_cast %2128 : vector<1x4x8x8xf32> to vector<4x8x8xf32>
    %c0_511 = arith.constant 0 : index
    %c0_512 = arith.constant 0 : index
    %c0_513 = arith.constant 0 : index
    %c1_514 = arith.constant 1 : index
    %2130 = vector.load %arg5[%c0_511, %c0_512, %c0_513, %c1_514] : memref<1x4x8x9xf32, #tpu.memory_space<vmem>>, vector<1x4x8x8xf32>
    %2131 = vector.shape_cast %2130 : vector<1x4x8x8xf32> to vector<4x8x8xf32>
    %2132 = arith.maximumf %2129, %2131 : vector<4x8x8xf32>
    %c0_515 = arith.constant 0 : index
    %c0_516 = arith.constant 0 : index
    %c0_517 = arith.constant 0 : index
    %2133 = vector.load %arg12[%c0_515, %c0_516, %c0_517] : memref<4x8x8xf32, #tpu.memory_space<vmem>>, vector<4x8x8xf32>
    %c0_518 = arith.constant 0 : index
    %c0_519 = arith.constant 0 : index
    %c1_520 = arith.constant 1 : index
    %2134 = vector.load %arg11[%c0_518, %c0_519, %c1_520] : memref<4x8x9xf32, #tpu.memory_space<vmem>>, vector<4x8x8xf32>
    %2135 = arith.maximumf %2133, %2134 : vector<4x8x8xf32>
    %2136 = arith.maximumf %2132, %2135 : vector<4x8x8xf32>
    %2137 = arith.truncf %2136 : vector<4x8x8xf32> to vector<4x8x8xbf16>
    %c0_521 = arith.constant 0 : index
    %c12_522 = arith.constant 12 : index
    %c0_523 = arith.constant 0 : index
    %c0_524 = arith.constant 0 : index
    %2138 = vector.load %arg9[%c0_521, %c12_522, %c0_523, %c0_524] : memref<1x16x8x8xbf16, #tpu.memory_space<vmem>>, vector<1x4x8x8xbf16>
    %2139 = vector.shape_cast %2138 : vector<1x4x8x8xbf16> to vector<4x8x8xbf16>
    %2140 = vector.shape_cast %2137 : vector<4x8x8xbf16> to vector<1x4x8x8xbf16>
    tpu.vector_store %arg9[%c0_521, %c12_522, %c0_523, %c0_524], %2140 {strides = array<i32>} : memref<1x16x8x8xbf16, #tpu.memory_space<vmem>>, vector<1x4x8x8xbf16>,
    %2141 = vector.extract_strided_slice %2136 {offsets = [0, 0, 0], sizes = [1, 8, 8], strides = [1, 1, 1]} : vector<4x8x8xf32> to vector<1x8x8xf32>
    %2142 = vector.shape_cast %2141 : vector<1x8x8xf32> to vector<8x8xf32>
    %2143 = vector.shape_cast %2142 : vector<8x8xf32> to vector<1x8x8xf32>
    %cst_525 = arith.constant dense<0.000000e+00> : vector<1xf32>
    %2144 = vector.multi_reduction <add>, %2143, %cst_525 [1, 2] : vector<1x8x8xf32> to vector<1xf32>
    %2145 = vector.shape_cast %2144 : vector<1xf32> to vector<1x1x1xf32>
    %2146 = vector.extract %2145[0, 0, 0] : f32 from vector<1x1x1xf32>
    %2147 = arith.mulf %2142, %2142 : vector<8x8xf32>
    %2148 = vector.shape_cast %2147 : vector<8x8xf32> to vector<1x8x8xf32>
    %cst_526 = arith.constant dense<0.000000e+00> : vector<1xf32>
    %2149 = vector.multi_reduction <add>, %2148, %cst_526 [1, 2] : vector<1x8x8xf32> to vector<1xf32>
    %2150 = vector.shape_cast %2149 : vector<1xf32> to vector<1x1x1xf32>
    %2151 = vector.extract %2150[0, 0, 0] : f32 from vector<1x1x1xf32>
    %2152 = vector.extract_strided_slice %2136 {offsets = [1, 0, 0], sizes = [1, 8, 8], strides = [1, 1, 1]} : vector<4x8x8xf32> to vector<1x8x8xf32>
    %2153 = vector.shape_cast %2152 : vector<1x8x8xf32> to vector<8x8xf32>
    %2154 = vector.shape_cast %2153 : vector<8x8xf32> to vector<1x8x8xf32>
    %cst_527 = arith.constant dense<0.000000e+00> : vector<1xf32>
    %2155 = vector.multi_reduction <add>, %2154, %cst_527 [1, 2] : vector<1x8x8xf32> to vector<1xf32>
    %2156 = vector.shape_cast %2155 : vector<1xf32> to vector<1x1x1xf32>
    %2157 = vector.extract %2156[0, 0, 0] : f32 from vector<1x1x1xf32>
    %2158 = arith.mulf %2153, %2153 : vector<8x8xf32>
    %2159 = vector.shape_cast %2158 : vector<8x8xf32> to vector<1x8x8xf32>
    %cst_528 = arith.constant dense<0.000000e+00> : vector<1xf32>
    %2160 = vector.multi_reduction <add>, %2159, %cst_528 [1, 2] : vector<1x8x8xf32> to vector<1xf32>
    %2161 = vector.shape_cast %2160 : vector<1xf32> to vector<1x1x1xf32>
    %2162 = vector.extract %2161[0, 0, 0] : f32 from vector<1x1x1xf32>
    %2163 = vector.extract_strided_slice %2136 {offsets = [2, 0, 0], sizes = [1, 8, 8], strides = [1, 1, 1]} : vector<4x8x8xf32> to vector<1x8x8xf32>
    %2164 = vector.shape_cast %2163 : vector<1x8x8xf32> to vector<8x8xf32>
    %2165 = vector.shape_cast %2164 : vector<8x8xf32> to vector<1x8x8xf32>
    %cst_529 = arith.constant dense<0.000000e+00> : vector<1xf32>
    %2166 = vector.multi_reduction <add>, %2165, %cst_529 [1, 2] : vector<1x8x8xf32> to vector<1xf32>
    %2167 = vector.shape_cast %2166 : vector<1xf32> to vector<1x1x1xf32>
    %2168 = vector.extract %2167[0, 0, 0] : f32 from vector<1x1x1xf32>
    %2169 = arith.mulf %2164, %2164 : vector<8x8xf32>
    %2170 = vector.shape_cast %2169 : vector<8x8xf32> to vector<1x8x8xf32>
    %cst_530 = arith.constant dense<0.000000e+00> : vector<1xf32>
    %2171 = vector.multi_reduction <add>, %2170, %cst_530 [1, 2] : vector<1x8x8xf32> to vector<1xf32>
    %2172 = vector.shape_cast %2171 : vector<1xf32> to vector<1x1x1xf32>
    %2173 = vector.extract %2172[0, 0, 0] : f32 from vector<1x1x1xf32>
    %2174 = vector.extract_strided_slice %2136 {offsets = [3, 0, 0], sizes = [1, 8, 8], strides = [1, 1, 1]} : vector<4x8x8xf32> to vector<1x8x8xf32>
    %2175 = vector.shape_cast %2174 : vector<1x8x8xf32> to vector<8x8xf32>
    %2176 = vector.shape_cast %2175 : vector<8x8xf32> to vector<1x8x8xf32>
    %cst_531 = arith.constant dense<0.000000e+00> : vector<1xf32>
    %2177 = vector.multi_reduction <add>, %2176, %cst_531 [1, 2] : vector<1x8x8xf32> to vector<1xf32>
    %2178 = vector.shape_cast %2177 : vector<1xf32> to vector<1x1x1xf32>
    %2179 = vector.extract %2178[0, 0, 0] : f32 from vector<1x1x1xf32>
    %2180 = arith.mulf %2175, %2175 : vector<8x8xf32>
    %2181 = vector.shape_cast %2180 : vector<8x8xf32> to vector<1x8x8xf32>
    %cst_532 = arith.constant dense<0.000000e+00> : vector<1xf32>
    %2182 = vector.multi_reduction <add>, %2181, %cst_532 [1, 2] : vector<1x8x8xf32> to vector<1xf32>
    %2183 = vector.shape_cast %2182 : vector<1xf32> to vector<1x1x1xf32>
    %2184 = vector.extract %2183[0, 0, 0] : f32 from vector<1x1x1xf32>
    %2185 = vector.broadcast %675 : f32 to vector<1xf32>
    %2186 = vector.broadcast %688 : f32 to vector<1xf32>
    %2187 = vector.broadcast %701 : f32 to vector<1xf32>
    %2188 = vector.broadcast %714 : f32 to vector<1xf32>
    %2189 = vector.broadcast %1379 : f32 to vector<1xf32>
    %2190 = vector.broadcast %1392 : f32 to vector<1xf32>
    %2191 = vector.broadcast %1405 : f32 to vector<1xf32>
    %2192 = vector.broadcast %1418 : f32 to vector<1xf32>
    %2193 = vector.broadcast %2083 : f32 to vector<1xf32>
    %2194 = vector.broadcast %2096 : f32 to vector<1xf32>
    %2195 = vector.broadcast %2109 : f32 to vector<1xf32>
    %2196 = vector.broadcast %2122 : f32 to vector<1xf32>
    %2197 = vector.broadcast %2146 : f32 to vector<1xf32>
    %2198 = vector.broadcast %2157 : f32 to vector<1xf32>
    %2199 = vector.broadcast %2168 : f32 to vector<1xf32>
    %2200 = vector.broadcast %2179 : f32 to vector<1xf32>
    %2201 = tpu.concatenate %2185, %2186, %2187, %2188, %2189, %2190, %2191, %2192, %2193, %2194, %2195, %2196, %2197, %2198, %2199, %2200 in 0 : vector<1xf32>, vector<1xf32>, vector<1xf32>, vector<1xf32>, vector<1xf32>, vector<1xf32>, vector<1xf32>, vector<1xf32>, vector<1xf32>, vector<1xf32>, vector<1xf32>, vector<1xf32>, vector<1xf32>, vector<1xf32>, vector<1xf32>, vector<1xf32> -> vector<16xf32>
    %2202 = vector.broadcast %680 : f32 to vector<1xf32>
    %2203 = vector.broadcast %693 : f32 to vector<1xf32>
    %2204 = vector.broadcast %706 : f32 to vector<1xf32>
    %2205 = vector.broadcast %719 : f32 to vector<1xf32>
    %2206 = vector.broadcast %1384 : f32 to vector<1xf32>
    %2207 = vector.broadcast %1397 : f32 to vector<1xf32>
    %2208 = vector.broadcast %1410 : f32 to vector<1xf32>
    %2209 = vector.broadcast %1423 : f32 to vector<1xf32>
    %2210 = vector.broadcast %2088 : f32 to vector<1xf32>
    %2211 = vector.broadcast %2101 : f32 to vector<1xf32>
    %2212 = vector.broadcast %2114 : f32 to vector<1xf32>
    %2213 = vector.broadcast %2127 : f32 to vector<1xf32>
    %2214 = vector.broadcast %2151 : f32 to vector<1xf32>
    %2215 = vector.broadcast %2162 : f32 to vector<1xf32>
    %2216 = vector.broadcast %2173 : f32 to vector<1xf32>
    %2217 = vector.broadcast %2184 : f32 to vector<1xf32>
    %2218 = tpu.concatenate %2202, %2203, %2204, %2205, %2206, %2207, %2208, %2209, %2210, %2211, %2212, %2213, %2214, %2215, %2216, %2217 in 0 : vector<1xf32>, vector<1xf32>, vector<1xf32>, vector<1xf32>, vector<1xf32>, vector<1xf32>, vector<1xf32>, vector<1xf32>, vector<1xf32>, vector<1xf32>, vector<1xf32>, vector<1xf32>, vector<1xf32>, vector<1xf32>, vector<1xf32>, vector<1xf32> -> vector<16xf32>
    %c0_533 = arith.constant 0 : index
    %c0_534 = arith.constant 0 : index
    %c0_535 = arith.constant 0 : index
    %c0_536 = arith.constant 0 : index
    %2219 = vector.load %arg10[%c0_533, %c0_534, %c0_535, %c0_536] : memref<1x1x2x16xf32, #tpu.memory_space<vmem>>, vector<1x1x1x16xf32>
    %2220 = vector.shape_cast %2219 : vector<1x1x1x16xf32> to vector<16xf32>
    %2221 = vector.shape_cast %2201 : vector<16xf32> to vector<1x1x1x16xf32>
    tpu.vector_store %arg10[%c0_533, %c0_534, %c0_535, %c0_536], %2221 {strides = array<i32>} : memref<1x1x2x16xf32, #tpu.memory_space<vmem>>, vector<1x1x1x16xf32>,
    %2222 = arith.mulf %2201, %2201 : vector<16xf32>
    %cst_537 = arith.constant 6.400000e+01 : f32
    %2223 = vector.broadcast %cst_537 : f32 to vector<16xf32>
    %2224 = arith.divf %2222, %2223 : vector<16xf32>
    %2225 = arith.subf %2218, %2224 : vector<16xf32>
    %c0_538 = arith.constant 0 : index
    %c0_539 = arith.constant 0 : index
    %c1_540 = arith.constant 1 : index
    %c0_541 = arith.constant 0 : index
    %2226 = vector.load %arg10[%c0_538, %c0_539, %c1_540, %c0_541] : memref<1x1x2x16xf32, #tpu.memory_space<vmem>>, vector<1x1x1x16xf32>
    %2227 = vector.shape_cast %2226 : vector<1x1x1x16xf32> to vector<16xf32>
    %2228 = vector.shape_cast %2225 : vector<16xf32> to vector<1x1x1x16xf32>
    tpu.vector_store %arg10[%c0_538, %c0_539, %c1_540, %c0_541], %2228 {strides = array<i32>} : memref<1x1x2x16xf32, #tpu.memory_space<vmem>>, vector<1x1x1x16xf32>,
    return
  }
  func.func @transform_0(%arg0: i32, %arg1: i32) -> i32 {
    %c0_i32 = arith.constant 0 : i32
    %c0_i32_0 = arith.constant 0 : i32
    return %c0_i32 : i32
  }
  func.func @transform_1(%arg0: i32, %arg1: i32) -> (i32, i32, i32, i32) {
    %c0_i32 = arith.constant 0 : i32
    %c0_i32_0 = arith.constant 0 : i32
    %c0_i32_1 = arith.constant 0 : i32
    return %arg0, %c0_i32, %arg1, %c0_i32_0 : i32, i32, i32, i32
  }
  func.func @transform_2(%arg0: i32, %arg1: i32) -> (i32, i32, i32, i32) {
    %c0_i32 = arith.constant 0 : i32
    %c0_i32_0 = arith.constant 0 : i32
    %c0_i32_1 = arith.constant 0 : i32
    return %arg0, %c0_i32, %arg1, %c0_i32_0 : i32, i32, i32, i32
  }
  func.func @transform_3(%arg0: i32, %arg1: i32) -> (i32, i32, i32, i32) {
    %c0_i32 = arith.constant 0 : i32
    %c0_i32_0 = arith.constant 0 : i32
    %c0_i32_1 = arith.constant 0 : i32
    return %arg0, %c0_i32, %arg1, %c0_i32_0 : i32, i32, i32, i32
  }
  func.func @transform_4(%arg0: i32, %arg1: i32) -> (i32, i32, i32, i32) {
    %c0_i32 = arith.constant 0 : i32
    %c0_i32_0 = arith.constant 0 : i32
    %c0_i32_1 = arith.constant 0 : i32
    return %arg0, %c0_i32, %arg1, %c0_i32_0 : i32, i32, i32, i32
  }
  func.func @transform_5(%arg0: i32, %arg1: i32) -> (i32, i32, i32, i32) {
    %c0_i32 = arith.constant 0 : i32
    %c0_i32_0 = arith.constant 0 : i32
    %c0_i32_1 = arith.constant 0 : i32
    return %arg0, %c0_i32, %arg1, %c0_i32_0 : i32, i32, i32, i32
  }
  func.func @transform_6(%arg0: i32, %arg1: i32) -> (i32, i32, i32, i32) {
    %c0_i32 = arith.constant 0 : i32
    %c0_i32_0 = arith.constant 0 : i32
    %c0_i32_1 = arith.constant 0 : i32
    return %arg0, %c0_i32, %arg1, %c0_i32_0 : i32, i32, i32, i32
  }
  func.func @transform_7(%arg0: i32, %arg1: i32) -> (i32, i32, i32, i32) {
    %c0_i32 = arith.constant 0 : i32
    %c0_i32_0 = arith.constant 0 : i32
    %c0_i32_1 = arith.constant 0 : i32
    return %arg0, %c0_i32, %arg1, %c0_i32_0 : i32, i32, i32, i32
  }
  func.func @transform_8(%arg0: i32, %arg1: i32) -> (i32, i32, i32, i32) {
    %c0_i32 = arith.constant 0 : i32
    %c0_i32_0 = arith.constant 0 : i32
    %c0_i32_1 = arith.constant 0 : i32
    return %arg0, %arg1, %c0_i32, %c0_i32_0 : i32, i32, i32, i32
  }
}

</mosaic_0001>

<bundles_post_ra>
// kernel: tpu_custom_call.1
= control target key start
LH: loop header
LB: loop body
LE: loop exit
PB: predicated region body
PF: predicated region fallthrough
CT: control target
= control target key end

     0   :  { %s7742_s0 = inlined_call_operand.hbm [shape: f32[432], index: 0, kind: input, shape index: {}]   ;;  %s7743_s1 = inlined_call_operand.hbm [shape: f32[2,4,8,9], index: 1, kind: input, shape index: {}]   ;;  %s7744_s2 = inlined_call_operand.hbm [shape: f32[2,4,8,8], index: 2, kind: input, shape index: {}]   ;;  %s7745_s3 = inlined_call_operand.hbm [shape: f32[2,4,8,9], index: 3, kind: input, shape index: {}]   ;;  %s7746_s4 = inlined_call_operand.hbm [shape: f32[2,4,8,8], index: 4, kind: input, shape index: {}]   ;;  %s7747_s5 = inlined_call_operand.vmem [shape: f32[2,4,1,9], index: 5, kind: input, shape index: {}]   ;;  %s7748_s6 = inlined_call_operand.vmem [shape: f32[2,4,1,8], index: 6, kind: input, shape index: {}]   ;;  %s7749_s7 = inlined_call_operand.vmem [shape: bf16[2,16,8,8], index: 7, kind: output, shape index: {0}]   ;;  %s7750_s8 = inlined_call_operand.hbm [shape: f32[2,1,2,16], index: 8, kind: output, shape index: {1}]  }
   0x1   :  { %7773 = sst [smem:[#allocation42_spill]] %s7742_s0 }
   0x2   :  { %7774 = sst [smem:[#allocation43_spill]] %s7743_s1 }
   0x3   :  { %7775 = sst [smem:[#allocation44_spill]] %s7744_s2 }
   0x4   :  { %7776 = sst [smem:[#allocation45_spill]] %s7745_s3 }
   0x5   :  { %7777 = sst [smem:[#allocation46_spill]] %s7748_s6 }
   0x6   :  { %7778 = sst [smem:[#allocation47_spill]] %s7749_s7 }
   0x7   :  { %7779 = sst [smem:[#allocation48_spill]] %s7750_s8 }
   0x8   :  { %14 = vsyncpa [#allocation7], 0 }
   0x9   :  { %15 = vsyncpa [#allocation5], 0 }
   0xa   :  { %17 = vsyncpa [#allocation5 + $0x1], 0 }
   0xb   :  { %18 = vsyncpa [#allocation10], 0 }
   0xc   :  { %20 = vsyncpa [#allocation10 + $0x1], 0 }
   0xd   :  { %21 = vsyncpa [#allocation13], 0 }
   0xe   :  { %23 = vsyncpa [#allocation13 + $0x1], 0 }
   0xf   :  { %24 = vsyncpa [#allocation6], 0 }
  0x10   :  { %26 = vsyncpa [#allocation6 + $0x1], 0  ;;  %s4760_s27 = smov 0   ;;  %s4762_s28 = smov 0  }
  0x11   :  { %s4764_s29 = smov 0   ;;  %s4766_s30 = smov 0  }
  0x12   :  { %s4768_s9 = smov 0   ;;  %s4770_s10 = smov 0  }
  0x13 LB: > { %7780 = sst [smem:[#allocation20_spill]] %s4684_s27  ;;  %s44_s11 = sadd.s32 1, %s4700_s9  ;;  %s4704_s10 = sphi %s4770_s10, %s32_s10   ;;  %s4700_s9 = sphi %s4768_s9, %s7887_s9   ;;  %s4696_s30 = sphi %s4766_s30, %s7886_s30   ;;  %s4692_s29 = sphi %s4764_s29, %s7885_s29   ;;  %s4688_s28 = sphi %s4762_s28, %s7889_s28   ;;  %s4684_s27 = sphi %s4760_s27, %s7888_s27  }
  0x14   : > { %7781 = sst [smem:[#allocation21_spill]] %s4692_s29  ;;  %s74_s12 = sadd.s32 1, %s4692_s29 }
  0x15   : > { %7782 = sst [smem:[#allocation22_spill]] %s4700_s9  ;;  %p46_p0 = scmp.ge.s32.totalorder %s44_s11, 2 }
  0x16   : > { %7783 = sst [smem:[#allocation23_spill]] %s4704_s10  ;;  %p7752_p1 = scmp.ne.s32.totalorder %s4692_s29, %s4688_s28 }
  0x17   : > { %p82_p2 = scmp.eq.s32.totalorder %s4704_s10, 0  ;;  %s7891_s11 = smov (%p46_p0, %s44_s11), 0 }
  0x18   : > { %7784 = sst [smem:[#allocation24_spill]] %s7891_s11  ;;  %p4405_p5 = scmp.lt.s32.totalorder %s4704_s10, 2 }
  0x19   : > { %p83_p4 = por %p82_p2, %p7752_p1  ;;  %s69_s13 = ssub.s32 %s4700_s9, %s7891_s11 }
  0x1a   : > { %s4805_s14 = sand.u32 1, %s4692_s29   ;;  %p72_p6 = scmp.eq.s32.totalorder %s69_s13, 0 }
  0x1b   : > { %s4808_s15 = sshll.u32 %s4805_s14, 5  ;;  %s4811_s16 = sshll.u32 %s4700_s9, 9 }
  0x1c   : > { %p4813_p7 = pnand %p4405_p5, %p83_p4  ;;  %s338_s19 = sand.u32 1, %s4704_s10  }
  0x1d   : > { %s4818_s18 = scalar_select %p72_p6, %s4692_s29, %s74_s12  }
  0x1e   : > { %s7787_s2 = sld [smem:[#allocation44_spill]]  ;;  %s342_s23 = scalar_lea.vmem [#allocation9], %s4808_s15 }
  0x1f   : > { %7786 = sst [smem:[#allocation25_spill]] %s4818_s18  ;;  %s350_s24 = sshll.u32 %s342_s23, 4  ;;  %s4828_s24 = int_to_ptr.vmem [resolvable:$true] %s350_s24 }
  0x20   : > { %s4830_s25 = scalar_lea.sflag [#allocation10], %s338_s19  ;;  %p4836_p9 = pneg %p4813_p7 }
  0x24   : > { %s4825_s22 = scalar_lea.hbm %s7787_s2, %s4811_s16  ;;  %s4482_s21 = scalar_lea.hbm %s7787_s2, 1024 }
  0x25   : > { %s4477_s26 = scalar_lea.hbm %s4825_s22, 512  ;;  %p4483_p12 = scmp.lt.u32.totalorder %s4825_s22, %s7787_s2 }
  0x26   : > { %p4478_p8 = scmp.ne.s32.totalorder %s4825_s22, %s4477_s26  ;;  %p4484_p13 = scmp.lt.u32.totalorder %s4482_s21, %s4477_s26 }
  0x27   : > { %p4486_p2 = scmp.lt.u32.totalorder %s4477_s26, %s4825_s22 }
  0x28   : > { %p4480_p10 = pnand %p4836_p9, %p4478_p8  ;;  %p4485_p0 = por %p4484_p13, %p4483_p12 }
  0x2a   : > { %p4481_p11 = pneg %p4480_p10  ;;  %p4487_p4 = por %p4486_p2, %p4485_p0 }
  0x2c   : > { %p4488_p5 = pnand %p4487_p4, %p4481_p11 }
  0x2e   : > { %4491 = shalt.err (!%p4488_p5)
}
  0x2f   : > { %s4492_s19 = scalar_lea.vmem %s4828_s24, 512  ;;  %s4706_s13 = smov [#allocation9]  }
  0x30   : > { %p4493_p6 = scmp.ne.s32.totalorder %s4828_s24, %s4492_s19  ;;  %s4497_s20 = sshll.u32 %s4706_s13, 4  ;;  %s4498_s20 = int_to_ptr.vmem [resolvable:$false] %s4497_s20 }
  0x31   : > { %s4499_s11 = scalar_lea.vmem %s4498_s20, 1024  ;;  %p4500_p3 = scmp.lt.s32.totalorder %s4828_s24, %s4498_s20 }
  0x32   : > { %p4495_p8 = pnand %p4493_p6, %p4836_p9  ;;  %p4501_p1 = scmp.lt.s32.totalorder %s4499_s11, %s4492_s19 }
  0x34   : > { %p4496_p10 = pneg %p4495_p8  ;;  %p4502_p12 = por %p4501_p1, %p4500_p3 }
  0x36   : > { %p4503_p13 = pnand %p4502_p12, %p4496_p10 }
  0x38   : > { %4506 = shalt.err (!%p4503_p13)
}
  0x39   : > { %s7753_s26 = smov 128   ;;  %s7755_s21 = smov 8  }
  0x3a   : > { %4393 = dma.hbm_to_vmem [thread:$0]  (!%p4813_p7), %s4825_s22, 512, %s4828_s24, %s4830_s25, %s7753_s26, %s7753_s26, %s7755_s21  }
  0x3b   : > { %s4864_s23 = sadd.s32 4294967295, %s4704_s10   ;;  %s3787_s19 = sadd.s32 4294967294, %s4704_s10  }
  0x3c   : > { %p87_p1 = scmp.ne.s32.totalorder %s4688_s28, %s4684_s27  ;;  %p7766_p3 = scmp.eq.s32.totalorder %s4864_s23, 0 }
  0x3d   : > { %p281_p11 = scmp.eq.s32.totalorder %s4864_s23, 1  ;;  %p287_p0 = scmp.eq.s32.totalorder %s3787_s19, 1 }
  0x3e   : > { %p3788_p2 = scmp.ge.s32.totalorder %s4704_s10, 1  ;;  %p4874_p4 = por %p7766_p3, %p87_p1 }
  0x3f   : > { %p7790_p5 = scmp.ne.s32.totalorder %s4692_s29, %s4688_s28  ;;  %p4885_p8 = por %p287_p0, %p87_p1 }
  0x40   : > { %s7789_s13 = scalar_select %p4874_p4, 1, 0 }
  0x41   : > { %p4881_p6 = por %p281_p11, %p7790_p5  ;;  %p294_p10 = scmp.lt.s32.totalorder %s4704_s10, 3 }
  0x42   : > { %s7793_s24 = scalar_select %p4885_p8, 1, 0 }
  0x43   : > { %s7791_s22 = scalar_select %p4881_p6, 1, 0 }
  0x44   : > { %7794 = sst [smem:[#allocation27_spill]] %s7793_s24  ;;  %p4890_p12 = pnand %p3788_p2, %p294_p10 }
  0x45   : > { %7792 = sst [smem:[#allocation26_spill]] %s7791_s22  ;;  %s7796_s1 = sld [smem:[#allocation43_spill]] }
  0x46   : > { %s7795_s20 = scalar_select %p4890_p12, 1, 0 }
  0x47   : > { %p4383_p13 = pneg %p4890_p12  ;;  %s320_s21 = scalar_lea.vmem [#allocation8], %s4808_s15 }
  0x48   : > { %s328_s2 = sshll.u32 %s320_s21, 4  ;;  %s7798_s3 = sld [smem:[#allocation45_spill]]  ;;  %s4903_s2 = int_to_ptr.vmem [resolvable:$true] %s328_s2 }
  0x49   : > { %p4907_p1 = pnand %p4383_p13, %p7766_p3  ;;  %s317_s29 = scalar_lea.sflag [#allocation5], %s4805_s14 }
  0x4b   : > { %s4898_s26 = scalar_lea.hbm %s7796_s1, %s4811_s16  ;;  %s4512_s27 = scalar_lea.hbm %s7796_s1, 1024 }
  0x4c   : > { %s7797_s9 = scalar_select %p4907_p1, 1, 0 }
  0x4d   : > { %s4507_s10 = scalar_lea.hbm %s4898_s26, 512  ;;  %p4513_p5 = scmp.lt.u32.totalorder %s4898_s26, %s7796_s1 }
  0x4e   : > { %s4915_s19 = scalar_lea.hbm %s7798_s3, %s4811_s16  ;;  %p4508_p11 = scmp.ne.s32.totalorder %s4898_s26, %s4507_s10 }
  0x4f   : > { %p4514_p10 = scmp.lt.u32.totalorder %s4512_s27, %s4507_s10  ;;  %p4516_p3 = scmp.lt.u32.totalorder %s4507_s10, %s4898_s26 }
  0x50   : > { %p4510_p0 = pnand %p4508_p11, %p4836_p9 }
  0x51   : > { %p4515_p13 = por %p4514_p10, %p4513_p5 }
  0x52   : > { %p4511_p2 = pneg %p4510_p0 }
  0x53   : > { %p4517_p8 = por %p4516_p3, %p4515_p13 }
  0x55   : > { %p4518_p6 = pnand %p4517_p8, %p4511_p2 }
  0x57   : > { %4521 = shalt.err (!%p4518_p6)
}
  0x58   : > { %s4522_s18 = scalar_lea.vmem %s4903_s2, 512  ;;  %s4709_s24 = smov [#allocation8]  }
  0x59   : > { %p4523_p11 = scmp.ne.s32.totalorder %s4903_s2, %s4522_s18  ;;  %s4527_s11 = sshll.u32 %s4709_s24, 4  ;;  %s4528_s11 = int_to_ptr.vmem [resolvable:$false] %s4527_s11 }
  0x5a   : > { %s4529_s8 = scalar_lea.vmem %s4528_s11, 1024  ;;  %p4530_p12 = scmp.lt.s32.totalorder %s4903_s2, %s4528_s11 }
  0x5b   : > { %p4525_p0 = pnand %p4523_p11, %p4836_p9  ;;  %p4531_p1 = scmp.lt.s32.totalorder %s4529_s8, %s4522_s18 }
  0x5d   : > { %p4526_p4 = pneg %p4525_p0  ;;  %p4532_p5 = por %p4531_p1, %p4530_p12 }
  0x5f   : > { %p4533_p10 = pnand %p4532_p5, %p4526_p4 }
  0x61   : > { %4536 = shalt.err (!%p4533_p10)
}
  0x62   : > { %s7799_s27 = smov 8   ;;  %s7800_s10 = smov 128  }
  0x63   : > { %4390 = dma.hbm_to_vmem [thread:$0]  (!%p4813_p7), %s4898_s26, 512, %s4903_s2, %s317_s29, %s7800_s10, %s7800_s10, %s7799_s27  }
  0x64   : > { %s364_s22 = scalar_lea.vmem [#allocation11], %s4808_s15  ;;  %s7801_s0 = sld [smem:[#allocation42_spill]] }
  0x65   : > { %s372_s21 = sshll.u32 %s364_s22, 4  ;;  %p7802_p4 = scmp.ne.s32.totalorder %s7797_s9, 0  ;;  %s4961_s21 = int_to_ptr.vmem [resolvable:$true] %s372_s21 }
  0x67   : > { %p4539_p6 = pneg %p7802_p4 }
  0x6a   : > { %s4537_s18 = scalar_lea.hbm %s7801_s0, 64 }
  0x6b   : > { %p4538_p3 = scmp.ne.s32.totalorder %s7801_s0, %s4537_s18  ;;  %p4544_p1 = scmp.lt.u32.totalorder %s4537_s18, %s7801_s0 }
  0x6d   : > { %p4540_p8 = pnand %p4539_p6, %p4538_p3 }
  0x6f   : > { %p4541_p12 = pneg %p4540_p8 }
  0x71   : > { %p4546_p2 = pnand %p4544_p1, %p4541_p12 }
  0x73   : > { %4549 = shalt.err (!%p4546_p2)
}
  0x74   : > { %s4710_s2 = smov [#allocation4]   ;;  %s4550_s1 = scalar_lea.hbm %s4915_s19, 512 }
  0x75   : > { %4386 = dma.hbm_to_smem (!%p7802_p4), %s7801_s0, 64, %s4710_s2, [#allocation7]  }
  0x76   : > { %p4551_p13 = scmp.ne.s32.totalorder %s4915_s19, %s4550_s1  ;;  %s4555_s9 = scalar_lea.hbm %s7798_s3, 1024 }
  0x77   : > { %p4556_p5 = scmp.lt.u32.totalorder %s4915_s19, %s7798_s3  ;;  %p4557_p10 = scmp.lt.u32.totalorder %s4555_s9, %s4550_s1 }
  0x78   : > { %p4553_p11 = pnand %p4551_p13, %p4836_p9  ;;  %p4559_p6 = scmp.lt.u32.totalorder %s4550_s1, %s4915_s19 }
  0x79   : > { %p4558_p3 = por %p4557_p10, %p4556_p5 }
  0x7a   : > { %p4554_p0 = pneg %p4553_p11 }
  0x7b   : > { %p4560_p8 = por %p4559_p6, %p4558_p3 }
  0x7d   : > { %p4561_p4 = pnand %p4560_p8, %p4554_p0 }
  0x7f   : > { %4564 = shalt.err (!%p4561_p4)
}
  0x80   : > { %s4565_s11 = scalar_lea.vmem %s4961_s21, 512  ;;  %s4711_s18 = smov [#allocation11]  }
  0x81   : > { %p4566_p12 = scmp.ne.s32.totalorder %s4961_s21, %s4565_s11  ;;  %s4570_s8 = sshll.u32 %s4711_s18, 4  ;;  %s4571_s8 = int_to_ptr.vmem [resolvable:$false] %s4570_s8 }
  0x82   : > { %s4572_s2 = scalar_lea.vmem %s4571_s8, 1024  ;;  %p4573_p13 = scmp.lt.s32.totalorder %s4961_s21, %s4571_s8 }
  0x83   : > { %p4568_p1 = pnand %p4566_p12, %p4836_p9  ;;  %p4574_p11 = scmp.lt.s32.totalorder %s4572_s2, %s4565_s11 }
  0x85   : > { %p4569_p2 = pneg %p4568_p1  ;;  %p4575_p5 = por %p4574_p11, %p4573_p13 }
  0x87   : > { %p4576_p10 = pnand %p4575_p5, %p4569_p2 }
  0x89   : > { %4579 = shalt.err (!%p4576_p10)
}
  0x8a   : > { %4396 = dma.hbm_to_vmem [thread:$0]  (!%p4813_p7), %s4915_s19, 512, %s4961_s21, %s4830_s25, %s7800_s10, %s7800_s10, %s7799_s27  }
  0x8b   : > { %s4992_s1 = scalar_lea.hbm %s7746_s4, %s4811_s16  ;;  %s386_s6 = scalar_lea.vmem [#allocation12], %s4808_s15 }
  0x8c   : > { %s394_s7 = sshll.u32 %s386_s6, 4  ;;  %s383_s9 = scalar_lea.sflag [#allocation13], %s4805_s14  ;;  %s4995_s7 = int_to_ptr.vmem [resolvable:$true] %s394_s7 }
  0x8d   : > { %s4580_s22 = scalar_lea.hbm %s4992_s1, 512  ;;  %s4585_s21 = scalar_lea.hbm %s7746_s4, 1024 }
  0x8e   : > { %p4581_p0 = scmp.ne.s32.totalorder %s4992_s1, %s4580_s22  ;;  %p4586_p8 = scmp.lt.u32.totalorder %s4992_s1, %s7746_s4 }
  0x8f   : > { %p4587_p4 = scmp.lt.u32.totalorder %s4585_s21, %s4580_s22  ;;  %p4589_p1 = scmp.lt.u32.totalorder %s4580_s22, %s4992_s1 }
  0x90   : > { %p4583_p3 = pnand %p4581_p0, %p4836_p9 }
  0x91   : > { %p4588_p12 = por %p4587_p4, %p4586_p8 }
  0x92   : > { %p4584_p6 = pneg %p4583_p3 }
  0x93   : > { %p4590_p2 = por %p4589_p1, %p4588_p12 }
  0x95   : > { %p4591_p13 = pnand %p4590_p2, %p4584_p6 }
  0x97   : > { %4594 = shalt.err (!%p4591_p13)
}
  0x98   : > { %s4595_s15 = scalar_lea.vmem %s4995_s7, 512  ;;  %s4712_s11 = smov [#allocation12]  }
  0x99   : > { %p4596_p11 = scmp.ne.s32.totalorder %s4995_s7, %s4595_s15  ;;  %s4600_s18 = sshll.u32 %s4712_s11, 4  ;;  %s4601_s18 = int_to_ptr.vmem [resolvable:$false] %s4600_s18 }
  0x9a   : > { %s4602_s8 = scalar_lea.vmem %s4601_s18, 1024  ;;  %p4603_p0 = scmp.lt.s32.totalorder %s4995_s7, %s4601_s18 }
  0x9b   : > { %p4598_p5 = pnand %p4596_p11, %p4836_p9  ;;  %p4604_p3 = scmp.lt.s32.totalorder %s4602_s8, %s4595_s15 }
  0x9d   : > { %p4599_p10 = pneg %p4598_p5  ;;  %p4605_p8 = por %p4604_p3, %p4603_p0 }
  0x9f   : > { %p4606_p4 = pnand %p4605_p8, %p4599_p10 }
  0xa1   : > { %4609 = shalt.err (!%p4606_p4)
}
  0xa2   : > { %4399 = dma.hbm_to_vmem [thread:$0]  (!%p4813_p7), %s4992_s1, 512, %s4995_s7, %s383_s9, %s7800_s10, %s7800_s10, %s7799_s27  }
  0xa3   : > { %p7803_p9 = scmp.ne.s32.totalorder %s7795_s20, 0 }
  0xa5   : > { %426 = sbr.rel (%p7803_p9) target bundleno = 974 (0x3ce), region = 48 }
  0xac   : > { %p7804_p6 = scmp.eq.s32.totalorder %s4864_s23, 0 }
  0xae   : > { %4663 = dma.done.wait (%p7804_p6), [#allocation7], 64   ;;  %p7805_p12 = pmov %p7804_p6 }
  0xaf   : > { %s5031_s17 = sand.u32 1, %s4688_s28   ;;  %p7806_p7 = scmp.ne.s32.totalorder %s7789_s13, 0 }
  0xb0   : > { %4665 = vsyncadd (%p7805_p12), [#allocation7], 4294967232  ;;  %s3805_s12 = sshll.u32 %s5031_s17, 5  ;;  %s433_s14 = scalar_lea.sflag [#allocation5], %s5031_s17 }
  0xb1   : > { %s5035_s2 = scalar_lea.vmem [#allocation8], %s3805_s12 }
  0xb2   : > { %4667 = dma.done.wait (%p7806_p7), %s433_s14, 512  }
  0xb3   : > { %4669 = vsyncadd (%p7806_p7), %s433_s14, 4294966784  ;;  %s441_s20 = sand.u32 1, %s4864_s23   ;;  %s5042_s10 = scalar_lea.vmem [#allocation9], %s3805_s12 }
  0xb4   : > { %s442_s27 = scalar_lea.sflag [#allocation10], %s441_s20 }
  0xb5   : > { %4671 = dma.done.wait (%p7806_p7), %s442_s27, 1024  }
  0xb6   : > { %4673 = vsyncadd (%p7806_p7), %s442_s27, 4294966272  ;;  %s5048_s29 = scalar_lea.vmem [#allocation11], %s3805_s12  ;;  %s460_s26 = scalar_lea.sflag [#allocation13], %s5031_s17 }
  0xb7   : > { %s5051_s1 = scalar_lea.vmem [#allocation12], %s3805_s12 }
  0xb8   : > { %4675 = dma.done.wait (%p7806_p7), %s460_s26, 512  }
  0xb9   : > { %4677 = vsyncadd (%p7806_p7), %s460_s26, 4294966784 }
  0xba   : > { %468 = sfence }
  0xbb   : > { %s3853_s23 = sld [smem:[#allocation4 + $0x4a]]  ;;  %s3854_s7 = sld [smem:[#allocation4 + $0x6e]]  ;;  %vm560_vm0 = vcmask 71680   ;;  %v5062_v0 = vld [vmem:[%s5035_s2] sm:$0xff]  ;;  %v557_v3 = vld [vmem:[%s5035_s2 + $0x9] sm:$0x7f] }
  0xbc   : > { %s3851_s6 = sld [smem:[#allocation4 + $0x2]]  ;;  %s3852_s9 = sld [smem:[#allocation4 + $0x26]]  ;;  %v556_v1 = vld [vmem:[%s5035_s2 + $0x1] sm:$0x7f]  ;;  %562 = vst.msk [vmem:[#allocation2 + $0x8] sm:$0x7f] %vm560_vm0, %v557_v3 }
  0xbd   : > { %s5057_s22 = sld [smem:[#allocation4 + $0x2f]]  ;;  %s5059_s25 = sld [smem:[#allocation4 + $0xb]]  ;;  %561 = vst.msk [vmem:[#allocation2] sm:$0x7f] %vm560_vm0, %v556_v1  ;;  %v558_v7 = vld [vmem:[%s5035_s2 + $0x11] sm:$0x7f] }
  0xbe   : > { %s5066_s13 = sld [smem:[#allocation4 + $0x77]]  ;;  %s5070_s19 = sld [smem:[#allocation4 + $0x53]]  ;;  %563 = vst.msk [vmem:[#allocation2 + $0x10] sm:$0x7f] %vm560_vm0, %v558_v7  ;;  %v559_v10 = vld [vmem:[%s5035_s2 + $0x19] sm:$0x7f] }
  0xbf   : > { %s7771_s21 = smov 127   ;;  %564 = vst.msk [vmem:[#allocation2 + $0x18] sm:$0x7f] %vm560_vm0, %v559_v10  ;;  %v5083_v13 = vld [vmem:[%s5035_s2 + $0x8] sm:$0xff]  ;;  %s3860_s16 = sld [smem:[#allocation4 + $0x38]]  ;;  %v5105_v22 = vld [vmem:[%s5035_s2 + $0x10] sm:$0xff] }
  0xc0   : > { %s3859_s24 = sld [smem:[#allocation4 + $0x14]]  ;;  %s5092_s15 = sld [smem:[#allocation4 + $0x80]]  ;;  %vm578_vm1 = vcmask 65536   ;;  %v5133_v35 = vld [vmem:[%s5035_s2 + $0x18] sm:$0xff]  ;;  %v5146_v44 = vld [vmem:[%s5048_s29] sm:$0xff]  ;;  %v5157_v53 = vld [vmem:[%s5048_s29 + $0x8] sm:$0xff] }
  0xc1   : > { %v751_v2 = vstv %s3853_s23  ;;  %v759_v6 = vstv %s3854_s7  ;;  %s5095_s11 = sld [smem:[#allocation4 + $0x5c]]  ;;  %p534_p1 = scmp.lt.s32.totalorder %s4696_s30, 1  ;;  %v5168_v62 = vld [vmem:[%s5048_s29 + $0x10] sm:$0xff]  ;;  %vm569_vm2 = vcmask 63488   ;;  %vm587_vm3 = vcmask 57344  }
  0xc2   : > { %v752_v4 = vmul.f32 %v751_v2, %v5062_v0  ;;  %v735_v5 = vstv %s3851_s6  ;;  %v743_v9 = vstv %s3852_s9  ;;  %v760_v11 = vmul.f32 %v759_v6, %v5062_v0  ;;  %s5100_s18 = sld [smem:[#allocation4 + $0x41]]  ;;  %s5110_s12 = sld [smem:[#allocation4 + $0x1d]] }
  0xc3   : > { %v736_v8 = vmul.f32 %v735_v5, %v5062_v0  ;;  %v744_v12 = vmul.f32 %v743_v9, %v5062_v0  ;;  %v775_v14 = vstv %s5057_s22  ;;  %v767_v15 = vstv %s5059_s25  ;;  %s5108_s8 = scalar_select %p534_p1, %s4696_s30, 1 }
  0xc4   : > { %754 = vrot.lane.b32.xlu1 %v752_v4, %s7771_s21  ;;  %v776_v16 = vmul.f32 %v5083_v13, %v775_v14  ;;  %v768_v17 = vmul.f32 %v5083_v13, %v767_v15  ;;  %v791_v18 = vstv %s5066_s13  ;;  %v783_v19 = vstv %s5070_s19  ;;  %s3866_s23 = sld [smem:[#allocation4 + $0x89]]  ;;  %s3865_s6 = sld [smem:[#allocation4 + $0x65]] }
  0xc5   : > { %738 = vrot.lane.b32.xlu0 %v736_v8, %s7771_s21  ;;  %v792_v20 = vmul.f32 %v5083_v13, %v791_v18  ;;  %v784_v21 = vmul.f32 %v5083_v13, %v783_v19  ;;  %v807_v23 = vstv %s3860_s16  ;;  %s3810_s14 = sshll.u32 %s5108_s8, 2  ;;  %s3906_s7 = sld [smem:[#allocation4 + $0x29]]  ;;  %v5179_v8 = vld [vmem:[%s5048_s29 + $0x18] sm:$0xff]  ;;  %v567_v18 = vld [vmem:[%s5042_s10 + $0x11] sm:$0x7f]  ;;  %vm1405_vm4 = vcmask 64512  }
  0xc6   : > { %v799_v24 = vstv %s3859_s24  ;;  %v808_v25 = vmul.f32 %v5105_v22, %v807_v23  ;;  %s540_s26 = scalar_lea.vmem %s7747_s5, %s3810_s14  ;;  %v823_v27 = vstv %s5092_s15  ;;  %s3905_s9 = sld [smem:[#allocation4 + $0x5]]  ;;  %v568_v19 = vld [vmem:[%s5042_s10 + $0x19] sm:$0x7f]  ;;  %572 = vst.msk [vmem:[#allocation3 + $0x10] sm:$0x7f] %vm569_vm2, %v567_v18  ;;  %vm1403_vm5 = vcmask 60416  }
  0xc7   : > { %v800_v26 = vmul.f32 %v5105_v22, %v799_v24  ;;  %v574_v28 = vld [vmem:[%s540_s26] sm:$0x1]  ;;  %v575_v29 = vld [vmem:[%s540_s26 + $0x1] sm:$0x1]  ;;  %v815_v30 = vstv %s5095_s11  ;;  %v576_v31 = vld [vmem:[%s540_s26 + $0x2] sm:$0x1]  ;;  %v824_v33 = vmul.f32 %v5105_v22, %v823_v27 }
  0xc8   : > { %762 = vrot.lane.b32.xlu1 %v760_v11, %s7771_s21  ;;  %579 = vst.msk [vmem:[#allocation2 + $0x7] sm:$0x1] %vm578_vm1, %v574_v28  ;;  %580 = vst.msk [vmem:[#allocation2 + $0xf] sm:$0x1] %vm578_vm1, %v575_v29  ;;  %v577_v32 = vld [vmem:[%s540_s26 + $0x3] sm:$0x1]  ;;  %v816_v34 = vmul.f32 %v5105_v22, %v815_v30  ;;  %v839_v36 = vstv %s5100_s18  ;;  %v831_v37 = vstv %s5110_s12 }
  0xc9   : > { %746 = vrot.lane.b32.xlu0 %v744_v12, %s7771_s21  ;;  %581 = vst.msk [vmem:[#allocation2 + $0x17] sm:$0x1] %vm578_vm1, %v576_v31  ;;  %582 = vst.msk [vmem:[#allocation2 + $0x1f] sm:$0x1] %vm578_vm1, %v577_v32  ;;  %v840_v38 = vmul.f32 %v5133_v35, %v839_v36  ;;  %v832_v39 = vmul.f32 %v5133_v35, %v831_v37  ;;  %s3908_s22 = sld [smem:[#allocation4 + $0x71]]  ;;  %s3907_s25 = sld [smem:[#allocation4 + $0x4d]] }
  0xca   : > { %v855_v40 = vstv %s3866_s23  ;;  %v847_v41 = vstv %s3865_s6  ;;  %s3910_s13 = sld [smem:[#allocation4 + $0x32]]  ;;  %s3909_s19 = sld [smem:[#allocation4 + $0xe]]  ;;  %573 = vst.msk [vmem:[#allocation3 + $0x18] sm:$0x7f] %vm569_vm2, %v568_v19 }
  0xcb   : > { %v856_v42 = vmul.f32 %v5133_v35, %v855_v40  ;;  %v848_v43 = vmul.f32 %v5133_v35, %v847_v41  ;;  %v1013_v45 = vstv %s3906_s7  ;;  %s3912_s16 = sld [smem:[#allocation4 + $0x7a]]  ;;  %s3911_s24 = sld [smem:[#allocation4 + $0x56]] }
  0xcc   : > { %778 = vrot.lane.b32.xlu1 %v776_v16, %s7771_s21  ;;  %v1005_v46 = vstv %s3905_s9  ;;  %v1014_v47 = vmul.f32 %v1013_v45, %v5146_v44  ;;  %s3914_s15 = sld [smem:[#allocation4 + $0x3b]]  ;;  %s3913_s11 = sld [smem:[#allocation4 + $0x17]]  ;;  %v565_v16 = vld [vmem:[%s5042_s10 + $0x1] sm:$0x7f] }
  0xcd   : > { %770 = vrot.lane.b32.xlu0 %v768_v17, %s7771_s21  ;;  %v1006_v48 = vmul.f32 %v1005_v46, %v5146_v44  ;;  %s3916_s18 = sld [smem:[#allocation4 + $0x83]]  ;;  %s3915_s12 = sld [smem:[#allocation4 + $0x5f]]  ;;  %v566_v17 = vld [vmem:[%s5042_s10 + $0x9] sm:$0x7f]  ;;  %570 = vst.msk [vmem:[#allocation3] sm:$0x7f] %vm569_vm2, %v565_v16 }
  0xce   : > { %s3918_s20 = sld [smem:[#allocation4 + $0x44]]  ;;  %s3917_s27 = sld [smem:[#allocation4 + $0x20]]  ;;  %571 = vst.msk [vmem:[#allocation3 + $0x8] sm:$0x7f] %vm569_vm2, %v566_v17 }
  0xcf   : > { %v1029_v49 = vstv %s3908_s22  ;;  %v1021_v50 = vstv %s3907_s25  ;;  %s3920_s26 = sld [smem:[#allocation4 + $0x8c]]  ;;  %s3919_s23 = sld [smem:[#allocation4 + $0x68]]  ;;  %v5201_v23 = vld [vmem:[#allocation2] sm:$0xff]  ;;  %v5215_v32 = vld [vmem:[#allocation2 + $0x8] sm:$0xff] }
  0xd0   : > { %794 = vrot.lane.b32.xlu1 %v792_v20, %s7771_s21  ;;  %v1030_v51 = vmul.f32 %v1029_v49, %v5146_v44  ;;  %v1022_v52 = vmul.f32 %v1021_v50, %v5146_v44  ;;  %v1045_v54 = vstv %s3910_s13  ;;  %v1037_v55 = vstv %s3909_s19  ;;  %s5181_s6 = sld [smem:[#allocation4 + $0x2c]]  ;;  %s5183_s7 = sld [smem:[#allocation4 + $0x8]] }
  0xd1   : > { %786 = vrot.lane.b32.xlu0 %v784_v21, %s7771_s21  ;;  %v1046_v56 = vmul.f32 %v5157_v53, %v1045_v54  ;;  %v1038_v57 = vmul.f32 %v5157_v53, %v1037_v55  ;;  %v1061_v58 = vstv %s3912_s16  ;;  %v1053_v59 = vstv %s3911_s24  ;;  %s5189_s9 = sld [smem:[#allocation4 + $0x74]]  ;;  %s5191_s22 = sld [smem:[#allocation4 + $0x50]] }
  0xd2   : > { %v1062_v60 = vmul.f32 %v5157_v53, %v1061_v58  ;;  %v1054_v61 = vmul.f32 %v5157_v53, %v1053_v59  ;;  %v1077_v63 = vstv %s3914_s15  ;;  %v1069_v1 = vstv %s3913_s11  ;;  %s3958_s25 = sld [smem:[#allocation4 + $0x35]]  ;;  %s3957_s13 = sld [smem:[#allocation4 + $0x11]] }
  0xd3   : > { %v1078_v2 = vmul.f32 %v5168_v62, %v1077_v63  ;;  %v1070_v3 = vmul.f32 %v5168_v62, %v1069_v1  ;;  %v1093_v4 = vstv %s3916_s18  ;;  %v1085_v5 = vstv %s3915_s12  ;;  %s3960_s19 = sld [smem:[#allocation4 + $0x7d]]  ;;  %s3959_s16 = sld [smem:[#allocation4 + $0x59]] }
  0xd4   : > { %810 = vrot.lane.b32.xlu1 %v808_v25, %s7771_s21  ;;  %v1094_v6 = vmul.f32 %v5168_v62, %v1093_v4  ;;  %v1086_v7 = vmul.f32 %v5168_v62, %v1085_v5  ;;  %v1109_v9 = vstv %s3918_s20  ;;  %v1101_v10 = vstv %s3917_s27  ;;  %s3962_s24 = sld [smem:[#allocation4 + $0x3e]]  ;;  %s3961_s15 = sld [smem:[#allocation4 + $0x1a]] }
  0xd5   : > { %802 = vrot.lane.b32.xlu0 %v800_v26, %s7771_s21  ;;  %v1110_v11 = vmul.f32 %v5179_v8, %v1109_v9  ;;  %v1102_v12 = vmul.f32 %v5179_v8, %v1101_v10  ;;  %v1125_v14 = vstv %s3920_s26  ;;  %v1117_v15 = vstv %s3919_s23  ;;  %s3964_s11 = sld [smem:[#allocation4 + $0x86]]  ;;  %s3963_s18 = sld [smem:[#allocation4 + $0x62]] }
  0xd6   : > { %v1126_v20 = vmul.f32 %v5179_v8, %v1125_v14  ;;  %v1118_v21 = vmul.f32 %v5179_v8, %v1117_v15  ;;  %v1283_v24 = vstv %s5181_s6  ;;  %v1275_v25 = vstv %s5183_s7  ;;  %s5227_s12 = sld [smem:[#allocation4 + $0x47]]  ;;  %s5229_s20 = sld [smem:[#allocation4 + $0x23]] }
  0xd7   : > { %v1284_v26 = vmul.f32 %v1283_v24, %v5201_v23  ;;  %v1276_v27 = vmul.f32 %v1275_v25, %v5201_v23  ;;  %v1299_v28 = vstv %s5189_s9  ;;  %v1291_v29 = vstv %s5191_s22  ;;  %s7807_s23 = sld [smem:[#allocation46_spill]]  ;;  %s5240_s7 = sld [smem:[#allocation4 + $0x8f]] }
  0xd8   : > { %826 = vrot.lane.b32.xlu1 %v824_v33, %s7771_s21  ;;  %v1300_v30 = vmul.f32 %v1299_v28, %v5201_v23  ;;  %v1292_v31 = vmul.f32 %v1291_v29, %v5201_v23  ;;  %v1315_v33 = vstv %s3958_s25  ;;  %s5242_s9 = sld [smem:[#allocation4 + $0x6b]]  ;;  %s5254_s22 = sld [smem:[#allocation4 + $0xb6]] }
  0xd9   : > { %818 = vrot.lane.b32.xlu0 %v816_v34, %s7771_s21  ;;  %v1307_v34 = vstv %s3957_s13  ;;  %v1316_v36 = vmul.f32 %v1315_v33, %v5215_v32  ;;  %s5261_s25 = sld [smem:[#allocation4 + $0xda]]  ;;  %s5264_s13 = sld [smem:[#allocation4 + $0x9b]] }
  0xda   : > { %v1308_v37 = vmul.f32 %v1307_v34, %v5215_v32  ;;  %v1339_v45 = vstv %s3961_s15  ;;  %s5276_s15 = sld [smem:[#allocation4 + $0x24]]  ;;  %s5288_s27 = sld [smem:[#allocation4 + $0x9]] }
  0xdb   : > { %v1355_v49 = vstv %s3963_s18  ;;  %s5281_s18 = sld [smem:[#allocation4 + $0x2d]]  ;;  %s5291_s26 = sld [smem:[#allocation4 + $0x6c]] }
  0xdc   : > { %842 = vrot.lane.b32.xlu1 %v840_v38, %s7771_s21  ;;  %v1331_v38 = vstv %s3960_s19  ;;  %v1379_v58 = vstv %s5227_s12  ;;  %v1371_v59 = vstv %s5229_s20  ;;  %s5266_s19 = sld [smem:[#allocation4 + $0x48]]  ;;  %s5284_s12 = sld [smem:[#allocation4 + $0xe3]] }
  0xdd   : > { %834 = vrot.lane.b32.xlu0 %v832_v39, %s7771_s21  ;;  %v1323_v39 = vstv %s3959_s16  ;;  %v1332_v40 = vmul.f32 %v1331_v38, %v5215_v32  ;;  %s547_s6 = scalar_lea.vmem %s7807_s23, %s3810_s14  ;;  %s5251_s14 = sld [smem:[#allocation4 + $0x92]]  ;;  %v1395_v63 = vstv %s5240_s7 }
  0xde   : > { %v1324_v41 = vmul.f32 %v1323_v39, %v5215_v32  ;;  %v583_v50 = vld [vmem:[%s547_s6] sm:$0x1]  ;;  %v585_v54 = vld [vmem:[%s547_s6 + $0x2] sm:$0x1]  ;;  %v586_v55 = vld [vmem:[%s547_s6 + $0x3] sm:$0x1]  ;;  %v1387_v1 = vstv %s5242_s9 }
  0xdf   : > { %588 = vst.msk [vmem:[#allocation3 + $0x7] sm:$0x1] %vm587_vm3, %v583_v50  ;;  %590 = vst.msk [vmem:[#allocation3 + $0x17] sm:$0x1] %vm587_vm3, %v585_v54  ;;  %s5270_s16 = sld [smem:[#allocation4 + $0x51]]  ;;  %v1644_v5 = vstv %s5254_s22  ;;  %s5286_s20 = sld [smem:[#allocation4]]  ;;  %v1652_v9 = vstv %s5261_s25  ;;  %v1668_v10 = vstv %s5264_s13 }
  0xe0   : > { %858 = vrot.lane.b32.xlu1 %v856_v42, %s7771_s21  ;;  %v5225_v42 = vld [vmem:[#allocation2 + $0x10] sm:$0xff]  ;;  %591 = vst.msk [vmem:[#allocation3 + $0x1f] sm:$0x1] %vm587_vm3, %v586_v55  ;;  %s5293_s23 = sld [smem:[#allocation4 + $0x75]]  ;;  %s5301_s7 = sld [smem:[#allocation4 + $0x36]]  ;;  %v1653_v14 = vmul.f32 %v1652_v9, %v5062_v0  ;;  %v1669_v15 = vmul.f32 %v5083_v13, %v1668_v10  ;;  %v598_v17 = vstv %s5276_s15  ;;  %v612_v25 = vstv %s5288_s27  ;;  %v663_v10 = vld [vmem:[%s5042_s10] sm:$0xff] }
  0xe1   : > { %850 = vrot.lane.b32.xlu0 %v848_v43, %s7771_s21  ;;  %v1347_v43 = vstv %s3962_s24  ;;  %s5272_s24 = sld [smem:[#allocation4 + $0x5a]]  ;;  %s5304_s9 = sld [smem:[#allocation4 + $0xa4]]  ;;  %v616_v18 = vstv %s5281_s18 }
  0xe2   : > { %v1348_v46 = vmul.f32 %v1347_v43, %v5225_v42  ;;  %s5308_s22 = sld [smem:[#allocation4 + $0x12]]  ;;  %s7808_s25 = smov 127   ;;  %v1684_v19 = vstv %s5284_s12 }
  0xe3   : > { %v1636_v4 = vstv %s5251_s14  ;;  %s5306_s14 = sld [smem:[#allocation4 + $0x63]]  ;;  %s5319_s13 = sld [smem:[#allocation4 + $0x107]]  ;;  %v1685_v33 = vmul.f32 %v5083_v13, %v1684_v19 }
  0xe4   : > { %1016 = vrot.lane.b32.xlu1 %v1014_v47, %s7771_s21  ;;  %v1340_v47 = vmul.f32 %v1339_v45, %v5225_v42  ;;  %s5329_s0 = sld [smem:[#allocation4 + $0x49]]  ;;  %s5334_s3 = sld [smem:[#allocation4 + $0x1b]] }
  0xe5   : > { %1008 = vrot.lane.b32.xlu0 %v1006_v48, %s7771_s21  ;;  %v1363_v48 = vstv %s3964_s11  ;;  %s5279_s11 = sld [smem:[#allocation4 + $0xfe]]  ;;  %v594_v24 = vstv %s5286_s20  ;;  %s5339_s15 = sld [smem:[#allocation4 + $0x87]] }
  0xe6   : > { %v624_v28 = vstv %s5293_s23  ;;  %v634_v38 = vstv %s5301_s7  ;;  %s5355_s18 = sld [smem:[#allocation4 + $0x25]]  ;;  %s5363_s20 = sld [smem:[#allocation4 + $0x1]] }
  0xe7   : > { %v1700_v39 = vstv %s5304_s9  ;;  %s5358_s12 = sld [smem:[#allocation4 + $0xad]]  ;;  %s5365_s27 = sld [smem:[#allocation4 + $0xa]]  ;;  %v635_v50 = vmul.f32 %v5105_v22, %v634_v38 }
  0xe8   : > { %1032 = vrot.lane.b32.xlu1 %v1030_v51, %s7771_s21  ;;  %v1364_v51 = vmul.f32 %v1363_v48, %v5225_v42  ;;  %v630_v45 = vstv %s5308_s22  ;;  %s5382_s23 = sld [smem:[#allocation4 + $0x2e]]  ;;  %s5390_s7 = sld [smem:[#allocation4 + $0x13]] }
  0xe9   : > { %1024 = vrot.lane.b32.xlu0 %v1022_v52, %s7771_s21  ;;  %v584_v52 = vld [vmem:[%s547_s6 + $0x1] sm:$0x1]  ;;  %s5299_s6 = sld [smem:[#allocation4 + $0xbf]]  ;;  %v1692_v54 = vstv %s5319_s13  ;;  %v631_v55 = vmul.f32 %v5105_v22, %v630_v45  ;;  %s5429_s22 = sld [smem:[#allocation4 + $0x40]] }
  0xea   : > { %589 = vst.msk [vmem:[#allocation3 + $0xf] sm:$0x1] %vm587_vm3, %v584_v52  ;;  %v1701_v52 = vmul.f32 %v5105_v22, %v1700_v39  ;;  %s5407_s9 = sld [smem:[#allocation4 + $0x37]]  ;;  %s5432_s13 = sld [smem:[#allocation4 + $0x64]] }
  0xeb   : > { %v1660_v16 = vstv %s5279_s11  ;;  %s5343_s11 = sld [smem:[#allocation4 + $0x52]] }
  0xec   : > { %1048 = vrot.lane.b32.xlu1 %v1046_v56, %s7771_s21  ;;  %v1356_v56 = vmul.f32 %v1355_v49, %v5225_v42  ;;  %v1661_v29 = vmul.f32 %v1660_v16, %v5062_v0 }
  0xed   : > { %1040 = vrot.lane.b32.xlu0 %v1038_v57, %s7771_s21  ;;  %v5248_v57 = vld [vmem:[#allocation2 + $0x18] sm:$0xff]  ;;  %v683_v19 = vstv %s5365_s27  ;;  %s5472_s27 = sld [smem:[#allocation4 + $0x15]] }
  0xef   : > { %v1676_v34 = vstv %s5299_s6  ;;  %s5387_s6 = sld [smem:[#allocation4 + $0x5b]] }
  0xf0   : > { %1064 = vrot.lane.b32.xlu1 %v1062_v60, %s7771_s21  ;;  %v1380_v60 = vmul.f32 %v1379_v58, %v5248_v57  ;;  %v1677_v49 = vmul.f32 %v5083_v13, %v1676_v34 }
  0xf1   : > { %1056 = vrot.lane.b32.xlu0 %v1054_v61, %s7771_s21  ;;  %v1372_v61 = vmul.f32 %v1371_v59, %v5248_v57 }
  0xf4   : > { %1080 = vrot.lane.b32.xlu1 %v1078_v2, %s7771_s21  ;;  %v1396_v2 = vmul.f32 %v1395_v63, %v5248_v57  ;;  %v648_v63 = vstv %s5334_s3  ;;  %s5404_s3 = sld [smem:[#allocation4 + $0x76]] }
  0xf5   : > { %1072 = vrot.lane.b32.xlu0 %v1070_v3, %s7771_s21  ;;  %v1388_v3 = vmul.f32 %v1387_v1, %v5248_v57  ;;  %v709_v38 = vstv %s5387_s6  ;;  %s5481_s6 = sld [smem:[#allocation4 + $0x81]] }
  0xf8   : > { %1096 = vrot.lane.b32.xlu1 %v1094_v6, %s7771_s21  ;;  %v1637_v6 = vmul.f32 %v1636_v4, %v5062_v0  ;;  %v1693_v4 = vmul.f32 %v5083_v13, %v1692_v54 }
  0xf9   : > { %1088 = vrot.lane.b32.xlu0 %v1086_v7, %s7771_s21  ;;  %v1645_v7 = vmul.f32 %v1644_v5, %v5062_v0 }
  0xfa   : > { %v695_v54 = vstv %s5404_s3  ;;  %s5493_s3 = sld [smem:[#allocation4 + $0x54]] }
  0xfc   : > { %1112 = vrot.lane.b32.xlu1 %v1110_v11, %s7771_s21  ;;  %v602_v11 = vstv %s5266_s19  ;;  %s5323_s19 = sld [smem:[#allocation4 + $0x3f]] }
  0xfd   : > { %1104 = vrot.lane.b32.xlu0 %v1102_v12, %s7771_s21  ;;  %v620_v12 = vstv %s5270_s16  ;;  %s5326_s16 = sld [smem:[#allocation4 + $0xec]] }
 0x100   : > { %1128 = vrot.lane.b32.xlu1 %v1126_v20, %s7771_s21  ;;  %v621_v20 = vmul.f32 %v5083_v13, %v620_v12 }
 0x101   : > { %1120 = vrot.lane.b32.xlu0 %v1118_v21, %s7771_s21  ;;  %v603_v21 = vmul.f32 %v602_v11, %v5062_v0  ;;  %v649_v11 = vmul.f32 %v5133_v35, %v648_v63 }
 0x103   : > { %v622_v43 = vadd.f32 %v621_v20, %v603_v21  ;;  %v1716_v58 = vstv %s5326_s16  ;;  %s5439_s16 = sld [smem:[#allocation4 + $0x88]] }
 0x104   : > { %1286 = vrot.lane.b32.xlu1 %v1284_v26, %s7771_s21  ;;  %v638_v26 = vstv %s5272_s24  ;;  %s5350_s24 = sld [smem:[#allocation4 + $0xc8]] }
 0x105   : > { %1278 = vrot.lane.b32.xlu0 %v1276_v27, %s7771_s21  ;;  %v606_v27 = vstv %s5291_s26  ;;  %s5369_s26 = sld [smem:[#allocation4 + $0x6d]] }
 0x106   : > { %v607_v48 = vmul.f32 %v606_v27, %v5062_v0 }
 0x108   : > { %1302 = vrot.lane.b32.xlu1 %v1300_v30, %s7771_s21  ;;  %v617_v30 = vmul.f32 %v5083_v13, %v616_v18  ;;  %v665_v18 = vstv %s5363_s20  ;;  %s5469_s20 = sld [smem:[#allocation4 + $0xc]] }
 0x109   : > { %1294 = vrot.lane.b32.xlu0 %v1292_v31, %s7771_s21  ;;  %v599_v31 = vmul.f32 %v598_v17, %v5062_v0  ;;  %v691_v17 = vstv %s5343_s11  ;;  %s5454_s11 = sld [smem:[#allocation4 + $0x30]] }
 0x10a   : > { %v1708_v9 = vstv %s5350_s24  ;;  %s5458_s24 = sld [smem:[#allocation4 + $0x39]] }
 0x10b   : > { %v677_v21 = vstv %s5369_s26  ;;  %s5474_s26 = sld [smem:[#allocation4 + $0x1e]] }
 0x10c   : > { %1318 = vrot.lane.b32.xlu1 %v1316_v36, %s7771_s21  ;;  %v613_v36 = vmul.f32 %v5083_v13, %v612_v25  ;;  %v1709_v25 = vmul.f32 %v5105_v22, %v1708_v9  ;;  %v727_v9 = vstv %s5432_s13  ;;  %s5518_s13 = sld [smem:[#allocation4 + $0x31]] }
 0x10d   : > { %1310 = vrot.lane.b32.xlu0 %v1308_v37, %s7771_s21  ;;  %v595_v37 = vmul.f32 %v594_v24, %v5062_v0  ;;  %v652_v0 = vstv %s5323_s19  ;;  %s5434_s19 = sld [smem:[#allocation4 + $0x1c]] }
 0x10e   : > { %v653_v5 = vmul.f32 %v5133_v35, %v652_v0 }
 0x110   : > { %1334 = vrot.lane.b32.xlu1 %v1332_v40, %s7771_s21  ;;  %v639_v40 = vmul.f32 %v5105_v22, %v638_v26  ;;  %v3836_v26 = vld [vmem:[%s5042_s10 + $0x8] sm:$0xff] }
 0x111   : > { %1326 = vrot.lane.b32.xlu0 %v1324_v41, %s7771_s21  ;;  %v656_v41 = vstv %s5306_s14  ;;  %s5426_s14 = sld [smem:[#allocation4 + $0x7f]] }
 0x112   : > { %v657_v59 = vmul.f32 %v5133_v35, %v656_v41  ;;  %v701_v41 = vstv %s5390_s7  ;;  %s5485_s7 = sld [smem:[#allocation4 + $0x8a]] }
 0x114   : > { %1350 = vrot.lane.b32.xlu1 %v1348_v46, %s7771_s21  ;;  %v625_v46 = vmul.f32 %v5083_v13, %v624_v28  ;;  %v669_v13 = vstv %s5355_s18  ;;  %s5460_s18 = sld [smem:[#allocation4 + $0x42]] }
 0x115   : > { %1342 = vrot.lane.b32.xlu0 %v1340_v47, %s7771_s21  ;;  %v670_v27 = vmul.f32 %v669_v13, %v663_v10 }
 0x118   : > { %1366 = vrot.lane.b32.xlu1 %v1364_v51, %s7771_s21  ;;  %v618_v51 = vadd.f32 %v617_v30, %v599_v31 }
 0x119   : > { %1358 = vrot.lane.b32.xlu0 %v1356_v56, %s7771_s21  ;;  %v614_v56 = vadd.f32 %v613_v36, %v595_v37  ;;  %v687_v36 = vstv %s5382_s23  ;;  %v692_v37 = vmul.f32 %v3836_v26, %v691_v17  ;;  %s5479_s23 = sld [smem:[#allocation4 + $0x78]] }
 0x11b   : > { %v632_v12 = vadd.f32 %v631_v55, %v614_v56  ;;  %v705_v56 = vstv %s5407_s9  ;;  %s5495_s9 = sld [smem:[#allocation4 + $0x5d]] }
 0x11c   : > { %1382 = vrot.lane.b32.xlu1 %v1380_v60, %s7771_s21  ;;  %v673_v60 = vstv %s5329_s0  ;;  %s5400_s0 = sld [smem:[#allocation4 + $0xd1]] }
 0x11d   : > { %1374 = vrot.lane.b32.xlu0 %v1372_v61, %s7771_s21  ;;  %v640_v61 = vadd.f32 %v639_v40, %v622_v43  ;;  %v674_v16 = vmul.f32 %v673_v60, %v663_v10  ;;  %v650_v34 = vadd.f32 %v649_v11, %v632_v12  ;;  %v684_v40 = vmul.f32 %v3836_v26, %v683_v19 }
 0x11e   : > { %v678_v43 = vmul.f32 %v677_v21, %v663_v10  ;;  %v696_v60 = vmul.f32 %v3836_v26, %v695_v54  ;;  %v731_v12 = vstv %s5439_s16  ;;  %s5531_s16 = sld [smem:[#allocation4 + $0x4]] }
 0x11f   : > { %v894_v54 = vstv %s5479_s23  ;;  %s5584_s23 = sld [smem:[#allocation4 + $0x5e]] }
 0x120   : > { %1398 = vrot.lane.b32.xlu1 %v1396_v2, %s7771_s21  ;;  %v660_v2 = vstv %s5339_s15  ;;  %s5452_s15 = sld [smem:[#allocation4 + $0x27]] }
 0x121   : > { %1390 = vrot.lane.b32.xlu0 %v1388_v3, %s7771_s21  ;;  %s5312_s21 = sld [smem:[#allocation4 + $0x7e]]  ;;  %v626_v3 = vadd.f32 %v625_v46, %v607_v48  ;;  %v661_v20 = vmul.f32 %v5133_v35, %v660_v2  ;;  %v658_v35 = vadd.f32 %v657_v59, %v640_v61  ;;  %v3841_v46 = vld [vmem:[%s5042_s10 + $0x10] sm:$0xff]  ;;  %v688_v48 = vmul.f32 %v3836_v26, %v687_v36 }
 0x122   : > { %v702_v59 = vmul.f32 %v3841_v46, %v701_v41  ;;  %v706_v63 = vmul.f32 %v3841_v46, %v705_v56 }
 0x124   : > { %1639 = vrot.lane.b32.xlu1 %v1637_v6, %s7808_s25  ;;  %v636_v6 = vadd.f32 %v635_v50, %v618_v51  ;;  %v1740_v50 = vstv %s5400_s0  ;;  %v675_v51 = vadd.f32 %v674_v16, %v658_v35  ;;  %s5489_s0 = sld [smem:[#allocation4 + $0x4b]]  ;;  %v904_v35 = vstv %s5458_s24  ;;  %s5550_s24 = sld [smem:[#allocation4 + $0x70]] }
 0x125   : > { %1647 = vrot.lane.b32.xlu0 %v1645_v7, %s7808_s25  ;;  %v1717_v7 = vmul.f32 %v5105_v22, %v1716_v58  ;;  %v710_v58 = vmul.f32 %v3841_v46, %v709_v38 }
 0x126   : > { %v654_v28 = vadd.f32 %v653_v5, %v636_v6  ;;  %v693_v2 = vadd.f32 %v692_v37, %v675_v51  ;;  %v723_v5 = vstv %s5429_s22  ;;  %s5513_s22 = sld [smem:[#allocation4 + $0x28]] }
 0x127   : > { %v642_v47 = vstv %s5312_s21  ;;  %s5378_s21 = sld [smem:[#allocation4 + $0x110]] }
 0x128   : > { %1655 = vrot.lane.b32.xlu1 %v1653_v14, %s7808_s25  ;;  %v643_v1 = vmul.f32 %v5105_v22, %v642_v47  ;;  %v5410_v14 = vld [vmem:[%s5035_s2 + $0x18] sm:$0xff]  ;;  %v711_v19 = vadd.f32 %v710_v58, %v693_v2  ;;  %v930_v2 = vstv %s5485_s7  ;;  %s5600_s7 = sld [smem:[#allocation4 + $0x67]] }
 0x129   : > { %1671 = vrot.lane.b32.xlu0 %v1669_v15, %s7808_s25  ;;  %v1732_v15 = vstv %s5358_s12  ;;  %s5467_s12 = sld [smem:[#allocation4 + $0x3]] }
 0x12a   : > { %v644_v24 = vadd.f32 %v643_v1, %v626_v3 }
 0x12c   : > { %1663 = vrot.lane.b32.xlu1 %v1661_v29, %s7808_s25  ;;  %v1733_v29 = vmul.f32 %v5410_v14, %v1732_v15  ;;  %v662_v47 = vadd.f32 %v661_v20, %v644_v24 }
 0x12d   : > { %1687 = vrot.lane.b32.xlu0 %v1685_v33, %s7808_s25  ;;  %v1724_v30 = vstv %s5378_s21  ;;  %v666_v33 = vmul.f32 %v665_v18, %v663_v10  ;;  %v719_v10 = vstv %s5434_s19  ;;  %s5477_s21 = sld [smem:[#allocation4 + $0x6f]]  ;;  %s5524_s19 = sld [smem:[#allocation4 + $0x3a]] }
 0x12e   : > { %v1725_v45 = vmul.f32 %v5105_v22, %v1724_v30  ;;  %v1741_v22 = vmul.f32 %v5410_v14, %v1740_v50  ;;  %v679_v61 = vadd.f32 %v678_v43, %v662_v47 }
 0x12f   : > { %v864_v43 = vstv %s5467_s12  ;;  %s5556_s12 = sld [smem:[#allocation4 + $0x4c]] }
 0x130   : > { %1679 = vrot.lane.b32.xlu1 %v1677_v49, %s7808_s25  ;;  %v671_v49 = vadd.f32 %v670_v27, %v654_v28  ;;  %v697_v15 = vadd.f32 %v696_v60, %v679_v61  ;;  %v868_v27 = vstv %s5452_s15  ;;  %v886_v28 = vstv %s5454_s11  ;;  %s5536_s15 = sld [smem:[#allocation4 + $0x43]]  ;;  %s5543_s11 = sld [smem:[#allocation4 + $0xd]] }
 0x131   : > { %1703 = vrot.lane.b32.xlu0 %v1701_v52, %s7808_s25  ;;  %v667_v52 = vadd.f32 %v666_v33, %v650_v34  ;;  %v922_v33 = vstv %s5460_s18  ;;  %v5499_v41 = vmul.f32 %v5157_v53, %v886_v28  ;;  %v912_v60 = vstv %s5481_s6  ;;  %s5554_s18 = sld [smem:[#allocation4 + $0x16]]  ;;  %s5596_s6 = sld [smem:[#allocation4 + $0x8b]] }
 0x132   : > { %v689_v1 = vadd.f32 %v688_v48, %v671_v49  ;;  %v5509_v47 = vmul.f32 %v5179_v8, %v922_v33  ;;  %v900_v48 = vstv %s5472_s27  ;;  %v918_v49 = vstv %s5474_s26  ;;  %s5567_s27 = sld [smem:[#allocation4 + $0x55]]  ;;  %s5574_s26 = sld [smem:[#allocation4 + $0x1f]] }
 0x133   : > { %v685_v3 = vadd.f32 %v684_v40, %v667_v52  ;;  %v869_v40 = vmul.f32 %v868_v27, %v5146_v44  ;;  %v876_v52 = vstv %s5477_s21  ;;  %v933_v27 = vld [vmem:[%s5051_s1] sm:$0xff]  ;;  %s5579_s21 = sld [smem:[#allocation4 + $0x82]] }
 0x134   : > { %1695 = vrot.lane.b32.xlu1 %v1693_v4, %s7808_s25  ;;  %v713_v4 = vstv %s5426_s14  ;;  %v707_v17 = vadd.f32 %v706_v63, %v689_v1  ;;  %s5503_s14 = sld [smem:[#allocation4 + $0x66]]  ;;  %v5528_v1 = vmul.f32 %v5179_v8, %v918_v49 }
 0x135   : > { %1719 = vrot.lane.b32.xlu0 %v1717_v7, %s7808_s25  ;;  %v3846_v7 = vld [vmem:[%s5042_s10 + $0x18] sm:$0xff]  ;;  %v714_v13 = vmul.f32 %v3841_v46, %v713_v4  ;;  %v703_v21 = vadd.f32 %v702_v59, %v685_v3  ;;  %v5506_v46 = vmul.f32 %v5168_v62, %v904_v35  ;;  %v865_v59 = vmul.f32 %v864_v43, %v5146_v44 }
 0x136   : > { %v5424_v31 = vpop.permute.xlu1 %754  ;;  %v724_v16 = vmul.f32 %v3846_v7, %v723_v5  ;;  %v728_v18 = vmul.f32 %v3846_v7, %v727_v9  ;;  %v720_v20 = vmul.f32 %v3846_v7, %v719_v10  ;;  %v732_v26 = vmul.f32 %v3846_v7, %v731_v12 }
 0x137   : > { %v5436_v39 = vpop.permute.xlu0 %738  ;;  %v877_v3 = vmul.f32 %v876_v52, %v5146_v44  ;;  %v895_v4 = vmul.f32 %v5157_v53, %v894_v54  ;;  %v872_v5 = vstv %s5489_s0  ;;  %v5540_v9 = vmul.f32 %v5168_v62, %v912_v60  ;;  %s5611_s0 = sld [smem:[#allocation4 + $0x2a]] }
 0x138   : > { %1711 = vrot.lane.b32.xlu1 %v1709_v25, %s7808_s25  ;;  %v725_v30 = vadd.f32 %v724_v16, %v707_v17  ;;  %v729_v34 = vadd.f32 %v728_v18, %v711_v19  ;;  %v721_v36 = vadd.f32 %v720_v20, %v703_v21  ;;  %v890_v10 = vstv %s5493_s3  ;;  %s5614_s3 = sld [smem:[#allocation4 + $0x33]] }
 0x139   : > { %1735 = vrot.lane.b32.xlu0 %v1733_v29, %s7808_s25  ;;  %v715_v29 = vadd.f32 %v714_v13, %v697_v15  ;;  %v5547_v15 = vmul.f32 %v5179_v8, %v930_v2  ;;  %v908_v16 = vstv %s5495_s9  ;;  %v873_v19 = vmul.f32 %v872_v5, %v5146_v44  ;;  %s5616_s9 = sld [smem:[#allocation4 + $0x3c]] }
 0x13a   : > { %v5447_v55 = vpop.permute.xlu1 %762  ;;  %v741_v56 = vadd.f32 %v5436_v39, %v721_v36  ;;  %v757_v12 = vadd.f32 %v5424_v31, %v729_v34  ;;  %v926_v20 = vstv %s5503_s14  ;;  %v909_v44 = vmul.f32 %v5168_v62, %v908_v16  ;;  %s5618_s14 = sld [smem:[#allocation4 + $0x45]] }
 0x13b   : > { %v5450_v0 = vpop.permute.xlu0 %746  ;;  %v733_v50 = vadd.f32 %v732_v26, %v715_v29  ;;  %v891_v26 = vmul.f32 %v5157_v53, %v890_v10  ;;  %v957_v35 = vstv %s5518_s13  ;;  %v927_v36 = vmul.f32 %v5179_v8, %v926_v20  ;;  %s5623_s13 = sld [smem:[#allocation4 + $0xf]] }
 0x13c   : > { %1727 = vrot.lane.b32.xlu1 %v1725_v45, %s7808_s25  ;;  %v882_v45 = vstv %s5469_s20  ;;  %v749_v51 = vadd.f32 %v5450_v0, %v725_v30  ;;  %v901_v0 = vmul.f32 %v5168_v62, %v900_v48  ;;  %s5562_s20 = sld [smem:[#allocation4 + $0x79]]  ;;  %v3890_v30 = vld [vmem:[%s5051_s1 + $0x8] sm:$0xff]  ;;  %v947_v60 = vstv %s5550_s24  ;;  %s5640_s24 = sld [smem:[#allocation4 + $0x84]] }
 0x13d   : > { %v971_v2 = vstv %s5554_s18  ;;  %s5642_s18 = sld [smem:[#allocation4 + $0x8d]] }
 0x13e   : > { %v779_v6 = vpop.permute.xlu1 %778 }
 0x13f   : > { %v771_v11 = vpop.permute.xlu0 %770  ;;  %v781_v61 = vadd.f32 %v779_v6, %v749_v51  ;;  %v765_v6 = vadd.f32 %v5447_v55, %v733_v50  ;;  %v958_v50 = vmul.f32 %v3890_v30, %v957_v35  ;;  %v993_v51 = vstv %s5536_s15  ;;  %s5634_s15 = sld [smem:[#allocation4 + $0x72]] }
 0x140   : > { %1743 = vrot.lane.b32.xlu1 %v1741_v22, %s7808_s25  ;;  %v883_v22 = vmul.f32 %v5157_v53, %v882_v45  ;;  %v773_v39 = vadd.f32 %v771_v11, %v741_v56  ;;  %v5571_v53 = vld [vmem:[%s5051_s1 + $0x10] sm:$0xff]  ;;  %v935_v45 = vstv %s5531_s16  ;;  %s5629_s16 = sld [smem:[#allocation4 + $0x21]] }
 0x142   : > { %v795_v24 = vpop.permute.xlu1 %794 }
 0x143   : > { %v5483_v25 = vpop.permute.xlu0 %786  ;;  %v797_v55 = vadd.f32 %v795_v24, %v765_v6  ;;  %v939_v24 = vstv %s5513_s22  ;;  %s5620_s22 = sld [smem:[#allocation4 + $0x6]] }
 0x144   : > { %v789_v31 = vadd.f32 %v5483_v25, %v757_v12  ;;  %v940_v43 = vmul.f32 %v939_v24, %v933_v27  ;;  %v948_v12 = vmul.f32 %v947_v60, %v933_v27 }
 0x146   : > { %v811_v37 = vpop.permute.xlu1 %810 }
 0x147   : > { %v803_v38 = vpop.permute.xlu0 %802  ;;  %v813_v7 = vadd.f32 %v811_v37, %v781_v61  ;;  %v975_v37 = vstv %s5524_s19  ;;  %s5625_s19 = sld [smem:[#allocation4 + $0x18]] }
 0x148   : > { %v805_v11 = vadd.f32 %v803_v38, %v773_v39  ;;  %v976_v54 = vmul.f32 %v5571_v53, %v975_v37  ;;  %v943_v39 = vstv %s5556_s12  ;;  %v1001_v37 = vstv %s5596_s6  ;;  %s5645_s12 = sld [smem:[#allocation4 + $0x4e]]  ;;  %s5685_s6 = sld [smem:[#allocation4 + $0x3d]] }
 0x14a   : > { %v827_v58 = vpop.permute.xlu1 %826 }
 0x14b   : > { %v819_v63 = vpop.permute.xlu0 %818  ;;  %v829_v28 = vadd.f32 %v827_v58, %v797_v55 }
 0x14c   : > { %v821_v25 = vadd.f32 %v819_v63, %v789_v31 }
 0x14e   : > { %v843_v13 = vpop.permute.xlu1 %842 }
 0x14f   : > { %v845_v17 = vadd.f32 %v843_v13, %v813_v7  ;;  %v835_v18 = vpop.permute.xlu0 %834 }
 0x150   : > { %v837_v21 = vadd.f32 %v835_v18, %v805_v11  ;;  %v989_v11 = vstv %s5574_s26  ;;  %s5655_s26 = sld [smem:[#allocation4 + $0x69]] }
 0x151   : > { %v870_v29 = vadd.f32 %v869_v40, %v845_v17  ;;  %v3900_v17 = vld [vmem:[%s5051_s1 + $0x18] sm:$0xff] }
 0x152   : > { %v866_v33 = vadd.f32 %v865_v59, %v837_v21  ;;  %v859_v34 = vpop.permute.xlu1 %858 }
 0x153   : > { %v888_v38 = vadd.f32 %v5499_v41, %v870_v29  ;;  %v861_v40 = vadd.f32 %v859_v34, %v829_v28  ;;  %v851_v62 = vpop.permute.xlu0 %850  ;;  %v953_v41 = vstv %s5543_s11  ;;  %v979_v29 = vstv %s5584_s23  ;;  %s5638_s11 = sld [smem:[#allocation4 + $0x7b]]  ;;  %s5678_s23 = sld [smem:[#allocation4 + $0x34]] }
 0x154   : > { %v884_v48 = vadd.f32 %v883_v22, %v866_v33  ;;  %v853_v49 = vadd.f32 %v851_v62, %v821_v25  ;;  %v936_v22 = vmul.f32 %v935_v45, %v933_v27  ;;  %v954_v6 = vmul.f32 %v3890_v30, %v953_v41 }
 0x155   : > { %v906_v8 = vadd.f32 %v5506_v46, %v888_v38  ;;  %v878_v52 = vadd.f32 %v877_v3, %v861_v40  ;;  %v990_v25 = vmul.f32 %v3900_v17, %v989_v11  ;;  %v980_v38 = vmul.f32 %v5571_v53, %v979_v29 }
 0x156   : > { %v902_v56 = vadd.f32 %v901_v0, %v884_v48  ;;  %v874_v58 = vadd.f32 %v873_v19, %v853_v49  ;;  %v5586_v59 = vpop.permute.xlu1 %1016  ;;  %v965_v0 = vstv %s5562_s20  ;;  %v972_v19 = vmul.f32 %v5571_v53, %v971_v2  ;;  %s5647_s20 = sld [smem:[#allocation4 + $0x57]] }
 0x157   : > { %v924_v61 = vadd.f32 %v5509_v47, %v906_v8  ;;  %v896_v63 = vadd.f32 %v895_v4, %v878_v52  ;;  %v5591_v46 = vpop.permute.xlu0 %1008  ;;  %v961_v47 = vstv %s5567_s27  ;;  %v997_v62 = vstv %s5600_s7  ;;  %s5653_s27 = sld [smem:[#allocation4 + $0x60]]  ;;  %s5687_s7 = sld [smem:[#allocation4 + $0x7]] }
 0x158   : > { %v920_v3 = vadd.f32 %v5528_v1, %v902_v56  ;;  %v892_v5 = vadd.f32 %v891_v26, %v874_v58  ;;  %v944_v1 = vmul.f32 %v943_v39, %v933_v27  ;;  %v983_v26 = vstv %s5579_s21  ;;  %s5676_s21 = sld [smem:[#allocation4 + $0x2b]] }
 0x159   : > { %v914_v7 = vadd.f32 %v5540_v9, %v896_v63  ;;  %v941_v10 = vadd.f32 %v940_v43, %v924_v61  ;;  %v966_v9 = vmul.f32 %v3890_v30, %v965_v0  ;;  %v962_v24 = vmul.f32 %v3890_v30, %v961_v47 }
 0x15a   : > { %v910_v4 = vadd.f32 %v909_v44, %v892_v5  ;;  %v937_v13 = vadd.f32 %v936_v22, %v920_v3  ;;  %v5603_v16 = vpop.permute.xlu1 %1032  ;;  %v984_v30 = vmul.f32 %v5571_v53, %v983_v26  ;;  %v1002_v48 = vmul.f32 %v3900_v17, %v1001_v37 }
 0x15b   : > { %v932_v55 = vadd.f32 %v5547_v15, %v914_v7  ;;  %v959_v18 = vadd.f32 %v958_v50, %v941_v10  ;;  %v5608_v20 = vpop.permute.xlu0 %1024  ;;  %v994_v15 = vmul.f32 %v3900_v17, %v993_v51  ;;  %v998_v51 = vmul.f32 %v3900_v17, %v997_v62 }
 0x15c   : > { %v928_v31 = vadd.f32 %v927_v36, %v910_v4  ;;  %v955_v21 = vadd.f32 %v954_v6, %v937_v13  ;;  %v1138_v52 = vstv %s5611_s0  ;;  %v1156_v41 = vstv %s5614_s3  ;;  %s5692_s0 = sld [smem:[#allocation4 + $0x46]]  ;;  %s5694_s3 = sld [smem:[#allocation4 + $0x10]] }
 0x15d   : > { %v949_v28 = vadd.f32 %v948_v12, %v932_v55  ;;  %v977_v35 = vadd.f32 %v976_v54, %v959_v18  ;;  %v1174_v56 = vstv %s5616_s9  ;;  %v1192_v58 = vstv %s5618_s14  ;;  %s5699_s9 = sld [smem:[#allocation4 + $0x19]]  ;;  %s5704_s14 = sld [smem:[#allocation4 + $0x73]] }
 0x15e   : > { %v945_v27 = vadd.f32 %v944_v1, %v928_v31  ;;  %v1049_v44 = vpop.permute.xlu1 %1048  ;;  %v973_v36 = vadd.f32 %v972_v19, %v955_v21  ;;  %v1134_v22 = vstv %s5620_s22  ;;  %v1152_v2 = vstv %s5623_s13  ;;  %s5709_s22 = sld [smem:[#allocation4 + $0x4f]]  ;;  %s5714_s13 = sld [smem:[#allocation4 + $0x7c]] }
 0x15f   : > { %v967_v33 = vadd.f32 %v966_v9, %v949_v28  ;;  %v1041_v34 = vpop.permute.xlu0 %1040  ;;  %v995_v45 = vadd.f32 %v994_v15, %v977_v35  ;;  %v1170_v39 = vstv %s5625_s19  ;;  %v1188_v6 = vstv %s5629_s16  ;;  %s5718_s19 = sld [smem:[#allocation4 + $0x58]]  ;;  %s5722_s16 = sld [smem:[#allocation4 + $0x85]] }
 0x160   : > { %v963_v40 = vadd.f32 %v962_v24, %v945_v27  ;;  %v991_v53 = vadd.f32 %v990_v25, %v973_v36  ;;  %v1139_v0 = vmul.f32 %v1138_v52, %v5201_v23  ;;  %v1157_v7 = vmul.f32 %v1156_v41, %v5215_v32 }
 0x161   : > { %v985_v49 = vadd.f32 %v984_v30, %v967_v33  ;;  %v1019_v60 = vadd.f32 %v5586_v59, %v995_v45  ;;  %v5665_v10 = vmul.f32 %v1174_v56, %v5225_v42  ;;  %v5668_v12 = vmul.f32 %v1192_v58, %v5248_v57  ;;  %v1221_v58 = vld [vmem:[#allocation3 + $0x8] sm:$0xff] }
 0x162   : > { %v5632_v43 = vpop.permute.xlu1 %1064  ;;  %v981_v8 = vadd.f32 %v980_v38, %v963_v40  ;;  %v1011_v3 = vadd.f32 %v5591_v46, %v991_v53  ;;  %v1135_v47 = vmul.f32 %v1134_v22, %v5201_v23  ;;  %v1153_v46 = vmul.f32 %v1152_v2, %v5215_v32 }
 0x163   : > { %v5636_v50 = vpop.permute.xlu0 %1056  ;;  %v1003_v61 = vadd.f32 %v1002_v48, %v985_v49  ;;  %v5673_v4 = vmul.f32 %v1170_v39, %v5225_v42  ;;  %v1146_v11 = vstv %s5634_s15  ;;  %v1051_v1 = vadd.f32 %v1049_v44, %v1019_v60  ;;  %s5730_s15 = sld [smem:[#allocation4 + $0x22]] }
 0x164   : > { %v999_v5 = vadd.f32 %v998_v51, %v981_v8  ;;  %v5682_v17 = vmul.f32 %v1188_v6, %v5248_v57  ;;  %v1164_v18 = vstv %s5638_s11  ;;  %v1043_v9 = vadd.f32 %v1041_v34, %v1011_v3  ;;  %s5732_s11 = sld [smem:[#allocation4 + $0x61]] }
 0x165   : > { %v1035_v13 = vadd.f32 %v5603_v16, %v1003_v61  ;;  %v1182_v31 = vstv %s5640_s24  ;;  %v1200_v21 = vstv %s5642_s18  ;;  %v1147_v26 = vmul.f32 %v1146_v11, %v5201_v23  ;;  %s5736_s24 = sld [smem:[#allocation4 + $0x8e]]  ;;  %s5743_s18 = sld [smem:[#allocation4 + $0x6a]] }
 0x166   : > { %v1081_v54 = vpop.permute.xlu1 %1080  ;;  %v1027_v19 = vadd.f32 %v5608_v20, %v999_v5  ;;  %v1142_v24 = vstv %s5645_s12  ;;  %v1160_v28 = vstv %s5647_s20  ;;  %v1165_v27 = vmul.f32 %v1164_v18, %v5215_v32  ;;  %s4304_s12 = sshll.u32 %s5108_s8, 6  ;;  %s4025_s8 = sld [smem:[#allocation4 + $0x119]] }
 0x167   : > { %v1073_v63 = vpop.permute.xlu0 %1072  ;;  %v1083_v16 = vadd.f32 %v1081_v54, %v1051_v1  ;;  %v1178_v44 = vstv %s5653_s27  ;;  %v1196_v20 = vstv %s5655_s26  ;;  %v1067_v35 = vadd.f32 %v5632_v43, %v1035_v13  ;;  %s7809_s26 = sld [smem:[#allocation47_spill]]  ;;  %s4174_s20 = sld [smem:[#allocation4 + $0x12b]] }
 0x168   : > { %v1075_v29 = vadd.f32 %v1073_v63, %v1043_v9  ;;  %v1183_v33 = vmul.f32 %v1182_v31, %v5225_v42  ;;  %v1201_v34 = vmul.f32 %v1200_v21, %v5248_v57  ;;  %v1059_v36 = vadd.f32 %v5636_v50, %v1027_v19  ;;  %s4180_s27 = sld [smem:[#allocation4 + $0x17c]] }
 0x169   : > { %v1143_v38 = vmul.f32 %v1142_v24, %v5201_v23  ;;  %v1161_v40 = vmul.f32 %v1160_v28, %v5215_v32  ;;  %v1179_v45 = vmul.f32 %v1178_v44, %v5225_v42  ;;  %v1197_v48 = vmul.f32 %v1196_v20, %v5248_v57  ;;  %v1203_v23 = vld [vmem:[#allocation3] sm:$0xff] }
 0x16a   : > { %v1097_v59 = vpop.permute.xlu1 %1096  ;;  %v1209_v51 = vstv %s5676_s21  ;;  %v1227_v32 = vstv %s5678_s23  ;;  %v1245_v41 = vstv %s5685_s6  ;;  %v1205_v42 = vstv %s5687_s7  ;;  %s4065_s23 = sld [smem:[#allocation4 + $0xb9]]  ;;  %s4024_s7 = sld [smem:[#allocation4 + $0xf5]] }
 0x16b   : > { %v1089_v55 = vpop.permute.xlu0 %1088  ;;  %v1099_v62 = vadd.f32 %v1097_v59, %v1067_v35  ;;  %v1263_v22 = vstv %s5692_s0  ;;  %v1223_v60 = vstv %s5694_s3  ;;  %v1210_v2 = vmul.f32 %v1209_v51, %v1203_v23  ;;  %v1257_v35 = vld [vmem:[#allocation3 + $0x18] sm:$0xff]  ;;  %s4067_s6 = sld [smem:[#allocation4 + $0x101]]  ;;  %s4069_s0 = sld [smem:[#allocation4 + $0xc2]] }
 0x16c   : > { %v1091_v49 = vadd.f32 %v1089_v55, %v1059_v36  ;;  %v1241_v39 = vstv %s5699_s9  ;;  %v1213_v11 = vstv %s5709_s22  ;;  %v1239_v55 = vld [vmem:[#allocation3 + $0x10] sm:$0xff]  ;;  %v1224_v18 = vmul.f32 %v1223_v60, %v1221_v58  ;;  %s4064_s3 = sld [smem:[#allocation4 + $0x95]]  ;;  %s4071_s9 = sld [smem:[#allocation4 + $0x10a]] }
 0x16d   : > { %v1231_v21 = vstv %s5718_s19  ;;  %v1214_v28 = vmul.f32 %v1213_v11, %v1203_v23  ;;  %v1259_v36 = vstv %s5730_s15  ;;  %s5754_s21 = scalar_lea.vmem %s7809_s26, %s4304_s12  ;;  %s4170_s22 = sld [smem:[#allocation4 + $0x122]] }
 0x16e   : > { %v1113_v15 = vpop.permute.xlu1 %1112  ;;  %s4172_s19 = sld [smem:[#allocation4 + $0x16a]]  ;;  %s4173_s15 = sld [smem:[#allocation4 + $0x18e]] }
 0x16f   : > { %v1115_v25 = vadd.f32 %v1113_v15, %v1083_v16  ;;  %v1105_v30 = vpop.permute.xlu0 %1104  ;;  %s4177_s12 = sld [smem:[#allocation4 + $0x197]] }
 0x170   : > { %v1107_v37 = vadd.f32 %v1105_v30, %v1075_v29  ;;  %s4175_s26 = sld [smem:[#allocation4 + $0x14f]] }
 0x171   : > { %v1140_v43 = vadd.f32 %v1139_v0, %v1115_v25  ;;  %v1206_v0 = vmul.f32 %v1205_v42, %v1203_v23  ;;  %v1242_v25 = vmul.f32 %v1241_v39, %v1239_v55 }
 0x172   : > { %v1136_v50 = vadd.f32 %v1135_v47, %v1107_v37  ;;  %v1129_v53 = vpop.permute.xlu1 %1128  ;;  %v1228_v47 = vmul.f32 %v1227_v32, %v1221_v58 }
 0x173   : > { %v1158_v8 = vadd.f32 %v1157_v7, %v1140_v43  ;;  %v1131_v52 = vadd.f32 %v1129_v53, %v1099_v62  ;;  %v1121_v54 = vpop.permute.xlu0 %1120  ;;  %v1217_v7 = vstv %s5704_s14  ;;  %s4066_s14 = sld [smem:[#allocation4 + $0xdd]] }
 0x174   : > { %v1154_v57 = vadd.f32 %v1153_v46, %v1136_v50  ;;  %v1123_v56 = vadd.f32 %v1121_v54, %v1091_v49  ;;  %v1218_v31 = vmul.f32 %v1217_v7, %v1203_v23  ;;  %v1260_v23 = vmul.f32 %v1259_v36, %v1257_v35 }
 0x175   : > { %v1176_v61 = vadd.f32 %v5665_v10, %v1158_v8  ;;  %v1148_v63 = vadd.f32 %v1147_v26, %v1131_v52  ;;  %v1253_v26 = vstv %s5722_s16  ;;  %v1267_v8 = vstv %s5743_s18  ;;  %s4070_s16 = sld [smem:[#allocation4 + $0xe6]] }
 0x176   : > { %v1172_v3 = vadd.f32 %v5673_v4, %v1154_v57  ;;  %v1144_v5 = vadd.f32 %v1143_v38, %v1123_v56  ;;  %v1287_v6 = vpop.permute.xlu1 %1286  ;;  %v1235_v4 = vstv %s5714_s13  ;;  %v1249_v38 = vstv %s5732_s11  ;;  %s4068_s13 = sld [smem:[#allocation4 + $0x9e]]  ;;  %s4072_s11 = sld [smem:[#allocation4 + $0xa7]] }
 0x177   : > { %v1194_v10 = vadd.f32 %v5668_v12, %v1176_v61  ;;  %v1166_v59 = vadd.f32 %v1165_v27, %v1148_v63  ;;  %v1279_v46 = vpop.permute.xlu0 %1278  ;;  %v1236_v27 = vmul.f32 %v1235_v4, %v1221_v58  ;;  %v1254_v50 = vmul.f32 %v1253_v26, %v1239_v55  ;;  %s4171_s18 = sld [smem:[#allocation4 + $0x146]] }
 0x178   : > { %v1190_v13 = vadd.f32 %v5682_v17, %v1172_v3  ;;  %v1162_v1 = vadd.f32 %v1161_v40, %v1144_v5  ;;  %v1246_v17 = vmul.f32 %v1245_v41, %v1239_v55  ;;  %v1271_v40 = vstv %s5736_s24  ;;  %s4176_s24 = sld [smem:[#allocation4 + $0x173]] }
 0x179   : > { %v1184_v19 = vadd.f32 %v1183_v33, %v1166_v59  ;;  %v1211_v9 = vadd.f32 %v1210_v2, %v1194_v10  ;;  %v1232_v33 = vmul.f32 %v1231_v21, %v1221_v58  ;;  %v1250_v32 = vmul.f32 %v1249_v38, %v1239_v55 }
 0x17a   : > { %v1180_v16 = vadd.f32 %v1179_v45, %v1162_v1  ;;  %v1207_v12 = vadd.f32 %v1206_v0, %v1190_v13  ;;  %v1303_v24 = vpop.permute.xlu1 %1302  ;;  %v1264_v45 = vmul.f32 %v1263_v22, %v1257_v35  ;;  %v1272_v41 = vmul.f32 %v1271_v40, %v1257_v35 }
 0x17b   : > { %v1202_v29 = vadd.f32 %v1201_v34, %v1184_v19  ;;  %v1229_v15 = vadd.f32 %v1228_v47, %v1211_v9  ;;  %v1295_v44 = vpop.permute.xlu0 %1294  ;;  %v1268_v58 = vmul.f32 %v1267_v8, %v1257_v35  ;;  %v1756_v40 = vstv %s4025_s8  ;;  %s4181_s8 = sld [smem:[#allocation4 + $0x1a0]] }
 0x17c   : > { %v1198_v20 = vadd.f32 %v1197_v48, %v1180_v16  ;;  %v1225_v30 = vadd.f32 %v1224_v18, %v1207_v12 }
 0x17d   : > { %v1219_v37 = vadd.f32 %v1218_v31, %v1202_v29  ;;  %v1247_v49 = vadd.f32 %v1246_v17, %v1229_v15 }
 0x17e   : > { %v1215_v62 = vadd.f32 %v1214_v28, %v1198_v20  ;;  %v1319_v43 = vpop.permute.xlu1 %1318  ;;  %v1243_v51 = vadd.f32 %v1242_v25, %v1225_v30 }
 0x17f   : > { %v1237_v34 = vadd.f32 %v1236_v27, %v1219_v37  ;;  %v1311_v53 = vpop.permute.xlu0 %1310  ;;  %v1265_v54 = vadd.f32 %v1264_v45, %v1247_v49  ;;  %v1908_v45 = vstv %s4065_s23  ;;  %s4178_s23 = sld [smem:[#allocation4 + $0x134]] }
 0x180   : > { %v1233_v48 = vadd.f32 %v1232_v33, %v1215_v62  ;;  %v1261_v56 = vadd.f32 %v1260_v23, %v1243_v51  ;;  %v1757_v62 = vmul.f32 %v5410_v14, %v1756_v40  ;;  %v5782_v51 = vld [vmem:[%s5048_s29 + $0x8] sm:$0xff] }
 0x181   : > { %v1255_v42 = vadd.f32 %v1254_v50, %v1237_v34  ;;  %v1289_v22 = vadd.f32 %v1287_v6, %v1265_v54  ;;  %v1924_v50 = vstv %s4067_s6  ;;  %v1748_v34 = vstv %s4024_s7  ;;  %s4184_s6 = sld [smem:[#allocation4 + $0x185]]  ;;  %s4179_s7 = sld [smem:[#allocation4 + $0x158]] }
 0x182   : > { %v1335_v52 = vpop.permute.xlu1 %1334  ;;  %v1251_v60 = vadd.f32 %v1250_v32, %v1233_v48  ;;  %v1281_v39 = vadd.f32 %v1279_v46, %v1261_v56  ;;  %v1749_v23 = vmul.f32 %v5410_v14, %v1748_v34  ;;  %v1940_v32 = vstv %s4069_s0  ;;  %s4224_s0 = sld [smem:[#allocation4 + $0x125]] }
 0x183   : > { %v1327_v57 = vpop.permute.xlu0 %1326  ;;  %v1273_v63 = vadd.f32 %v1272_v41, %v1255_v42  ;;  %v1321_v7 = vadd.f32 %v1319_v43, %v1289_v22  ;;  %v5774_v43 = vld [vmem:[%s5048_s29] sm:$0xff]  ;;  %v1900_v48 = vstv %s4064_s3  ;;  %v1941_v8 = vmul.f32 %v5782_v51, %v1940_v32  ;;  %s4182_s3 = sld [smem:[#allocation4 + $0x13d]] }
 0x184   : > { %v1269_v3 = vadd.f32 %v1268_v58, %v1251_v60  ;;  %v1313_v47 = vadd.f32 %v1311_v53, %v1281_v39  ;;  %v1909_v49 = vmul.f32 %v1908_v45, %v5774_v43  ;;  %v1925_v53 = vmul.f32 %v1924_v50, %v5774_v43 }
 0x185   : > { %v1305_v0 = vadd.f32 %v1303_v24, %v1273_v63  ;;  %v1956_v54 = vstv %s4071_s9  ;;  %v1916_v41 = vstv %s4066_s14  ;;  %v2524_v56 = vstv %s4170_s22  ;;  %s4225_s9 = sld [smem:[#allocation4 + $0x149]]  ;;  %s4076_s22 = sld [smem:[#allocation4 + $0xb0]] }
 0x186   : > { %v1351_v61 = vpop.permute.xlu1 %1350  ;;  %v1297_v59 = vadd.f32 %v1295_v44, %v1269_v3  ;;  %v1957_v14 = vmul.f32 %v5782_v51, %v1956_v54  ;;  %v1917_v42 = vmul.f32 %v1916_v41, %v5774_v43  ;;  %v1932_v58 = vstv %s4068_s13  ;;  %s4183_s14 = sld [smem:[#allocation4 + $0x161]] }
 0x187   : > { %v1343_v2 = vpop.permute.xlu0 %1342  ;;  %v1353_v11 = vadd.f32 %v1351_v61, %v1321_v7  ;;  %v1337_v55 = vadd.f32 %v1335_v52, %v1305_v0  ;;  %v1901_v52 = vmul.f32 %v1900_v48, %v5774_v43  ;;  %v1933_v61 = vmul.f32 %v5782_v51, %v1932_v58  ;;  %s4185_s13 = sld [smem:[#allocation4 + $0x1a9]] }
 0x188   : > { %v1345_v13 = vadd.f32 %v1343_v2, %v1313_v47  ;;  %v1329_v6 = vadd.f32 %v1327_v57, %v1297_v59  ;;  %v5793_v57 = vld [vmem:[%s5035_s2] sm:$0xff]  ;;  %v2540_v22 = vstv %s4172_s19  ;;  %v1948_v63 = vstv %s4070_s16  ;;  %v5811_v59 = vld [vmem:[%s5035_s2 + $0x8] sm:$0xff]  ;;  %s4228_s19 = sld [smem:[#allocation4 + $0x12e]]  ;;  %s4073_s16 = sld [smem:[#allocation4 + $0xcb]] }
 0x189   : > { %v2525_v60 = vmul.f32 %v2524_v56, %v5793_v57  ;;  %v2541_v2 = vmul.f32 %v2540_v22, %v5793_v57  ;;  %v1949_v39 = vmul.f32 %v5782_v51, %v1948_v63  ;;  %v2548_v3 = vstv %s4173_s15  ;;  %s4077_s15 = sld [smem:[#allocation4 + $0xd4]] }
 0x18a   : > { %v1367_v5 = vpop.permute.xlu1 %1366  ;;  %v1964_v0 = vstv %s4072_s11  ;;  %v2549_v7 = vmul.f32 %v2548_v3, %v5793_v57  ;;  %v2572_v47 = vstv %s4176_s24  ;;  %s4074_s11 = sld [smem:[#allocation4 + $0xef]]  ;;  %s4229_s24 = sld [smem:[#allocation4 + $0x152]] }
 0x18b   : > { %v1359_v10 = vpop.permute.xlu0 %1358  ;;  %v1369_v19 = vadd.f32 %v1367_v5, %v1337_v55  ;;  %v5804_v5 = vld [vmem:[%s5048_s29 + $0x10] sm:$0xff]  ;;  %v2580_v55 = vstv %s4177_s12  ;;  %s4230_s12 = sld [smem:[#allocation4 + $0x176]] }
 0x18c   : > { %v1361_v31 = vadd.f32 %v1359_v10, %v1329_v6  ;;  %v1965_v10 = vmul.f32 %v5804_v5, %v1964_v0 }
 0x18d   : > { %v2644_v40 = vstv %s4185_s13  ;;  %s5892_s13 = sld [smem:[#allocation4 + $0xab]] }
 0x18e   : > { %v1383_v1 = vpop.permute.xlu1 %1382  ;;  %v2820_v50 = vstv %s4228_s19  ;;  %v1972_v34 = vstv %s4073_s16  ;;  %s5897_s19 = sld [smem:[#allocation4 + $0x140]]  ;;  %s5899_s16 = sld [smem:[#allocation4 + $0xc6]] }
 0x18f   : > { %v1385_v18 = vadd.f32 %v1383_v1, %v1353_v11  ;;  %v1375_v4 = vpop.permute.xlu0 %1374  ;;  %v2532_v11 = vstv %s4171_s18  ;;  %s4226_s18 = sld [smem:[#allocation4 + $0x16d]]  ;;  %v2004_v32 = vstv %s4077_s15  ;;  %s5902_s15 = sld [smem:[#allocation4 + $0x137]] }
 0x190   : > { %v1377_v46 = vadd.f32 %v1375_v4, %v1345_v13  ;;  %v2573_v13 = vmul.f32 %v5811_v59, %v2572_v47  ;;  %v2533_v1 = vmul.f32 %v2532_v11, %v5793_v57  ;;  %v2581_v4 = vmul.f32 %v5811_v59, %v2580_v55 }
 0x191   : > { %v1427_v9 = vpack.c.bf16 %v1385_v18, %v1385_v18  ;;  %v1430_v27 = vsel %vm1405_vm4, %v1385_v18, 0.0  ;;  %v1440_v44 = vmul.f32 %v1385_v18, %v1385_v18  ;;  %v2556_v18 = vstv %s4174_s20  ;;  %s4075_s20 = sld [smem:[#allocation4 + $0x113]] }
 0x192   : > { %v1402_v21 = vpack.c.bf16 %v1377_v46, %v1377_v46  ;;  %v1399_v16 = vpop.permute.xlu1 %1398  ;;  %v1406_v12 = vsel %vm1405_vm4, %v1377_v46, 0.0  ;;  %v1416_v25 = vmul.f32 %v1377_v46, %v1377_v46  ;;  %v2557_v6 = vmul.f32 %v5811_v59, %v2556_v18  ;;  %v5822_v46 = vld [vmem:[%s5035_s2 + $0x10] sm:$0xff] }
 0x193   : > { %3969 = vst.msk [vmem:[%s5754_s21 + $0x4] sm:$0xf] %vm1403_vm5, %v1427_v9  ;;  %v1401_v26 = vadd.f32 %v1399_v16, %v1369_v19  ;;  %v1391_v24 = vpop.permute.xlu0 %1390  ;;  %1407 = vadd.xlane.f32.xlu0 %v1406_v12  ;;  %v1441_v35 = vsel %vm1405_vm4, %v1440_v44, 0.0  ;;  %v2604_v19 = vstv %s4180_s27  ;;  %v2564_v9 = vstv %s4175_s26  ;;  %s5862_s27 = sld [smem:[#allocation4 + $0x11c]]  ;;  %s5864_s26 = sld [smem:[#allocation4 + $0x191]] }
 0x194   : > { %1404 = vst.msk [vmem:[%s5754_s21] sm:$0xf] %vm1403_vm5, %v1402_v21  ;;  %v1393_v28 = vadd.f32 %v1391_v24, %v1361_v31  ;;  %v1417_v33 = vsel %vm1405_vm4, %v1416_v25, 0.0  ;;  %v2605_v31 = vmul.f32 %v5822_v46, %v2604_v19  ;;  %v2565_v21 = vmul.f32 %v5811_v59, %v2564_v9 }
 0x195   : > { %v1475_v29 = vpack.c.bf16 %v1401_v26, %v1401_v26  ;;  %v1478_v20 = vsel %vm1405_vm4, %v1401_v26, 0.0  ;;  %v1488_v37 = vmul.f32 %v1401_v26, %v1401_v26  ;;  %v2612_v16 = vstv %s4181_s8  ;;  %s5866_s8 = sld [smem:[#allocation4 + $0x90]] }
 0x196   : > { %v1451_v17 = vpack.c.bf16 %v1393_v28, %v1393_v28  ;;  %v1454_v15 = vsel %vm1405_vm4, %v1393_v28, 0.0  ;;  %v1464_v30 = vmul.f32 %v1393_v28, %v1393_v28  ;;  %v2588_v12 = vstv %s4178_s23  ;;  %v5833_v28 = vld [vmem:[%s5035_s2 + $0x18] sm:$0xff]  ;;  %s5870_s23 = sld [smem:[#allocation4 + $0x99]]  ;;  %v5878_v58 = vpop.permute.xlu1 %1639 }
 0x197   : > { %3971 = vst.msk [vmem:[%s5754_s21 + $0xc] sm:$0xf] %vm1403_vm5, %v1475_v29  ;;  %1455 = vadd.xlane.f32.xlu1 %v1454_v15  ;;  %1431 = vadd.xlane.f32.xlu0 %v1430_v27  ;;  %v1489_v38 = vsel %vm1405_vm4, %v1488_v37, 0.0  ;;  %v2613_v26 = vmul.f32 %v5822_v46, %v2612_v16  ;;  %v2589_v24 = vmul.f32 %v5822_v46, %v2588_v12  ;;  %v2636_v29 = vstv %s4184_s6  ;;  %s5874_s6 = sld [smem:[#allocation4 + $0x15b]]  ;;  %v5923_v11 = vpop.permute.xlu0 %1647 }
 0x198   : > { %3970 = vst.msk [vmem:[%s5754_s21 + $0x8] sm:$0xf] %vm1403_vm5, %v1451_v17  ;;  %v1465_v36 = vsel %vm1405_vm4, %v1464_v30, 0.0  ;;  %v2596_v17 = vstv %s4179_s7  ;;  %v2637_v15 = vmul.f32 %v5833_v28, %v2636_v29  ;;  %v2788_v44 = vstv %s4224_s0  ;;  %s5876_s7 = sld [smem:[#allocation4 + $0xa2]]  ;;  %s5880_s0 = sld [smem:[#allocation4 + $0xf8]] }
 0x199   : > { %v2597_v27 = vmul.f32 %v5822_v46, %v2596_v17  ;;  %v2796_v30 = vstv %s4225_s9  ;;  %v1980_v48 = vstv %s4074_s11  ;;  %v2828_v54 = vstv %s4229_s24  ;;  %s5884_s9 = sld [smem:[#allocation4 + $0xbd]]  ;;  %s5904_s11 = sld [smem:[#allocation4 + $0xfc]] }
 0x19a   : > { %v2804_v41 = vstv %s4226_s18  ;;  %v2836_v56 = vstv %s4230_s12  ;;  %v2020_v63 = vstv %s5862_s27  ;;  %s5906_s24 = sld [smem:[#allocation4 + $0x105]]  ;;  %s5909_s18 = sld [smem:[#allocation4 + $0xea]]  ;;  %v5911_v3 = vpop.permute.xlu1 %1655  ;;  %v1552_v12 = vstv %s5892_s13 }
 0x19b   : > { %1479 = vadd.xlane.f32.xlu1 %v1478_v20  ;;  %1442 = vadd.xlane.f32.xlu0 %v1441_v35  ;;  %v2620_v20 = vstv %s4182_s3  ;;  %v2789_v35 = vmul.f32 %v2788_v44, %v5774_v43  ;;  %s5882_s3 = sld [smem:[#allocation4 + $0xb4]]  ;;  %s5916_s12 = sld [smem:[#allocation4 + $0xcf]]  ;;  %v2852_v44 = vstv %s5902_s15 }
 0x19c   : > { %v2621_v25 = vmul.f32 %v5833_v28, %v2620_v20  ;;  %s5926_s27 = sld [smem:[#allocation4 + $0x19a]]  ;;  %s5977_s13 = sld [smem:[#allocation4 + $0xbc]] }
 0x19d   : > { %v2860_v47 = vstv %s5874_s6  ;;  %s5944_s6 = sld [smem:[#allocation4 + $0xb5]]  ;;  %s5987_s15 = sld [smem:[#allocation4 + $0xa3]] }
 0x19e   : > { %v1535_v16 = vstv %s5876_s7  ;;  %s5955_s7 = sld [smem:[#allocation4 + $0x17f]] }
 0x19f   : > { %1418 = vadd.xlane.f32.xlu1 %v1417_v33  ;;  %1466 = vadd.xlane.f32.xlu0 %v1465_v36  ;;  %v2628_v33 = vstv %s4183_s14  ;;  %v2797_v36 = vmul.f32 %v2796_v30, %v5774_v43  ;;  %s5886_s14 = sld [smem:[#allocation4 + $0xd8]] }
 0x1a0   : > { %v2629_v37 = vmul.f32 %v5833_v28, %v2628_v33  ;;  %v1530_v30 = vstv %s5906_s24  ;;  %s6000_s24 = sld [smem:[#allocation4 + $0xc7]] }
 0x1a1   : > { %v1505_v18 = vstv %s5882_s3  ;;  %s5957_s3 = sld [smem:[#allocation4 + $0x9a]] }
 0x1a3   : > { %1490 = vadd.xlane.f32.xlu0 %v1489_v38  ;;  %v1996_v38 = vstv %s4076_s22  ;;  %s5888_s22 = sld [smem:[#allocation4 + $0xe1]] }
 0x1a5   : > { %v1509_v9 = vstv %s5886_s14  ;;  %s5965_s14 = sld [smem:[#allocation4 + $0xd9]] }
 0x1b0   : > { %1759 = vrot.lane.b32.xlu1 %v1757_v62, %s7808_s25  ;;  %v5848_v62 = vld [vmem:[%s5048_s29 + $0x18] sm:$0xff] }
 0x1b1   : > { %v1997_v45 = vmul.f32 %v5848_v62, %v1996_v38  ;;  %v2021_v0 = vmul.f32 %v5848_v62, %v2020_v63  ;;  %v1543_v38 = vstv %s5909_s18  ;;  %s6005_s18 = sld [smem:[#allocation4 + $0xa1]] }
 0x1b4   : > { %1911 = vrot.lane.b32.xlu1 %v1909_v49, %s7808_s25  ;;  %v2645_v49 = vmul.f32 %v5833_v28, %v2644_v40  ;;  %v5967_v40 = vpop.permute.xlu0 %1671 }
 0x1b8   : > { %1927 = vrot.lane.b32.xlu1 %v1925_v53, %s7808_s25  ;;  %v2821_v53 = vmul.f32 %v5782_v51, %v2820_v50  ;;  %v1556_v50 = vstv %s5916_s12  ;;  %s6010_s12 = sld [smem:[#allocation4 + $0x188]] }
 0x1b9   : > { %1751 = vrot.lane.b32.xlu0 %v1749_v23, %s7808_s25  ;;  %v1973_v23 = vmul.f32 %v5804_v5, %v1972_v34  ;;  %v2853_v34 = vmul.f32 %v5804_v5, %v2852_v44  ;;  %v2172_v44 = vstv %s5977_s13  ;;  %s6088_s13 = sld [smem:[#allocation4 + $0x9c]] }
 0x1bc   : > { %1943 = vrot.lane.b32.xlu1 %v1941_v8, %s7808_s25  ;;  %v2005_v8 = vmul.f32 %v5848_v62, %v2004_v32 }
 0x1bd   : > { %1903 = vrot.lane.b32.xlu0 %v1901_v52, %s7808_s25  ;;  %v1981_v52 = vmul.f32 %v5804_v5, %v1980_v48 }
 0x1c0   : > { %1959 = vrot.lane.b32.xlu1 %v1957_v14, %s7808_s25  ;;  %v2829_v14 = vmul.f32 %v5782_v51, %v2828_v54 }
 0x1c1   : > { %1919 = vrot.lane.b32.xlu0 %v1917_v42, %s7808_s25  ;;  %v2805_v42 = vmul.f32 %v2804_v41, %v5774_v43 }
 0x1c4   : > { %2527 = vrot.lane.b32.xlu1 %v2525_v60, %s7808_s25  ;;  %v1988_v60 = vstv %s4075_s20  ;;  %s5921_s20 = sld [smem:[#allocation4 + $0x164]] }
 0x1c5   : > { %1935 = vrot.lane.b32.xlu0 %v1933_v61, %s7808_s25  ;;  %v2837_v61 = vmul.f32 %v5782_v51, %v2836_v56  ;;  %v1989_v22 = vmul.f32 %v5804_v5, %v1988_v60 }
 0x1c8   : > { %2543 = vrot.lane.b32.xlu1 %v2541_v2, %s7808_s25  ;;  %v2812_v2 = vstv %s5864_s26  ;;  %s5931_s26 = sld [smem:[#allocation4 + $0x10e]] }
 0x1c9   : > { %1951 = vrot.lane.b32.xlu0 %v1949_v39, %s7808_s25  ;;  %v1501_v39 = vstv %s5866_s8  ;;  %s5934_s8 = sld [smem:[#allocation4 + $0x91]] }
 0x1cc   : > { %2551 = vrot.lane.b32.xlu1 %v2549_v7, %s7808_s25  ;;  %v1518_v7 = vstv %s5870_s23  ;;  %s5938_s23 = sld [smem:[#allocation4 + $0xf3]] }
 0x1cd   : > { %1967 = vrot.lane.b32.xlu0 %v1965_v10, %s7808_s25  ;;  %v2813_v10 = vmul.f32 %v2812_v2, %v5774_v43  ;;  %v5997_v2 = vld [vmem:[%s5042_s10] sm:$0xff] }
 0x1cf   : > { %v1569_v60 = vstv %s5934_s8  ;;  %s6029_s8 = sld [smem:[#allocation4 + $0xd0]] }
 0x1d0   : > { %2575 = vrot.lane.b32.xlu1 %v2573_v13, %s7808_s25  ;;  %v2012_v13 = vstv %s5880_s0  ;;  %s5949_s0 = sld [smem:[#allocation4 + $0x1ac]] }
 0x1d1   : > { %2535 = vrot.lane.b32.xlu0 %v2533_v1, %s7808_s25  ;;  %v4460_v1 = vld [vmem:[%s5035_s2] sm:$0xff] }
 0x1d2   : > { %v1502_v55 = vmul.f32 %v4460_v1, %v1501_v39  ;;  %v1506_v29 = vmul.f32 %v4460_v1, %v1505_v18  ;;  %v1510_v20 = vmul.f32 %v4460_v1, %v1509_v9  ;;  %v2868_v18 = vstv %s5955_s7  ;;  %s6053_s7 = sld [smem:[#allocation4 + $0xf4]] }
 0x1d4   : > { %2583 = vrot.lane.b32.xlu1 %v2581_v4, %s7808_s25  ;;  %v1522_v4 = vstv %s5884_s9  ;;  %s5961_s9 = sld [smem:[#allocation4 + $0x117]] }
 0x1d5   : > { %2559 = vrot.lane.b32.xlu0 %v2557_v6, %s7808_s25  ;;  %v4461_v6 = vld [vmem:[%s5035_s2 + $0x8] sm:$0xff] }
 0x1d6   : > { %v1519_v19 = vmul.f32 %v4461_v6, %v1518_v7  ;;  %v1523_v17 = vmul.f32 %v4461_v6, %v1522_v4  ;;  %v1531_v48 = vmul.f32 %v4461_v6, %v1530_v30  ;;  %v1586_v4 = vstv %s5957_s3  ;;  %s6066_s3 = sld [smem:[#allocation4 + $0xaa]] }
 0x1d8   : > { %2607 = vrot.lane.b32.xlu1 %v2605_v31, %s7808_s25  ;;  %v1526_v31 = vstv %s5888_s22  ;;  %v1520_v33 = vadd.f32 %v1519_v19, %v1502_v55  ;;  %s5972_s22 = sld [smem:[#allocation4 + $0xbe]]  ;;  %v6007_v55 = vpop.permute.xlu0 %1687 }
 0x1d9   : > { %2567 = vrot.lane.b32.xlu0 %v2565_v21, %s7808_s25  ;;  %v2861_v21 = vmul.f32 %v5804_v5, %v2860_v47 }
 0x1da   : > { %v1564_v9 = vstv %s5961_s9  ;;  %s6070_s9 = sld [smem:[#allocation4 + $0xe0]] }
 0x1dc   : > { %2615 = vrot.lane.b32.xlu1 %v2613_v26, %s7808_s25  ;;  %v2013_v26 = vmul.f32 %v5848_v62, %v2012_v13 }
 0x1dd   : > { %2591 = vrot.lane.b32.xlu0 %v2589_v24, %s7808_s25  ;;  %v2884_v24 = vstv %s5897_s19  ;;  %s5980_s19 = sld [smem:[#allocation4 + $0x1a3]] }
 0x1e0   : > { %2639 = vrot.lane.b32.xlu1 %v2637_v15, %s7808_s25  ;;  %v1539_v15 = vstv %s5899_s16  ;;  %s5984_s16 = sld [smem:[#allocation4 + $0xfd]] }
 0x1e1   : > { %2599 = vrot.lane.b32.xlu0 %v2597_v27, %s7808_s25  ;;  %v5952_v27 = vpop.permute.xlu1 %1663 }
 0x1e4   : > { %2791 = vrot.lane.b32.xlu1 %v2789_v35, %s7808_s25  ;;  %v1527_v35 = vmul.f32 %v4461_v6, %v1526_v31 }
 0x1e5   : > { %2623 = vrot.lane.b32.xlu0 %v2621_v25, %s7808_s25  ;;  %v1513_v25 = vstv %s5904_s11  ;;  %s5990_s11 = sld [smem:[#allocation4 + $0xe2]] }
 0x1e6   : > { %v1514_v32 = vmul.f32 %v4460_v1, %v1513_v25  ;;  %v1528_v41 = vadd.f32 %v1527_v35, %v1510_v20 }
 0x1e8   : > { %2799 = vrot.lane.b32.xlu1 %v2797_v36, %s7808_s25  ;;  %v4462_v36 = vld [vmem:[%s5035_s2 + $0x10] sm:$0xff]  ;;  %v1532_v13 = vadd.f32 %v1531_v48, %v1514_v32 }
 0x1e9   : > { %2631 = vrot.lane.b32.xlu0 %v2629_v37, %s7808_s25  ;;  %v1536_v37 = vmul.f32 %v4462_v36, %v1535_v16  ;;  %v6018_v16 = vld [vmem:[%s5042_s10 + $0x8] sm:$0xff] }
 0x1eb   : > { %v1537_v56 = vadd.f32 %v1536_v37, %v1520_v33  ;;  %v2876_v33 = vstv %s5980_s19  ;;  %s6093_s19 = sld [smem:[#allocation4 + $0x10d]] }
 0x1ec   : > { %1999 = vrot.lane.b32.xlu1 %v1997_v45, %s7808_s25  ;;  %v2885_v45 = vmul.f32 %v5848_v62, %v2884_v24 }
 0x1ed   : > { %2647 = vrot.lane.b32.xlu0 %v2645_v49, %s7808_s25  ;;  %v1540_v49 = vmul.f32 %v4462_v36, %v1539_v15  ;;  %v6033_v15 = vld [vmem:[#allocation2] sm:$0xff] }
 0x1ee   : > { %v2173_v32 = vmul.f32 %v2172_v44, %v6033_v15 }
 0x1f0   : > { %2823 = vrot.lane.b32.xlu1 %v2821_v53, %s7808_s25  ;;  %v2892_v53 = vstv %s5921_s20  ;;  %s6014_s20 = sld [smem:[#allocation4 + $0x106]] }
 0x1f1   : > { %1975 = vrot.lane.b32.xlu0 %v1973_v23, %s7808_s25  ;;  %v1524_v23 = vadd.f32 %v1523_v17, %v1506_v29  ;;  %v2893_v63 = vmul.f32 %v5848_v62, %v2892_v53  ;;  %v1590_v29 = vstv %s5972_s22  ;;  %v2869_v17 = vmul.f32 %v5804_v5, %v2868_v18  ;;  %s6081_s22 = sld [smem:[#allocation4 + $0x93]] }
 0x1f2   : > { %v1594_v53 = vstv %s5990_s11  ;;  %v1591_v48 = vmul.f32 %v6018_v16, %v1590_v29  ;;  %s6105_s11 = sld [smem:[#allocation4 + $0xae]] }
 0x1f3   : > { %v1541_v47 = vadd.f32 %v1540_v49, %v1524_v23  ;;  %v6055_v23 = vpop.permute.xlu0 %1703 }
 0x1f4   : > { %2007 = vrot.lane.b32.xlu1 %v2005_v8, %s7808_s25  ;;  %v2844_v8 = vstv %s5926_s27  ;;  %s6020_s27 = sld [smem:[#allocation4 + $0xac]] }
 0x1f5   : > { %1983 = vrot.lane.b32.xlu0 %v1981_v52, %s7808_s25  ;;  %v4463_v52 = vld [vmem:[%s5035_s2 + $0x18] sm:$0xff]  ;;  %v2845_v7 = vmul.f32 %v5782_v51, %v2844_v8  ;;  %v1607_v8 = vstv %s6000_s24  ;;  %s6107_s24 = sld [smem:[#allocation4 + $0xb7]] }
 0x1f6   : > { %v1553_v54 = vmul.f32 %v4463_v52, %v1552_v12  ;;  %v1557_v39 = vmul.f32 %v4463_v52, %v1556_v50  ;;  %v1577_v12 = vstv %s5965_s14  ;;  %v1565_v25 = vmul.f32 %v4463_v52, %v1564_v9  ;;  %v6049_v50 = vld [vmem:[%s5042_s10 + $0x10] sm:$0xff]  ;;  %s6075_s14 = sld [smem:[#allocation4 + $0x118]] }
 0x1f7   : > { %v1608_v18 = vmul.f32 %v6049_v50, %v1607_v8 }
 0x1f8   : > { %2831 = vrot.lane.b32.xlu1 %v2829_v14, %s7808_s25  ;;  %v1544_v14 = vmul.f32 %v4462_v36, %v1543_v38  ;;  %v1554_v31 = vadd.f32 %v1553_v54, %v1537_v56  ;;  %v1558_v20 = vadd.f32 %v1557_v39, %v1541_v47  ;;  %v1578_v38 = vmul.f32 %v1577_v12, %v5997_v2  ;;  %v6063_v54 = vld [vmem:[#allocation2 + $0x8] sm:$0xff]  ;;  %v6096_v12 = vpop.permute.xlu0 %1719 }
 0x1f9   : > { %2807 = vrot.lane.b32.xlu0 %v2805_v42, %s7808_s25  ;;  %v1547_v42 = vstv %s5931_s26  ;;  %s6023_s26 = sld [smem:[#allocation4 + $0xeb]]  ;;  %v1595_v39 = vmul.f32 %v6018_v16, %v1594_v53  ;;  %v2180_v53 = vstv %s6070_s9  ;;  %s6176_s9 = sld [smem:[#allocation4 + $0x131]] }
 0x1fa   : > { %v1548_v1 = vmul.f32 %v4462_v36, %v1547_v42  ;;  %v1545_v6 = vadd.f32 %v1544_v14, %v1528_v41  ;;  %v1587_v36 = vmul.f32 %v6018_v16, %v1586_v4  ;;  %v2196_v41 = vstv %s6005_s18  ;;  %s6110_s18 = sld [smem:[#allocation4 + $0xc0]] }
 0x1fb   : > { %v1624_v4 = vstv %s6029_s8  ;;  %s6132_s8 = sld [smem:[#allocation4 + $0xb8]] }
 0x1fc   : > { %2839 = vrot.lane.b32.xlu1 %v2837_v61, %s7808_s25  ;;  %v1560_v61 = vstv %s5938_s23  ;;  %s6036_s23 = sld [smem:[#allocation4 + $0xc5]]  ;;  %v1549_v35 = vadd.f32 %v1548_v1, %v1532_v13  ;;  %v4005_v1 = vld [vmem:[%s5042_s10 + $0x18] sm:$0xff]  ;;  %v1632_v8 = vstv %s6075_s14  ;;  %s6189_s14 = sld [smem:[#allocation4 + $0xf2]] }
 0x1fd   : > { %1991 = vrot.lane.b32.xlu0 %v1989_v22, %s7808_s25  ;;  %v5992_v22 = vpop.permute.xlu1 %1679  ;;  %v1561_v19 = vmul.f32 %v4463_v52, %v1560_v61  ;;  %v2877_v52 = vmul.f32 %v5804_v5, %v2876_v33 }
 0x1fe   : > { %v1566_v42 = vadd.f32 %v1565_v25, %v1549_v35  ;;  %v1628_v35 = vstv %s6053_s7  ;;  %v1625_v25 = vmul.f32 %v4005_v1, %v1624_v4  ;;  %s6157_s7 = sld [smem:[#allocation4 + $0xca]] }
 0x1ff   : > { %v1562_v37 = vadd.f32 %v1561_v19, %v1545_v6  ;;  %v1611_v47 = vstv %s6023_s26  ;;  %s6130_s26 = sld [smem:[#allocation4 + $0xd2]] }
 0x200   : > { %2023 = vrot.lane.b32.xlu1 %v2021_v0, %s7808_s25  ;;  %v1573_v0 = vstv %s5944_s6  ;;  %s6041_s6 = sld [smem:[#allocation4 + $0x98]]  ;;  %v1612_v29 = vmul.f32 %v6049_v50, %v1611_v47  ;;  %v1816_v47 = vstv %s6105_s11  ;;  %s6237_s11 = sld [smem:[#allocation4 + $0x18c]] }
 0x201   : > { %2815 = vrot.lane.b32.xlu0 %v2813_v10, %s7808_s25  ;;  %v2908_v10 = vstv %s5949_s0  ;;  %v1574_v24 = vmul.f32 %v1573_v0, %v5997_v2  ;;  %v6038_v30 = vpop.permute.xlu1 %1695  ;;  %s6046_s0 = sld [smem:[#allocation4 + $0x10f]]  ;;  %v1598_v0 = vstv %s6014_s20  ;;  %s6121_s20 = sld [smem:[#allocation4 + $0x14c]] }
 0x202   : > { %v2204_v19 = vstv %s6036_s23  ;;  %s6143_s23 = sld [smem:[#allocation4 + $0x128]] }
 0x203   : > { %v1575_v14 = vadd.f32 %v1574_v24, %v1558_v20 }
 0x204   : > { %2863 = vrot.lane.b32.xlu1 %v2861_v21, %s7808_s25  ;;  %v1570_v21 = vmul.f32 %v1569_v60, %v5997_v2  ;;  %v2900_v60 = vstv %s6010_s12  ;;  %s6119_s12 = sld [smem:[#allocation4 + $0xe9]] }
 0x205   : > { %2015 = vrot.lane.b32.xlu0 %v2013_v26, %s7808_s25  ;;  %v2909_v26 = vmul.f32 %v5848_v62, %v2908_v10  ;;  %v1620_v10 = vstv %s6020_s27  ;;  %v6079_v13 = vpop.permute.xlu1 %1711  ;;  %v2901_v6 = vmul.f32 %v5848_v62, %v2900_v60  ;;  %v1592_v9 = vadd.f32 %v1591_v48, %v1575_v14  ;;  %s6126_s27 = sld [smem:[#allocation4 + $0xc9]] }
 0x206   : > { %v1571_v49 = vadd.f32 %v1570_v21, %v1554_v31  ;;  %v1599_v21 = vmul.f32 %v6018_v16, %v1598_v0  ;;  %v1621_v20 = vmul.f32 %v4005_v1, %v1620_v10  ;;  %v2205_v16 = vmul.f32 %v2204_v19, %v6063_v54 }
 0x207   : > { %v1629_v48 = vmul.f32 %v4005_v1, %v1628_v35  ;;  %v1765_v14 = vstv %s6081_s22  ;;  %v2220_v60 = vstv %s6093_s19  ;;  %s6191_s22 = sld [smem:[#allocation4 + $0xd7]]  ;;  %s6198_s19 = sld [smem:[#allocation4 + $0x168]] }
 0x208   : > { %2887 = vrot.lane.b32.xlu1 %v2885_v45, %s7808_s25  ;;  %v1581_v45 = vstv %s5984_s16  ;;  %s6098_s16 = sld [smem:[#allocation4 + $0xa5]] }
 0x209   : > { %2855 = vrot.lane.b32.xlu0 %v2853_v34, %s7808_s25  ;;  %v1603_v34 = vstv %s5987_s15  ;;  %v1582_v56 = vmul.f32 %v1581_v45, %v5997_v2  ;;  %v2197_v2 = vmul.f32 %v2196_v41, %v6063_v54  ;;  %s6101_s15 = sld [smem:[#allocation4 + $0x104]]  ;;  %v6134_v41 = vpop.permute.xlu0 %1735 }
 0x20a   : > { %v1604_v61 = vmul.f32 %v6049_v50, %v1603_v34  ;;  %v6124_v34 = vpop.permute.xlu1 %1727 }
 0x20b   : > { %v1583_v31 = vadd.f32 %v1582_v56, %v1566_v42  ;;  %v1782_v42 = vstv %s6088_s13  ;;  %v2181_v56 = vmul.f32 %v2180_v53, %v6033_v15  ;;  %v1803_v35 = vstv %s6126_s27  ;;  %s6196_s13 = sld [smem:[#allocation4 + $0x170]]  ;;  %s6259_s27 = sld [smem:[#allocation4 + $0x17a]] }
 0x20c   : > { %2895 = vrot.lane.b32.xlu1 %v2893_v63, %s7808_s25  ;;  %v1579_v63 = vadd.f32 %v1578_v38, %v1562_v37  ;;  %v2228_v37 = vstv %s6066_s3  ;;  %v1609_v38 = vadd.f32 %v1608_v18, %v1592_v9  ;;  %s6159_s3 = sld [smem:[#allocation4 + $0xce]]  ;;  %v6162_v18 = vmul.f32 %v1765_v14, %v5774_v43 }
 0x20d   : > { %2847 = vrot.lane.b32.xlu0 %v2845_v7, %s7808_s25  ;;  %v1588_v7 = vadd.f32 %v1587_v36, %v1571_v49  ;;  %v6116_v36 = vld [vmem:[#allocation2 + $0x10] sm:$0xff]  ;;  %v1600_v45 = vadd.f32 %v1599_v21, %v1583_v31  ;;  %v6165_v4 = vmul.f32 %v5782_v51, %v1782_v42  ;;  %v2221_v9 = vmul.f32 %v2220_v60, %v6063_v54 }
 0x20e   : > { %v1596_v24 = vadd.f32 %v1595_v39, %v1579_v63  ;;  %v1633_v39 = vmul.f32 %v4005_v1, %v1632_v8  ;;  %v1799_v10 = vstv %s6098_s16  ;;  %v1786_v1 = vstv %s6110_s18  ;;  %s6207_s16 = sld [smem:[#allocation4 + $0x155]]  ;;  %v6214_v8 = vld [vmem:[#allocation2 + $0x18] sm:$0xff]  ;;  %s6243_s18 = sld [smem:[#allocation4 + $0x116]] }
 0x20f   : > { %v1605_v44 = vadd.f32 %v1604_v61, %v1588_v7  ;;  %v6147_v61 = vadd.f32 %v1625_v25, %v1609_v38  ;;  %v2188_v0 = vstv %s6101_s15  ;;  %s6229_s15 = sld [smem:[#allocation4 + $0x171]] }
 0x210   : > { %2911 = vrot.lane.b32.xlu1 %v2909_v26, %s7808_s25  ;;  %v2164_v26 = vstv %s6041_s6  ;;  %s6145_s6 = sld [smem:[#allocation4 + $0xb3]]  ;;  %v2189_v21 = vmul.f32 %v2188_v0, %v6033_v15 }
 0x211   : > { %2871 = vrot.lane.b32.xlu0 %v2869_v17, %s7808_s25  ;;  %v1615_v17 = vstv %s6046_s0  ;;  %v2165_v33 = vmul.f32 %v2164_v26, %v6033_v15  ;;  %s6150_s0 = sld [smem:[#allocation4 + $0xc1]]  ;;  %v2212_v26 = vstv %s6119_s12 }
 0x212   : > { %v1616_v49 = vmul.f32 %v6049_v50, %v1615_v17  ;;  %v2229_v50 = vmul.f32 %v2228_v37, %v6116_v36  ;;  %v6181_v17 = vmul.f32 %v5804_v5, %v1799_v10  ;;  %v2236_v0 = vstv %s6159_s3  ;;  %s6248_s12 = sld [smem:[#allocation4 + $0x179]]  ;;  %s6285_s3 = sld [smem:[#allocation4 + $0x94]] }
 0x214   : > { %2175 = vrot.lane.b32.xlu1 %v2173_v32, %s7808_s25  ;;  %v1613_v32 = vadd.f32 %v1612_v29, %v1596_v24  ;;  %v1617_v63 = vadd.f32 %v1616_v49, %v1600_v45  ;;  %v3060_v24 = vstv %s6121_s20  ;;  %v2213_v49 = vmul.f32 %v2212_v26, %v6063_v54  ;;  %s6255_s20 = sld [smem:[#allocation4 + $0x19e]] }
 0x215   : > { %2879 = vrot.lane.b32.xlu0 %v2877_v52, %s7808_s25  ;;  %v1622_v52 = vadd.f32 %v1621_v20, %v1605_v44  ;;  %v6184_v44 = vmul.f32 %v5848_v62, %v1816_v47  ;;  %v3061_v53 = vmul.f32 %v3060_v24, %v6033_v15  ;;  %v2237_v26 = vmul.f32 %v2236_v0, %v6116_v36 }
 0x216   : > { %v6152_v7 = vadd.f32 %v1629_v48, %v1613_v32  ;;  %v6178_v29 = vadd.f32 %v1633_v39, %v1617_v63  ;;  %v2244_v24 = vstv %s6189_s14  ;;  %s6300_s14 = sld [smem:[#allocation4 + $0x169]] }
 0x217   : > { %v1642_v37 = vadd.f32 %v5878_v58, %v1622_v52  ;;  %v6211_v58 = vld [vmem:[%s5051_s1] sm:$0xff]  ;;  %v2260_v52 = vstv %s6145_s6  ;;  %s6283_s6 = sld [smem:[#allocation4 + $0x194]] }
 0x218   : > { %2199 = vrot.lane.b32.xlu1 %v2197_v2, %s7808_s25  ;;  %v1769_v2 = vstv %s6107_s24  ;;  %s6239_s24 = sld [smem:[#allocation4 + $0x195]] }
 0x219   : > { %2903 = vrot.lane.b32.xlu0 %v2901_v6, %s7808_s25  ;;  %v6168_v6 = vpop.permute.xlu1 %1743  ;;  %v6187_v20 = vmul.f32 %v1769_v2, %v5774_v43  ;;  %v6202_v43 = vmul.f32 %v5782_v51, %v1786_v1  ;;  %v3052_v51 = vstv %s6143_s23  ;;  %v6232_v10 = vadd.f32 %v5967_v40, %v1642_v37  ;;  %s6280_s23 = sld [smem:[#allocation4 + $0x183]] }
 0x21a   : > { %v3053_v2 = vmul.f32 %v3052_v51, %v6033_v15  ;;  %v2261_v1 = vmul.f32 %v2260_v52, %v6214_v8  ;;  %v2397_v37 = vstv %s6198_s19  ;;  %v3092_v51 = vstv %s6207_s16  ;;  %s6306_s19 = sld [smem:[#allocation4 + $0xd3]]  ;;  %s6316_s16 = sld [smem:[#allocation4 + $0x196]] }
 0x21c   : > { %2207 = vrot.lane.b32.xlu1 %v2205_v16, %s7808_s25  ;;  %v1820_v16 = vstv %s6130_s26  ;;  %s6273_s26 = sld [smem:[#allocation4 + $0x1a7]] }
 0x21d   : > { %2167 = vrot.lane.b32.xlu0 %v2165_v33, %s7808_s25  ;;  %v1837_v33 = vstv %s6132_s8  ;;  %v6221_v14 = vmul.f32 %v5848_v62, %v1820_v16  ;;  %s6277_s8 = sld [smem:[#allocation4 + $0x11f]] }
 0x21e   : > { %v2418_v63 = vstv %s6239_s24  ;;  %s6328_s24 = sld [smem:[#allocation4 + $0x13a]] }
 0x220   : > { %v1408_v19 = vpop.xlane.xlu0 %1407  ;;  %2231 = vrot.lane.b32.xlu1 %v2229_v50, %s7808_s25  ;;  %v6218_v50 = vmul.f32 %v5804_v5, %v1803_v35  ;;  %v2268_v35 = vstv %s6191_s22  ;;  %s6302_s22 = sld [smem:[#allocation4 + $0x15e]] }
 0x221   : > { %v1409_v31 = vrot.slane %v1408_v19, 4  ;;  %2183 = vrot.lane.b32.xlu0 %v2181_v56, %s7808_s25  ;;  %v6224_v56 = vmul.f32 %v1837_v33, %v6211_v58  ;;  %v3068_v33 = vstv %s6196_s13  ;;  %s6304_s13 = sld [smem:[#allocation4 + $0xfb]] }
 0x223   : > { %v1410_v25 = vadd.f32 %v1409_v31, %v1408_v19  ;;  %7810 = vst [vmem:[#allocation28_spill] sm:$0xff] %v6224_v56  ;;  %v3084_v31 = vstv %s6176_s9  ;;  %v2435_v56 = vstv %s6255_s20  ;;  %s6295_s9 = sld [smem:[#allocation4 + $0x18d]]  ;;  %s6338_s20 = sld [smem:[#allocation4 + $0xaf]] }
 0x224   : > { %v1456_v38 = vpop.xlane.xlu1 %1455  ;;  %v1432_v45 = vpop.xlane.xlu0 %1431  ;;  %2223 = vrot.lane.b32.xlu1 %v2221_v9, %s7808_s25 }
 0x225   : > { %v1433_v32 = vrot.slane %v1432_v45, 4  ;;  %v1411_v48 = vrot.slane %v1410_v25, 2  ;;  %2191 = vrot.lane.b32.xlu0 %v2189_v21, %s7808_s25  ;;  %v1457_v42 = vrot.slane %v1456_v38, 4 }
 0x227   : > { %v1412_v60 = vadd.f32 %v1411_v48, %v1410_v25  ;;  %v1434_v47 = vadd.f32 %v1433_v32, %v1432_v45  ;;  %v1458_v21 = vadd.f32 %v1457_v42, %v1456_v38 }
 0x228   : > { %v1480_v5 = vpop.xlane.xlu1 %1479  ;;  %v1443_v62 = vpop.xlane.xlu0 %1442  ;;  %3063 = vrot.lane.b32.xlu1 %v3061_v53, %s7808_s25 }
 0x229   : > { %v1481_v19 = vrot.slane %v1480_v5, 4  ;;  %v1444_v40 = vrot.slane %v1443_v62, 4  ;;  %v1413_v9 = vrot.slane %v1412_v60, 1  ;;  %2215 = vrot.lane.b32.xlu0 %v2213_v49, %s7808_s25  ;;  %v1435_v48 = vrot.slane %v1434_v47, 2 }
 0x22a   : > { %v3085_v49 = vmul.f32 %v3084_v31, %v6063_v54  ;;  %v1459_v0 = vrot.slane %v1458_v21, 2 }
 0x22b   : > { %v1445_v16 = vadd.f32 %v1444_v40, %v1443_v62  ;;  %v1414_v25 = vadd.f32 %v1413_v9, %v1412_v60  ;;  %v1482_v45 = vadd.f32 %v1481_v19, %v1480_v5  ;;  %v2245_v60 = vmul.f32 %v2244_v24, %v6116_v36 }
 0x22c   : > { %v1419_v53 = vpop.xlane.xlu1 %1418  ;;  %v1467_v32 = vpop.xlane.xlu0 %1466  ;;  %2263 = vrot.lane.b32.xlu1 %v2261_v1, %s7808_s25  ;;  %v2269_v5 = vmul.f32 %v2268_v35, %v6214_v8  ;;  %v6263_v62 = vmul.f32 %v3068_v33, %v6033_v15  ;;  %v2398_v1 = vmul.f32 %v2397_v37, %v5793_v57  ;;  %v2414_v9 = vstv %s6229_s15  ;;  %s6322_s15 = sld [smem:[#allocation4 + $0x143]] }
 0x22d   : > { %v1420_v38 = vrot.slane %v1419_v53, 4  ;;  %v1468_v52 = vrot.slane %v1467_v32, 4  ;;  %4305 = vpush %v1414_v25  ;;  %3055 = vrot.lane.b32.xlu0 %v3053_v2, %s7808_s25  ;;  %v1446_v42 = vrot.slane %v1445_v16, 2  ;;  %v3093_v2 = vmul.f32 %v3092_v51, %v6063_v54 }
 0x22e   : > { %v1436_v25 = vadd.f32 %v1435_v48, %v1434_v47  ;;  %v1483_v39 = vrot.slane %v1482_v45, 2  ;;  %v2401_v35 = vstv %s6237_s11  ;;  %v1460_v51 = vadd.f32 %v1459_v0, %v1458_v21  ;;  %s6325_s11 = sld [smem:[#allocation4 + $0x172]] }
 0x22f   : > { %v1421_v19 = vadd.f32 %v1420_v38, %v1419_v53  ;;  %v1469_v40 = vadd.f32 %v1468_v52, %v1467_v32  ;;  %v1447_v53 = vadd.f32 %v1446_v42, %v1445_v16  ;;  %v2252_v32 = vstv %s6243_s18  ;;  %s6333_s18 = sld [smem:[#allocation4 + $0x9d]] }
 0x230   : > { %v6268_v31 = vpop.permute.xlu1 %1759  ;;  %v1491_v24 = vpop.xlane.xlu0 %1490  ;;  %3087 = vrot.lane.b32.xlu1 %v3085_v49, %s7808_s25  ;;  %v2415_v47 = vmul.f32 %v5811_v59, %v2414_v9  ;;  %v3100_v48 = vstv %s6248_s12  ;;  %v2419_v52 = vmul.f32 %v5811_v59, %v2418_v63  ;;  %v1437_v0 = vrot.slane %v1436_v25, 1  ;;  %s6335_s12 = sld [smem:[#allocation4 + $0xa6]] }
 0x231   : > { %7811 = vst [vmem:[#allocation29_spill] sm:$0xff] %v6268_v31  ;;  %v1492_v33 = vrot.slane %v1491_v24, 4  ;;  %v1422_v37 = vrot.slane %v1421_v19, 2  ;;  %2239 = vrot.lane.b32.xlu0 %v2237_v26, %s7808_s25  ;;  %v1470_v38 = vrot.slane %v1469_v40, 2  ;;  %v2402_v26 = vmul.f32 %v2401_v35, %v5793_v57 }
 0x232   : > { %v1484_v31 = vadd.f32 %v1483_v39, %v1482_v45  ;;  %v2253_v57 = vmul.f32 %v2252_v32, %v6116_v36  ;;  %v1461_v59 = vrot.slane %v1460_v51, 1  ;;  %v2416_v45 = vadd.f32 %v2415_v47, %v2398_v1 }
 0x233   : > { %v1493_v49 = vadd.f32 %v1492_v33, %v1491_v24  ;;  %v1423_v16 = vadd.f32 %v1422_v37, %v1421_v19  ;;  %v1471_v9 = vadd.f32 %v1470_v38, %v1469_v40  ;;  %v1448_v33 = vrot.slane %v1447_v53, 1 }
 0x234   : > { %v6289_v42 = vpop.permute.xlu1 %1911  ;;  %v6291_v21 = vpop.permute.xlu0 %1751  ;;  %2271 = vrot.lane.b32.xlu1 %v2269_v5, %s7808_s25  ;;  %v2431_v19 = vstv %s6259_s27  ;;  %v3101_v40 = vmul.f32 %v3100_v48, %v6063_v54  ;;  %v2436_v35 = vmul.f32 %v5822_v46, %v2435_v56  ;;  %v1438_v38 = vadd.f32 %v1437_v0, %v1436_v25  ;;  %s6346_s27 = sld [smem:[#allocation4 + $0x19f]] }
 0x235   : > { %7812 = vst [vmem:[#allocation30_spill] sm:$0xff] %v6289_v42  ;;  %7813 = vst [vmem:[#allocation31_spill] sm:$0xff] %v6291_v21  ;;  %v1424_v24 = vrot.slane %v1423_v16, 1  ;;  %2247 = vrot.lane.b32.xlu0 %v2245_v60, %s7808_s25  ;;  %v1472_v63 = vrot.slane %v1471_v9, 1  ;;  %v1494_v39 = vrot.slane %v1493_v49, 2  ;;  %v2420_v60 = vadd.f32 %v2419_v52, %v2402_v26 }
 0x236   : > { %v1485_v42 = vrot.slane %v1484_v31, 1  ;;  %v2452_v1 = vstv %s6273_s26  ;;  %v1449_v47 = vadd.f32 %v1448_v33, %v1447_v53  ;;  %v2432_v56 = vmul.f32 %v5822_v46, %v2431_v19  ;;  %v6350_v33 = vld [vmem:[%s5051_s1 + $0x8] sm:$0xff]  ;;  %s6356_s26 = sld [smem:[#allocation4 + $0x167]] }
 0x237   : > { %v1425_v5 = vadd.f32 %v1424_v24, %v1423_v16  ;;  %v1495_v21 = vadd.f32 %v1494_v39, %v1493_v49  ;;  %v1473_v48 = vadd.f32 %v1472_v63, %v1471_v9  ;;  %v2284_v16 = vstv %s6277_s8  ;;  %s6372_s8 = sld [smem:[#allocation4 + $0x17b]] }
 0x238   : > { %v6310_v37 = vpop.permute.xlu1 %1927  ;;  %v6312_v32 = vpop.permute.xlu0 %1903  ;;  %3095 = vrot.lane.b32.xlu1 %v3093_v2, %s7808_s25  ;;  %v1462_v25 = vadd.f32 %v1461_v59, %v1460_v51  ;;  %v2448_v26 = vstv %s6280_s23  ;;  %v3076_v2 = vstv %s6283_s6  ;;  %v1650_v53 = vadd.f32 %v5923_v11, %v6147_v61  ;;  %s6375_s23 = sld [smem:[#allocation4 + $0x19d]]  ;;  %s6415_s6 = sld [smem:[#allocation4 + $0x182]] }
 0x239   : > { %7814 = vst [vmem:[#allocation32_spill] sm:$0xff] %v6310_v37  ;;  %4307 = vpush %v1425_v5  ;;  %3071 = vrot.lane.b32.xlu0 %v6263_v62, %s7808_s25  ;;  %v1496_v49 = vrot.slane %v1495_v21, 1  ;;  %v1833_v52 = vstv %s6285_s3  ;;  %v2437_v46 = vadd.f32 %v2436_v35, %v2420_v60  ;;  %v2453_v62 = vmul.f32 %v5833_v28, %v2452_v1  ;;  %v6366_v5 = vld [vmem:[%s5051_s1 + $0x10] sm:$0xff]  ;;  %s6419_s3 = sld [smem:[#allocation4 + $0x120]] }
 0x23a   : > { %4309 = vpush %v1438_v38  ;;  %v1486_v51 = vadd.f32 %v1485_v42, %v1484_v31  ;;  %v2469_v61 = vstv %s6295_s9  ;;  %v2285_v24 = vmul.f32 %v2284_v16, %v6214_v8  ;;  %v2433_v31 = vadd.f32 %v2432_v56, %v2416_v45  ;;  %s6421_s9 = sld [smem:[#allocation4 + $0x129]] }
 0x23b   : > { %4311 = vpush %v1449_v47  ;;  %v1497_v11 = vadd.f32 %v1496_v49, %v1495_v21  ;;  %v2449_v42 = vmul.f32 %v5833_v28, %v2448_v26  ;;  %v3077_v21 = vmul.f32 %v3076_v2, %v6033_v15  ;;  %v3124_v19 = vstv %s6302_s22  ;;  %s6436_s22 = sld [smem:[#allocation4 + $0x14d]] }
 0x23c   : > { %4313 = vpush %v1462_v25  ;;  %v6340_v0 = vpop.permute.xlu1 %1943  ;;  %v6342_v9 = vpop.permute.xlu0 %1919  ;;  %3103 = vrot.lane.b32.xlu1 %v3101_v40, %s7808_s25  ;;  %v1706_v59 = vadd.f32 %v6055_v23, %v6232_v10  ;;  %v7816_v63 = vstv %s6150_s0  ;;  %v2465_v45 = vstv %s6300_s14  ;;  %v2276_v28 = vstv %s6304_s13  ;;  %s6393_s0 = sld [smem:[#allocation4 + $0x1a8]]  ;;  %s6431_s14 = sld [smem:[#allocation4 + $0x144]] }
 0x23d   : > { %7815 = vst [vmem:[#allocation33_spill] sm:$0xff] %v6342_v9  ;;  %4315 = vpush %v1473_v48  ;;  %2255 = vrot.lane.b32.xlu0 %v2253_v57, %s7808_s25  ;;  %v6363_v39 = vmul.f32 %v6350_v33, %v7816_v63  ;;  %v6369_v57 = vld [vmem:[%s5042_s10] sm:$0xff]  ;;  %v7817_v15 = vstv %s6157_s7  ;;  %v1888_v10 = vstv %s6306_s19  ;;  %v2454_v40 = vadd.f32 %v2453_v62, %v2437_v46  ;;  %s6401_s7 = sld [smem:[#allocation4 + $0x184]]  ;;  %s6441_s13 = sld [smem:[#allocation4 + $0x1af]] }
 0x23e   : > { %4317 = vpush %v1486_v51  ;;  %v6380_v23 = vmul.f32 %v6366_v5, %v7817_v15  ;;  %v2470_v60 = vmul.f32 %v2469_v61, %v6369_v57  ;;  %v1682_v35 = vadd.f32 %v5992_v22, %v1650_v53  ;;  %v6386_v38 = vmul.f32 %v1833_v52, %v6211_v58  ;;  %v6398_v22 = vld [vmem:[%s5051_s1 + $0x18] sm:$0xff]  ;;  %v6411_v52 = vld [vmem:[%s5042_s10 + $0x8] sm:$0xff]  ;;  %s6451_s19 = sld [smem:[#allocation4 + $0x1a6]] }
 0x23f   : > { %4319 = vpush %v1497_v11  ;;  %v2486_v48 = vstv %s6316_s16  ;;  %v3125_v56 = vmul.f32 %v3124_v19, %v6116_v36  ;;  %v2450_v16 = vadd.f32 %v2449_v42, %v2433_v31  ;;  %v2466_v25 = vmul.f32 %v2465_v45, %v6369_v57  ;;  %s6453_s16 = sld [smem:[#allocation4 + $0xff]] }
 0x240   : > { %v6388_v1 = vpop.permute.xlu1 %1959  ;;  %v6390_v47 = vpop.permute.xlu0 %1935  ;;  %2287 = vrot.lane.b32.xlu1 %v2285_v24, %s7808_s25  ;;  %v2277_v49 = vmul.f32 %v2276_v28, %v6214_v8  ;;  %v3148_v26 = vstv %s6322_s15  ;;  %v1738_v2 = vadd.f32 %v6134_v41, %v1706_v59  ;;  %v6408_v53 = vmul.f32 %v6398_v22, %v1888_v10  ;;  %s6461_s15 = sld [smem:[#allocation4 + $0x132]] }
 0x241   : > { %7818 = vst [vmem:[#allocation34_spill] sm:$0xff] %v6388_v1  ;;  %3079 = vrot.lane.b32.xlu0 %v3077_v21, %s7808_s25  ;;  %v2482_v46 = vstv %s6325_s11  ;;  %v3116_v62 = vstv %s6328_s24  ;;  %v1850_v51 = vstv %s6333_s18  ;;  %v2471_v61 = vadd.f32 %v2470_v60, %v2454_v40  ;;  %s6476_s11 = sld [smem:[#allocation4 + $0x156]]  ;;  %s6489_s24 = sld [smem:[#allocation4 + $0x18b]] }
 0x242   : > { %v1867_v11 = vstv %s6335_s12  ;;  %v2487_v41 = vmul.f32 %v6411_v52, %v2486_v48  ;;  %v1714_v24 = vadd.f32 %v6079_v13, %v1682_v35  ;;  %v1884_v31 = vstv %s6338_s20  ;;  %v6447_v40 = vld [vmem:[%s5042_s10 + $0x10] sm:$0xff]  ;;  %s6491_s18 = sld [smem:[#allocation4 + $0x108]]  ;;  %s6495_s12 = sld [smem:[#allocation4 + $0x13b]] }
 0x243   : > { %v2503_v19 = vstv %s6346_s27  ;;  %v3149_v59 = vmul.f32 %v3148_v26, %v6214_v8  ;;  %v2467_v63 = vadd.f32 %v2466_v25, %v2450_v16  ;;  %v2483_v45 = vmul.f32 %v6411_v52, %v2482_v46  ;;  %s6508_s20 = sld [smem:[#allocation4 + $0x15f]]  ;;  %s6517_s27 = sld [smem:[#allocation4 + $0xdb]] }
 0x244   : > { %v6426_v42 = vpop.permute.xlu1 %2527  ;;  %v6428_v21 = vpop.permute.xlu0 %1951  ;;  %3127 = vrot.lane.b32.xlu1 %v3125_v56, %s7808_s25  ;;  %v3117_v13 = vmul.f32 %v3116_v62, %v6116_v36  ;;  %v3156_v28 = vstv %s6356_s26  ;;  %v1658_v15 = vadd.f32 %v5911_v3, %v6152_v7  ;;  %v1767_v10 = vadd.f32 %v6162_v18, %v1738_v2  ;;  %s6524_s26 = sld [smem:[#allocation4 + $0x11a]] }
 0x245   : > { %7819 = vst [vmem:[#allocation35_spill] sm:$0xff] %v6428_v21  ;;  %2279 = vrot.lane.b32.xlu0 %v2277_v49, %s7808_s25  ;;  %v2499_v60 = vstv %s6372_s8  ;;  %v3108_v35 = vstv %s6375_s23  ;;  %v6456_v48 = vmul.f32 %v6350_v33, %v1850_v51  ;;  %v6459_v56 = vmul.f32 %v6366_v5, %v1867_v11  ;;  %s6527_s8 = sld [smem:[#allocation4 + $0x121]]  ;;  %s6530_s23 = sld [smem:[#allocation4 + $0xe4]] }
 0x246   : > { %v2488_v3 = vadd.f32 %v2487_v41, %v2471_v61  ;;  %v2504_v7 = vmul.f32 %v6447_v40, %v2503_v19  ;;  %v1666_v18 = vadd.f32 %v5952_v27, %v6178_v29  ;;  %v1746_v16 = vadd.f32 %v6168_v6, %v1714_v24  ;;  %v6486_v61 = vld [vmem:[%s5042_s10 + $0x18] sm:$0xff]  ;;  %s6500_s10 = sld [smem:[#allocation4 + $0x111]] }
 0x247   : > { %v2520_v26 = vstv %s6393_s0  ;;  %v3157_v2 = vmul.f32 %v3156_v28, %v6214_v8  ;;  %v2484_v46 = vadd.f32 %v2483_v45, %v2467_v63  ;;  %v2500_v62 = vmul.f32 %v6447_v40, %v2499_v60  ;;  %s6539_s0 = sld [smem:[#allocation4 + $0xed]] }
 0x248   : > { %v6467_v25 = vpop.permute.xlu1 %2543  ;;  %v6469_v49 = vpop.permute.xlu0 %1967  ;;  %3151 = vrot.lane.b32.xlu1 %v3149_v59, %s7808_s25  ;;  %v2516_v51 = vstv %s6401_s7  ;;  %v3109_v27 = vmul.f32 %v3108_v35, %v6063_v54  ;;  %v1690_v6 = vadd.f32 %v6007_v55, %v1658_v15  ;;  %v1784_v29 = vadd.f32 %v6165_v4, %v1767_v10  ;;  %v4464_v35 = vld [vmem:[%s5035_s2] sm:$0xff]  ;;  %s6542_s7 = sld [smem:[#allocation4 + $0x145]] }
 0x249   : > { %3119 = vrot.lane.b32.xlu0 %v3117_v13, %s7808_s25  ;;  %v6483_v11 = vmul.f32 %v6398_v22, %v1884_v31  ;;  %v3132_v41 = vstv %s6415_s6  ;;  %v2389_v24 = vstv %s6419_s3  ;;  %v2406_v19 = vstv %s6421_s9  ;;  %s6556_s6 = sld [smem:[#allocation4 + $0x100]]  ;;  %s6559_s3 = sld [smem:[#allocation4 + $0x12a]] }
 0x24a   : > { %v2505_v55 = vadd.f32 %v2504_v7, %v2488_v3  ;;  %v2521_v54 = vmul.f32 %v6486_v61, %v2520_v26  ;;  %v1698_v4 = vadd.f32 %v6038_v30, %v1666_v18  ;;  %v1771_v31 = vadd.f32 %v6187_v20, %v1746_v16  ;;  %v3279_v20 = vld [vmem:[%s5048_s29] sm:$0xff]  ;;  %v4465_v7 = vld [vmem:[%s5035_s2 + $0x8] sm:$0xff]  ;;  %s6565_s9 = sld [smem:[#allocation4 + $0x16b]] }
 0x24b   : > { %v2517_v59 = vmul.f32 %v6486_v61, %v2516_v51  ;;  %v2393_v45 = vstv %s6431_s14  ;;  %v2501_v28 = vadd.f32 %v2500_v62, %v2484_v46  ;;  %v2410_v15 = vstv %s6436_s22  ;;  %s6568_s14 = sld [smem:[#allocation4 + $0xf6]] }
 0x24c   : > { %v2552_v63 = vpop.permute.xlu1 %2551  ;;  %v6504_v13 = vpop.permute.xlu0 %2535  ;;  %3159 = vrot.lane.b32.xlu1 %v3157_v2, %s7808_s25  ;;  %v3133_v30 = vmul.f32 %v3132_v41, %v6116_v36  ;;  %v3172_v10 = vstv %s6441_s13  ;;  %v6515_v60 = vadd.f32 %v6096_v12, %v1690_v6  ;;  %v2390_v3 = vmul.f32 %v4464_v35, %v2389_v24  ;;  %s6572_s22 = sld [smem:[#allocation4 + $0x14e]]  ;;  %s6584_s13 = sld [smem:[#allocation4 + $0x174]] }
 0x24d   : > { %3111 = vrot.lane.b32.xlu0 %v3109_v27, %s7808_s25  ;;  %v2407_v18 = vmul.f32 %v4465_v7, %v2406_v19  ;;  %v3140_v16 = vstv %s6451_s19  ;;  %v1801_v26 = vadd.f32 %v6181_v17, %v1784_v29  ;;  %v1777_v2 = vstv %s6453_s16  ;;  %s6587_s19 = sld [smem:[#allocation4 + $0x109]]  ;;  %s6591_s16 = sld [smem:[#allocation4 + $0x133]] }
 0x24e   : > { %v2423_v46 = vstv %s6461_s15  ;;  %v2522_v62 = vadd.f32 %v2521_v54, %v2505_v55  ;;  %v1788_v12 = vadd.f32 %v6202_v43, %v1771_v31  ;;  %v2394_v51 = vmul.f32 %v4464_v35, %v2393_v45  ;;  %v6547_v55 = vld [vmem:[%s5048_s29] sm:$0xff]  ;;  %s6608_s15 = sld [smem:[#allocation4 + $0x157]] }
 0x24f   : > { %v2411_v27 = vmul.f32 %v4465_v7, %v2410_v15  ;;  %v3173_v17 = vmul.f32 %v3172_v10, %v6214_v8  ;;  %v6537_v29 = vadd.f32 %v6124_v34, %v1698_v4  ;;  %v2518_v43 = vadd.f32 %v2517_v59, %v2501_v28  ;;  %v4467_v34 = vld [vmem:[%s5035_s2 + $0x10] sm:$0xff] }
 0x250   : > { %v2576_v6 = vpop.permute.xlu1 %2575  ;;  %v6532_v41 = vpop.permute.xlu0 %2559  ;;  %3287 = vrot.lane.b32.xlu1 %v3279_v20, %s7808_s25  ;;  %v2427_v24 = vstv %s6476_s11  ;;  %v3141_v19 = vmul.f32 %v3140_v16, %v6116_v36  ;;  %v6550_v54 = vmul.f32 %v6547_v55, %v1777_v2  ;;  %v2408_v31 = vadd.f32 %v2407_v18, %v2390_v3  ;;  %v3308_v16 = vld [vmem:[#allocation2 + $0x8] sm:$0xff]  ;;  %s6620_s11 = sld [smem:[#allocation4 + $0x112]] }
 0x251   : > { %3135 = vrot.lane.b32.xlu0 %v3133_v30, %s7808_s25  ;;  %v2424_v4 = vmul.f32 %v4467_v34, %v2423_v46  ;;  %v3164_v45 = vstv %s6489_s24  ;;  %v1818_v15 = vadd.f32 %v6184_v44, %v1801_v26  ;;  %v1794_v59 = vstv %s6491_s18  ;;  %v6577_v26 = vld [vmem:[%s5048_s29 + $0x8] sm:$0xff]  ;;  %s6629_s24 = sld [smem:[#allocation4 + $0x13c]]  ;;  %s6634_s18 = sld [smem:[#allocation4 + $0x11b]] }
 0x252   : > { %v2440_v28 = vstv %s6495_s12  ;;  %v2554_v30 = vadd.f32 %v2552_v63, %v2522_v62  ;;  %v1805_v36 = vadd.f32 %v6218_v50, %v1788_v12  ;;  %v1811_v20 = vstv %s6500_s10  ;;  %s6640_s12 = sld [smem:[#allocation4 + $0x186]]  ;;  %s6645_s10 = sld [smem:[#allocation4 + $0xdc]] }
 0x253   : > { %v2412_v10 = vadd.f32 %v2411_v27, %v2394_v51  ;;  %v2428_v35 = vmul.f32 %v4467_v34, %v2427_v24  ;;  %v2546_v44 = vadd.f32 %v6467_v25, %v2518_v43  ;;  %v2444_v63 = vstv %s6508_s20  ;;  %v4469_v25 = vld [vmem:[%s5035_s2 + $0x18] sm:$0xff]  ;;  %v6594_v24 = vld [vmem:[%s5048_s29 + $0x10] sm:$0xff]  ;;  %s6602_s2 = sld [smem:[#allocation4 + $0x17d]]  ;;  %s6648_s20 = sld [smem:[#allocation4 + $0x160]] }
 0x254   : > { %v2584_v3 = vpop.permute.xlu1 %2583  ;;  %v6563_v7 = vpop.permute.xlu0 %2567  ;;  %3175 = vrot.lane.b32.xlu1 %v3173_v17, %s7808_s25  ;;  %v3165_v18 = vmul.f32 %v3164_v45, %v6214_v8  ;;  %v6580_v2 = vmul.f32 %v6577_v26, %v1794_v59  ;;  %v1773_v46 = vstv %s6517_s27  ;;  %v2425_v62 = vadd.f32 %v2424_v4, %v2408_v31  ;;  %s6656_s27 = sld [smem:[#allocation4 + $0xe5]] }
 0x255   : > { %v2586_v50 = vadd.f32 %v2584_v3, %v2554_v30  ;;  %3143 = vrot.lane.b32.xlu0 %v3141_v19, %s7808_s25  ;;  %v2441_v12 = vmul.f32 %v4469_v25, %v2440_v28  ;;  %v1828_v51 = vstv %s6524_s26  ;;  %v1835_v27 = vadd.f32 %v6386_v38, %v1818_v15  ;;  %v3309_v30 = vld [vmem:[#allocation2 + $0x10] sm:$0xff]  ;;  %v3307_v3 = vld [vmem:[#allocation2] sm:$0xff]  ;;  %s6658_s26 = sld [smem:[#allocation4 + $0xee]] }
 0x256   : > { %v2457_v17 = vstv %s6527_s8  ;;  %v2578_v43 = vadd.f32 %v2576_v6, %v2546_v44  ;;  %v6597_v19 = vmul.f32 %v6594_v24, %v1811_v20  ;;  %v1790_v31 = vstv %s6530_s23  ;;  %v6612_v20 = vld [vmem:[%s5048_s29 + $0x18] sm:$0xff]  ;;  %s6670_s8 = sld [smem:[#allocation4 + $0xf7]]  ;;  %s6678_s23 = sld [smem:[#allocation4 + $0x16c]] }
 0x257   : > { %v2429_v34 = vadd.f32 %v2428_v35, %v2412_v10  ;;  %v2445_v4 = vmul.f32 %v4469_v25, %v2444_v63  ;;  %v1822_v38 = vadd.f32 %v6221_v14, %v1805_v36  ;;  %v1807_v6 = vstv %s6539_s0  ;;  %s6683_s0 = sld [smem:[#allocation4 + $0x123]] }
 0x258   : > { %v2608_v45 = vpop.permute.xlu1 %2607  ;;  %v6600_v59 = vpop.permute.xlu0 %2591  ;;  %3317 = vrot.lane.b32.xlu1 %v3308_v16, %s7808_s25  ;;  %v2461_v15 = vstv %s6542_s7  ;;  %v6615_v10 = vmul.f32 %v6612_v20, %v1828_v51  ;;  %v6618_v35 = vmul.f32 %v6547_v55, %v1773_v46  ;;  %v2442_v14 = vadd.f32 %v2441_v12, %v2425_v62  ;;  %s6691_s7 = sld [smem:[#allocation4 + $0x12c]] }
 0x259   : > { %v2610_v28 = vadd.f32 %v2608_v45, %v2578_v43  ;;  %3167 = vrot.lane.b32.xlu0 %v3165_v18, %s7808_s25  ;;  %v2458_v36 = vmul.f32 %v2457_v17, %v6369_v57  ;;  %v6624_v44 = vmul.f32 %v6577_v26, %v1790_v31  ;;  %v1845_v63 = vstv %s6556_s6  ;;  %s6693_s6 = sld [smem:[#allocation4 + $0x135]] }
 0x25a   : > { %v1852_v18 = vadd.f32 %v6456_v48, %v1835_v27  ;;  %v2474_v16 = vstv %s6559_s3  ;;  %v6632_v46 = vmul.f32 %v6594_v24, %v1807_v6  ;;  %v2446_v62 = vadd.f32 %v2445_v4, %v2429_v34  ;;  %v7820_v48 = vld [vmem:[#allocation28_spill] sm:$0xff]  ;;  %s6701_s3 = sld [smem:[#allocation4 + $0x147]] }
 0x25b   : > { %v2462_v25 = vmul.f32 %v2461_v15, %v6369_v57  ;;  %v2661_v17 = vstv %s6565_s9  ;;  %v1839_v27 = vadd.f32 %v7820_v48, %v1822_v38  ;;  %v1824_v43 = vstv %s6568_s14  ;;  %v3280_v6 = vld [vmem:[%s5048_s29 + $0x8] sm:$0xff]  ;;  %s6706_s9 = sld [smem:[#allocation4 + $0x13e]]  ;;  %s6712_s14 = sld [smem:[#allocation4 + $0x175]] }
 0x25c   : > { %v2616_v12 = vpop.permute.xlu1 %2615  ;;  %v6637_v51 = vpop.permute.xlu0 %2599  ;;  %3319 = vrot.lane.b32.xlu1 %v3309_v30, %s7808_s25  ;;  %v2478_v31 = vstv %s6572_s22  ;;  %v6654_v34 = vmul.f32 %v1845_v63, %v6211_v58  ;;  %v2459_v4 = vadd.f32 %v2458_v36, %v2442_v14  ;;  %v2475_v45 = vmul.f32 %v6411_v52, %v2474_v16  ;;  %s6721_s22 = sld [smem:[#allocation4 + $0x150]] }
 0x25d   : > { %v6650_v57 = vadd.f32 %v2616_v12, %v2586_v50  ;;  %3315 = vrot.lane.b32.xlu0 %v3307_v3, %s7808_s25  ;;  %v2678_v38 = vstv %s6584_s13  ;;  %v1862_v15 = vstv %s6587_s19  ;;  %v1869_v50 = vadd.f32 %v6459_v56, %v1852_v18  ;;  %s6724_s13 = sld [smem:[#allocation4 + $0x17e]]  ;;  %s6733_s19 = sld [smem:[#allocation4 + $0x124]] }
 0x25e   : > { %v2491_v30 = vstv %s6591_s16  ;;  %v2662_v3 = vmul.f32 %v6547_v55, %v2661_v17  ;;  %v6668_v12 = vmul.f32 %v6612_v20, %v1824_v43  ;;  %v2463_v63 = vadd.f32 %v2462_v25, %v2446_v62  ;;  %s6744_s16 = sld [smem:[#allocation4 + $0x187]] }
 0x25f   : > { %v2479_v14 = vmul.f32 %v6411_v52, %v2478_v31  ;;  %v2695_v36 = vstv %s6602_s2  ;;  %v1856_v56 = vadd.f32 %v6363_v39, %v1839_v27  ;;  %v2495_v18 = vstv %s6608_s15  ;;  %v3281_v39 = vld [vmem:[%s5048_s29 + $0x10] sm:$0xff]  ;;  %s6758_s2 = sld [smem:[#allocation4 + $0x18f]]  ;;  %s6764_s15 = sld [smem:[#allocation4 + $0x12d]] }
 0x260   : > { %v2640_v16 = vpop.permute.xlu1 %2639  ;;  %v6674_v48 = vpop.permute.xlu0 %2623  ;;  %3321 = vrot.lane.b32.xlu1 %v6214_v8, %s7808_s25  ;;  %v2679_v17 = vmul.f32 %v6577_v26, %v2678_v38  ;;  %v6687_v52 = vmul.f32 %v6350_v33, %v1862_v15  ;;  %v1879_v25 = vstv %s6620_s11  ;;  %v2476_v8 = vadd.f32 %v2475_v45, %v2459_v4  ;;  %s6769_s11 = sld [smem:[#allocation4 + $0x136]] }
 0x261   : > { %v2642_v62 = vadd.f32 %v2640_v16, %v2610_v28  ;;  %3289 = vrot.lane.b32.xlu0 %v3280_v6, %s7808_s25  ;;  %v2492_v43 = vmul.f32 %v6447_v40, %v2491_v30  ;;  %v6697_v28 = vadd.f32 %v6483_v11, %v1869_v50  ;;  %v2508_v27 = vstv %s6629_s24  ;;  %s6794_s24 = sld [smem:[#allocation4 + $0x162]] }
 0x262   : > { %v2696_v31 = vmul.f32 %v6594_v24, %v2695_v36  ;;  %v1896_v4 = vstv %s6634_s18  ;;  %v2480_v45 = vadd.f32 %v2479_v14, %v2463_v63  ;;  %v2496_v6 = vmul.f32 %v6447_v40, %v2495_v18  ;;  %s6801_s18 = sld [smem:[#allocation4 + $0x148]] }
 0x263   : > { %v2663_v38 = vadd.f32 %v2662_v3, %v2642_v62  ;;  %v2712_v15 = vstv %s6640_s12  ;;  %v1873_v50 = vadd.f32 %v6380_v23, %v1856_v56  ;;  %v1841_v3 = vstv %s6645_s10  ;;  %v3282_v62 = vld [vmem:[%s5048_s29 + $0x18] sm:$0xff]  ;;  %s6737_s29 = sld [smem:[#allocation4 + $0x159]]  ;;  %s6803_s12 = sld [smem:[#allocation4 + $0x198]] }
 0x264   : > { %v6708_v30 = vpop.permute.xlu1 %2791  ;;  %v6710_v11 = vpop.permute.xlu0 %2631  ;;  %v2512_v36 = vstv %s6648_s20  ;;  %v1858_v63 = vstv %s6656_s27  ;;  %v1875_v40 = vstv %s6658_s26  ;;  %v2493_v14 = vadd.f32 %v2492_v43, %v2476_v8  ;;  %s6810_s10 = sld [smem:[#allocation4 + $0x151]]  ;;  %s6828_s27 = sld [smem:[#allocation4 + $0x96]] }
 0x265   : > { %7821 = vst [vmem:[#allocation28_spill] sm:$0xff] %v6708_v30  ;;  %v2680_v16 = vadd.f32 %v2679_v17, %v2663_v38  ;;  %3291 = vrot.lane.b32.xlu0 %v3281_v39, %s7808_s25  ;;  %v2509_v18 = vmul.f32 %v6486_v61, %v2508_v27  ;;  %v6727_v30 = vmul.f32 %v6366_v5, %v1879_v25  ;;  %v1892_v8 = vstv %s6670_s8  ;;  %s6812_s20 = sld [smem:[#allocation4 + $0x1a1]]  ;;  %s6837_s26 = sld [smem:[#allocation4 + $0x1aa]] }
 0x266   : > { %v6730_v23 = vmul.f32 %v6398_v22, %v1896_v4  ;;  %v2713_v56 = vmul.f32 %v6612_v20, %v2712_v15  ;;  %v2497_v43 = vadd.f32 %v2496_v6, %v2480_v45  ;;  %v2513_v39 = vmul.f32 %v6486_v61, %v2512_v36  ;;  %s6839_s8 = sld [smem:[#allocation4 + $0x9f]] }
 0x267   : > { %v2697_v17 = vadd.f32 %v2696_v31, %v2680_v16  ;;  %v2729_v38 = vstv %s6678_s23  ;;  %v6747_v31 = vadd.f32 %v6408_v53, %v1873_v50  ;;  %v6750_v4 = vmul.f32 %v1841_v3, %v6211_v58  ;;  %s6845_s23 = sld [smem:[#allocation4 + $0x15a]] }
 0x268   : > { %7822 = vst [vmem:[#allocation36_spill] sm:$0xff] %v6730_v23  ;;  %v6739_v27 = vpop.permute.xlu1 %2799  ;;  %v6741_v25 = vpop.permute.xlu0 %2647  ;;  %v6753_v45 = vmul.f32 %v6350_v33, %v1858_v63  ;;  %v6756_v61 = vmul.f32 %v6366_v5, %v1875_v40  ;;  %v2510_v6 = vadd.f32 %v2509_v18, %v2493_v14  ;;  %v2653_v15 = vstv %s6683_s0  ;;  %v7825_v40 = vld [vmem:[#allocation31_spill] sm:$0xff]  ;;  %s6847_s0 = sld [smem:[#allocation4 + $0xa8]] }
 0x269   : > { %7823 = vst [vmem:[#allocation37_spill] sm:$0xff] %v6739_v27  ;;  %3293 = vrot.lane.b32.xlu0 %v3282_v62, %s7808_s25  ;;  %v2670_v36 = vstv %s6691_s7  ;;  %v2687_v53 = vstv %s6693_s6  ;;  %v6767_v50 = vmul.f32 %v6398_v22, %v1892_v8  ;;  %v2714_v3 = vadd.f32 %v2713_v56, %v2697_v17  ;;  %v7826_v56 = vld [vmem:[#allocation29_spill] sm:$0xff]  ;;  %s6792_s25 = sld [smem:[#allocation4 + $0x13f]]  ;;  %s6853_s7 = sld [smem:[#allocation4 + $0x163]] }
 0x26a   : > { %v2657_v16 = vstv %s6701_s3  ;;  %v2730_v63 = vmul.f32 %v2729_v38, %v6211_v58  ;;  %v1754_v62 = vadd.f32 %v7825_v40, %v6515_v60  ;;  %v2514_v27 = vadd.f32 %v2513_v39, %v2497_v43  ;;  %s6865_s6 = sld [smem:[#allocation4 + $0xb1]]  ;;  %s6873_s3 = sld [smem:[#allocation4 + $0xba]] }
 0x26b   : > { %7824 = vst [vmem:[#allocation38_spill] sm:$0xff] %v6767_v50  ;;  %v2704_v14 = vstv %s6706_s9  ;;  %v2746_v8 = vstv %s6712_s14  ;;  %v1762_v17 = vadd.f32 %v7826_v56, %v6537_v29  ;;  %v6784_v21 = vmul.f32 %v6547_v55, %v2653_v15  ;;  %s6878_s9 = sld [smem:[#allocation4 + $0x190]]  ;;  %s6899_s14 = sld [smem:[#allocation4 + $0x199]] }
 0x26c   : > { %v6776_v18 = vpop.permute.xlu1 %1999  ;;  %v6778_v1 = vpop.permute.xlu0 %1975  ;;  %v6787_v38 = vmul.f32 %v6577_v26, %v2670_v36  ;;  %v6790_v60 = vmul.f32 %v6594_v24, %v2687_v53  ;;  %v2530_v43 = vadd.f32 %v6426_v42, %v2510_v6  ;;  %v6798_v39 = vmul.f32 %v6547_v55, %v2657_v16 }
 0x26d   : > { %v2674_v29 = vstv %s6721_s22  ;;  %v2763_v15 = vstv %s6724_s13  ;;  %v6807_v36 = vmul.f32 %v6612_v20, %v2704_v14  ;;  %v2721_v53 = vstv %s6733_s19  ;;  %s6901_s22 = sld [smem:[#allocation4 + $0x1a2]]  ;;  %s6913_s13 = sld [smem:[#allocation4 + $0xc3]] }
 0x26e   : > { %v2731_v42 = vadd.f32 %v2730_v63, %v2714_v3  ;;  %v2747_v6 = vmul.f32 %v6350_v33, %v2746_v8  ;;  %v1775_v16 = vadd.f32 %v6618_v35, %v1754_v62  ;;  %v2562_v40 = vadd.f32 %v6532_v41, %v2530_v43  ;;  %s6915_s19 = sld [smem:[#allocation4 + $0x97]] }
 0x26f   : > { %v2691_v56 = vstv %s6737_s29  ;;  %v2780_v14 = vstv %s6744_s16  ;;  %v1779_v23 = vadd.f32 %v6550_v54, %v1762_v17  ;;  %v6825_v50 = vmul.f32 %v6577_v26, %v2674_v29  ;;  %s6921_s29 = sld [smem:[#allocation4 + $0xcc]]  ;;  %s6923_s16 = sld [smem:[#allocation4 + $0x1ab]] }
 0x270   : > { %v6818_v37 = vpop.permute.xlu1 %2823  ;;  %v6820_v9 = vpop.permute.xlu0 %1983  ;;  %v2665_v3 = vstv %s6758_s2  ;;  %v2764_v63 = vmul.f32 %v6366_v5, %v2763_v15  ;;  %v2538_v35 = vadd.f32 %v6504_v13, %v2514_v27  ;;  %v2594_v41 = vadd.f32 %v6600_v59, %v2562_v40  ;;  %s6952_s2 = sld [smem:[#allocation4 + $0xd5]] }
 0x271   : > { %v6834_v62 = vmul.f32 %v2721_v53, %v6211_v58  ;;  %v2738_v8 = vstv %s6764_s15  ;;  %v2755_v54 = vstv %s6769_s11  ;;  %v6843_v17 = vmul.f32 %v6594_v24, %v2691_v56  ;;  %s6954_s15 = sld [smem:[#allocation4 + $0xa0]]  ;;  %s6966_s11 = sld [smem:[#allocation4 + $0xa9]] }
 0x272   : > { %v2748_v13 = vadd.f32 %v2747_v6, %v2731_v42  ;;  %v2781_v59 = vmul.f32 %v6398_v22, %v2780_v14  ;;  %v1792_v58 = vadd.f32 %v6624_v44, %v1775_v16  ;;  %v2570_v27 = vadd.f32 %v6563_v7, %v2538_v35 }
 0x273   : > { %v2626_v43 = vadd.f32 %v6674_v48, %v2594_v41  ;;  %v6856_v29 = vmul.f32 %v6547_v55, %v2665_v3  ;;  %v1796_v42 = vadd.f32 %v6580_v2, %v1779_v23  ;;  %v6862_v6 = vmul.f32 %v6350_v33, %v2738_v8 }
 0x274   : > { %v6858_v15 = vpop.permute.xlu1 %2007  ;;  %v2808_v53 = vpop.permute.xlu0 %2807  ;;  %v2772_v44 = vstv %s6792_s25  ;;  %v2765_v7 = vadd.f32 %v2764_v63, %v2748_v13  ;;  %v2602_v48 = vadd.f32 %v6637_v51, %v2570_v27  ;;  %v6869_v16 = vmul.f32 %v6366_v5, %v2755_v54  ;;  %v4472_v13 = vld [vmem:[%s5051_s1] sm:$0xff]  ;;  %s6980_s25 = sld [smem:[#allocation4 + $0xb2]] }
 0x275   : > { %v2708_v40 = vstv %s6794_s24  ;;  %v2725_v55 = vstv %s6801_s18  ;;  %v2742_v56 = vstv %s6810_s10  ;;  %v2682_v14 = vstv %s6803_s12  ;;  %s6988_s24 = sld [smem:[#allocation4 + $0xbb]]  ;;  %s6994_s18 = sld [smem:[#allocation4 + $0x102]] }
 0x276   : > { %v2699_v2 = vstv %s6812_s20  ;;  %v2782_v23 = vadd.f32 %v2781_v59, %v2765_v7  ;;  %v1809_v3 = vadd.f32 %v6632_v46, %v1792_v58  ;;  %v2655_v63 = vadd.f32 %v6784_v21, %v2626_v43  ;;  %s6996_s12 = sld [smem:[#allocation4 + $0x10b]]  ;;  %s7023_s10 = sld [smem:[#allocation4 + $0x114]] }
 0x277   : > { %v6883_v51 = vmul.f32 %v6398_v22, %v2772_v44  ;;  %v2634_v35 = vadd.f32 %v6710_v11, %v2602_v48  ;;  %v1813_v54 = vadd.f32 %v6597_v19, %v1796_v42  ;;  %v6892_v46 = vmul.f32 %v6612_v20, %v2708_v40  ;;  %s7025_s20 = sld [smem:[#allocation4 + $0x11d]] }
 0x278   : > { %v6886_v41 = vpop.permute.xlu1 %2831  ;;  %v6888_v8 = vpop.permute.xlu0 %1991  ;;  %v6895_v21 = vmul.f32 %v4472_v13, %v2725_v55  ;;  %v6897_v59 = vadd.f32 %v2808_v53, %v2782_v23  ;;  %v6904_v11 = vmul.f32 %v6350_v33, %v2742_v56  ;;  %v6907_v58 = vmul.f32 %v6577_v26, %v2682_v14 }
 0x279   : > { %7827 = vst [vmem:[#allocation31_spill] sm:$0xff] %v6886_v41  ;;  %v6910_v19 = vmul.f32 %v6594_v24, %v2699_v2  ;;  %v2716_v27 = vstv %s6837_s26  ;;  %v2759_v43 = vstv %s6845_s23  ;;  %v2029_v53 = vstv %s6828_s27  ;;  %s7037_s27 = sld [smem:[#allocation4 + $0xde]]  ;;  %s7039_s26 = sld [smem:[#allocation4 + $0xc4]] }
 0x27a   : > { %7828 = vst [vmem:[#allocation29_spill] sm:$0xff] %v6897_v59  ;;  %v2046_v42 = vstv %s6839_s8  ;;  %v2063_v44 = vstv %s6847_s0  ;;  %v1826_v26 = vadd.f32 %v6668_v12, %v1809_v3  ;;  %v2672_v24 = vadd.f32 %v6787_v38, %v2655_v63  ;;  %v6943_v38 = vld [vmem:[#allocation2] sm:$0xff]  ;;  %v6946_v3 = vld [vmem:[#allocation2 + $0x8] sm:$0xff]  ;;  %s7045_s8 = sld [smem:[#allocation4 + $0xe7]]  ;;  %s7051_s23 = sld [smem:[#allocation4 + $0xcd]] }
 0x27b   : > { %v2659_v7 = vadd.f32 %v6798_v39, %v2634_v35  ;;  %v2776_v48 = vstv %s6853_s7  ;;  %v1830_v56 = vadd.f32 %v6615_v10, %v1813_v54  ;;  %v1906_v14 = vadd.f32 %v6312_v32, %v6697_v28  ;;  %v6960_v28 = vld [vmem:[#allocation2 + $0x10] sm:$0xff]  ;;  %s7063_s0 = sld [smem:[#allocation4 + $0xd6]]  ;;  %s7071_s7 = sld [smem:[#allocation4 + $0xf0]] }
 0x27c   : > { %v6929_v40 = vpop.permute.xlu1 %2839  ;;  %v6931_v55 = vpop.permute.xlu0 %2815  ;;  %v6937_v2 = vmul.f32 %v6612_v20, %v2716_v27  ;;  %v2080_v23 = vstv %s6865_s6  ;;  %v6941_v12 = vmul.f32 %v6366_v5, %v2759_v43  ;;  %v2030_v39 = vmul.f32 %v6943_v38, %v2029_v53  ;;  %v6971_v53 = vld [vmem:[#allocation2 + $0x18] sm:$0xff]  ;;  %s7091_s6 = sld [smem:[#allocation4 + $0xf9]] }
 0x27d   : > { %7829 = vst [vmem:[#allocation39_spill] sm:$0xff] %v6929_v40  ;;  %7830 = vst [vmem:[#allocation40_spill] sm:$0xff] %v6931_v55  ;;  %v6949_v63 = vmul.f32 %v6946_v3, %v2046_v42  ;;  %v2033_v10 = vstv %s6873_s3  ;;  %v1938_v32 = vadd.f32 %v6390_v47, %v1906_v14  ;;  %v6958_v20 = vmul.f32 %v6398_v22, %v2776_v48  ;;  %s7108_s3 = sld [smem:[#allocation4 + $0x126]] }
 0x27e   : > { %v6963_v35 = vmul.f32 %v6960_v28, %v2063_v44  ;;  %v2733_v54 = vstv %s6878_s9  ;;  %v1843_v27 = vadd.f32 %v6750_v4, %v1826_v26  ;;  %v2689_v43 = vadd.f32 %v6790_v60, %v2672_v24  ;;  %s7110_s9 = sld [smem:[#allocation4 + $0xdf]] }
 0x27f   : > { %v2676_v47 = vadd.f32 %v6825_v50, %v2659_v7  ;;  %v6974_v42 = vmul.f32 %v6971_v53, %v2080_v23  ;;  %v1847_v4 = vadd.f32 %v6654_v34, %v1830_v56  ;;  %v1970_v60 = vadd.f32 %v6469_v49, %v1938_v32  ;;  %v6998_v23 = vld [vmem:[#allocation3] sm:$0xff] }
 0x280   : > { %v6976_v48 = vpop.permute.xlu1 %2023  ;;  %v6978_v44 = vpop.permute.xlu0 %2015  ;;  %v6985_v50 = vmul.f32 %v6943_v38, %v2033_v10  ;;  %v2750_v26 = vstv %s6899_s14  ;;  %v2050_v24 = vstv %s6913_s13  ;;  %v6991_v7 = vmul.f32 %v4472_v13, %v2733_v54  ;;  %s7115_s14 = sld [smem:[#allocation4 + $0x12f]]  ;;  %s7123_s13 = sld [smem:[#allocation4 + $0x141]] }
 0x281   : > { %v2767_v14 = vstv %s6901_s22  ;;  %v2097_v40 = vstv %s6915_s19  ;;  %v2650_v49 = vadd.f32 %v6741_v25, %v6650_v57  ;;  %v2002_v34 = vadd.f32 %v6776_v18, %v1970_v60  ;;  %s7117_s22 = sld [smem:[#allocation4 + $0x138]] }
 0x282   : > { %v2067_v56 = vstv %s6921_s29  ;;  %v2784_v10 = vstv %s6923_s16  ;;  %v1860_v32 = vadd.f32 %v6753_v45, %v1843_v27  ;;  %v2706_v13 = vadd.f32 %v6807_v36, %v2689_v43  ;;  %s7150_s19 = sld [smem:[#allocation4 + $0xe8]]  ;;  %s7160_s29 = sld [smem:[#allocation4 + $0x103]] }
 0x283   : > { %v2693_v54 = vadd.f32 %v6843_v17, %v2676_v47  ;;  %v7010_v59 = vmul.f32 %v6350_v33, %v2750_v26  ;;  %v1864_v57 = vadd.f32 %v6687_v52, %v1847_v4  ;;  %v7018_v25 = vmul.f32 %v6946_v3, %v2050_v24  ;;  %v7831_v17 = vld [vmem:[#allocation30_spill] sm:$0xff]  ;;  %v7047_v47 = vld [vmem:[#allocation3 + $0x8] sm:$0xff]  ;;  %s7162_s16 = sld [smem:[#allocation4 + $0x10c]] }
 0x284   : > { %v7012_v55 = vpop.permute.xlu1 %2863  ;;  %v7014_v41 = vpop.permute.xlu0 %2855  ;;  %v7021_v18 = vmul.f32 %v6366_v5, %v2767_v14  ;;  %v7028_v33 = vmul.f32 %v2097_v40, %v6998_v23  ;;  %v7031_v45 = vmul.f32 %v6960_v28, %v2067_v56  ;;  %v2084_v36 = vstv %s6952_s2  ;;  %v7049_v4 = vld [vmem:[#allocation3 + $0x10] sm:$0xff]  ;;  %v7061_v24 = vld [vmem:[#allocation3 + $0x18] sm:$0xff]  ;;  %s7170_s2 = sld [smem:[#allocation4 + $0x14a]] }
 0x285   : > { %v7035_v52 = vmul.f32 %v6398_v22, %v2784_v10  ;;  %v2114_v5 = vstv %s6954_s15  ;;  %v1914_v27 = vadd.f32 %v7831_v17, %v6747_v31  ;;  %v2667_v43 = vadd.f32 %v6856_v29, %v2650_v49  ;;  %s7180_s15 = sld [smem:[#allocation4 + $0xf1]] }
 0x286   : > { %v2031_v40 = vadd.f32 %v2030_v39, %v2002_v34  ;;  %v2131_v22 = vstv %s6966_s11  ;;  %v1877_v60 = vadd.f32 %v6756_v61, %v1860_v32  ;;  %v2723_v26 = vadd.f32 %v6834_v62, %v2706_v13  ;;  %s7186_s11 = sld [smem:[#allocation4 + $0x115]] }
 0x287   : > { %v2710_v31 = vadd.f32 %v6892_v46, %v2693_v54  ;;  %v2148_v14 = vstv %s6980_s25  ;;  %v1881_v49 = vadd.f32 %v6727_v30, %v1864_v57  ;;  %v1946_v34 = vadd.f32 %v6340_v0, %v1914_v27  ;;  %v7833_v57 = vld [vmem:[#allocation38_spill] sm:$0xff]  ;;  %v7836_v27 = vld [vmem:[#allocation36_spill] sm:$0xff]  ;;  %s7191_s25 = sld [smem:[#allocation4 + $0x153]] }
 0x288   : > { %v7057_v29 = vpop.permute.xlu1 %2887  ;;  %v7059_v39 = vpop.permute.xlu0 %2847  ;;  %v7069_v56 = vmul.f32 %v6971_v53, %v2084_v36  ;;  %v2101_v61 = vstv %s6988_s24  ;;  %v2041_v62 = vstv %s6994_s18  ;;  %v2058_v46 = vstv %s6996_s12  ;;  %s7210_s24 = sld [smem:[#allocation4 + $0xfa]]  ;;  %s7221_s18 = sld [smem:[#allocation4 + $0x15c]] }
 0x289   : > { %7832 = vst [vmem:[#allocation30_spill] sm:$0xff] %v7059_v39  ;;  %v7077_v10 = vmul.f32 %v2114_v5, %v7047_v47  ;;  %v7080_v32 = vmul.f32 %v2131_v22, %v7049_v4  ;;  %v2684_v13 = vadd.f32 %v6907_v58, %v2667_v43  ;;  %v2048_v30 = vadd.f32 %v6949_v63, %v2031_v40  ;;  %v7838_v39 = vld [vmem:[#allocation32_spill] sm:$0xff]  ;;  %s7224_s12 = sld [smem:[#allocation4 + $0x11e]] }
 0x28a   : > { %v1978_v0 = vadd.f32 %v6778_v1, %v1946_v34  ;;  %v7086_v54 = vmul.f32 %v2148_v14, %v7061_v24  ;;  %v1894_v36 = vadd.f32 %v7833_v57, %v1877_v60  ;;  %v2740_v5 = vadd.f32 %v6862_v6, %v2723_v26 }
 0x28b   : > { %v2727_v17 = vadd.f32 %v6895_v21, %v2710_v31  ;;  %v7098_v1 = vmul.f32 %v2101_v61, %v6998_v23  ;;  %v1898_v43 = vadd.f32 %v7836_v27, %v1881_v49  ;;  %v7103_v6 = vmul.f32 %v6943_v38, %v2041_v62  ;;  %v7837_v61 = vld [vmem:[#allocation33_spill] sm:$0xff] }
 0x28c   : > { %v7093_v58 = vpop.permute.xlu1 %2895  ;;  %v7095_v63 = vpop.permute.xlu0 %2871  ;;  %v2010_v40 = vadd.f32 %v6858_v15, %v1978_v0  ;;  %v7106_v21 = vmul.f32 %v6946_v3, %v2058_v46  ;;  %v2075_v22 = vstv %s7023_s10  ;;  %v2092_v60 = vstv %s7025_s20  ;;  %s7227_s10 = sld [smem:[#allocation4 + $0x165]]  ;;  %s7232_s20 = sld [smem:[#allocation4 + $0x127]] }
 0x28d   : > { %7834 = vst [vmem:[#allocation38_spill] sm:$0xff] %v7093_v58  ;;  %7835 = vst [vmem:[#allocation41_spill] sm:$0xff] %v7095_v63  ;;  %v2037_v26 = vstv %s7037_s27  ;;  %v2118_v15 = vstv %s7039_s26  ;;  %v2701_v31 = vadd.f32 %v6910_v19, %v2684_v13  ;;  %v2065_v14 = vadd.f32 %v6963_v35, %v2048_v30  ;;  %s7248_s27 = sld [smem:[#allocation4 + $0x192]]  ;;  %s7260_s26 = sld [smem:[#allocation4 + $0x19b]] }
 0x28e   : > { %v2054_v49 = vstv %s7045_s8  ;;  %v2135_v34 = vstv %s7051_s23  ;;  %v1922_v62 = vadd.f32 %v7837_v61, %v1894_v36  ;;  %v2757_v46 = vadd.f32 %v6869_v16, %v2740_v5  ;;  %s7262_s8 = sld [smem:[#allocation4 + $0x16e]]  ;;  %s7283_s23 = sld [smem:[#allocation4 + $0x130]] }
 0x28f   : > { %v2744_v0 = vadd.f32 %v6904_v11, %v2727_v17  ;;  %v2152_v63 = vstv %s7063_s0  ;;  %v1930_v58 = vadd.f32 %v7838_v39, %v1898_v43  ;;  %v2035_v19 = vadd.f32 %v6985_v50, %v2010_v40  ;;  %v7839_v43 = vld [vmem:[#allocation35_spill] sm:$0xff]  ;;  %s7287_s0 = sld [smem:[#allocation4 + $0x1a4]] }
 0x290   : > { %v7129_v57 = vpop.permute.xlu1 %2911  ;;  %v7131_v27 = vpop.permute.xlu0 %2879  ;;  %v7137_v35 = vmul.f32 %v6960_v28, %v2075_v22  ;;  %v2071_v13 = vstv %s7071_s7  ;;  %v7141_v30 = vmul.f32 %v6971_v53, %v2092_v60  ;;  %v2038_v16 = vmul.f32 %v6943_v38, %v2037_v26  ;;  %v7840_v26 = vld [vmem:[#allocation34_spill] sm:$0xff]  ;;  %s7289_s7 = sld [smem:[#allocation4 + $0x177]] }
 0x291   : > { %v7145_v11 = vmul.f32 %v2118_v15, %v7047_v47  ;;  %v7148_v36 = vmul.f32 %v2135_v34, %v7049_v4  ;;  %v2718_v50 = vadd.f32 %v6937_v2, %v2701_v31  ;;  %v2082_v39 = vadd.f32 %v6974_v42, %v2065_v14 }
 0x292   : > { %v7155_v5 = vmul.f32 %v6946_v3, %v2054_v49  ;;  %v7158_v17 = vmul.f32 %v2152_v63, %v7061_v24  ;;  %v1954_v40 = vadd.f32 %v7839_v43, %v1922_v62  ;;  %v2774_v2 = vadd.f32 %v6883_v51, %v2757_v46 }
 0x293   : > { %v2761_v22 = vadd.f32 %v6941_v12, %v2744_v0  ;;  %v7168_v42 = vmul.f32 %v6960_v28, %v2071_v13  ;;  %v1962_v15 = vadd.f32 %v7840_v26, %v1930_v58  ;;  %v2052_v31 = vadd.f32 %v7018_v25, %v2035_v19  ;;  %v7841_v58 = vld [vmem:[#allocation28_spill] sm:$0xff] }
 0x294   : > { %v7172_v63 = vpop.permute.xlu1 %2175  ;;  %v7174_v60 = vpop.permute.xlu0 %2903  ;;  %v2088_v14 = vstv %s7091_s6  ;;  %v2917_v49 = vstv %s7108_s3  ;;  %v1986_v51 = vadd.f32 %v6820_v9, %v1954_v40  ;;  %v2934_v12 = vstv %s7115_s14  ;;  %s7306_s6 = sld [smem:[#allocation4 + $0x14b]]  ;;  %s7312_s3 = sld [smem:[#allocation4 + $0x180]] }
 0x295   : > { %v2951_v34 = vstv %s7117_s22  ;;  %v2105_v61 = vstv %s7110_s9  ;;  %v1994_v62 = vadd.f32 %v6888_v8, %v1962_v15  ;;  %v2735_v46 = vadd.f32 %v6991_v7, %v2718_v50  ;;  %s7317_s9 = sld [smem:[#allocation4 + $0x154]]  ;;  %s7345_s14 = sld [smem:[#allocation4 + $0x189]] }
 0x296   : > { %v2968_v0 = vstv %s7123_s13  ;;  %v2099_v25 = vadd.f32 %v7028_v33, %v2082_v39  ;;  %v2794_v19 = vadd.f32 %v7841_v58, %v2774_v2  ;;  %v2778_v13 = vadd.f32 %v6958_v20, %v2761_v22  ;;  %s7347_s22 = sld [smem:[#allocation4 + $0x139]]  ;;  %s7352_s13 = sld [smem:[#allocation4 + $0x1ad]] }
 0x297   : > { %v7197_v9 = vmul.f32 %v6971_v53, %v2088_v14  ;;  %v2018_v43 = vadd.f32 %v6978_v44, %v1986_v51  ;;  %v2069_v7 = vadd.f32 %v7031_v45, %v2052_v31  ;;  %v2026_v33 = vadd.f32 %v6976_v48, %v1994_v62  ;;  %v7842_v31 = vld [vmem:[#allocation37_spill] sm:$0xff] }
 0x298   : > { %v7200_v40 = vpop.permute.xlu1 %2199  ;;  %v7202_v8 = vpop.permute.xlu0 %2167  ;;  %v2918_v50 = vmul.f32 %v6943_v38, %v2917_v49  ;;  %v7208_v39 = vmul.f32 %v2105_v61, %v6998_v23  ;;  %v7213_v20 = vmul.f32 %v6946_v3, %v2934_v12  ;;  %v7216_v44 = vmul.f32 %v6960_v28, %v2951_v34 }
 0x299   : > { %v7219_v2 = vmul.f32 %v6971_v53, %v2968_v0  ;;  %v2122_v48 = vstv %s7150_s19  ;;  %v2752_v45 = vadd.f32 %v7010_v59, %v2735_v46  ;;  %v2116_v22 = vadd.f32 %v7077_v10, %v2099_v25  ;;  %s7361_s19 = sld [smem:[#allocation4 + $0x15d]] }
 0x29a   : > { %v2109_v26 = vstv %s7160_s29  ;;  %v2126_v15 = vstv %s7162_s16  ;;  %v2802_v14 = vadd.f32 %v7842_v31, %v2778_v13  ;;  %v2826_v49 = vadd.f32 %v6818_v37, %v2794_v19  ;;  %v7843_v19 = vld [vmem:[#allocation31_spill] sm:$0xff]  ;;  %s7363_s29 = sld [smem:[#allocation4 + $0x142]]  ;;  %s7367_s16 = sld [smem:[#allocation4 + $0x193]] }
 0x29b   : > { %v2039_v51 = vadd.f32 %v2038_v16, %v2018_v43  ;;  %v2921_v12 = vstv %s7170_s2  ;;  %v2086_v59 = vadd.f32 %v7069_v56, %v2069_v7  ;;  %v2043_v10 = vadd.f32 %v7103_v6, %v2026_v33  ;;  %s7380_s2 = sld [smem:[#allocation4 + $0x16f]] }
 0x29c   : > { %v7237_v34 = vpop.permute.xlu1 %2207  ;;  %v7239_v61 = vpop.permute.xlu0 %2183  ;;  %v7244_v62 = vmul.f32 %v2122_v48, %v7047_v47  ;;  %v2139_v46 = vstv %s7180_s15  ;;  %v2858_v0 = vadd.f32 %v7014_v41, %v2826_v49  ;;  %v7251_v37 = vmul.f32 %v2109_v26, %v6998_v23  ;;  %s7385_s15 = sld [smem:[#allocation4 + $0x166]] }
 0x29d   : > { %v7254_v16 = vmul.f32 %v2126_v15, %v7047_v47  ;;  %v2143_v25 = vstv %s7186_s11  ;;  %v2769_v56 = vadd.f32 %v7021_v18, %v2752_v45  ;;  %v2922_v6 = vmul.f32 %v6943_v38, %v2921_v12  ;;  %s7391_s11 = sld [smem:[#allocation4 + $0x19c]] }
 0x29e   : > { %v2938_v58 = vstv %s7191_s25  ;;  %v2133_v41 = vadd.f32 %v7080_v32, %v2116_v22  ;;  %v2834_v13 = vadd.f32 %v7843_v19, %v2802_v14  ;;  %v2056_v43 = vadd.f32 %v7155_v5, %v2039_v51  ;;  %s7400_s25 = sld [smem:[#allocation4 + $0x178]] }
 0x29f   : > { %v2890_v7 = vadd.f32 %v7057_v29, %v2858_v0  ;;  %v7269_v18 = vmul.f32 %v2139_v46, %v7049_v4  ;;  %v2060_v45 = vadd.f32 %v7106_v21, %v2043_v10  ;;  %v2103_v26 = vadd.f32 %v7098_v1, %v2086_v59  ;;  %v7845_v0 = vld [vmem:[#allocation40_spill] sm:$0xff] }
 0x2a0   : > { %v2232_v33 = vpop.permute.xlu1 %2231  ;;  %v7271_v48 = vpop.permute.xlu0 %2191  ;;  %v2156_v15 = vstv %s7210_s24  ;;  %v7277_v32 = vmul.f32 %v2143_v25, %v7049_v4  ;;  %v2866_v22 = vadd.f32 %v7012_v55, %v2834_v13  ;;  %v2939_v5 = vmul.f32 %v6946_v3, %v2938_v58  ;;  %v7844_v55 = vld [vmem:[#allocation38_spill] sm:$0xff]  ;;  %s7408_s24 = sld [smem:[#allocation4 + $0x1a5]] }
 0x2a1   : > { %v2955_v29 = vstv %s7221_s18  ;;  %v2160_v31 = vstv %s7224_s12  ;;  %v2786_v14 = vadd.f32 %v7035_v52, %v2769_v56  ;;  %v2972_v49 = vstv %s7227_s10  ;;  %s7418_s18 = sld [smem:[#allocation4 + $0x181]]  ;;  %s7424_s12 = sld [smem:[#allocation4 + $0x1ae]] }
 0x2a2   : > { %v2150_v1 = vadd.f32 %v7086_v54, %v2133_v41  ;;  %v2985_v21 = vstv %s7232_s20  ;;  %v2073_v51 = vadd.f32 %v7168_v42, %v2056_v43  ;;  %v2919_v12 = vadd.f32 %v2918_v50, %v2890_v7  ;;  %v7847_v7 = vld [vmem:[#allocation29_spill] sm:$0xff]  ;;  %s7431_s10 = sld [smem:[#allocation4 + $0x18a]] }
 0x2a3   : > { %v2898_v59 = vadd.f32 %v7844_v55, %v2866_v22  ;;  %v7296_v10 = vmul.f32 %v2156_v15, %v7061_v24  ;;  %v2818_v25 = vadd.f32 %v7845_v0, %v2786_v14  ;;  %v2077_v54 = vadd.f32 %v7137_v35, %v2060_v45  ;;  %v7848_v45 = vld [vmem:[#allocation39_spill] sm:$0xff]  ;;  %v7849_v0 = vld [vmem:[#allocation41_spill] sm:$0xff] }
 0x2a4   : > { %v7298_v46 = vpop.permute.xlu1 %2223  ;;  %v7300_v52 = vpop.permute.xlu0 %2215  ;;  %v2120_v56 = vadd.f32 %v7145_v11, %v2103_v26  ;;  %v2170_v42 = vadd.f32 %v7202_v8, %v2150_v1  ;;  %v2956_v50 = vmul.f32 %v6960_v28, %v2955_v29  ;;  %v7310_v58 = vmul.f32 %v6971_v53, %v2972_v49  ;;  %v7846_v11 = vld [vmem:[#allocation30_spill] sm:$0xff] }
 0x2a5   : > { %v7315_v41 = vmul.f32 %v2160_v31, %v7061_v24  ;;  %v7320_v35 = vmul.f32 %v2985_v21, %v6998_v23  ;;  %v2850_v19 = vadd.f32 %v7846_v11, %v2818_v25  ;;  %v2929_v8 = vstv %s7248_s27 }
 0x2a6   : > { %v2946_v13 = vstv %s7260_s26  ;;  %v2925_v43 = vstv %s7262_s8  ;;  %v2842_v26 = vadd.f32 %v7848_v45, %v7847_v7  ;;  %v2090_v15 = vadd.f32 %v7197_v9, %v2073_v51 }
 0x2a7   : > { %v2936_v22 = vadd.f32 %v7213_v20, %v2919_v12  ;;  %v2923_v29 = vadd.f32 %v2922_v6, %v2898_v59  ;;  %v2094_v49 = vadd.f32 %v7141_v30, %v2077_v54  ;;  %v2882_v1 = vadd.f32 %v7131_v27, %v2850_v19 }
 0x2a8   : > { %v7330_v31 = vpop.permute.xlu1 %3063  ;;  %v7332_v14 = vpop.permute.xlu0 %3055  ;;  %v2137_v21 = vadd.f32 %v7148_v36, %v2120_v56  ;;  %v2202_v55 = vadd.f32 %v7200_v40, %v2170_v42  ;;  %v2874_v25 = vadd.f32 %v7849_v0, %v2842_v26  ;;  %v2930_v11 = vmul.f32 %v6943_v38, %v2929_v8 }
 0x2a9   : > { %v2947_v9 = vmul.f32 %v6946_v3, %v2946_v13  ;;  %v3002_v20 = vstv %s7283_s23  ;;  %v2963_v6 = vstv %s7287_s0  ;;  %v2926_v51 = vmul.f32 %v6943_v38, %v2925_v43 }
 0x2aa   : > { %v2942_v12 = vstv %s7289_s7  ;;  %v2234_v27 = vadd.f32 %v2232_v33, %v2202_v55  ;;  %v2953_v30 = vadd.f32 %v7216_v44, %v2936_v22  ;;  %v2940_v36 = vadd.f32 %v2939_v5, %v2923_v29 }
 0x2ab   : > { %v2906_v40 = vadd.f32 %v7174_v60, %v2874_v25  ;;  %v2107_v59 = vadd.f32 %v7208_v39, %v2090_v15  ;;  %v2914_v38 = vadd.f32 %v7129_v57, %v2882_v1  ;;  %v2154_v42 = vadd.f32 %v7158_v17, %v2137_v21 }
 0x2ac   : > { %v2264_v54 = vpop.permute.xlu1 %2263  ;;  %v2240_v56 = vpop.permute.xlu0 %2239  ;;  %v2111_v33 = vadd.f32 %v7251_v37, %v2094_v49  ;;  %v2943_v8 = vmul.f32 %v6946_v3, %v2942_v12  ;;  %v2959_v13 = vstv %s7312_s3  ;;  %v2989_v44 = vstv %s7306_s6 }
 0x2ad   : > { %v2266_v19 = vadd.f32 %v2264_v54, %v2234_v27  ;;  %v3006_v5 = vstv %s7317_s9  ;;  %v2178_v60 = vadd.f32 %v7172_v63, %v2154_v42  ;;  %v2970_v17 = vadd.f32 %v7219_v2, %v2953_v30 }
 0x2ae   : > { %v2957_v37 = vadd.f32 %v2956_v50, %v2940_v36  ;;  %v2927_v3 = vadd.f32 %v2926_v51, %v2906_v40  ;;  %v2124_v7 = vadd.f32 %v7244_v62, %v2107_v59  ;;  %v2931_v63 = vadd.f32 %v2930_v11, %v2914_v38 }
 0x2af   : > { %v2291_v39 = vpack.c.bf16 %v2266_v19, %v2266_v19  ;;  %v2294_v57 = vsel %vm1405_vm4, %v2266_v19, 0.0  ;;  %v2304_v43 = vmul.f32 %v2266_v19, %v2266_v19  ;;  %v2210_v15 = vadd.f32 %v7237_v34, %v2178_v60 }
 0x2b0   : > { %v7371_v45 = vpop.permute.xlu1 %3087  ;;  %2295 = vadd.xlane.f32.xlu0 %v2294_v57  ;;  %v7373_v26 = vpop.permute.xlu0 %2247  ;;  %v2128_v22 = vadd.f32 %v7254_v16, %v2111_v33  ;;  %v2964_v62 = vmul.f32 %v6960_v28, %v2963_v6  ;;  %v2990_v50 = vmul.f32 %v2989_v44, %v6998_v23  ;;  %v3007_v29 = vmul.f32 %v3006_v5, %v7047_v47 }
 0x2b1   : > { %4128 = vst.msk [vmem:[%s5754_s21 + $0x10] sm:$0xf] %vm1403_vm5, %v2291_v39  ;;  %v2305_v2 = vsel %vm1405_vm4, %v2304_v43, 0.0  ;;  %v3003_v49 = vmul.f32 %v3002_v20, %v7047_v47  ;;  %v2960_v34 = vmul.f32 %v6960_v28, %v2959_v13  ;;  %v2976_v16 = vstv %s7345_s14 }
 0x2b2   : > { %2306 = vadd.xlane.f32.xlu1 %v2305_v2  ;;  %v3019_v1 = vstv %s7347_s22  ;;  %v2242_v21 = vadd.f32 %v2240_v56, %v2210_v15  ;;  %v2974_v55 = vadd.f32 %v7310_v58, %v2957_v37  ;;  %v2944_v0 = vadd.f32 %v2943_v8, %v2927_v3 }
 0x2b3   : > { %v2987_v25 = vadd.f32 %v7320_v35, %v2970_v17  ;;  %v2980_v20 = vstv %s7352_s13  ;;  %v2948_v51 = vadd.f32 %v2947_v9, %v2931_v63  ;;  %v2141_v28 = vadd.f32 %v7269_v18, %v2124_v7 }
 0x2b4   : > { %v2272_v11 = vpop.permute.xlu1 %2271  ;;  %v7395_v6 = vpop.permute.xlu0 %3071  ;;  %v2145_v12 = vadd.f32 %v7277_v32, %v2128_v22  ;;  %v2977_v30 = vmul.f32 %v6971_v53, %v2976_v16  ;;  %v3023_v36 = vstv %s7361_s19  ;;  %v3020_v58 = vmul.f32 %v3019_v1, %v7049_v4 }
 0x2b5   : > { %v2274_v27 = vadd.f32 %v2272_v11, %v2242_v21  ;;  %v3036_v40 = vstv %s7363_s29  ;;  %v2997_v9 = vstv %s7367_s16  ;;  %v2961_v18 = vadd.f32 %v2960_v34, %v2944_v0 }
 0x2b6   : > { %v2991_v32 = vadd.f32 %v2990_v50, %v2974_v55  ;;  %v3004_v56 = vadd.f32 %v3003_v49, %v2987_v25  ;;  %v2981_v33 = vmul.f32 %v6971_v53, %v2980_v20  ;;  %v2965_v19 = vadd.f32 %v2964_v62, %v2948_v51 }
 0x2b7   : > { %v2315_v35 = vpack.c.bf16 %v2274_v27, %v2274_v27  ;;  %v2318_v59 = vsel %vm1405_vm4, %v2274_v27, 0.0  ;;  %v2328_v54 = vmul.f32 %v2274_v27, %v2274_v27  ;;  %v2158_v8 = vadd.f32 %v7296_v10, %v2141_v28 }
 0x2b8   : > { %v7410_v38 = vpop.permute.xlu1 %3095  ;;  %2319 = vadd.xlane.f32.xlu0 %v2318_v59  ;;  %v2256_v42 = vpop.permute.xlu0 %2255  ;;  %v2162_v13 = vadd.f32 %v7315_v41, %v2145_v12  ;;  %v2993_v44 = vstv %s7380_s2  ;;  %v3024_v5 = vmul.f32 %v3023_v36, %v7049_v4  ;;  %v3040_v60 = vstv %s7385_s15 }
 0x2b9   : > { %4129 = vst.msk [vmem:[%s5754_s21 + $0x14] sm:$0xf] %vm1403_vm5, %v2315_v35  ;;  %v3037_v39 = vmul.f32 %v3036_v40, %v7061_v24  ;;  %v2998_v57 = vmul.f32 %v2997_v9, %v6998_v23  ;;  %v2186_v53 = vadd.f32 %v7239_v61, %v2158_v8  ;;  %v2329_v41 = vsel %vm1405_vm4, %v2328_v54, 0.0 }
 0x2ba   : > { %v2194_v10 = vadd.f32 %v7271_v48, %v2162_v13  ;;  %v3014_v43 = vstv %s7391_s11  ;;  %v2978_v17 = vadd.f32 %v2977_v30, %v2961_v18  ;;  %v3008_v37 = vadd.f32 %v3007_v29, %v2991_v32 }
 0x2bb   : > { %v3021_v3 = vadd.f32 %v3020_v58, %v3004_v56  ;;  %v2994_v7 = vmul.f32 %v2993_v44, %v6998_v23  ;;  %v2218_v48 = vadd.f32 %v7300_v52, %v2186_v53  ;;  %v3010_v22 = vstv %s7400_s25 }
 0x2bc   : > { %v7433_v63 = vpop.permute.xlu1 %3103  ;;  %2330 = vadd.xlane.f32.xlu0 %v2329_v41  ;;  %v7435_v15 = vpop.permute.xlu0 %3079  ;;  %v2226_v61 = vadd.f32 %v7298_v46, %v2194_v10  ;;  %v2982_v2 = vadd.f32 %v2981_v33, %v2965_v19  ;;  %v3041_v62 = vmul.f32 %v3040_v60, %v7061_v24  ;;  %v3015_v49 = vmul.f32 %v3014_v43, %v7047_v47 }
 0x2bd   : > { %v2250_v50 = vadd.f32 %v7373_v26, %v2218_v48  ;;  %v3031_v34 = vstv %s7408_s24  ;;  %v3025_v16 = vadd.f32 %v3024_v5, %v3008_v37  ;;  %v3038_v1 = vadd.f32 %v3037_v39, %v3021_v3 }
 0x2be   : > { %v2258_v29 = vadd.f32 %v2256_v42, %v2226_v61  ;;  %v2995_v21 = vadd.f32 %v2994_v7, %v2978_v17  ;;  %v3011_v55 = vmul.f32 %v3010_v22, %v7047_v47  ;;  %v3027_v52 = vstv %s7418_s18 }
 0x2bf   : > { %v2999_v25 = vadd.f32 %v2998_v57, %v2982_v2  ;;  %v3058_v51 = vadd.f32 %v7332_v14, %v3038_v1  ;;  %v3032_v26 = vmul.f32 %v3031_v34, %v7049_v4  ;;  %v3048_v28 = vstv %s7424_s12 }
 0x2c0   : > { %v2288_v0 = vpop.permute.xlu1 %2287  ;;  %v2280_v46 = vpop.permute.xlu0 %2279  ;;  %v3042_v58 = vadd.f32 %v3041_v62, %v3025_v16  ;;  %v3012_v40 = vadd.f32 %v3011_v55, %v2995_v21  ;;  %v3028_v35 = vmul.f32 %v3027_v52, %v7049_v4  ;;  %v3044_v59 = vstv %s7431_s10  ;;  %v3275_v52 = vld [vmem:[%s5051_s1] sm:$0xff] }
 0x2c1   : > { %v2290_v11 = vadd.f32 %v2288_v0, %v2258_v29  ;;  %v2282_v20 = vadd.f32 %v2280_v46, %v2250_v50  ;;  %v3090_v14 = vadd.f32 %v7371_v45, %v3058_v51  ;;  %v3016_v18 = vadd.f32 %v3015_v49, %v2999_v25 }
 0x2c2   : > { %v3066_v42 = vadd.f32 %v7330_v31, %v3042_v58  ;;  %v3029_v8 = vadd.f32 %v3028_v35, %v3012_v40  ;;  %v3045_v13 = vmul.f32 %v3044_v59, %v7061_v24  ;;  %v3049_v44 = vmul.f32 %v3048_v28, %v7061_v24 }
 0x2c3   : > { %v2363_v12 = vpack.c.bf16 %v2290_v11, %v2290_v11  ;;  %v2339_v27 = vpack.c.bf16 %v2282_v20, %v2282_v20  ;;  %v2342_v30 = vsel %vm1405_vm4, %v2282_v20, 0.0  ;;  %v2352_v36 = vmul.f32 %v2282_v20, %v2282_v20 }
 0x2c4   : > { %v3128_v54 = vpop.permute.xlu1 %3127  ;;  %2343 = vadd.xlane.f32.xlu1 %v2342_v30  ;;  %v3120_v9 = vpop.permute.xlu0 %3119  ;;  %v2376_v56 = vmul.f32 %v2290_v11, %v2290_v11  ;;  %v2366_v19 = vsel %vm1405_vm4, %v2290_v11, 0.0  ;;  %v3098_v60 = vadd.f32 %v7410_v38, %v3066_v42  ;;  %v3033_v39 = vadd.f32 %v3032_v26, %v3016_v18 }
 0x2c5   : > { %4131 = vst.msk [vmem:[%s5754_s21 + $0x1c] sm:$0xf] %vm1403_vm5, %v2363_v12  ;;  %4130 = vst.msk [vmem:[%s5754_s21 + $0x18] sm:$0xf] %vm1403_vm5, %v2339_v27  ;;  %v2353_v32 = vsel %vm1405_vm4, %v2352_v36, 0.0  ;;  %v3122_v33 = vadd.f32 %v3120_v9, %v3090_v14  ;;  %v3046_v17 = vadd.f32 %v3045_v13, %v3029_v8  ;;  %v3276_v36 = vld [vmem:[%s5051_s1 + $0x8] sm:$0xff] }
 0x2c6   : > { %2354 = vadd.xlane.f32.xlu0 %v2353_v32  ;;  %v2377_v53 = vsel %vm1405_vm4, %v2376_v56, 0.0  ;;  %v3130_v31 = vadd.f32 %v3128_v54, %v3098_v60  ;;  %v3050_v7 = vadd.f32 %v3049_v44, %v3033_v39  ;;  %v3277_v32 = vld [vmem:[%s5051_s1 + $0x10] sm:$0xff]  ;;  %v3278_v60 = vld [vmem:[%s5051_s1 + $0x18] sm:$0xff]  ;;  %s4306_s1 = spop %4305 }
 0x2c7   : > { %v3074_v48 = vadd.f32 %v7395_v6, %v3046_v17 }
 0x2c8   : > { %v3152_v45 = vpop.permute.xlu1 %3151  ;;  %2367 = vadd.xlane.f32.xlu1 %v2366_v19  ;;  %v3112_v5 = vpop.permute.xlu0 %3111  ;;  %v3082_v22 = vadd.f32 %v7435_v15, %v3050_v7 }
 0x2c9   : > { %v3154_v57 = vadd.f32 %v3152_v45, %v3122_v33  ;;  %v3106_v34 = vadd.f32 %v7433_v63, %v3074_v48 }
 0x2ca   : > { %2378 = vadd.xlane.f32.xlu0 %v2377_v53  ;;  %v3114_v16 = vadd.f32 %v3112_v5, %v3082_v22 }
 0x2cb   : > { %v3179_v10 = vpack.c.bf16 %v3154_v57, %v3154_v57  ;;  %v3182_v41 = vsel %vm1405_vm4, %v3154_v57, 0.0  ;;  %v3192_v43 = vmul.f32 %v3154_v57, %v3154_v57 }
 0x2cc   : > { %v3160_v37 = vpop.permute.xlu1 %3159  ;;  %3183 = vadd.xlane.f32.xlu1 %v3182_v41  ;;  %v3136_v3 = vpop.permute.xlu0 %3135 }
 0x2cd   : > { %4288 = vst.msk [vmem:[%s5754_s21 + $0x20] sm:$0xf] %vm1403_vm5, %v3179_v10  ;;  %v3162_v61 = vadd.f32 %v3160_v37, %v3130_v31  ;;  %v3193_v38 = vsel %vm1405_vm4, %v3192_v43, 0.0  ;;  %v3138_v6 = vadd.f32 %v3136_v3, %v3106_v34 }
 0x2ce   : > { %3194 = vadd.xlane.f32.xlu0 %v3193_v38 }
 0x2cf   : > { %v3203_v2 = vpack.c.bf16 %v3162_v61, %v3162_v61  ;;  %v3206_v62 = vsel %vm1405_vm4, %v3162_v61, 0.0  ;;  %v3216_v50 = vmul.f32 %v3162_v61, %v3162_v61 }
 0x2d0   : > { %v3288_v29 = vpop.permute.xlu1 %3287  ;;  %3207 = vadd.xlane.f32.xlu1 %v3206_v62  ;;  %v3144_v49 = vpop.permute.xlu0 %3143 }
 0x2d1   : > { %4289 = vst.msk [vmem:[%s5754_s21 + $0x24] sm:$0xf] %vm1403_vm5, %v3203_v2  ;;  %v3217_v1 = vsel %vm1405_vm4, %v3216_v50, 0.0  ;;  %v3146_v15 = vadd.f32 %v3144_v49, %v3114_v16  ;;  %v3299_v28 = vmax.f32 %v3275_v52, %v3288_v29 }
 0x2d2   : > { %3218 = vadd.xlane.f32.xlu0 %v3217_v1 }
 0x2d4   : > { %v3176_v21 = vpop.permute.xlu1 %3175  ;;  %v3168_v55 = vpop.permute.xlu0 %3167 }
 0x2d5   : > { %v3178_v0 = vadd.f32 %v3176_v21, %v3146_v15  ;;  %v3170_v46 = vadd.f32 %v3168_v55, %v3138_v6 }
 0x2d7   : > { %v3251_v25 = vpack.c.bf16 %v3178_v0, %v3178_v0  ;;  %v3227_v11 = vpack.c.bf16 %v3170_v46, %v3170_v46  ;;  %v3230_v63 = vsel %vm1405_vm4, %v3170_v46, 0.0  ;;  %v3240_v20 = vmul.f32 %v3170_v46, %v3170_v46 }
 0x2d8   : > { %3231 = vadd.xlane.f32.xlu1 %v3230_v63  ;;  %v3316_v51 = vpop.permute.xlu0 %3315  ;;  %v3318_v26 = vpop.permute.xlu1 %3317  ;;  %v3264_v30 = vmul.f32 %v3178_v0, %v3178_v0  ;;  %v3254_v40 = vsel %vm1405_vm4, %v3178_v0, 0.0 }
 0x2d9   : > { %4291 = vst.msk [vmem:[%s5754_s21 + $0x2c] sm:$0xf] %vm1403_vm5, %v3251_v25  ;;  %4290 = vst.msk [vmem:[%s5754_s21 + $0x28] sm:$0xf] %vm1403_vm5, %v3227_v11  ;;  %v3327_v12 = vmax.f32 %v6998_v23, %v3316_v51  ;;  %v3241_v27 = vsel %vm1405_vm4, %v3240_v20, 0.0  ;;  %v3328_v35 = vmax.f32 %v7047_v47, %v3318_v26 }
 0x2da   : > { %3242 = vadd.xlane.f32.xlu0 %v3241_v27  ;;  %v3265_v14 = vsel %vm1405_vm4, %v3264_v30, 0.0 }
 0x2db   : > { %v3331_v58 = vmax.f32 %v3299_v28, %v3327_v12 }
 0x2dc   : > { %3255 = vadd.xlane.f32.xlu1 %v3254_v40  ;;  %v3290_v59 = vpop.permute.xlu0 %3289  ;;  %v3320_v54 = vpop.permute.xlu1 %3319 }
 0x2dd   : > { %v3335_v9 = vpack.c.bf16 %v3331_v58, %v3331_v58  ;;  %v3300_v18 = vmax.f32 %v3276_v36, %v3290_v59  ;;  %v3354_v23 = vmul.f32 %v3331_v58, %v3331_v58  ;;  %v3344_v42 = vsel %vm1405_vm4, %v3331_v58, 0.0 }
 0x2de   : > { %3266 = vadd.xlane.f32.xlu0 %v3265_v14  ;;  %v3329_v33 = vmax.f32 %v7049_v4, %v3320_v54 }
 0x2df   : > { %4292 = vst.msk [vmem:[%s5754_s21 + $0x30] sm:$0xf] %vm1403_vm5, %v3335_v9  ;;  %v3332_v56 = vmax.f32 %v3300_v18, %v3328_v35  ;;  %v3355_v13 = vsel %vm1405_vm4, %v3354_v23, 0.0 }
 0x2e0   : > { %3345 = vadd.xlane.f32.xlu1 %v3344_v42  ;;  %v3292_v47 = vpop.permute.xlu0 %3291  ;;  %v3322_v19 = vpop.permute.xlu1 %3321 }
 0x2e1   : > { %v3336_v8 = vpack.c.bf16 %v3332_v56, %v3332_v56  ;;  %v3301_v44 = vmax.f32 %v3277_v32, %v3292_v47  ;;  %v3365_v45 = vsel %vm1405_vm4, %v3332_v56, 0.0  ;;  %v3375_v5 = vmul.f32 %v3332_v56, %v3332_v56 }
 0x2e2   : > { %3356 = vadd.xlane.f32.xlu0 %v3355_v13  ;;  %v3330_v57 = vmax.f32 %v7061_v24, %v3322_v19 }
 0x2e3   : > { %4293 = vst.msk [vmem:[%s5754_s21 + $0x34] sm:$0xf] %vm1403_vm5, %v3336_v8  ;;  %v3333_v39 = vmax.f32 %v3301_v44, %v3329_v33  ;;  %v3376_v4 = vsel %vm1405_vm4, %v3375_v5, 0.0 }
 0x2e4   : > { %3366 = vadd.xlane.f32.xlu1 %v3365_v45  ;;  %v3294_v53 = vpop.permute.xlu0 %3293 }
 0x2e5   : > { %v3337_v31 = vpack.c.bf16 %v3333_v39, %v3333_v39  ;;  %v3302_v10 = vmax.f32 %v3278_v60, %v3294_v53  ;;  %v3386_v41 = vsel %vm1405_vm4, %v3333_v39, 0.0  ;;  %v3396_v43 = vmul.f32 %v3333_v39, %v3333_v39 }
 0x2e6   : > { %3377 = vadd.xlane.f32.xlu0 %v3376_v4 }
 0x2e7   : > { %4294 = vst.msk [vmem:[%s5754_s21 + $0x38] sm:$0xf] %vm1403_vm5, %v3337_v31  ;;  %v3334_v17 = vmax.f32 %v3302_v10, %v3330_v57  ;;  %v3397_v37 = vsel %vm1405_vm4, %v3396_v43, 0.0 }
 0x2e8   : > { %3387 = vadd.xlane.f32.xlu1 %v3386_v41 }
 0x2e9   : > { %v3338_v3 = vpack.c.bf16 %v3334_v17, %v3334_v17  ;;  %v3407_v24 = vsel %vm1405_vm4, %v3334_v17, 0.0  ;;  %v3417_v7 = vmul.f32 %v3334_v17, %v3334_v17 }
 0x2ea   : > { %3398 = vadd.xlane.f32.xlu0 %v3397_v37 }
 0x2eb   : > { %4295 = vst.msk [vmem:[%s5754_s21 + $0x3c] sm:$0xf] %vm1403_vm5, %v3338_v3  ;;  %v3418_v61 = vsel %vm1405_vm4, %v3417_v7, 0.0  ;;  %s4308_s21 = spop %4307  ;;  %vm3522_vm5 = vcmask 122880  }
 0x2ec   : > { %3408 = vadd.xlane.f32.xlu1 %v3407_v24  ;;  %s4310_s20 = spop %4309 }
 0x2ed   : > { %s4312_s27 = spop %4311 }
 0x2ee   : > { %3419 = vadd.xlane.f32.xlu0 %v3418_v61  ;;  %s4314_s26 = spop %4313 }
 0x2ef   : > { %s4316_s8 = spop %4315 }
 0x2f0   : > { %s4318_s23 = spop %4317 }
 0x2f1   : > { %s7507_s0 = spop %4319 }
 0x33d   : > { %v2296_v38 = vpop.xlane.xlu0 %2295 }
 0x33e   : > { %v2297_v48 = vrot.slane %v2296_v38, 4 }
 0x33f   : > { %v2307_v22 = vpop.xlane.xlu1 %2306 }
 0x340   : > { %v2298_v2 = vadd.f32 %v2297_v48, %v2296_v38  ;;  %v2308_v62 = vrot.slane %v2307_v22, 4 }
 0x342   : > { %v2299_v50 = vrot.slane %v2298_v2, 2  ;;  %v2309_v29 = vadd.f32 %v2308_v62, %v2307_v22 }
 0x344   : > { %v2310_v49 = vrot.slane %v2309_v29, 2  ;;  %v2300_v34 = vadd.f32 %v2299_v50, %v2298_v2 }
 0x345   : > { %v2320_v16 = vpop.xlane.xlu0 %2319 }
 0x346   : > { %v2321_v1 = vrot.slane %v2320_v16, 4  ;;  %v2301_v6 = vrot.slane %v2300_v34, 1  ;;  %v2311_v15 = vadd.f32 %v2310_v49, %v2309_v29 }
 0x348   : > { %v2322_v21 = vadd.f32 %v2321_v1, %v2320_v16  ;;  %v2302_v55 = vadd.f32 %v2301_v6, %v2300_v34  ;;  %v2312_v0 = vrot.slane %v2311_v15, 1 }
 0x349   : > { %v2331_v46 = vpop.xlane.xlu0 %2330 }
 0x34a   : > { %v2323_v52 = vrot.slane %v2322_v21, 2  ;;  %v2332_v25 = vrot.slane %v2331_v46, 4  ;;  %4321 = vpush %v2302_v55  ;;  %v2313_v11 = vadd.f32 %v2312_v0, %v2311_v15 }
 0x34c   : > { %v2333_v63 = vadd.f32 %v2332_v25, %v2331_v46  ;;  %4323 = vpush %v2313_v11  ;;  %v2324_v20 = vadd.f32 %v2323_v52, %v2322_v21 }
 0x34e   : > { %v2334_v51 = vrot.slane %v2333_v63, 2  ;;  %v2325_v26 = vrot.slane %v2324_v20, 1 }
 0x350   : > { %v2326_v28 = vadd.f32 %v2325_v26, %v2324_v20  ;;  %v2335_v12 = vadd.f32 %v2334_v51, %v2333_v63 }
 0x351   : > { %v2344_v27 = vpop.xlane.xlu1 %2343 }
 0x352   : > { %v2345_v30 = vrot.slane %v2344_v27, 4  ;;  %4325 = vpush %v2326_v28  ;;  %v2336_v36 = vrot.slane %v2335_v12, 1 }
 0x353   : > { %v2355_v58 = vpop.xlane.xlu0 %2354 }
 0x354   : > { %v2346_v40 = vadd.f32 %v2345_v30, %v2344_v27  ;;  %v2356_v35 = vrot.slane %v2355_v58, 4  ;;  %v2337_v59 = vadd.f32 %v2336_v36, %v2335_v12 }
 0x355   : > { %v2368_v54 = vpop.xlane.xlu1 %2367 }
 0x356   : > { %v2347_v9 = vrot.slane %v2346_v40, 2  ;;  %v2357_v14 = vadd.f32 %v2356_v35, %v2355_v58  ;;  %v2369_v18 = vrot.slane %v2368_v54, 4  ;;  %4327 = vpush %v2337_v59 }
 0x357   : > { %v2379_v23 = vpop.xlane.xlu0 %2378 }
 0x358   : > { %v2358_v32 = vrot.slane %v2357_v14, 2  ;;  %v2370_v56 = vadd.f32 %v2369_v18, %v2368_v54  ;;  %v2380_v42 = vrot.slane %v2379_v23, 4  ;;  %v2348_v33 = vadd.f32 %v2347_v9, %v2346_v40 }
 0x359   : > { %v3184_v47 = vpop.xlane.xlu1 %3183 }
 0x35a   : > { %v2371_v19 = vrot.slane %v2370_v56, 2  ;;  %v2381_v8 = vadd.f32 %v2380_v42, %v2379_v23  ;;  %v3185_v13 = vrot.slane %v3184_v47, 4  ;;  %v2349_v44 = vrot.slane %v2348_v33, 1 }
 0x35b   : > { %v3195_v45 = vpop.xlane.xlu0 %3194  ;;  %v2359_v5 = vadd.f32 %v2358_v32, %v2357_v14 }
 0x35c   : > { %v2382_v60 = vrot.slane %v2381_v8, 2  ;;  %v3186_v39 = vadd.f32 %v3185_v13, %v3184_v47  ;;  %v3196_v57 = vrot.slane %v3195_v45, 4  ;;  %v2350_v4 = vadd.f32 %v2349_v44, %v2348_v33 }
 0x35d   : > { %v3208_v53 = vpop.xlane.xlu1 %3207  ;;  %v2360_v31 = vrot.slane %v2359_v5, 1  ;;  %v2372_v10 = vadd.f32 %v2371_v19, %v2370_v56 }
 0x35e   : > { %v3187_v41 = vrot.slane %v3186_v39, 2  ;;  %v3197_v43 = vadd.f32 %v3196_v57, %v3195_v45  ;;  %v3209_v17 = vrot.slane %v3208_v53, 4  ;;  %4329 = vpush %v2350_v4  ;;  %v2383_v37 = vadd.f32 %v2382_v60, %v2381_v8 }
 0x35f   : > { %v3219_v3 = vpop.xlane.xlu0 %3218  ;;  %v2361_v24 = vadd.f32 %v2360_v31, %v2359_v5  ;;  %v2373_v7 = vrot.slane %v2372_v10, 1 }
 0x360   : > { %v3198_v61 = vrot.slane %v3197_v43, 2  ;;  %v3210_v38 = vadd.f32 %v3209_v17, %v3208_v53  ;;  %v3220_v48 = vrot.slane %v3219_v3, 4  ;;  %v2384_v22 = vrot.slane %v2383_v37, 1 }
 0x361   : > { %4331 = vpush %v2361_v24  ;;  %v2374_v2 = vadd.f32 %v2373_v7, %v2372_v10  ;;  %v3188_v62 = vadd.f32 %v3187_v41, %v3186_v39 }
 0x362   : > { %v3211_v50 = vrot.slane %v3210_v38, 2  ;;  %v3221_v29 = vadd.f32 %v3220_v48, %v3219_v3  ;;  %v2385_v49 = vadd.f32 %v2384_v22, %v2383_v37  ;;  %v3199_v34 = vadd.f32 %v3198_v61, %v3197_v43 }
 0x363   : > { %4333 = vpush %v2374_v2  ;;  %v3189_v16 = vrot.slane %v3188_v62, 1 }
 0x364   : > { %v3222_v1 = vrot.slane %v3221_v29, 2  ;;  %4335 = vpush %v2385_v49  ;;  %v3200_v6 = vrot.slane %v3199_v34, 1  ;;  %v3212_v15 = vadd.f32 %v3211_v50, %v3210_v38 }
 0x365   : > { %v3232_v21 = vpop.xlane.xlu1 %3231  ;;  %v3190_v55 = vadd.f32 %v3189_v16, %v3188_v62 }
 0x366   : > { %v3233_v0 = vrot.slane %v3232_v21, 4  ;;  %v3201_v46 = vadd.f32 %v3200_v6, %v3199_v34  ;;  %v3213_v52 = vrot.slane %v3212_v15, 1  ;;  %v3223_v25 = vadd.f32 %v3222_v1, %v3221_v29 }
 0x367   : > { %4337 = vpush %v3190_v55  ;;  %v3243_v11 = vpop.xlane.xlu0 %3242 }
 0x368   : > { %v3234_v63 = vadd.f32 %v3233_v0, %v3232_v21  ;;  %v3244_v20 = vrot.slane %v3243_v11, 4  ;;  %4339 = vpush %v3201_v46  ;;  %v3214_v51 = vadd.f32 %v3213_v52, %v3212_v15  ;;  %v3224_v26 = vrot.slane %v3223_v25, 1 }
 0x369   : > { %v3256_v28 = vpop.xlane.xlu1 %3255 }
 0x36a   : > { %v3235_v12 = vrot.slane %v3234_v63, 2  ;;  %v3245_v27 = vadd.f32 %v3244_v20, %v3243_v11  ;;  %v3257_v30 = vrot.slane %v3256_v28, 4  ;;  %4341 = vpush %v3214_v51  ;;  %v3225_v36 = vadd.f32 %v3224_v26, %v3223_v25 }
 0x36b   : > { %v3267_v58 = vpop.xlane.xlu0 %3266 }
 0x36c   : > { %v3246_v40 = vrot.slane %v3245_v27, 2  ;;  %v3258_v35 = vadd.f32 %v3257_v30, %v3256_v28  ;;  %v3268_v59 = vrot.slane %v3267_v58, 4  ;;  %4343 = vpush %v3225_v36  ;;  %v3236_v54 = vadd.f32 %v3235_v12, %v3234_v63 }
 0x36d   : > { %v3346_v9 = vpop.xlane.xlu1 %3345 }
 0x36e   : > { %v3259_v14 = vrot.slane %v3258_v35, 2  ;;  %v3269_v18 = vadd.f32 %v3268_v59, %v3267_v58  ;;  %v3347_v23 = vrot.slane %v3346_v9, 4  ;;  %v3237_v32 = vrot.slane %v3236_v54, 1 }
 0x36f   : > { %v3357_v56 = vpop.xlane.xlu0 %3356  ;;  %v3247_v42 = vadd.f32 %v3246_v40, %v3245_v27 }
 0x370   : > { %v3270_v33 = vrot.slane %v3269_v18, 2  ;;  %v3348_v47 = vadd.f32 %v3347_v23, %v3346_v9  ;;  %v3358_v19 = vrot.slane %v3357_v56, 4  ;;  %v3238_v8 = vadd.f32 %v3237_v32, %v3236_v54 }
 0x371   : > { %v3367_v13 = vpop.xlane.xlu1 %3366  ;;  %v3248_v44 = vrot.slane %v3247_v42, 1  ;;  %v3260_v45 = vadd.f32 %v3259_v14, %v3258_v35 }
 0x372   : > { %v3349_v5 = vrot.slane %v3348_v47, 2  ;;  %v3359_v60 = vadd.f32 %v3358_v19, %v3357_v56  ;;  %v3368_v39 = vrot.slane %v3367_v13, 4  ;;  %4345 = vpush %v3238_v8  ;;  %v3271_v57 = vadd.f32 %v3270_v33, %v3269_v18 }
 0x373   : > { %v3378_v4 = vpop.xlane.xlu0 %3377  ;;  %v3249_v53 = vadd.f32 %v3248_v44, %v3247_v42  ;;  %v3261_v31 = vrot.slane %v3260_v45, 1  ;;  %v3444_v42 = vlaneseq  ;;  %v3429_v33 = vstv %s4310_s20 }
 0x374   : > { %v3360_v10 = vrot.slane %v3359_v60, 2  ;;  %v3369_v41 = vadd.f32 %v3368_v39, %v3367_v13  ;;  %v3379_v43 = vrot.slane %v3378_v4, 4  ;;  %v3272_v17 = vrot.slane %v3271_v57, 1 }
 0x375   : > { %4347 = vpush %v3249_v53  ;;  %v3388_v37 = vpop.xlane.xlu1 %3387  ;;  %v3262_v3 = vadd.f32 %v3261_v31, %v3260_v45  ;;  %v3350_v24 = vadd.f32 %v3349_v5, %v3348_v47  ;;  %vm3446_vm6 = vcmp.lt.s32.totalorder %v3444_v42, 1  ;;  %v3428_v47 = vstv %s4306_s1 }
 0x376   : > { %v3370_v7 = vrot.slane %v3369_v41, 2  ;;  %v3380_v61 = vadd.f32 %v3379_v43, %v3378_v4  ;;  %v3389_v38 = vrot.slane %v3388_v37, 4  ;;  %v3273_v48 = vadd.f32 %v3272_v17, %v3271_v57 }
 0x377   : > { %4349 = vpush %v3262_v3  ;;  %v3399_v22 = vpop.xlane.xlu0 %3398  ;;  %v3351_v2 = vrot.slane %v3350_v24, 1  ;;  %v3361_v62 = vadd.f32 %v3360_v10, %v3359_v60  ;;  %vm7521_vm7 = vcmp.lt.s32.totalorder %v3444_v42, 2  ;;  %v3491_v8 = vstv %s4308_s21 }
 0x378   : > { %v3381_v50 = vrot.slane %v3380_v61, 2  ;;  %v3390_v29 = vadd.f32 %v3389_v38, %v3388_v37  ;;  %v3400_v49 = vrot.slane %v3399_v22, 4  ;;  %4351 = vpush %v3273_v48  ;;  %v3371_v34 = vadd.f32 %v3370_v7, %v3369_v41 }
 0x379   : > { %v3409_v16 = vpop.xlane.xlu1 %3408  ;;  %v3352_v1 = vadd.f32 %v3351_v2, %v3350_v24  ;;  %v3362_v6 = vrot.slane %v3361_v62, 1  ;;  %v3448_v13 = vsel %vm3446_vm6, %v3428_v47, %v3429_v33  ;;  %v3492_v44 = vstv %s4312_s27  ;;  %s3809_s27 = sshll.u32 %s5031_s17, 1 }
 0x37a   : > { %v3391_v15 = vrot.slane %v3390_v29, 2  ;;  %v3401_v21 = vadd.f32 %v3400_v49, %v3399_v22  ;;  %v3410_v55 = vrot.slane %v3409_v16, 4  ;;  %v3372_v0 = vrot.slane %v3371_v34, 1 }
 0x37b   : > { %4353 = vpush %v3352_v1  ;;  %v3420_v46 = vpop.xlane.xlu0 %3419  ;;  %v3363_v52 = vadd.f32 %v3362_v6, %v3361_v62  ;;  %v3382_v25 = vadd.f32 %v3381_v50, %v3380_v61  ;;  %s7509_s7 = spop %4321  ;;  %v3430_v45 = vstv %s4314_s26  ;;  %v3507_v5 = vsel %vm3446_vm6, %v3491_v8, %v3492_v44 }
 0x37c   : > { %v3402_v11 = vrot.slane %v3401_v21, 2  ;;  %v3411_v63 = vadd.f32 %v3410_v55, %v3409_v16  ;;  %v3421_v20 = vrot.slane %v3420_v46, 4  ;;  %v3373_v51 = vadd.f32 %v3372_v0, %v3371_v34 }
 0x37d   : > { %4355 = vpush %v3363_v52  ;;  %v3383_v26 = vrot.slane %v3382_v25, 1  ;;  %v3392_v28 = vadd.f32 %v3391_v15, %v3390_v29  ;;  %s7511_s6 = spop %4323  ;;  %v3451_v60 = vsel %vm7521_vm7, %v3448_v13, %v3430_v45  ;;  %v3493_v39 = vstv %s4316_s8 }
 0x37e   : > { %v3412_v12 = vrot.slane %v3411_v63, 2  ;;  %v3422_v27 = vadd.f32 %v3421_v20, %v3420_v46  ;;  %v3403_v30 = vadd.f32 %v3402_v11, %v3401_v21  ;;  %4357 = vpush %v3373_v51  ;;  %vm3452_vm8 = vcmp.lt.s32.totalorder %v3444_v42, 3 }
 0x37f   : > { %v3384_v36 = vadd.f32 %v3383_v26, %v3382_v25  ;;  %v3393_v58 = vrot.slane %v3392_v28, 1  ;;  %v3494_v57 = vstv %s7507_s0  ;;  %v3431_v4 = vstv %s4318_s23  ;;  %s533_s0 = scalar_lea.vmem [#allocation14], %s3809_s27 }
 0x380   : > { %v3413_v40 = vadd.f32 %v3412_v12, %v3411_v63  ;;  %v3423_v35 = vrot.slane %v3422_v27, 2  ;;  %v3404_v59 = vrot.slane %v3403_v30, 1  ;;  %v3508_v53 = vsel %vm7521_vm7, %v3507_v5, %v3493_v39 }
 0x381   : > { %4359 = vpush %v3384_v36  ;;  %v3394_v54 = vadd.f32 %v3393_v58, %v3392_v28  ;;  %v3454_v31 = vsel %vm3452_vm8, %v3451_v60, %v3431_v4  ;;  %v3432_v10 = vstv %s7509_s7  ;;  %vm7547_vm9 = vcmp.lt.s32.totalorder %v3444_v42, 4  ;;  %s7876_s7 = sld [smem:[#allocation26_spill]] }
 0x382   : > { %v3424_v9 = vadd.f32 %v3423_v35, %v3422_v27  ;;  %v3405_v14 = vadd.f32 %v3404_v59, %v3403_v30  ;;  %v3414_v18 = vrot.slane %v3413_v40, 1  ;;  %v3509_v43 = vsel %vm3452_vm8, %v3508_v53, %v3494_v57 }
 0x383   : > { %4361 = vpush %v3394_v54  ;;  %s7513_s3 = spop %4325  ;;  %vm7555_vm10 = vcmp.lt.s32.totalorder %v3444_v42, 5  ;;  %vm7560_vm11 = vcmp.lt.s32.totalorder %v3444_v42, 6  ;;  %vm7568_vm12 = vcmp.lt.s32.totalorder %v3444_v42, 7  ;;  %vm7573_vm13 = vcmp.lt.s32.totalorder %v3444_v42, 8 }
 0x384   : > { %4363 = vpush %v3405_v14  ;;  %v3415_v23 = vadd.f32 %v3414_v18, %v3413_v40  ;;  %v3425_v32 = vrot.slane %v3424_v9, 1  ;;  %v3433_v17 = vstv %s7513_s3  ;;  %vm7578_vm14 = vcmp.lt.s32.totalorder %v3444_v42, 9  ;;  %s3555_s3 = sshll.u32 %s533_s0, 4  ;;  %s7694_s3 = int_to_ptr.vmem [resolvable:$true] %s3555_s3 }
 0x385   : > { %v3457_v48 = vsel %vm7547_vm9, %v3454_v31, %v3432_v10  ;;  %vm7588_vm15 = vcmp.lt.s32.totalorder %v3444_v42, 10  ;;  %vm7593_vm0 = vcmp.lt.s32.totalorder %v3444_v42, 11  ;;  %v3495_v50 = vstv %s7511_s6  ;;  %s4297_s6 = sshll.u32 %s4696_s30, 5  ;;  %s3538_s30 = scalar_lea.sflag [#allocation6], %s5031_s17 }
 0x386   : > { %4365 = vpush %v3415_v23  ;;  %v3426_v56 = vadd.f32 %v3425_v32, %v3424_v9  ;;  %v3460_v29 = vsel %vm7555_vm10, %v3457_v48, %v3433_v17  ;;  %vm7606_vm1 = vcmp.lt.s32.totalorder %v3444_v42, 12  ;;  %vm7617_vm2 = vcmp.lt.s32.totalorder %v3444_v42, 13 }
 0x387   : > { %s7516_s9 = spop %4327  ;;  %vm7626_vm3 = vcmp.lt.s32.totalorder %v3444_v42, 14  ;;  %v3510_v52 = vsel %vm7547_vm9, %v3509_v43, %v3495_v50  ;;  %vm7661_vm4 = vcmp.lt.s32.totalorder %v3444_v42, 15  ;;  %p7878_p13 = scmp.ne.s32.totalorder %s7876_s7, 0 }
 0x388   : > { %4367 = vpush %v3426_v56  ;;  %v3496_v16 = vstv %s7516_s9 }
 0x389   : > { %v3511_v20 = vsel %vm7555_vm10, %v3510_v52, %v3496_v16 }
 0x38f   : > { %s7518_s14 = spop %4329 }
 0x390   : > { %v3434_v24 = vstv %s7518_s14 }
 0x391   : > { %v3463_v1 = vsel %vm7560_vm11, %v3460_v29, %v3434_v24 }
 0x392   : > { %s7525_s22 = spop %4331 }
 0x393   : > { %v3497_v21 = vstv %s7525_s22  ;;  %s7877_s22 = sld [smem:[#allocation48_spill]] }
 0x394   : > { %s7527_s13 = spop %4333  ;;  %v3512_v12 = vsel %vm7560_vm11, %v3511_v20, %v3497_v21 }
 0x395   : > { %s7529_s19 = spop %4335  ;;  %v3435_v22 = vstv %s7527_s13 }
 0x396   : > { %v3466_v55 = vsel %vm7568_vm12, %v3463_v1, %v3435_v22  ;;  %v3498_v25 = vstv %s7529_s19  ;;  %s4610_s19 = scalar_lea.vmem %s7694_s3, 32 }
 0x397   : > { %v3513_v58 = vsel %vm7568_vm12, %v3512_v12, %v3498_v25  ;;  %p4611_p2 = scmp.ne.s32.totalorder %s7694_s3, %s4610_s19 }
 0x398   : > { %s7531_s29 = spop %4337 }
 0x399   : > { %s7536_s16 = spop %4339  ;;  %v3436_v49 = vstv %s7531_s29  ;;  %s7692_s13 = scalar_lea.hbm %s7877_s22, %s4297_s6 }
 0x39a   : > { %v3469_v11 = vsel %vm7573_vm13, %v3466_v55, %v3436_v49  ;;  %v3499_v51 = vstv %s7536_s16  ;;  %p4612_p11 = pnand %p4611_p2, %p7878_p13  ;;  %s4714_s29 = smov [#allocation14]  }
 0x39b   : > { %s7539_s2 = spop %4341  ;;  %v3514_v54 = vsel %vm7573_vm13, %v3513_v58, %v3499_v51  ;;  %s4614_s16 = sshll.u32 %s4714_s29, 4  ;;  %s4615_s16 = int_to_ptr.vmem [resolvable:$false] %s4614_s16 }
 0x39c   : > { %v3437_v6 = vstv %s7539_s2  ;;  %p4613_p5 = pneg %p4612_p11  ;;  %s4616_s2 = scalar_lea.vmem %s4615_s16, 64 }
 0x39d   : > { %s7541_s15 = spop %4343  ;;  %v3472_v26 = vsel %vm7578_vm14, %v3469_v11, %v3437_v6  ;;  %p4617_p10 = scmp.lt.s32.totalorder %s7694_s3, %s4615_s16 }
 0x39e   : > { %v3500_v27 = vstv %s7541_s15  ;;  %p4618_p0 = scmp.lt.s32.totalorder %s4616_s2, %s4610_s19 }
 0x39f   : > { %v3515_v23 = vsel %vm7578_vm14, %v3514_v54, %v3500_v27 }
 0x3a0   : > { %p4619_p3 = por %p4618_p0, %p4617_p10 }
 0x3a2   : > { %p4620_p8 = pnand %p4619_p3, %p4613_p5 }
 0x3a3   : > { %s7551_s11 = spop %4345 }
 0x3a4   : > { %v3438_v0 = vstv %s7551_s11 }
 0x3a5   : > { %v3475_v30 = vsel %vm7588_vm15, %v3472_v26, %v3438_v0 }
 0x3a6   : > { %s7564_s25 = spop %4347 }
 0x3a7   : > { %v3501_v40 = vstv %s7564_s25 }
 0x3a8   : > { %s7582_s24 = spop %4349  ;;  %v3516_v33 = vsel %vm7588_vm15, %v3515_v23, %v3501_v40 }
 0x3a9   : > { %s7597_s18 = spop %4351  ;;  %v3439_v63 = vstv %s7582_s24 }
 0x3aa   : > { %v3478_v35 = vsel %vm7593_vm0, %v3475_v30, %v3439_v63  ;;  %v3502_v9 = vstv %s7597_s18 }
 0x3ab   : > { %v3517_v8 = vsel %vm7593_vm0, %v3516_v33, %v3502_v9 }
 0x3ac   : > { %s7603_s12 = spop %4353 }
 0x3ad   : > { %v3440_v28 = vstv %s7603_s12 }
 0x3ae   : > { %s7614_s10 = spop %4355  ;;  %v3481_v14 = vsel %vm7606_vm1, %v3478_v35, %v3440_v28 }
 0x3af   : > { %s4358_s1 = spop %4357  ;;  %v3503_v32 = vstv %s7614_s10 }
 0x3b0   : > { %v3441_v36 = vstv %s4358_s1  ;;  %v3518_v45 = vsel %vm7606_vm1, %v3517_v8, %v3503_v32 }
 0x3b1   : > { %v3484_v56 = vsel %vm7617_vm2, %v3481_v14, %v3441_v36 }
 0x3b2   : > { %s7642_s21 = spop %4359 }
 0x3b3   : > { %v3504_v47 = vstv %s7642_s21 }
 0x3b4   : > { %s4362_s20 = spop %4361  ;;  %v3519_v39 = vsel %vm7617_vm2, %v3518_v45, %v3504_v47 }
 0x3b5   : > { %v3442_v59 = vstv %s4362_s20  ;;  %s4364_s26 = spop %4363 }
 0x3b6   : > { %v3487_v42 = vsel %vm7626_vm3, %v3484_v56, %v3442_v59  ;;  %v3505_v13 = vstv %s4364_s26 }
 0x3b7   : > { %s4366_s8 = spop %4365  ;;  %v3520_v57 = vsel %vm7626_vm3, %v3519_v39, %v3505_v13 }
 0x3b8   : > { %v3443_v19 = vstv %s4366_s8 }
 0x3b9   : > { %v3490_v44 = vsel %vm7661_vm4, %v3487_v42, %v3443_v19  ;;  %s4368_s23 = spop %4367 }
 0x3ba   : > { %3523 = vst.msk [vmem:[%s533_s0] sm:$0x1] %vm3522_vm5, %v3490_v44  ;;  %v3524_v5 = vmul.f32 %v3490_v44, %v3490_v44  ;;  %v3506_v60 = vstv %s4368_s23 }
 0x3bb   : > { %v3521_v53 = vsel %vm7661_vm4, %v3520_v57, %v3506_v60 }
 0x3bc   : > { %v3526_v4 = vmul.f32 0.015625, %v3524_v5 }
 0x3be   : > { %v3527_v31 = vsub.f32 %v3521_v53, %v3526_v4 }
 0x3c0   : > { %3528 = vst.msk [vmem:[%s533_s0 + $0x1] sm:$0x1] %vm3522_vm5, %v3527_v31 }
 0x3c1   : > { %4623 = shalt.err (!%p4620_p8)
}
 0x3c2   : > { %s4624_s17 = scalar_lea.hbm %s7692_s13, 32  ;;  %s4628_s25 = scalar_lea.hbm %s7877_s22, 64 }
 0x3c3   : > { %p4625_p4 = scmp.ne.s32.totalorder %s7692_s13, %s4624_s17  ;;  %p4629_p12 = scmp.lt.u32.totalorder %s7692_s13, %s7877_s22 }
 0x3c4   : > { %p4630_p7 = scmp.lt.u32.totalorder %s4628_s25, %s4624_s17  ;;  %p4632_p2 = scmp.lt.u32.totalorder %s4624_s17, %s7692_s13 }
 0x3c5   : > { %p4626_p9 = pnand %p4625_p4, %p7878_p13 }
 0x3c6   : > { %p4631_p1 = por %p4630_p7, %p4629_p12 }
 0x3c7   : > { %p4627_p6 = pneg %p4626_p9 }
 0x3c8   : > { %p4633_p11 = por %p4632_p2, %p4631_p1 }
 0x3ca   : > { %p4634_p5 = pnand %p4633_p11, %p4627_p6 }
 0x3cc   : > { %4637 = shalt.err (!%p4634_p5)
}
 0x3cd   : > { %4381 = dma.vmem_to_hbm [thread:$0]  (%p7878_p13), %s7694_s3, 32, %s7692_s13, %s3538_s30  }
 0x3ce PF: > { %s7879_s12 = sld [smem:[#allocation20_spill]]  ;;  %s7880_s10 = sld [smem:[#allocation27_spill]] }
 0x3cf   : > { %s7881_s1 = sld [smem:[#allocation23_spill]] }
 0x3d4   : > { %s3578_s21 = sand.u32 1, %s7879_s12   ;;  %p7882_p10 = scmp.ne.s32.totalorder %s7880_s10, 0 }
 0x3d5   : > { %p7883_p0 = scmp.ge.s32.totalorder %s7881_s1, 2  ;;  %s3579_s20 = scalar_lea.sflag [#allocation6], %s3578_s21 }
 0x3d7   : > { %p4401_p3 = pnand %p7883_p0, %p7882_p10 }
 0x3d9   : > { %4679 = dma.done.wait (!%p4401_p3), %s3579_s20, 32  }
 0x3da   : > { %4681 = vsyncadd (!%p4401_p3), %s3579_s20, 4294967264  ;;  %s32_s10 = sadd.s32 1, %s7881_s1   ;;  %s7884_s26 = sld [smem:[#allocation21_spill]] }
 0x3db   : > { %p29_p8 = scmp.ge.s32.totalorder %s32_s10, 4   ;;  %s7885_s29 = sld [smem:[#allocation25_spill]] }
 0x3dc   : > { %s7886_s30 = sld [smem:[#allocation22_spill]]  ;;  %s7887_s9 = sld [smem:[#allocation24_spill]] }
 0x3dd   : > { %s7888_s27 = smov %s4688_s28  ;;  %31 = sbr.rel (!%p29_p8) target bundleno = 19 (0x13), region = 183 }
 0x3e0   : > { %s7889_s28 = smov %s7884_s26 }
 0x3e4   :  { %3584 = vsyncpa [#allocation5], 1 }
 0x3e5   :  { %3586 = vsyncpa [#allocation5 + $0x1], 1 }
 0x3e6   :  { %3587 = vsyncpa [#allocation10], 1 }
 0x3e7   :  { %3589 = vsyncpa [#allocation10 + $0x1], 1 }
 0x3e8   :  { %3590 = vsyncpa [#allocation13], 1 }
 0x3e9   :  { %3592 = vsyncpa [#allocation13 + $0x1], 1 }
 0x3ea   :  { %3593 = vsyncpa [#allocation6], 1 }
 0x3eb   :  { %3595 = vsyncpa [#allocation6 + $0x1], 1 }
 0x3ec   :  { %3596 = vsyncpa [#allocation7], 1 }
 0x3ed   :  { %3598 = vsyncpa [#allocation7 + $0x1], 1 }

</bundles_post_ra>
